<compile_context>
chip_gen: v7x
topology: tpu7x:2x2x1
jax: 0.10.0
libtpu: 0.0.40
codegen_flags: <defaults>
</compile_context>

<pallas_src>
import math

import jax
import jax.numpy as jnp
from jax.experimental import pallas as pl
from jax.experimental.pallas import tpu as pltpu

BERT_N_HEADS = 4
LEN_AFTER_AE = 500
BN_EPS = 1e-5
ALPHA = 0.6                  # AdaptiveResidualLayer.alpha initial value
MID = LEN_AFTER_AE // 2      # 250
MID_PAD = 256                # lane-dense padded mid dim


# ----------------------------- in-kernel math helpers -----------------------------

def _erf(x):
    # Abramowitz & Stegun 7.1.26 (|err| < 1.5e-7); exp + EUP reciprocal only.
    a1, a2, a3, a4, a5 = 0.254829592, -0.284496736, 1.421413741, -1.453152027, 1.061405429
    p = 0.3275911
    s = jnp.where(x >= 0.0, 1.0, -1.0)
    z = jnp.abs(x)
    t = pl.reciprocal(1.0 + p * z, approx=True)
    poly = ((((a5 * t + a4) * t + a3) * t + a2) * t + a1) * t
    return s * (1.0 - poly * jnp.exp(-z * z))


def _gelu(x):
    # matches torch: x * 0.5 * (1 + erf(x / sqrt(2)))
    return x * 0.5 * (1.0 + _erf(x * (1.0 / math.sqrt(2.0))))


def _softmax_last(x):
    m = jnp.max(x, axis=-1, keepdims=True)
    e = jnp.exp(x - m)
    return e * pl.reciprocal(jnp.sum(e, axis=-1, keepdims=True), approx=True)


def _sigmoid(x):
    return pl.reciprocal(1.0 + jnp.exp(-x), approx=True)


# ------------------------------------ kernel ---------------------------------------

def ae2_kernel(x_ref, w1_ref, bvec_ref, wsq_ref, wqkv_ref,
               w2_ref, b2_ref, w3_ref, w4_ref, b4_ref,
               z_ref, y_ref,
               qkv_ref, ctx_ref, hres_ref):
    f32 = jnp.float32
    bf16 = jnp.bfloat16

    x = x_ref[...].astype(bf16)                                   # (2B, vs)

    bvec = bvec_ref[...]                                          # (5, hid) packed biases
    b1, ba, bs1, bs2, b3 = (bvec[0:1, :], bvec[1:2, :], bvec[2:3, :],
                            bvec[3:4, :], bvec[4:5, :])

    # --- l1 -> gelu (dropout identity in eval); M = 2B ---
    h = _gelu(jnp.dot(x, w1_ref[...], preferred_element_type=f32) + b1)

    # --- BN1(eval) + AdaptiveResidual folded: h @ (S1 (Wa + alpha I)) + ba' ---
    h = jnp.dot(h.astype(bf16), wsq_ref[0], preferred_element_type=f32) + ba

    # --- SwiGLU: linear1(h) * sigmoid(linear2(h)) ---
    hb = h.astype(bf16)
    u = jnp.dot(hb, wsq_ref[1], preferred_element_type=f32) + bs1
    g = jnp.dot(hb, wsq_ref[2], preferred_element_type=f32) + bs2
    h = u * _sigmoid(g)                                           # (2B, hid) f32

    # Stash h (bounds its live range) and fused QKV at full M = 2B.
    hres_ref[...] = h
    qkv_ref[...] = jnp.dot(h.astype(bf16), wqkv_ref[...],
                           preferred_element_type=f32).astype(bf16)   # (2B, 3*hid) bf16

    hid = h.shape[-1]
    dk = hid // BERT_N_HEADS
    B = hid                        # per-half batch == hid (asserted in wrapper)

    # --- Attention per half: h + fc(context); 1/sqrt(dk) folded in W_Q ---
    for hf in range(2):
        rows = pl.ds(hf * B, B)
        qf = qkv_ref[rows, pl.ds(0, hid)]                         # (B, hid) bf16
        kf = qkv_ref[rows, pl.ds(hid, hid)]
        vf = qkv_ref[rows, pl.ds(2 * hid, hid)]
        for hh in range(BERT_N_HEADS):
            lo = hh * dk
            q_h = qf[:, lo:lo + dk]                               # sub-vreg lane slices;
            k_h = kf[:, lo:lo + dk]                               # relayout cost accepted
            v_h = vf[:, lo:lo + dk]
            # scores = q_h @ k_h.T (contract last dims; no explicit transpose)
            s = jax.lax.dot_general(q_h, k_h, (((1,), (1,)), ((), ())),
                                    preferred_element_type=f32)   # (B, B)
            att = _softmax_last(s).astype(bf16)                   # attn dropout = identity
            ctx_ref[:, lo:lo + dk] = jnp.dot(att, v_h,
                                             preferred_element_type=f32)   # (B, dk)
        # torch: context.transpose(1,2).reshape(-1, H) == ctx.T exactly when B == hid.
        ctxT = ctx_ref[...].T.astype(bf16)                        # (hid, B) == (B, hid)
        out = jnp.dot(ctxT, wsq_ref[3], preferred_element_type=f32)
        hres_ref[rows, :] = hres_ref[rows, :] + out               # residual add

    h2 = hres_ref[...]                                            # (2B, hid) f32

    # --- l2 (first returned tensor; mid padded 250 -> 256, lane-dense store) ---
    z = jnp.dot(h2.astype(bf16), w2_ref[...], preferred_element_type=f32) + b2_ref[...]
    z_ref[...] = z

    # --- l3 -> gelu -> (BN3 folded into l4) -> l4 (vs padded -> 128, lane-dense store) ---
    y = _gelu(jnp.dot(z.astype(bf16), w3_ref[...], preferred_element_type=f32) + b3)
    y_ref[...] = jnp.dot(y.astype(bf16), w4_ref[...], preferred_element_type=f32) + b4_ref[...]


# -------------------------------- parameter setup -----------------------------------

def make_raw_params(key, vector_size):
    """PyTorch-equivalent parameters: Linear weights stored (in, out), BN eval stats."""
    vs = vector_size // 2
    hid = (vs + LEN_AFTER_AE // 2) // 2
    keys = jax.random.split(key, 12)

    def lin(k, din, dout):
        lim = 1.0 / math.sqrt(din)
        kw, kb = jax.random.split(k)
        w = jax.random.uniform(kw, (din, dout), jnp.float32, -lim, lim)
        b = jax.random.uniform(kb, (1, dout), jnp.float32, -lim, lim)
        return w, b

    def lin_nb(k, din, dout):
        lim = 1.0 / math.sqrt(din)
        return jax.random.uniform(k, (din, dout), jnp.float32, -lim, lim)

    p = {}
    p["w1"], p["b1"] = lin(keys[0], vs, hid)
    p["wa"], p["ba"] = lin(keys[1], hid, hid)
    p["ws1"], p["bs1"] = lin(keys[2], hid, hid)
    p["ws2"], p["bs2"] = lin(keys[3], hid, hid)
    p["wq"] = lin_nb(keys[4], hid, hid)
    p["wk"] = lin_nb(keys[5], hid, hid)
    p["wv"] = lin_nb(keys[6], hid, hid)
    p["wfc"] = lin_nb(keys[7], hid, hid)
    p["w2"], p["b2"] = lin(keys[8], hid, MID)
    p["w3"], p["b3"] = lin(keys[9], MID, hid)
    p["w4"], p["b4"] = lin(keys[10], hid, vs)
    ones = jnp.ones((1, hid), jnp.float32)
    zeros = jnp.zeros((1, hid), jnp.float32)
    p["g1"], p["be1"], p["m1"], p["v1"] = ones, zeros, zeros, ones   # BN1 eval defaults
    p["g3"], p["be3"], p["m3"], p["v3"] = ones, zeros, zeros, ones   # BN3 eval defaults
    return p


def prepare_packed_params(p):
    """Fold BN/alpha/scale constants, pad to lane-dense widths, cast weights to bf16."""
    hid = p["w1"].shape[1]
    vs = p["w4"].shape[1]
    dk = hid // BERT_N_HEADS
    bf16 = jnp.bfloat16

    # BN1(eval) affine + alpha residual folded into the adaptive-residual Linear.
    s1 = p["g1"] * jax.lax.rsqrt(p["v1"] + BN_EPS)                # (1, hid)
    t1 = p["be1"] - p["m1"] * s1
    wa_res = p["wa"] + ALPHA * jnp.eye(hid, dtype=jnp.float32)
    wa_eff = s1.reshape(hid, 1) * wa_res
    ba_eff = t1 @ wa_res + p["ba"]

    # BN3(eval) affine folded into l4.
    s3 = p["g3"] * jax.lax.rsqrt(p["v3"] + BN_EPS)
    t3 = p["be3"] - p["m3"] * s3
    w4_eff = s3.reshape(hid, 1) * p["w4"]
    b4_eff = t3 @ p["w4"] + p["b4"]

    # Fused QKV, attention scale folded into W_Q.
    wqkv = jnp.concatenate([p["wq"] * (1.0 / math.sqrt(dk)), p["wk"], p["wv"]], axis=1)

    # Pad mid 250 -> 256 (exact: padded z columns are zero, padded w3 rows are zero).
    pad_mid = MID_PAD - MID
    w2_pad = jnp.pad(p["w2"], ((0, 0), (0, pad_mid)))
    b2_pad = jnp.pad(p["b2"], ((0, 0), (0, pad_mid)))
    w3_pad = jnp.pad(p["w3"], ((0, pad_mid), (0, 0)))

    # Pad vs -> multiple of 128 for a lane-dense y store (padded columns are exactly zero).
    vs_pad = ((vs + 127) // 128) * 128
    w4_pad = jnp.pad(w4_eff, ((0, 0), (0, vs_pad - vs)))
    b4_pad = jnp.pad(b4_eff, ((0, 0), (0, vs_pad - vs)))

    bvec = jnp.concatenate([p["b1"], ba_eff, p["bs1"], p["bs2"], p["b3"]], axis=0)  # (5, hid) f32
    wsq = jnp.stack([wa_eff, p["ws1"], p["ws2"], p["wfc"]], axis=0)                 # (4, hid, hid)

    # Weights bf16 (MXU-native), biases f32 (added to f32 accumulators).
    return (p["w1"].astype(bf16), bvec, wsq.astype(bf16), wqkv.astype(bf16),
            w2_pad.astype(bf16), b2_pad, w3_pad.astype(bf16),
            w4_pad.astype(bf16), b4_pad)


# ------------------------------------ wrapper ---------------------------------------

def ae2_forward(X, packed, vector_size):
    vs = vector_size // 2
    B = X.shape[0]
    hid = (vs + LEN_AFTER_AE // 2) // 2
    # Required so torch's transpose(1,2).reshape reorder equals a single transpose.
    assert B == hid, "demo requires batch == hidden dim"

    w1, bvec, wsq, wqkv, w2p, b2p, w3p, w4p, b4p = packed
    mid_pad = w2p.shape[1]
    vs_pad = w4p.shape[1]

    # Merge both halves along rows: all Linear layers run once at M = 2B.
    Xh = jnp.concatenate([X[:, :vs], X[:, vs:]], axis=0)          # (2B, vs)

    out_shape = (jax.ShapeDtypeStruct((2 * B, mid_pad), jnp.float32),
                 jax.ShapeDtypeStruct((2 * B, vs_pad), jnp.float32))

    Z, Y = pl.pallas_call(
        ae2_kernel,
        out_shape=out_shape,
        # Whole arrays as single VMEM blocks (no grid): total footprint ~1.5 MiB,
        # comfortably within the default scoped-VMEM limit on all generations.
        scratch_shapes=[
            pltpu.VMEM((2 * B, 3 * hid), jnp.bfloat16),   # fused QKV activations
            pltpu.VMEM((B, hid), jnp.float32),            # per-half attention context
            pltpu.VMEM((2 * B, hid), jnp.float32),        # SwiGLU out + attn residual
        ],
    )(Xh, *packed)

    X_out = jnp.concatenate([Z[:B, :MID], Z[B:, :MID]], axis=1)   # (B, 500)
    X_AE = jnp.concatenate([Y[:B, :vs], Y[B:, :vs]], axis=1)      # (B, 2*vs)
    return X_out, X_AE


if __name__ == "__main__":
    vector_size = 12          # -> vs = 6, hidden = (6 + 250)//2 = 128
    B = 128                   # batch == hidden (see note above)

    key = jax.random.PRNGKey(0)
    kx, kp = jax.random.split(key)
    X = jax.random.normal(kx, (B, vector_size), jnp.float32)
    raw = make_raw_params(kp, vector_size)
    packed = prepare_packed_params(raw)

    fwd = jax.jit(lambda x: ae2_forward(x, packed, vector_size))
    X_out, X_AE = fwd(X)
    jax.block_until_ready((X_out, X_AE))

    assert X_out.shape == (B, LEN_AFTER_AE)
    assert X_AE.shape == (B, 2 * (vector_size // 2))
    assert bool(jnp.all(jnp.isfinite(X_out))) and bool(jnp.all(jnp.isfinite(X_AE)))
    print("KERNEL_OK")
</pallas_src>

<mosaic_0001>
module attributes {stable_mosaic.version = 11 : i64} {
  func.func @ae2_kernel(%arg0: memref<256x6xf32, #tpu.memory_space<vmem>>, %arg1: memref<6x128xbf16, #tpu.memory_space<vmem>>, %arg2: memref<5x128xf32, #tpu.memory_space<vmem>>, %arg3: memref<4x128x128xbf16, #tpu.memory_space<vmem>>, %arg4: memref<128x384xbf16, #tpu.memory_space<vmem>>, %arg5: memref<128x256xbf16, #tpu.memory_space<vmem>>, %arg6: memref<1x256xf32, #tpu.memory_space<vmem>>, %arg7: memref<256x128xbf16, #tpu.memory_space<vmem>>, %arg8: memref<128x128xbf16, #tpu.memory_space<vmem>>, %arg9: memref<1x128xf32, #tpu.memory_space<vmem>>, %arg10: memref<256x256xf32, #tpu.memory_space<vmem>>, %arg11: memref<256x128xf32, #tpu.memory_space<vmem>>, %arg12: memref<256x384xbf16, #tpu.memory_space<vmem>>, %arg13: memref<128x128xf32, #tpu.memory_space<vmem>>, %arg14: memref<256x128xf32, #tpu.memory_space<vmem>>) attributes {dimension_semantics = [], scalar_prefetch = 0 : i64, scratch_operands = 3 : i64, tpu.core_type = #tpu.core_type<tc>} {
    %c0 = arith.constant 0 : index
    %c0_0 = arith.constant 0 : index
    %0 = vector.load %arg0[%c0, %c0_0] : memref<256x6xf32, #tpu.memory_space<vmem>>, vector<256x6xf32>
    %1 = arith.truncf %0 : vector<256x6xf32> to vector<256x6xbf16>
    %c0_1 = arith.constant 0 : index
    %c0_2 = arith.constant 0 : index
    %2 = vector.load %arg2[%c0_1, %c0_2] : memref<5x128xf32, #tpu.memory_space<vmem>>, vector<5x128xf32>
    %3 = vector.extract_strided_slice %2 {offsets = [0, 0], sizes = [1, 128], strides = [1, 1]} : vector<5x128xf32> to vector<1x128xf32>
    %4 = vector.extract_strided_slice %2 {offsets = [1, 0], sizes = [1, 128], strides = [1, 1]} : vector<5x128xf32> to vector<1x128xf32>
    %5 = vector.extract_strided_slice %2 {offsets = [2, 0], sizes = [1, 128], strides = [1, 1]} : vector<5x128xf32> to vector<1x128xf32>
    %6 = vector.extract_strided_slice %2 {offsets = [3, 0], sizes = [1, 128], strides = [1, 1]} : vector<5x128xf32> to vector<1x128xf32>
    %7 = vector.extract_strided_slice %2 {offsets = [4, 0], sizes = [1, 128], strides = [1, 1]} : vector<5x128xf32> to vector<1x128xf32>
    %c0_3 = arith.constant 0 : index
    %c0_4 = arith.constant 0 : index
    %8 = vector.load %arg1[%c0_3, %c0_4] : memref<6x128xbf16, #tpu.memory_space<vmem>>, vector<6x128xbf16>
    %cst = arith.constant dense<0.000000e+00> : vector<256x128xf32>
    %9 = tpu.matmul %1, %8, %cst {dimension_numbers = #tpu.dot_dimension_numbers<[1], [0], [0], [1], [0, 0, 1, 1], [], []>} : vector<256x6xbf16>, vector<6x128xbf16>, vector<256x128xf32> -> vector<256x128xf32>
    %10 = vector.broadcast %3 : vector<1x128xf32> to vector<256x128xf32>
    %11 = arith.addf %9, %10 : vector<256x128xf32>
    %cst_5 = arith.constant 5.000000e-01 : f32
    %12 = vector.broadcast %cst_5 : f32 to vector<256x128xf32>
    %13 = arith.mulf %11, %12 : vector<256x128xf32>
    %cst_6 = arith.constant 0.707106769 : f32
    %14 = vector.broadcast %cst_6 : f32 to vector<256x128xf32>
    %15 = arith.mulf %11, %14 : vector<256x128xf32>
    %cst_7 = arith.constant 0.000000e+00 : f32
    %16 = vector.broadcast %cst_7 : f32 to vector<256x128xf32>
    %17 = arith.cmpf oge, %15, %16 : vector<256x128xf32>
    %cst_8 = arith.constant 1.000000e+00 : f32
    %cst_9 = arith.constant -1.000000e+00 : f32
    %18 = vector.broadcast %cst_8 : f32 to vector<256x128xf32>
    %19 = vector.broadcast %cst_9 : f32 to vector<256x128xf32>
    %20 = arith.select %17, %18, %19 : vector<256x128xi1>, vector<256x128xf32>
    %21 = math.absf %15 : vector<256x128xf32>
    %cst_10 = arith.constant 0.327591091 : f32
    %22 = vector.broadcast %cst_10 : f32 to vector<256x128xf32>
    %23 = arith.mulf %22, %21 : vector<256x128xf32>
    %cst_11 = arith.constant 1.000000e+00 : f32
    %24 = vector.broadcast %cst_11 : f32 to vector<256x128xf32>
    %25 = arith.addf %24, %23 : vector<256x128xf32>
    %26 = tpu.reciprocal %25 {approx = true} : vector<256x128xf32> -> vector<256x128xf32>
    %cst_12 = arith.constant 1.06140542 : f32
    %27 = vector.broadcast %cst_12 : f32 to vector<256x128xf32>
    %28 = arith.mulf %27, %26 : vector<256x128xf32>
    %cst_13 = arith.constant -1.45315206 : f32
    %29 = vector.broadcast %cst_13 : f32 to vector<256x128xf32>
    %30 = arith.addf %28, %29 : vector<256x128xf32>
    %31 = arith.mulf %30, %26 : vector<256x128xf32>
    %cst_14 = arith.constant 1.42141378 : f32
    %32 = vector.broadcast %cst_14 : f32 to vector<256x128xf32>
    %33 = arith.addf %31, %32 : vector<256x128xf32>
    %34 = arith.mulf %33, %26 : vector<256x128xf32>
    %cst_15 = arith.constant -0.284496725 : f32
    %35 = vector.broadcast %cst_15 : f32 to vector<256x128xf32>
    %36 = arith.addf %34, %35 : vector<256x128xf32>
    %37 = arith.mulf %36, %26 : vector<256x128xf32>
    %cst_16 = arith.constant 0.254829586 : f32
    %38 = vector.broadcast %cst_16 : f32 to vector<256x128xf32>
    %39 = arith.addf %37, %38 : vector<256x128xf32>
    %40 = arith.mulf %39, %26 : vector<256x128xf32>
    %cst_17 = arith.constant 0.000000e+00 : f32
    %41 = vector.broadcast %cst_17 : f32 to vector<256x128xf32>
    %42 = arith.subf %41, %21 : vector<256x128xf32>
    %43 = arith.mulf %42, %21 : vector<256x128xf32>
    %44 = math.exp %43 : vector<256x128xf32>
    %45 = arith.mulf %40, %44 : vector<256x128xf32>
    %cst_18 = arith.constant 1.000000e+00 : f32
    %46 = vector.broadcast %cst_18 : f32 to vector<256x128xf32>
    %47 = arith.subf %46, %45 : vector<256x128xf32>
    %48 = arith.mulf %20, %47 : vector<256x128xf32>
    %cst_19 = arith.constant 1.000000e+00 : f32
    %49 = vector.broadcast %cst_19 : f32 to vector<256x128xf32>
    %50 = arith.addf %49, %48 : vector<256x128xf32>
    %51 = arith.mulf %13, %50 : vector<256x128xf32>
    %52 = arith.truncf %51 : vector<256x128xf32> to vector<256x128xbf16>
    %c0_20 = arith.constant 0 : index
    %c0_21 = arith.constant 0 : index
    %c0_22 = arith.constant 0 : index
    %53 = vector.load %arg3[%c0_20, %c0_21, %c0_22] : memref<4x128x128xbf16, #tpu.memory_space<vmem>>, vector<1x128x128xbf16>
    %54 = vector.shape_cast %53 : vector<1x128x128xbf16> to vector<128x128xbf16>
    %cst_23 = arith.constant dense<0.000000e+00> : vector<256x128xf32>
    %55 = tpu.matmul %52, %54, %cst_23 {dimension_numbers = #tpu.dot_dimension_numbers<[1], [0], [0], [1], [0, 0, 1, 1], [], []>} : vector<256x128xbf16>, vector<128x128xbf16>, vector<256x128xf32> -> vector<256x128xf32>
    %56 = vector.broadcast %4 : vector<1x128xf32> to vector<256x128xf32>
    %57 = arith.addf %55, %56 : vector<256x128xf32>
    %58 = arith.truncf %57 : vector<256x128xf32> to vector<256x128xbf16>
    %c1 = arith.constant 1 : index
    %c0_24 = arith.constant 0 : index
    %c0_25 = arith.constant 0 : index
    %59 = vector.load %arg3[%c1, %c0_24, %c0_25] : memref<4x128x128xbf16, #tpu.memory_space<vmem>>, vector<1x128x128xbf16>
    %60 = vector.shape_cast %59 : vector<1x128x128xbf16> to vector<128x128xbf16>
    %cst_26 = arith.constant dense<0.000000e+00> : vector<256x128xf32>
    %61 = tpu.matmul %58, %60, %cst_26 {dimension_numbers = #tpu.dot_dimension_numbers<[1], [0], [0], [1], [0, 0, 1, 1], [], []>} : vector<256x128xbf16>, vector<128x128xbf16>, vector<256x128xf32> -> vector<256x128xf32>
    %62 = vector.broadcast %5 : vector<1x128xf32> to vector<256x128xf32>
    %63 = arith.addf %61, %62 : vector<256x128xf32>
    %c2 = arith.constant 2 : index
    %c0_27 = arith.constant 0 : index
    %c0_28 = arith.constant 0 : index
    %64 = vector.load %arg3[%c2, %c0_27, %c0_28] : memref<4x128x128xbf16, #tpu.memory_space<vmem>>, vector<1x128x128xbf16>
    %65 = vector.shape_cast %64 : vector<1x128x128xbf16> to vector<128x128xbf16>
    %cst_29 = arith.constant dense<0.000000e+00> : vector<256x128xf32>
    %66 = tpu.matmul %58, %65, %cst_29 {dimension_numbers = #tpu.dot_dimension_numbers<[1], [0], [0], [1], [0, 0, 1, 1], [], []>} : vector<256x128xbf16>, vector<128x128xbf16>, vector<256x128xf32> -> vector<256x128xf32>
    %67 = vector.broadcast %6 : vector<1x128xf32> to vector<256x128xf32>
    %68 = arith.addf %66, %67 : vector<256x128xf32>
    %cst_30 = arith.constant 0.000000e+00 : f32
    %69 = vector.broadcast %cst_30 : f32 to vector<256x128xf32>
    %70 = arith.subf %69, %68 : vector<256x128xf32>
    %71 = math.exp %70 : vector<256x128xf32>
    %cst_31 = arith.constant 1.000000e+00 : f32
    %72 = vector.broadcast %cst_31 : f32 to vector<256x128xf32>
    %73 = arith.addf %72, %71 : vector<256x128xf32>
    %74 = tpu.reciprocal %73 {approx = true} : vector<256x128xf32> -> vector<256x128xf32>
    %75 = arith.mulf %63, %74 : vector<256x128xf32>
    %c0_32 = arith.constant 0 : index
    %c0_33 = arith.constant 0 : index
    %76 = vector.load %arg14[%c0_32, %c0_33] : memref<256x128xf32, #tpu.memory_space<vmem>>, vector<256x128xf32>
    tpu.vector_store %arg14[%c0_32, %c0_33], %75 {strides = array<i32>} : memref<256x128xf32, #tpu.memory_space<vmem>>, vector<256x128xf32>,
    %77 = arith.truncf %75 : vector<256x128xf32> to vector<256x128xbf16>
    %c0_34 = arith.constant 0 : index
    %c0_35 = arith.constant 0 : index
    %78 = vector.load %arg4[%c0_34, %c0_35] : memref<128x384xbf16, #tpu.memory_space<vmem>>, vector<128x384xbf16>
    %cst_36 = arith.constant dense<0.000000e+00> : vector<256x384xf32>
    %79 = tpu.matmul %77, %78, %cst_36 {dimension_numbers = #tpu.dot_dimension_numbers<[1], [0], [0], [1], [0, 0, 1, 1], [], []>} : vector<256x128xbf16>, vector<128x384xbf16>, vector<256x384xf32> -> vector<256x384xf32>
    %80 = arith.truncf %79 : vector<256x384xf32> to vector<256x384xbf16>
    %c0_37 = arith.constant 0 : index
    %c0_38 = arith.constant 0 : index
    %81 = vector.load %arg12[%c0_37, %c0_38] : memref<256x384xbf16, #tpu.memory_space<vmem>>, vector<256x384xbf16>
    tpu.vector_store %arg12[%c0_37, %c0_38], %80 {strides = array<i32>} : memref<256x384xbf16, #tpu.memory_space<vmem>>, vector<256x384xbf16>,
    %c0_39 = arith.constant 0 : index
    %c0_40 = arith.constant 0 : index
    %82 = vector.load %arg12[%c0_39, %c0_40] : memref<256x384xbf16, #tpu.memory_space<vmem>>, vector<128x128xbf16>
    %c0_41 = arith.constant 0 : index
    %c128 = arith.constant 128 : index
    %83 = vector.load %arg12[%c0_41, %c128] : memref<256x384xbf16, #tpu.memory_space<vmem>>, vector<128x128xbf16>
    %c0_42 = arith.constant 0 : index
    %c256 = arith.constant 256 : index
    %84 = vector.load %arg12[%c0_42, %c256] : memref<256x384xbf16, #tpu.memory_space<vmem>>, vector<128x128xbf16>
    %85 = vector.extract_strided_slice %82 {offsets = [0, 0], sizes = [128, 32], strides = [1, 1]} : vector<128x128xbf16> to vector<128x32xbf16>
    %86 = vector.extract_strided_slice %83 {offsets = [0, 0], sizes = [128, 32], strides = [1, 1]} : vector<128x128xbf16> to vector<128x32xbf16>
    %87 = vector.extract_strided_slice %84 {offsets = [0, 0], sizes = [128, 32], strides = [1, 1]} : vector<128x128xbf16> to vector<128x32xbf16>
    %cst_43 = arith.constant dense<0.000000e+00> : vector<128x128xf32>
    %88 = tpu.matmul %85, %86, %cst_43 {dimension_numbers = #tpu.dot_dimension_numbers<[1], [1], [0], [0], [0, 0, 1, 0], [], []>} : vector<128x32xbf16>, vector<128x32xbf16>, vector<128x128xf32> -> vector<128x128xf32>
    %cst_44 = arith.constant dense<0xFF800000> : vector<128xf32>
    %89 = vector.multi_reduction <maximumf>, %88, %cst_44 [1] : vector<128x128xf32> to vector<128xf32>
    %90 = vector.shape_cast %89 : vector<128xf32> to vector<128x1xf32>
    %91 = vector.broadcast %90 : vector<128x1xf32> to vector<128x128xf32>
    %92 = arith.subf %88, %91 : vector<128x128xf32>
    %93 = math.exp %92 : vector<128x128xf32>
    %cst_45 = arith.constant dense<0.000000e+00> : vector<128xf32>
    %94 = vector.multi_reduction <add>, %93, %cst_45 [1] : vector<128x128xf32> to vector<128xf32>
    %95 = vector.shape_cast %94 : vector<128xf32> to vector<128x1xf32>
    %96 = tpu.reciprocal %95 {approx = true} : vector<128x1xf32> -> vector<128x1xf32>
    %97 = vector.broadcast %96 : vector<128x1xf32> to vector<128x128xf32>
    %98 = arith.mulf %93, %97 : vector<128x128xf32>
    %99 = arith.truncf %98 : vector<128x128xf32> to vector<128x128xbf16>
    %cst_46 = arith.constant dense<0.000000e+00> : vector<128x32xf32>
    %100 = tpu.matmul %99, %87, %cst_46 {dimension_numbers = #tpu.dot_dimension_numbers<[1], [0], [0], [1], [0, 0, 1, 1], [], []>} : vector<128x128xbf16>, vector<128x32xbf16>, vector<128x32xf32> -> vector<128x32xf32>
    %c0_47 = arith.constant 0 : index
    %c0_48 = arith.constant 0 : index
    %101 = vector.load %arg13[%c0_47, %c0_48] : memref<128x128xf32, #tpu.memory_space<vmem>>, vector<128x32xf32>
    tpu.vector_store %arg13[%c0_47, %c0_48], %100 {strides = array<i32>} : memref<128x128xf32, #tpu.memory_space<vmem>>, vector<128x32xf32>,
    %102 = vector.extract_strided_slice %82 {offsets = [0, 32], sizes = [128, 32], strides = [1, 1]} : vector<128x128xbf16> to vector<128x32xbf16>
    %103 = vector.extract_strided_slice %83 {offsets = [0, 32], sizes = [128, 32], strides = [1, 1]} : vector<128x128xbf16> to vector<128x32xbf16>
    %104 = vector.extract_strided_slice %84 {offsets = [0, 32], sizes = [128, 32], strides = [1, 1]} : vector<128x128xbf16> to vector<128x32xbf16>
    %cst_49 = arith.constant dense<0.000000e+00> : vector<128x128xf32>
    %105 = tpu.matmul %102, %103, %cst_49 {dimension_numbers = #tpu.dot_dimension_numbers<[1], [1], [0], [0], [0, 0, 1, 0], [], []>} : vector<128x32xbf16>, vector<128x32xbf16>, vector<128x128xf32> -> vector<128x128xf32>
    %cst_50 = arith.constant dense<0xFF800000> : vector<128xf32>
    %106 = vector.multi_reduction <maximumf>, %105, %cst_50 [1] : vector<128x128xf32> to vector<128xf32>
    %107 = vector.shape_cast %106 : vector<128xf32> to vector<128x1xf32>
    %108 = vector.broadcast %107 : vector<128x1xf32> to vector<128x128xf32>
    %109 = arith.subf %105, %108 : vector<128x128xf32>
    %110 = math.exp %109 : vector<128x128xf32>
    %cst_51 = arith.constant dense<0.000000e+00> : vector<128xf32>
    %111 = vector.multi_reduction <add>, %110, %cst_51 [1] : vector<128x128xf32> to vector<128xf32>
    %112 = vector.shape_cast %111 : vector<128xf32> to vector<128x1xf32>
    %113 = tpu.reciprocal %112 {approx = true} : vector<128x1xf32> -> vector<128x1xf32>
    %114 = vector.broadcast %113 : vector<128x1xf32> to vector<128x128xf32>
    %115 = arith.mulf %110, %114 : vector<128x128xf32>
    %116 = arith.truncf %115 : vector<128x128xf32> to vector<128x128xbf16>
    %cst_52 = arith.constant dense<0.000000e+00> : vector<128x32xf32>
    %117 = tpu.matmul %116, %104, %cst_52 {dimension_numbers = #tpu.dot_dimension_numbers<[1], [0], [0], [1], [0, 0, 1, 1], [], []>} : vector<128x128xbf16>, vector<128x32xbf16>, vector<128x32xf32> -> vector<128x32xf32>
    %c0_53 = arith.constant 0 : index
    %c32 = arith.constant 32 : index
    %118 = vector.load %arg13[%c0_53, %c32] : memref<128x128xf32, #tpu.memory_space<vmem>>, vector<128x32xf32>
    tpu.vector_store %arg13[%c0_53, %c32], %117 {strides = array<i32>} : memref<128x128xf32, #tpu.memory_space<vmem>>, vector<128x32xf32>,
    %119 = vector.extract_strided_slice %82 {offsets = [0, 64], sizes = [128, 32], strides = [1, 1]} : vector<128x128xbf16> to vector<128x32xbf16>
    %120 = vector.extract_strided_slice %83 {offsets = [0, 64], sizes = [128, 32], strides = [1, 1]} : vector<128x128xbf16> to vector<128x32xbf16>
    %121 = vector.extract_strided_slice %84 {offsets = [0, 64], sizes = [128, 32], strides = [1, 1]} : vector<128x128xbf16> to vector<128x32xbf16>
    %cst_54 = arith.constant dense<0.000000e+00> : vector<128x128xf32>
    %122 = tpu.matmul %119, %120, %cst_54 {dimension_numbers = #tpu.dot_dimension_numbers<[1], [1], [0], [0], [0, 0, 1, 0], [], []>} : vector<128x32xbf16>, vector<128x32xbf16>, vector<128x128xf32> -> vector<128x128xf32>
    %cst_55 = arith.constant dense<0xFF800000> : vector<128xf32>
    %123 = vector.multi_reduction <maximumf>, %122, %cst_55 [1] : vector<128x128xf32> to vector<128xf32>
    %124 = vector.shape_cast %123 : vector<128xf32> to vector<128x1xf32>
    %125 = vector.broadcast %124 : vector<128x1xf32> to vector<128x128xf32>
    %126 = arith.subf %122, %125 : vector<128x128xf32>
    %127 = math.exp %126 : vector<128x128xf32>
    %cst_56 = arith.constant dense<0.000000e+00> : vector<128xf32>
    %128 = vector.multi_reduction <add>, %127, %cst_56 [1] : vector<128x128xf32> to vector<128xf32>
    %129 = vector.shape_cast %128 : vector<128xf32> to vector<128x1xf32>
    %130 = tpu.reciprocal %129 {approx = true} : vector<128x1xf32> -> vector<128x1xf32>
    %131 = vector.broadcast %130 : vector<128x1xf32> to vector<128x128xf32>
    %132 = arith.mulf %127, %131 : vector<128x128xf32>
    %133 = arith.truncf %132 : vector<128x128xf32> to vector<128x128xbf16>
    %cst_57 = arith.constant dense<0.000000e+00> : vector<128x32xf32>
    %134 = tpu.matmul %133, %121, %cst_57 {dimension_numbers = #tpu.dot_dimension_numbers<[1], [0], [0], [1], [0, 0, 1, 1], [], []>} : vector<128x128xbf16>, vector<128x32xbf16>, vector<128x32xf32> -> vector<128x32xf32>
    %c0_58 = arith.constant 0 : index
    %c64 = arith.constant 64 : index
    %135 = vector.load %arg13[%c0_58, %c64] : memref<128x128xf32, #tpu.memory_space<vmem>>, vector<128x32xf32>
    tpu.vector_store %arg13[%c0_58, %c64], %134 {strides = array<i32>} : memref<128x128xf32, #tpu.memory_space<vmem>>, vector<128x32xf32>,
    %136 = vector.extract_strided_slice %82 {offsets = [0, 96], sizes = [128, 32], strides = [1, 1]} : vector<128x128xbf16> to vector<128x32xbf16>
    %137 = vector.extract_strided_slice %83 {offsets = [0, 96], sizes = [128, 32], strides = [1, 1]} : vector<128x128xbf16> to vector<128x32xbf16>
    %138 = vector.extract_strided_slice %84 {offsets = [0, 96], sizes = [128, 32], strides = [1, 1]} : vector<128x128xbf16> to vector<128x32xbf16>
    %cst_59 = arith.constant dense<0.000000e+00> : vector<128x128xf32>
    %139 = tpu.matmul %136, %137, %cst_59 {dimension_numbers = #tpu.dot_dimension_numbers<[1], [1], [0], [0], [0, 0, 1, 0], [], []>} : vector<128x32xbf16>, vector<128x32xbf16>, vector<128x128xf32> -> vector<128x128xf32>
    %cst_60 = arith.constant dense<0xFF800000> : vector<128xf32>
    %140 = vector.multi_reduction <maximumf>, %139, %cst_60 [1] : vector<128x128xf32> to vector<128xf32>
    %141 = vector.shape_cast %140 : vector<128xf32> to vector<128x1xf32>
    %142 = vector.broadcast %141 : vector<128x1xf32> to vector<128x128xf32>
    %143 = arith.subf %139, %142 : vector<128x128xf32>
    %144 = math.exp %143 : vector<128x128xf32>
    %cst_61 = arith.constant dense<0.000000e+00> : vector<128xf32>
    %145 = vector.multi_reduction <add>, %144, %cst_61 [1] : vector<128x128xf32> to vector<128xf32>
    %146 = vector.shape_cast %145 : vector<128xf32> to vector<128x1xf32>
    %147 = tpu.reciprocal %146 {approx = true} : vector<128x1xf32> -> vector<128x1xf32>
    %148 = vector.broadcast %147 : vector<128x1xf32> to vector<128x128xf32>
    %149 = arith.mulf %144, %148 : vector<128x128xf32>
    %150 = arith.truncf %149 : vector<128x128xf32> to vector<128x128xbf16>
    %cst_62 = arith.constant dense<0.000000e+00> : vector<128x32xf32>
    %151 = tpu.matmul %150, %138, %cst_62 {dimension_numbers = #tpu.dot_dimension_numbers<[1], [0], [0], [1], [0, 0, 1, 1], [], []>} : vector<128x128xbf16>, vector<128x32xbf16>, vector<128x32xf32> -> vector<128x32xf32>
    %c0_63 = arith.constant 0 : index
    %c96 = arith.constant 96 : index
    %152 = vector.load %arg13[%c0_63, %c96] : memref<128x128xf32, #tpu.memory_space<vmem>>, vector<128x32xf32>
    tpu.vector_store %arg13[%c0_63, %c96], %151 {strides = array<i32>} : memref<128x128xf32, #tpu.memory_space<vmem>>, vector<128x32xf32>,
    %c0_64 = arith.constant 0 : index
    %c0_65 = arith.constant 0 : index
    %153 = vector.load %arg13[%c0_64, %c0_65] : memref<128x128xf32, #tpu.memory_space<vmem>>, vector<128x128xf32>
    %154 = tpu.transpose %153, [1, 0] : vector<128x128xf32> -> vector<128x128xf32>
    %155 = arith.truncf %154 : vector<128x128xf32> to vector<128x128xbf16>
    %c3 = arith.constant 3 : index
    %c0_66 = arith.constant 0 : index
    %c0_67 = arith.constant 0 : index
    %156 = vector.load %arg3[%c3, %c0_66, %c0_67] : memref<4x128x128xbf16, #tpu.memory_space<vmem>>, vector<1x128x128xbf16>
    %157 = vector.shape_cast %156 : vector<1x128x128xbf16> to vector<128x128xbf16>
    %cst_68 = arith.constant dense<0.000000e+00> : vector<128x128xf32>
    %158 = tpu.matmul %155, %157, %cst_68 {dimension_numbers = #tpu.dot_dimension_numbers<[1], [0], [0], [1], [0, 0, 1, 1], [], []>} : vector<128x128xbf16>, vector<128x128xbf16>, vector<128x128xf32> -> vector<128x128xf32>
    %c0_69 = arith.constant 0 : index
    %c0_70 = arith.constant 0 : index
    %159 = vector.load %arg14[%c0_69, %c0_70] : memref<256x128xf32, #tpu.memory_space<vmem>>, vector<128x128xf32>
    %160 = arith.addf %159, %158 : vector<128x128xf32>
    %c0_71 = arith.constant 0 : index
    %c0_72 = arith.constant 0 : index
    %161 = vector.load %arg14[%c0_71, %c0_72] : memref<256x128xf32, #tpu.memory_space<vmem>>, vector<128x128xf32>
    tpu.vector_store %arg14[%c0_71, %c0_72], %160 {strides = array<i32>} : memref<256x128xf32, #tpu.memory_space<vmem>>, vector<128x128xf32>,
    %c128_73 = arith.constant 128 : index
    %c0_74 = arith.constant 0 : index
    %162 = vector.load %arg12[%c128_73, %c0_74] : memref<256x384xbf16, #tpu.memory_space<vmem>>, vector<128x128xbf16>
    %c128_75 = arith.constant 128 : index
    %c128_76 = arith.constant 128 : index
    %163 = vector.load %arg12[%c128_75, %c128_76] : memref<256x384xbf16, #tpu.memory_space<vmem>>, vector<128x128xbf16>
    %c128_77 = arith.constant 128 : index
    %c256_78 = arith.constant 256 : index
    %164 = vector.load %arg12[%c128_77, %c256_78] : memref<256x384xbf16, #tpu.memory_space<vmem>>, vector<128x128xbf16>
    %165 = vector.extract_strided_slice %162 {offsets = [0, 0], sizes = [128, 32], strides = [1, 1]} : vector<128x128xbf16> to vector<128x32xbf16>
    %166 = vector.extract_strided_slice %163 {offsets = [0, 0], sizes = [128, 32], strides = [1, 1]} : vector<128x128xbf16> to vector<128x32xbf16>
    %167 = vector.extract_strided_slice %164 {offsets = [0, 0], sizes = [128, 32], strides = [1, 1]} : vector<128x128xbf16> to vector<128x32xbf16>
    %cst_79 = arith.constant dense<0.000000e+00> : vector<128x128xf32>
    %168 = tpu.matmul %165, %166, %cst_79 {dimension_numbers = #tpu.dot_dimension_numbers<[1], [1], [0], [0], [0, 0, 1, 0], [], []>} : vector<128x32xbf16>, vector<128x32xbf16>, vector<128x128xf32> -> vector<128x128xf32>
    %cst_80 = arith.constant dense<0xFF800000> : vector<128xf32>
    %169 = vector.multi_reduction <maximumf>, %168, %cst_80 [1] : vector<128x128xf32> to vector<128xf32>
    %170 = vector.shape_cast %169 : vector<128xf32> to vector<128x1xf32>
    %171 = vector.broadcast %170 : vector<128x1xf32> to vector<128x128xf32>
    %172 = arith.subf %168, %171 : vector<128x128xf32>
    %173 = math.exp %172 : vector<128x128xf32>
    %cst_81 = arith.constant dense<0.000000e+00> : vector<128xf32>
    %174 = vector.multi_reduction <add>, %173, %cst_81 [1] : vector<128x128xf32> to vector<128xf32>
    %175 = vector.shape_cast %174 : vector<128xf32> to vector<128x1xf32>
    %176 = tpu.reciprocal %175 {approx = true} : vector<128x1xf32> -> vector<128x1xf32>
    %177 = vector.broadcast %176 : vector<128x1xf32> to vector<128x128xf32>
    %178 = arith.mulf %173, %177 : vector<128x128xf32>
    %179 = arith.truncf %178 : vector<128x128xf32> to vector<128x128xbf16>
    %cst_82 = arith.constant dense<0.000000e+00> : vector<128x32xf32>
    %180 = tpu.matmul %179, %167, %cst_82 {dimension_numbers = #tpu.dot_dimension_numbers<[1], [0], [0], [1], [0, 0, 1, 1], [], []>} : vector<128x128xbf16>, vector<128x32xbf16>, vector<128x32xf32> -> vector<128x32xf32>
    %c0_83 = arith.constant 0 : index
    %c0_84 = arith.constant 0 : index
    %181 = vector.load %arg13[%c0_83, %c0_84] : memref<128x128xf32, #tpu.memory_space<vmem>>, vector<128x32xf32>
    tpu.vector_store %arg13[%c0_83, %c0_84], %180 {strides = array<i32>} : memref<128x128xf32, #tpu.memory_space<vmem>>, vector<128x32xf32>,
    %182 = vector.extract_strided_slice %162 {offsets = [0, 32], sizes = [128, 32], strides = [1, 1]} : vector<128x128xbf16> to vector<128x32xbf16>
    %183 = vector.extract_strided_slice %163 {offsets = [0, 32], sizes = [128, 32], strides = [1, 1]} : vector<128x128xbf16> to vector<128x32xbf16>
    %184 = vector.extract_strided_slice %164 {offsets = [0, 32], sizes = [128, 32], strides = [1, 1]} : vector<128x128xbf16> to vector<128x32xbf16>
    %cst_85 = arith.constant dense<0.000000e+00> : vector<128x128xf32>
    %185 = tpu.matmul %182, %183, %cst_85 {dimension_numbers = #tpu.dot_dimension_numbers<[1], [1], [0], [0], [0, 0, 1, 0], [], []>} : vector<128x32xbf16>, vector<128x32xbf16>, vector<128x128xf32> -> vector<128x128xf32>
    %cst_86 = arith.constant dense<0xFF800000> : vector<128xf32>
    %186 = vector.multi_reduction <maximumf>, %185, %cst_86 [1] : vector<128x128xf32> to vector<128xf32>
    %187 = vector.shape_cast %186 : vector<128xf32> to vector<128x1xf32>
    %188 = vector.broadcast %187 : vector<128x1xf32> to vector<128x128xf32>
    %189 = arith.subf %185, %188 : vector<128x128xf32>
    %190 = math.exp %189 : vector<128x128xf32>
    %cst_87 = arith.constant dense<0.000000e+00> : vector<128xf32>
    %191 = vector.multi_reduction <add>, %190, %cst_87 [1] : vector<128x128xf32> to vector<128xf32>
    %192 = vector.shape_cast %191 : vector<128xf32> to vector<128x1xf32>
    %193 = tpu.reciprocal %192 {approx = true} : vector<128x1xf32> -> vector<128x1xf32>
    %194 = vector.broadcast %193 : vector<128x1xf32> to vector<128x128xf32>
    %195 = arith.mulf %190, %194 : vector<128x128xf32>
    %196 = arith.truncf %195 : vector<128x128xf32> to vector<128x128xbf16>
    %cst_88 = arith.constant dense<0.000000e+00> : vector<128x32xf32>
    %197 = tpu.matmul %196, %184, %cst_88 {dimension_numbers = #tpu.dot_dimension_numbers<[1], [0], [0], [1], [0, 0, 1, 1], [], []>} : vector<128x128xbf16>, vector<128x32xbf16>, vector<128x32xf32> -> vector<128x32xf32>
    %c0_89 = arith.constant 0 : index
    %c32_90 = arith.constant 32 : index
    %198 = vector.load %arg13[%c0_89, %c32_90] : memref<128x128xf32, #tpu.memory_space<vmem>>, vector<128x32xf32>
    tpu.vector_store %arg13[%c0_89, %c32_90], %197 {strides = array<i32>} : memref<128x128xf32, #tpu.memory_space<vmem>>, vector<128x32xf32>,
    %199 = vector.extract_strided_slice %162 {offsets = [0, 64], sizes = [128, 32], strides = [1, 1]} : vector<128x128xbf16> to vector<128x32xbf16>
    %200 = vector.extract_strided_slice %163 {offsets = [0, 64], sizes = [128, 32], strides = [1, 1]} : vector<128x128xbf16> to vector<128x32xbf16>
    %201 = vector.extract_strided_slice %164 {offsets = [0, 64], sizes = [128, 32], strides = [1, 1]} : vector<128x128xbf16> to vector<128x32xbf16>
    %cst_91 = arith.constant dense<0.000000e+00> : vector<128x128xf32>
    %202 = tpu.matmul %199, %200, %cst_91 {dimension_numbers = #tpu.dot_dimension_numbers<[1], [1], [0], [0], [0, 0, 1, 0], [], []>} : vector<128x32xbf16>, vector<128x32xbf16>, vector<128x128xf32> -> vector<128x128xf32>
    %cst_92 = arith.constant dense<0xFF800000> : vector<128xf32>
    %203 = vector.multi_reduction <maximumf>, %202, %cst_92 [1] : vector<128x128xf32> to vector<128xf32>
    %204 = vector.shape_cast %203 : vector<128xf32> to vector<128x1xf32>
    %205 = vector.broadcast %204 : vector<128x1xf32> to vector<128x128xf32>
    %206 = arith.subf %202, %205 : vector<128x128xf32>
    %207 = math.exp %206 : vector<128x128xf32>
    %cst_93 = arith.constant dense<0.000000e+00> : vector<128xf32>
    %208 = vector.multi_reduction <add>, %207, %cst_93 [1] : vector<128x128xf32> to vector<128xf32>
    %209 = vector.shape_cast %208 : vector<128xf32> to vector<128x1xf32>
    %210 = tpu.reciprocal %209 {approx = true} : vector<128x1xf32> -> vector<128x1xf32>
    %211 = vector.broadcast %210 : vector<128x1xf32> to vector<128x128xf32>
    %212 = arith.mulf %207, %211 : vector<128x128xf32>
    %213 = arith.truncf %212 : vector<128x128xf32> to vector<128x128xbf16>
    %cst_94 = arith.constant dense<0.000000e+00> : vector<128x32xf32>
    %214 = tpu.matmul %213, %201, %cst_94 {dimension_numbers = #tpu.dot_dimension_numbers<[1], [0], [0], [1], [0, 0, 1, 1], [], []>} : vector<128x128xbf16>, vector<128x32xbf16>, vector<128x32xf32> -> vector<128x32xf32>
    %c0_95 = arith.constant 0 : index
    %c64_96 = arith.constant 64 : index
    %215 = vector.load %arg13[%c0_95, %c64_96] : memref<128x128xf32, #tpu.memory_space<vmem>>, vector<128x32xf32>
    tpu.vector_store %arg13[%c0_95, %c64_96], %214 {strides = array<i32>} : memref<128x128xf32, #tpu.memory_space<vmem>>, vector<128x32xf32>,
    %216 = vector.extract_strided_slice %162 {offsets = [0, 96], sizes = [128, 32], strides = [1, 1]} : vector<128x128xbf16> to vector<128x32xbf16>
    %217 = vector.extract_strided_slice %163 {offsets = [0, 96], sizes = [128, 32], strides = [1, 1]} : vector<128x128xbf16> to vector<128x32xbf16>
    %218 = vector.extract_strided_slice %164 {offsets = [0, 96], sizes = [128, 32], strides = [1, 1]} : vector<128x128xbf16> to vector<128x32xbf16>
    %cst_97 = arith.constant dense<0.000000e+00> : vector<128x128xf32>
    %219 = tpu.matmul %216, %217, %cst_97 {dimension_numbers = #tpu.dot_dimension_numbers<[1], [1], [0], [0], [0, 0, 1, 0], [], []>} : vector<128x32xbf16>, vector<128x32xbf16>, vector<128x128xf32> -> vector<128x128xf32>
    %cst_98 = arith.constant dense<0xFF800000> : vector<128xf32>
    %220 = vector.multi_reduction <maximumf>, %219, %cst_98 [1] : vector<128x128xf32> to vector<128xf32>
    %221 = vector.shape_cast %220 : vector<128xf32> to vector<128x1xf32>
    %222 = vector.broadcast %221 : vector<128x1xf32> to vector<128x128xf32>
    %223 = arith.subf %219, %222 : vector<128x128xf32>
    %224 = math.exp %223 : vector<128x128xf32>
    %cst_99 = arith.constant dense<0.000000e+00> : vector<128xf32>
    %225 = vector.multi_reduction <add>, %224, %cst_99 [1] : vector<128x128xf32> to vector<128xf32>
    %226 = vector.shape_cast %225 : vector<128xf32> to vector<128x1xf32>
    %227 = tpu.reciprocal %226 {approx = true} : vector<128x1xf32> -> vector<128x1xf32>
    %228 = vector.broadcast %227 : vector<128x1xf32> to vector<128x128xf32>
    %229 = arith.mulf %224, %228 : vector<128x128xf32>
    %230 = arith.truncf %229 : vector<128x128xf32> to vector<128x128xbf16>
    %cst_100 = arith.constant dense<0.000000e+00> : vector<128x32xf32>
    %231 = tpu.matmul %230, %218, %cst_100 {dimension_numbers = #tpu.dot_dimension_numbers<[1], [0], [0], [1], [0, 0, 1, 1], [], []>} : vector<128x128xbf16>, vector<128x32xbf16>, vector<128x32xf32> -> vector<128x32xf32>
    %c0_101 = arith.constant 0 : index
    %c96_102 = arith.constant 96 : index
    %232 = vector.load %arg13[%c0_101, %c96_102] : memref<128x128xf32, #tpu.memory_space<vmem>>, vector<128x32xf32>
    tpu.vector_store %arg13[%c0_101, %c96_102], %231 {strides = array<i32>} : memref<128x128xf32, #tpu.memory_space<vmem>>, vector<128x32xf32>,
    %c0_103 = arith.constant 0 : index
    %c0_104 = arith.constant 0 : index
    %233 = vector.load %arg13[%c0_103, %c0_104] : memref<128x128xf32, #tpu.memory_space<vmem>>, vector<128x128xf32>
    %234 = tpu.transpose %233, [1, 0] : vector<128x128xf32> -> vector<128x128xf32>
    %235 = arith.truncf %234 : vector<128x128xf32> to vector<128x128xbf16>
    %c3_105 = arith.constant 3 : index
    %c0_106 = arith.constant 0 : index
    %c0_107 = arith.constant 0 : index
    %236 = vector.load %arg3[%c3_105, %c0_106, %c0_107] : memref<4x128x128xbf16, #tpu.memory_space<vmem>>, vector<1x128x128xbf16>
    %237 = vector.shape_cast %236 : vector<1x128x128xbf16> to vector<128x128xbf16>
    %cst_108 = arith.constant dense<0.000000e+00> : vector<128x128xf32>
    %238 = tpu.matmul %235, %237, %cst_108 {dimension_numbers = #tpu.dot_dimension_numbers<[1], [0], [0], [1], [0, 0, 1, 1], [], []>} : vector<128x128xbf16>, vector<128x128xbf16>, vector<128x128xf32> -> vector<128x128xf32>
    %c128_109 = arith.constant 128 : index
    %c0_110 = arith.constant 0 : index
    %239 = vector.load %arg14[%c128_109, %c0_110] : memref<256x128xf32, #tpu.memory_space<vmem>>, vector<128x128xf32>
    %240 = arith.addf %239, %238 : vector<128x128xf32>
    %c128_111 = arith.constant 128 : index
    %c0_112 = arith.constant 0 : index
    %241 = vector.load %arg14[%c128_111, %c0_112] : memref<256x128xf32, #tpu.memory_space<vmem>>, vector<128x128xf32>
    tpu.vector_store %arg14[%c128_111, %c0_112], %240 {strides = array<i32>} : memref<256x128xf32, #tpu.memory_space<vmem>>, vector<128x128xf32>,
    %c0_113 = arith.constant 0 : index
    %c0_114 = arith.constant 0 : index
    %242 = vector.load %arg14[%c0_113, %c0_114] : memref<256x128xf32, #tpu.memory_space<vmem>>, vector<256x128xf32>
    %243 = arith.truncf %242 : vector<256x128xf32> to vector<256x128xbf16>
    %c0_115 = arith.constant 0 : index
    %c0_116 = arith.constant 0 : index
    %244 = vector.load %arg5[%c0_115, %c0_116] : memref<128x256xbf16, #tpu.memory_space<vmem>>, vector<128x256xbf16>
    %cst_117 = arith.constant dense<0.000000e+00> : vector<256x256xf32>
    %245 = tpu.matmul %243, %244, %cst_117 {dimension_numbers = #tpu.dot_dimension_numbers<[1], [0], [0], [1], [0, 0, 1, 1], [], []>} : vector<256x128xbf16>, vector<128x256xbf16>, vector<256x256xf32> -> vector<256x256xf32>
    %c0_118 = arith.constant 0 : index
    %c0_119 = arith.constant 0 : index
    %246 = vector.load %arg6[%c0_118, %c0_119] : memref<1x256xf32, #tpu.memory_space<vmem>>, vector<1x256xf32>
    %247 = vector.broadcast %246 : vector<1x256xf32> to vector<256x256xf32>
    %248 = arith.addf %245, %247 : vector<256x256xf32>
    %c0_120 = arith.constant 0 : index
    %c0_121 = arith.constant 0 : index
    %249 = vector.load %arg10[%c0_120, %c0_121] : memref<256x256xf32, #tpu.memory_space<vmem>>, vector<256x256xf32>
    tpu.vector_store %arg10[%c0_120, %c0_121], %248 {strides = array<i32>} : memref<256x256xf32, #tpu.memory_space<vmem>>, vector<256x256xf32>,
    %250 = arith.truncf %248 : vector<256x256xf32> to vector<256x256xbf16>
    %c0_122 = arith.constant 0 : index
    %c0_123 = arith.constant 0 : index
    %251 = vector.load %arg7[%c0_122, %c0_123] : memref<256x128xbf16, #tpu.memory_space<vmem>>, vector<256x128xbf16>
    %cst_124 = arith.constant dense<0.000000e+00> : vector<256x128xf32>
    %252 = tpu.matmul %250, %251, %cst_124 {dimension_numbers = #tpu.dot_dimension_numbers<[1], [0], [0], [1], [0, 0, 1, 1], [], []>} : vector<256x256xbf16>, vector<256x128xbf16>, vector<256x128xf32> -> vector<256x128xf32>
    %253 = vector.broadcast %7 : vector<1x128xf32> to vector<256x128xf32>
    %254 = arith.addf %252, %253 : vector<256x128xf32>
    %cst_125 = arith.constant 5.000000e-01 : f32
    %255 = vector.broadcast %cst_125 : f32 to vector<256x128xf32>
    %256 = arith.mulf %254, %255 : vector<256x128xf32>
    %cst_126 = arith.constant 0.707106769 : f32
    %257 = vector.broadcast %cst_126 : f32 to vector<256x128xf32>
    %258 = arith.mulf %254, %257 : vector<256x128xf32>
    %cst_127 = arith.constant 0.000000e+00 : f32
    %259 = vector.broadcast %cst_127 : f32 to vector<256x128xf32>
    %260 = arith.cmpf oge, %258, %259 : vector<256x128xf32>
    %cst_128 = arith.constant 1.000000e+00 : f32
    %cst_129 = arith.constant -1.000000e+00 : f32
    %261 = vector.broadcast %cst_128 : f32 to vector<256x128xf32>
    %262 = vector.broadcast %cst_129 : f32 to vector<256x128xf32>
    %263 = arith.select %260, %261, %262 : vector<256x128xi1>, vector<256x128xf32>
    %264 = math.absf %258 : vector<256x128xf32>
    %cst_130 = arith.constant 0.327591091 : f32
    %265 = vector.broadcast %cst_130 : f32 to vector<256x128xf32>
    %266 = arith.mulf %265, %264 : vector<256x128xf32>
    %cst_131 = arith.constant 1.000000e+00 : f32
    %267 = vector.broadcast %cst_131 : f32 to vector<256x128xf32>
    %268 = arith.addf %267, %266 : vector<256x128xf32>
    %269 = tpu.reciprocal %268 {approx = true} : vector<256x128xf32> -> vector<256x128xf32>
    %cst_132 = arith.constant 1.06140542 : f32
    %270 = vector.broadcast %cst_132 : f32 to vector<256x128xf32>
    %271 = arith.mulf %270, %269 : vector<256x128xf32>
    %cst_133 = arith.constant -1.45315206 : f32
    %272 = vector.broadcast %cst_133 : f32 to vector<256x128xf32>
    %273 = arith.addf %271, %272 : vector<256x128xf32>
    %274 = arith.mulf %273, %269 : vector<256x128xf32>
    %cst_134 = arith.constant 1.42141378 : f32
    %275 = vector.broadcast %cst_134 : f32 to vector<256x128xf32>
    %276 = arith.addf %274, %275 : vector<256x128xf32>
    %277 = arith.mulf %276, %269 : vector<256x128xf32>
    %cst_135 = arith.constant -0.284496725 : f32
    %278 = vector.broadcast %cst_135 : f32 to vector<256x128xf32>
    %279 = arith.addf %277, %278 : vector<256x128xf32>
    %280 = arith.mulf %279, %269 : vector<256x128xf32>
    %cst_136 = arith.constant 0.254829586 : f32
    %281 = vector.broadcast %cst_136 : f32 to vector<256x128xf32>
    %282 = arith.addf %280, %281 : vector<256x128xf32>
    %283 = arith.mulf %282, %269 : vector<256x128xf32>
    %cst_137 = arith.constant 0.000000e+00 : f32
    %284 = vector.broadcast %cst_137 : f32 to vector<256x128xf32>
    %285 = arith.subf %284, %264 : vector<256x128xf32>
    %286 = arith.mulf %285, %264 : vector<256x128xf32>
    %287 = math.exp %286 : vector<256x128xf32>
    %288 = arith.mulf %283, %287 : vector<256x128xf32>
    %cst_138 = arith.constant 1.000000e+00 : f32
    %289 = vector.broadcast %cst_138 : f32 to vector<256x128xf32>
    %290 = arith.subf %289, %288 : vector<256x128xf32>
    %291 = arith.mulf %263, %290 : vector<256x128xf32>
    %cst_139 = arith.constant 1.000000e+00 : f32
    %292 = vector.broadcast %cst_139 : f32 to vector<256x128xf32>
    %293 = arith.addf %292, %291 : vector<256x128xf32>
    %294 = arith.mulf %256, %293 : vector<256x128xf32>
    %295 = arith.truncf %294 : vector<256x128xf32> to vector<256x128xbf16>
    %c0_140 = arith.constant 0 : index
    %c0_141 = arith.constant 0 : index
    %296 = vector.load %arg8[%c0_140, %c0_141] : memref<128x128xbf16, #tpu.memory_space<vmem>>, vector<128x128xbf16>
    %cst_142 = arith.constant dense<0.000000e+00> : vector<256x128xf32>
    %297 = tpu.matmul %295, %296, %cst_142 {dimension_numbers = #tpu.dot_dimension_numbers<[1], [0], [0], [1], [0, 0, 1, 1], [], []>} : vector<256x128xbf16>, vector<128x128xbf16>, vector<256x128xf32> -> vector<256x128xf32>
    %c0_143 = arith.constant 0 : index
    %c0_144 = arith.constant 0 : index
    %298 = vector.load %arg9[%c0_143, %c0_144] : memref<1x128xf32, #tpu.memory_space<vmem>>, vector<1x128xf32>
    %299 = vector.broadcast %298 : vector<1x128xf32> to vector<256x128xf32>
    %300 = arith.addf %297, %299 : vector<256x128xf32>
    %c0_145 = arith.constant 0 : index
    %c0_146 = arith.constant 0 : index
    %301 = vector.load %arg11[%c0_145, %c0_146] : memref<256x128xf32, #tpu.memory_space<vmem>>, vector<256x128xf32>
    tpu.vector_store %arg11[%c0_145, %c0_146], %300 {strides = array<i32>} : memref<256x128xf32, #tpu.memory_space<vmem>>, vector<256x128xf32>,
    return
  }
}

</mosaic_0001>

<bundles_post_ra>
// kernel: _lambda_.1
= control target key start
LH: loop header
LB: loop body
LE: loop exit
PB: predicated region body
PF: predicated region fallthrough
CT: control target
= control target key end

     0   :  { %vm141_vm0 = vcmask 1042432   ;;  %vm92_vm1 = vcmask 48128   ;;  %v88_v58 = vlaneseq  ;;  %s11929_s18 = smov 64   ;;  %s11930_s19 = smov 32   ;;  %s17062_s1 = inlined_call_operand.vmem [shape: bf16[6,128], index: 1, kind: input, shape index: {}]   ;;  %s17063_s0 = inlined_call_operand.vmem [shape: f32[256,6], index: 0, kind: input, shape index: {}]   ;;  %s17064_s3 = inlined_call_operand.vmem [shape: bf16[4,128,128], index: 3, kind: input, shape index: {}]   ;;  %s17065_s2 = inlined_call_operand.vmem [shape: f32[5,128], index: 2, kind: input, shape index: {}]   ;;  %s17066_s4 = inlined_call_operand.vmem [shape: bf16[128,384], index: 4, kind: input, shape index: {}]   ;;  %s17067_s5 = inlined_call_operand.vmem [shape: bf16[128,256], index: 5, kind: input, shape index: {}]   ;;  %s17068_s6 = inlined_call_operand.vmem [shape: f32[1,256], index: 6, kind: input, shape index: {}]   ;;  %s17069_s10 = inlined_call_operand.vmem [shape: f32[256,256], index: 10, kind: output, shape index: {0}]   ;;  %s17070_s7 = inlined_call_operand.vmem [shape: bf16[256,128], index: 7, kind: input, shape index: {}]   ;;  %s17071_s8 = inlined_call_operand.vmem [shape: bf16[128,128], index: 8, kind: input, shape index: {}]   ;;  %s17072_s9 = inlined_call_operand.vmem [shape: f32[1,128], index: 9, kind: input, shape index: {}]   ;;  %s17073_s11 = inlined_call_operand.vmem [shape: f32[256,128], index: 11, kind: output, shape index: {1}]  }
   0x1   :  { %v87_v0 = vld [vmem:[%s17062_s1] sm:$0x7]  ;;  %v39_v2 = vld [vmem:[%s17063_s0 + $0x8] sm:$0xff]  ;;  %v40_v5 = vld [vmem:[%s17063_s0 + $0x10] sm:$0xff] }
   0x2   :  { %v38_v1 = vld [vmem:[%s17063_s0] sm:$0xff]  ;;  %10836 = vmatprep.subr.msk.bf16.mxu0 %vm141_vm0, %v87_v0  ;;  %v143_v3 = vsel %vm141_vm0, %v87_v0, 0  ;;  %v41_v6 = vld [vmem:[%s17063_s0 + $0x18] sm:$0xff]  ;;  %10837 = vmatprep.subr.msk.bf16.mxu1 %vm141_vm0, %v87_v0  ;;  %v43_v9 = vld [vmem:[%s17063_s0 + $0x28] sm:$0xff]  ;;  %v12130_v59 = vshrl.u32 %v88_v58, 7 }
   0x3   :  { %v70_v4 = vpack.c.bf16 %v39_v2, %v38_v1  ;;  %v42_v7 = vld [vmem:[%s17063_s0 + $0x20] sm:$0xff]  ;;  %9985 = vmatpush3.bf16.msra.mxu0 %v143_v3  ;;  %v71_v8 = vpack.c.bf16 %v41_v6, %v40_v5  ;;  %10835 = vmatpush3.bf16.msra.mxu1 %v143_v3  ;;  %v44_v11 = vld [vmem:[%s17063_s0 + $0x30] sm:$0xff]  ;;  %v45_v12 = vld [vmem:[%s17063_s0 + $0x38] sm:$0xff] }
   0x4   :  { %v72_v10 = vpack.c.bf16 %v43_v9, %v42_v7  ;;  %v46_v13 = vld [vmem:[%s17063_s0 + $0x40] sm:$0xff]  ;;  %v55_v15 = vld [vmem:[%s17063_s0 + $0x88] sm:$0xff]  ;;  %v56_v16 = vld [vmem:[%s17063_s0 + $0x90] sm:$0xff]  ;;  %v73_v24 = vpack.c.bf16 %v45_v12, %v44_v11  ;;  %17247 = vst [vmem:[#allocation5_spill] sm:$0xff] %v12130_v59  ;;  %v17074_v60 = vsub.s32 0, %v12130_v59 }
   0x5   :  { %9986 = vmatprep.mubr.msk.bf16.mxu0 %vm92_vm1, %v70_v4  ;;  %v54_v14 = vld [vmem:[%s17063_s0 + $0x80] sm:$0xff]  ;;  %v57_v17 = vld [vmem:[%s17063_s0 + $0x98] sm:$0xff]  ;;  %v47_v18 = vld [vmem:[%s17063_s0 + $0x48] sm:$0xff] }
   0x6   :  { %9987 = vmatmul.mubr.msk.bf16.vlgmr.msra.gmra.mrb[0].mxu0 %vm92_vm1, %v71_v8  ;;  %v78_v19 = vpack.c.bf16 %v55_v15, %v54_v14  ;;  %v79_v20 = vpack.c.bf16 %v57_v17, %v56_v16  ;;  %v58_v21 = vld [vmem:[%s17063_s0 + $0xa0] sm:$0xff]  ;;  %v59_v22 = vld [vmem:[%s17063_s0 + $0xa8] sm:$0xff]  ;;  %v74_v25 = vpack.c.bf16 %v47_v18, %v46_v13  ;;  %v60_v26 = vld [vmem:[%s17063_s0 + $0xb0] sm:$0xff] }
   0x7   :  { %9990 = vmatprep.mubr.msk.bf16.mxu0 %vm92_vm1, %v72_v10  ;;  %v80_v23 = vpack.c.bf16 %v59_v22, %v58_v21  ;;  %v61_v27 = vld [vmem:[%s17063_s0 + $0xb8] sm:$0xff]  ;;  %v62_v28 = vld [vmem:[%s17063_s0 + $0xc0] sm:$0xff]  ;;  %v63_v29 = vld [vmem:[%s17063_s0 + $0xc8] sm:$0xff] }
   0x8   :  { %10002 = vmatprep.mubr.msk.bf16.mxu1 %vm92_vm1, %v78_v19  ;;  %v48_v30 = vld [vmem:[%s17063_s0 + $0x50] sm:$0xff]  ;;  %v49_v31 = vld [vmem:[%s17063_s0 + $0x58] sm:$0xff]  ;;  %v81_v32 = vpack.c.bf16 %v61_v27, %v60_v26  ;;  %v50_v33 = vld [vmem:[%s17063_s0 + $0x60] sm:$0xff]  ;;  %v82_v35 = vpack.c.bf16 %v63_v29, %v62_v28 }
   0x9   :  { %10003 = vmatmul.mubr.msk.bf16.vlgmr.msra.gmra.mrb[0].mxu1 %vm92_vm1, %v79_v20  ;;  %v51_v34 = vld [vmem:[%s17063_s0 + $0x68] sm:$0xff]  ;;  %v75_v36 = vpack.c.bf16 %v49_v31, %v48_v30  ;;  %v64_v38 = vld [vmem:[%s17063_s0 + $0xd0] sm:$0xff]  ;;  %v65_v39 = vld [vmem:[%s17063_s0 + $0xd8] sm:$0xff] }
   0xa   :  { %10006 = vmatprep.mubr.msk.bf16.mxu1 %vm92_vm1, %v80_v23  ;;  %v76_v37 = vpack.c.bf16 %v51_v34, %v50_v33  ;;  %v66_v40 = vld [vmem:[%s17063_s0 + $0xe0] sm:$0xff]  ;;  %v67_v41 = vld [vmem:[%s17063_s0 + $0xe8] sm:$0xff]  ;;  %v52_v42 = vld [vmem:[%s17063_s0 + $0x70] sm:$0xff]  ;;  %v83_v44 = vpack.c.bf16 %v65_v39, %v64_v38 }
   0xb   :  { %v53_v43 = vld [vmem:[%s17063_s0 + $0x78] sm:$0xff]  ;;  %v84_v45 = vpack.c.bf16 %v67_v41, %v66_v40  ;;  %v68_v47 = vld [vmem:[%s17063_s0 + $0xf0] sm:$0xff]  ;;  %v10907_v50 = vld [vmem:[%s17064_s3] sm:$0xff]  }
   0xc   :  { %v77_v46 = vpack.c.bf16 %v53_v43, %v52_v42  ;;  %v69_v48 = vld [vmem:[%s17063_s0 + $0xf8] sm:$0xff]  ;;  %10018 = vmatprep.subr.bf16.mxu1 %v10907_v50  ;;  %v10908_v51 = vld [vmem:[%s17064_s3 + $0x8] sm:$0xff]   ;;  %v10909_v52 = vld [vmem:[%s17064_s3 + $0x10] sm:$0xff]  }
   0xd   :  { %v85_v49 = vpack.c.bf16 %v69_v48, %v68_v47  ;;  %10019 = vmatpush3.bf16.msra.mxu1 %v10907_v50  ;;  %v10910_v53 = vld [vmem:[%s17064_s3 + $0x18] sm:$0xff]   ;;  %v10911_v54 = vld [vmem:[%s17064_s3 + $0x20] sm:$0xff]   ;;  %v10912_v55 = vld [vmem:[%s17064_s3 + $0x28] sm:$0xff]  }
   0xe   :  { %9991 = vmatmul.mubr.msk.bf16.gmra.mrb[4].mxu0 %vm92_vm1, %v73_v24  ;;  %10020 = vmatprep.subr.bf16.mxu1 %v10908_v51  ;;  %v10913_v56 = vld [vmem:[%s17064_s3 + $0x30] sm:$0xff]   ;;  %v10914_v57 = vld [vmem:[%s17064_s3 + $0x38] sm:$0xff]   ;;  %v86_v61 = vld [vmem:[%s17065_s2] sm:$0x1f] }
   0xf   :  { %9994 = vmatprep.mubr.msk.bf16.mxu0 %vm92_vm1, %v74_v25  ;;  %v12138_v62 = vrot.slane %v86_v61, %v17074_v60 }
  0x11   :  { %10007 = vmatmul.mubr.msk.bf16.gmra.mrb[4].mxu1 %vm92_vm1, %v81_v32  ;;  %v17075_v32 = vmov -1.0  }
  0x12   :  { %10010 = vmatprep.mubr.msk.bf16.mxu1 %vm92_vm1, %v82_v35  ;;  %10021 = vmatpush3.bf16.msra.mxu1 %v10908_v51 }
  0x13   :  { %10022 = vmatprep.subr.bf16.mxu1 %v10909_v52 }
  0x16   :  { %9995 = vmatmul.mubr.msk.bf16.gmra.mrb[8].mxu0 %vm92_vm1, %v75_v36  ;;  %10023 = vmatpush3.bf16.msra.mxu1 %v10909_v52 }
  0x17   :  { %9998 = vmatprep.mubr.msk.bf16.mxu0 %vm92_vm1, %v76_v37  ;;  %10024 = vmatprep.subr.bf16.mxu1 %v10910_v53 }
  0x19   :  { %10011 = vmatmul.mubr.msk.bf16.gmra.mrb[8].mxu1 %vm92_vm1, %v83_v44 }
  0x1a   :  { %10014 = vmatprep.mubr.msk.bf16.mxu1 %vm92_vm1, %v84_v45  ;;  %10025 = vmatpush3.bf16.msra.mxu1 %v10910_v53 }
  0x1b   :  { %10026 = vmatprep.subr.bf16.mxu1 %v10911_v54 }
  0x1e   :  { %9999 = vmatmul.mubr.msk.bf16.gmra.mrb[12].mxu0 %vm92_vm1, %v77_v46  ;;  %10027 = vmatpush3.bf16.msra.mxu1 %v10911_v54 }
  0x1f   :  { %10028 = vmatprep.subr.bf16.mxu1 %v10912_v55 }
  0x21   :  { %10015 = vmatmul.mubr.msk.bf16.gmra.mrb[12].mxu1 %vm92_vm1, %v85_v49 }
  0x22   :  { %10029 = vmatpush3.bf16.msra.mxu1 %v10912_v55 }
  0x23   :  { %10030 = vmatprep.subr.bf16.mxu1 %v10913_v56 }
  0x26   :  { %10031 = vmatpush3.bf16.msra.mxu1 %v10913_v56 }
  0x27   :  { %10032 = vmatprep.subr.bf16.mxu1 %v10914_v57 }
  0x2a   :  { %10033 = vmatpush3.bf16.msra.mxu1 %v10914_v57 }
  0xd9   :  { %v9988_v63 = vpop.f32.mrb[0].mxu0 }
  0xda   :  { %v188_v0 = vadd.f32 %v9988_v63, %v12138_v62  ;;  %v179_v1 = vpop.f32.mrb[1].mxu0 }
  0xdb   :  { %v180_v2 = vadd.f32 %v179_v1, %v12138_v62  ;;  %v9989_v3 = vpop.f32.mrb[2].mxu0 }
  0xdc   :  { %v340_v4 = vmul.f32 0.70710677, %v188_v0  ;;  %v191_v5 = vadd.f32 %v9989_v3, %v12138_v62  ;;  %v182_v6 = vpop.f32.mrb[3].mxu0  ;;  %v10004_v12 = vpop.f32.mrb[0].mxu1  ;;  %v12144_v13 = vmul.f32 0.5, %v188_v0 }
  0xdd   :  { %v338_v7 = vmul.f32 0.70710677, %v180_v2  ;;  %v183_v10 = vadd.f32 %v182_v6, %v12138_v62  ;;  %v12146_v16 = vpop.f32.mrb[1].mxu1  ;;  %v12148_v22 = vmul.f32 0.5, %v180_v2  ;;  %v12189_v63 = vadd.f32 %v10004_v12, %v12138_v62 }
  0xde   :  { %v436_v8 = vand.u32 2147483647, %v340_v4  ;;  %v341_v9 = vmul.f32 0.70710677, %v191_v5  ;;  %vm372_vm2 = vcmp.ge.f32.partialorder %v340_v4, 0.0  ;;  %v12150_v25 = vpop.f32.mrb[2].mxu1 }
  0xdf   :  { %v434_v11 = vand.u32 2147483647, %v338_v7  ;;  %v339_v23 = vmul.f32 0.70710677, %v183_v10  ;;  %v12152_v31 = vpop.f32.mrb[3].mxu1  ;;  %v12156_v33 = vsel %vm372_vm2, 1.0, %v17075_v32 }
  0xe0   :  { %v468_v14 = vmul.f32 0.3275911, %v436_v8  ;;  %v852_v15 = vsub.f32 0.0, %v436_v8  ;;  %v437_v19 = vand.u32 2147483647, %v341_v9  ;;  %v12158_v34 = vmul.f32 0.5, %v191_v5 }
  0xe1   :  { %v466_v17 = vmul.f32 0.3275911, %v434_v11  ;;  %v850_v18 = vsub.f32 0.0, %v434_v11  ;;  %v9992_v24 = vpop.f32.mrb[4].mxu0  ;;  %v435_v35 = vand.u32 2147483647, %v339_v23 }
  0xe2   :  { %v500_v20 = vadd.f32 1.0, %v468_v14  ;;  %v884_v21 = vmul.f32 %v852_v15, %v436_v8  ;;  %v469_v28 = vmul.f32 0.3275911, %v437_v19  ;;  %v853_v29 = vsub.f32 0.0, %v437_v19  ;;  %v195_v30 = vpop.f32.mrb[5].mxu0 }
  0xe3   :  { %v498_v26 = vadd.f32 1.0, %v466_v17  ;;  %v882_v27 = vmul.f32 %v850_v18, %v434_v11  ;;  %v9993_v36 = vpop.f32.mrb[6].mxu0  ;;  %vm370_vm3 = vcmp.ge.f32.partialorder %v338_v7, 0.0  ;;  %vm373_vm4 = vcmp.ge.f32.partialorder %v341_v9, 0.0 }
  0xe4   :  { %11027 = vrcp.f32 %v500_v20  ;;  %v918_v37 = vmul.f32 1.442695, %v884_v21  ;;  %v501_v38 = vadd.f32 1.0, %v469_v28  ;;  %v885_v39 = vmul.f32 %v853_v29, %v437_v19  ;;  %v198_v40 = vpop.f32.mrb[7].mxu0  ;;  %v12160_v42 = vpop.f32.mrb[4].mxu1 }
  0xe5   :  { %11029 = vrcp.f32 %v498_v26  ;;  %v914_v41 = vmul.f32 1.442695, %v882_v27  ;;  %vm371_vm5 = vcmp.ge.f32.partialorder %v339_v23, 0.0  ;;  %17248 = vst [vmem:[#allocation6_spill] sm:$0xff] %v12160_v42  ;;  %v467_v43 = vmul.f32 0.3275911, %v435_v35 }
  0xe6   :  { %v851_v44 = vsub.f32 0.0, %v435_v35  ;;  %v204_v45 = vadd.f32 %v9992_v24, %v12138_v62  ;;  %v196_v46 = vadd.f32 %v195_v30, %v12138_v62  ;;  %v12164_v47 = vpop.f32.mrb[5].mxu1  ;;  %11031 = vrcp.f32 %v501_v38 }
  0xe7   :  { %17249 = vst [vmem:[#allocation7_spill] sm:$0xff] %v12164_v47  ;;  %v920_v48 = vmul.f32 1.442695, %v885_v39  ;;  %v12166_v49 = vmul.f32 0.5, %v183_v10  ;;  %v207_v50 = vadd.f32 %v9993_v36, %v12138_v62  ;;  %v12169_v51 = vpop.f32.mrb[6].mxu1  ;;  %11033 = vpow2.f32 %v918_v37 }
  0xe8   :  { %17250 = vst [vmem:[#allocation8_spill] sm:$0xff] %v12169_v51  ;;  %v12173_v52 = vsel %vm370_vm3, 1.0, %v17075_v32  ;;  %v12176_v53 = vsel %vm373_vm4, 1.0, %v17075_v32  ;;  %v344_v54 = vmul.f32 0.70710677, %v204_v45  ;;  %v12180_v56 = vpop.f32.mrb[7].mxu1  ;;  %11035 = vpow2.f32 %v914_v41 }
  0xe9   :  { %v12178_v55 = vpop.f32.mrb[8].mxu0  ;;  %17251 = vst [vmem:[#allocation9_spill] sm:$0xff] %v12180_v56  ;;  %v12184_v57 = vsel %vm371_vm5, 1.0, %v17075_v32  ;;  %v342_v58 = vmul.f32 0.70710677, %v196_v46  ;;  %v499_v0 = vadd.f32 1.0, %v467_v43  ;;  %v883_v1 = vmul.f32 %v851_v44, %v435_v35 }
  0xea   :  { %v12186_v61 = vpop.f32.mrb[9].mxu0  ;;  %v440_v2 = vand.u32 2147483647, %v344_v54  ;;  %v345_v3 = vmul.f32 0.70710677, %v207_v50  ;;  %11037 = vpow2.f32 %v920_v48  ;;  %v12193_v5 = vmul.f32 0.5, %v204_v45 }
  0xeb   :  { %v12191_v4 = vpop.f32.mrb[10].mxu0  ;;  %v12195_v6 = vmul.f32 0.5, %v196_v46  ;;  %v438_v7 = vand.u32 2147483647, %v342_v58  ;;  %vm376_vm6 = vcmp.ge.f32.partialorder %v344_v54, 0.0  ;;  %v199_v11 = vadd.f32 %v198_v40, %v12138_v62 }
  0xec   :  { %v12197_v8 = vpop.f32.mrb[11].mxu0  ;;  %v472_v9 = vmul.f32 0.3275911, %v440_v2  ;;  %v856_v10 = vsub.f32 0.0, %v440_v2  ;;  %vm374_vm7 = vcmp.ge.f32.partialorder %v342_v58, 0.0  ;;  %vm377_vm8 = vcmp.ge.f32.partialorder %v345_v3, 0.0 }
  0xed   :  { %v470_v14 = vmul.f32 0.3275911, %v438_v7  ;;  %v854_v15 = vsub.f32 0.0, %v438_v7  ;;  %v441_v17 = vand.u32 2147483647, %v345_v3  ;;  %v12203_v21 = vpop.f32.mrb[8].mxu1  ;;  %11039 = vrcp.f32 %v499_v0 }
  0xee   :  { %v12200_v12 = vpop.eup %11027  ;;  %v916_v19 = vmul.f32 1.442695, %v883_v1  ;;  %v888_v20 = vmul.f32 %v856_v10, %v440_v2  ;;  %17252 = vst [vmem:[#allocation10_spill] sm:$0xff] %v12203_v21  ;;  %v12208_v24 = vsel %vm376_vm6, 1.0, %v17075_v32  ;;  %v12210_v27 = vmul.f32 0.5, %v207_v50  ;;  %v12212_v29 = vpop.f32.mrb[9].mxu1 }
  0xef   :  { %v564_v18 = vmul.f32 1.0614054, %v12200_v12  ;;  %v12205_v23 = vpop.eup %11029  ;;  %v886_v26 = vmul.f32 %v854_v15, %v438_v7  ;;  %v857_v28 = vsub.f32 0.0, %v441_v17  ;;  %17253 = vst [vmem:[#allocation11_spill] sm:$0xff] %v12212_v29  ;;  %v504_v35 = vadd.f32 1.0, %v472_v9  ;;  %v12225_v44 = vpop.f32.mrb[10].mxu1 }
  0xf0   :  { %v12216_v36 = vsel %vm374_vm7, 1.0, %v17075_v32  ;;  %v343_v37 = vmul.f32 0.70710677, %v199_v11  ;;  %v12218_v38 = vpop.eup %11031  ;;  %v502_v39 = vadd.f32 1.0, %v470_v14  ;;  %v12221_v40 = vsel %vm377_vm8, 1.0, %v17075_v32  ;;  %17254 = vst [vmem:[#allocation12_spill] sm:$0xff] %v12225_v44 }
  0xf1   :  { %v596_v30 = vadd.f32 -1.4531521, %v564_v18  ;;  %v473_v41 = vmul.f32 0.3275911, %v441_v17  ;;  %v12223_v43 = vpop.f32.mrb[12].mxu0  ;;  %v12227_v45 = vpop.eup %11033  ;;  %11041 = vpow2.f32 %v916_v19  ;;  %v889_v2 = vmul.f32 %v857_v28, %v441_v17 }
  0xf2   :  { %v565_v48 = vmul.f32 1.0614054, %v12218_v38  ;;  %v926_v50 = vmul.f32 1.442695, %v888_v20  ;;  %v12231_v54 = vpop.f32.mrb[13].mxu0  ;;  %v12233_v58 = vpop.f32.mrb[11].mxu1  ;;  %11043 = vrcp.f32 %v504_v35  ;;  %v220_v15 = vadd.f32 %v12178_v55, %v12138_v62 }
  0xf3   :  { %v628_v46 = vmul.f32 %v12200_v12, %v596_v30  ;;  %17255 = vst [vmem:[#allocation13_spill] sm:$0xff] %v12233_v58  ;;  %v12235_v0 = vpop.eup %11035  ;;  %v922_v1 = vmul.f32 1.442695, %v886_v26  ;;  %v12237_v3 = vmul.f32 0.5, %v199_v11  ;;  %v439_v7 = vand.u32 2147483647, %v343_v37 }
  0xf4   :  { %v12239_v9 = vpop.f32.mrb[14].mxu0  ;;  %v597_v14 = vadd.f32 -1.4531521, %v565_v48  ;;  %v12245_v19 = vpop.eup %11037  ;;  %11045 = vrcp.f32 %v502_v39  ;;  %v505_v20 = vadd.f32 1.0, %v473_v41  ;;  %v212_v11 = vadd.f32 %v12186_v61, %v12138_v62 }
  0xf5   :  { %v660_v10 = vadd.f32 1.4214138, %v628_v46  ;;  %v12243_v18 = vpop.f32.mrb[15].mxu0  ;;  %v855_v30 = vsub.f32 0.0, %v439_v7  ;;  %v12249_v17 = vpop.f32.mrb[12].mxu1  ;;  %vm375_vm9 = vcmp.ge.f32.partialorder %v343_v37, 0.0  ;;  %11047 = vpow2.f32 %v926_v50 }
  0xf6   :  { %17256 = vst [vmem:[#allocation14_spill] sm:$0xff] %v12249_v17  ;;  %v629_v28 = vmul.f32 %v12218_v38, %v597_v14  ;;  %v348_v35 = vmul.f32 0.70710677, %v220_v15  ;;  %v928_v55 = vmul.f32 1.442695, %v889_v2  ;;  %11049 = vpow2.f32 %v922_v1  ;;  %v12253_v41 = vpop.f32.mrb[13].mxu1 }
  0xf7   :  { %v692_v26 = vmul.f32 %v12200_v12, %v660_v10  ;;  %v471_v46 = vmul.f32 0.3275911, %v439_v7  ;;  %v346_v48 = vmul.f32 0.70710677, %v212_v11  ;;  %v887_v39 = vmul.f32 %v855_v30, %v439_v7  ;;  %17257 = vst [vmem:[#allocation15_spill] sm:$0xff] %v12253_v41  ;;  %v12266_v1 = vpop.eup %11039 }
  0xf8   :  { %v661_v32 = vadd.f32 1.4214138, %v629_v28  ;;  %11051 = vrcp.f32 %v505_v20  ;;  %v17258_v61 = vmov -1.0   ;;  %v12258_v17 = vmul.f32 0.5, %v220_v15 }
  0xf9   :  { %v724_v60 = vadd.f32 -0.28449672, %v692_v26  ;;  %v12256_v59 = vsel %vm375_vm9, 1.0, %v17258_v61  ;;  %v444_v10 = vand.u32 2147483647, %v348_v35  ;;  %v223_v14 = vadd.f32 %v12191_v4, %v12138_v62  ;;  %v12264_v26 = vpop.f32.mrb[14].mxu1 }
  0xfa   :  { %17259 = vst [vmem:[#allocation16_spill] sm:$0xff] %v12258_v17  ;;  %v693_v50 = vmul.f32 %v12218_v38, %v661_v32  ;;  %v442_v2 = vand.u32 2147483647, %v346_v48  ;;  %17260 = vst [vmem:[#allocation17_spill] sm:$0xff] %v12264_v26  ;;  %v503_v7 = vadd.f32 1.0, %v471_v46  ;;  %vm380_vm10 = vcmp.ge.f32.partialorder %v348_v35, 0.0 }
  0xfb   :  { %v756_v37 = vmul.f32 %v12200_v12, %v724_v60  ;;  %v476_v20 = vmul.f32 0.3275911, %v444_v10  ;;  %v860_v30 = vsub.f32 0.0, %v444_v10  ;;  %v12268_v28 = vpop.eup %11041  ;;  %11053 = vpow2.f32 %v928_v55 }
  0xfc   :  { %v725_v41 = vadd.f32 -0.28449672, %v693_v50  ;;  %v924_v60 = vmul.f32 1.442695, %v887_v39  ;;  %vm378_vm11 = vcmp.ge.f32.partialorder %v346_v48, 0.0  ;;  %v858_v58 = vsub.f32 0.0, %v442_v2  ;;  %v12272_v44 = vpop.eup %11043 }
  0xfd   :  { %v788_v15 = vadd.f32 0.2548296, %v756_v37  ;;  %v474_v32 = vmul.f32 0.3275911, %v442_v2  ;;  %v215_v4 = vadd.f32 %v12197_v8, %v12138_v62  ;;  %v508_v29 = vadd.f32 1.0, %v476_v20  ;;  %v12284_v50 = vpop.f32.mrb[15].mxu1 }
  0xfe   :  { %v757_v46 = vmul.f32 %v12218_v38, %v725_v41  ;;  %v349_v21 = vmul.f32 0.70710677, %v223_v14  ;;  %v12276_v56 = vpop.eup %11045  ;;  %11055 = vrcp.f32 %v503_v7  ;;  %v12280_v55 = vsel %vm380_vm10, 1.0, %v17258_v61  ;;  %17263 = vst [vmem:[#allocation20_spill] sm:$0xff] %v12284_v50 }
  0xff   :  { %v820_v26 = vmul.f32 %v12200_v12, %v788_v15  ;;  %17261 = vst [vmem:[#allocation18_spill] sm:$0xff] %v12280_v55  ;;  %v892_v39 = vmul.f32 %v860_v30, %v444_v10  ;;  %v12282_v37 = vmul.f32 0.5, %v212_v11  ;;  %11057 = vpow2.f32 %v924_v60  ;;  %v12287_v41 = vpop.eup %11047 }
 0x100   :  { %v789_v51 = vadd.f32 0.2548296, %v757_v46  ;;  %v890_v12 = vmul.f32 %v858_v58, %v442_v2  ;;  %v12291_v20 = vsel %vm378_vm11, 1.0, %v17258_v61  ;;  %v506_v7 = vadd.f32 1.0, %v474_v32  ;;  %v12295_v10 = vpop.eup %11049 }
 0x101   :  { %17262 = vst [vmem:[#allocation19_spill] sm:$0xff] %v12282_v37  ;;  %v980_v8 = vmul.f32 %v12227_v45, %v820_v26  ;;  %v12293_v35 = vmul.f32 0.5, %v223_v14  ;;  %v445_v15 = vand.u32 2147483647, %v349_v21  ;;  %11059 = vrcp.f32 %v508_v29 }
 0x102   :  { %v821_v30 = vmul.f32 %v12218_v38, %v789_v51  ;;  %v347_v45 = vmul.f32 0.70710677, %v215_v4  ;;  %v12298_v26 = vpop.eup %11051  ;;  %v934_v58 = vmul.f32 1.442695, %v892_v39  ;;  %v236_v48 = vadd.f32 %v12223_v43, %v12138_v62 }
 0x103   :  { %17264 = vst [vmem:[#allocation21_spill] sm:$0xff] %v12293_v35  ;;  %v1012_v11 = vsub.f32 1.0, %v980_v8  ;;  %v477_v2 = vmul.f32 0.3275911, %v445_v15  ;;  %v861_v60 = vsub.f32 0.0, %v445_v15  ;;  %11061 = vrcp.f32 %v506_v7 }
 0x104   :  { %v981_v14 = vmul.f32 %v12245_v19, %v821_v30  ;;  %v930_v46 = vmul.f32 1.442695, %v890_v12  ;;  %v443_v50 = vand.u32 2147483647, %v347_v45  ;;  %vm381_vm12 = vcmp.ge.f32.partialorder %v349_v21, 0.0 }
 0x105   :  { %v1044_v32 = vmul.f32 %v1012_v11, %v12156_v33  ;;  %vm379_vm13 = vcmp.ge.f32.partialorder %v347_v45, 0.0  ;;  %v228_v51 = vadd.f32 %v12231_v54, %v12138_v62  ;;  %v12306_v29 = vpop.eup %11053  ;;  %v509_v39 = vadd.f32 1.0, %v477_v2 }
 0x106   :  { %v1013_v38 = vsub.f32 1.0, %v981_v14  ;;  %v893_v8 = vmul.f32 %v861_v60, %v445_v15  ;;  %v859_v35 = vsub.f32 0.0, %v443_v50  ;;  %11063 = vpow2.f32 %v934_v58 }
 0x107   :  { %v1076_v17 = vadd.f32 1.0, %v1044_v32  ;;  %v12308_v43 = vmul.f32 0.5, %v215_v4  ;;  %v352_v33 = vmul.f32 0.70710677, %v236_v48  ;;  %11065 = vpow2.f32 %v930_v46 }
 0x108   :  { %v1045_v19 = vmul.f32 %v1013_v38, %v12176_v53  ;;  %v12312_v21 = vsel %vm381_vm12, 1.0, %v17258_v61  ;;  %v475_v12 = vmul.f32 0.3275911, %v443_v50  ;;  %v12314_v7 = vpop.eup %11055  ;;  %v12318_v54 = vsel %vm379_vm13, 1.0, %v17258_v61 }
 0x109   :  { %17265 = vst [vmem:[#allocation22_spill] sm:$0xff] %v12308_v43  ;;  %17266 = vst [vmem:[#allocation23_spill] sm:$0xff] %v12312_v21  ;;  %v891_v15 = vmul.f32 %v859_v35, %v443_v50  ;;  %v448_v11 = vand.u32 2147483647, %v352_v33  ;;  %v350_v30 = vmul.f32 0.70710677, %v228_v51  ;;  %v12320_v58 = vpop.eup %11057  ;;  %11067 = vrcp.f32 %v509_v39 }
 0x10a   :  { %v1077_v4 = vadd.f32 1.0, %v1045_v19  ;;  %v936_v2 = vmul.f32 1.442695, %v893_v8  ;;  %v12322_v53 = vmul.f32 0.5, %v236_v48  ;;  %v12325_v60 = vmul.f32 %v1076_v17, %v12144_v13 }
 0x10b   :  { %v480_v32 = vmul.f32 0.3275911, %v448_v11  ;;  %v864_v14 = vsub.f32 0.0, %v448_v11  ;;  %v446_v46 = vand.u32 2147483647, %v350_v30  ;;  %v12327_v38 = vpop.eup %11059  ;;  %v507_v50 = vadd.f32 1.0, %v475_v12 }
 0x10c   :  { %17267 = vst [vmem:[#allocation24_spill] sm:$0xff] %v12322_v53  ;;  %v12330_v45 = vmul.f32 %v1077_v4, %v12158_v34  ;;  %vm384_vm14 = vcmp.ge.f32.partialorder %v352_v33, 0.0  ;;  %v239_v35 = vadd.f32 %v12239_v9, %v12138_v62  ;;  %v932_v39 = vmul.f32 1.442695, %v891_v15 }
 0x10d   :  { %v896_v8 = vmul.f32 %v864_v14, %v448_v11  ;;  %v478_v48 = vmul.f32 0.3275911, %v446_v46  ;;  %v862_v19 = vsub.f32 0.0, %v446_v46  ;;  %v512_v17 = vadd.f32 1.0, %v480_v32  ;;  %v12338_v21 = vpop.eup %11061 }
 0x10e   :  { %v353_v53 = vmul.f32 0.70710677, %v239_v35  ;;  %v231_v47 = vadd.f32 %v12243_v18, %v12138_v62  ;;  %11069 = vpow2.f32 %v936_v2  ;;  %vm382_vm15 = vcmp.ge.f32.partialorder %v350_v30, 0.0 }
 0x10f   :  { %v942_v34 = vmul.f32 1.442695, %v896_v8  ;;  %v894_v12 = vmul.f32 %v862_v19, %v446_v46  ;;  %11071 = vrcp.f32 %v507_v50  ;;  %v12342_v9 = vsel %vm384_vm14, 1.0, %v17258_v61 }
 0x110   :  { %17268 = vst [vmem:[#allocation25_spill] sm:$0xff] %v12342_v9  ;;  %v12344_v15 = vmul.f32 0.5, %v228_v51  ;;  %v449_v11 = vand.u32 2147483647, %v353_v53  ;;  %v12346_v4 = vpop.eup %11063  ;;  %11073 = vpow2.f32 %v932_v39  ;;  %v510_v32 = vadd.f32 1.0, %v478_v48 }
 0x111   :  { %17270 = vst [vmem:[#allocation27_spill] sm:$0xff] %v12346_v4  ;;  %v351_v14 = vmul.f32 0.70710677, %v231_v47  ;;  %v562_v18 = vmul.f32 1.0614054, %v12205_v23  ;;  %v12349_v13 = vpop.eup %11065  ;;  %11075 = vrcp.f32 %v512_v17  ;;  %v12352_v30 = vsel %vm382_vm15, 1.0, %v17258_v61 }
 0x112   :  { %17269 = vst [vmem:[#allocation26_spill] sm:$0xff] %v12344_v15  ;;  %17271 = vst [vmem:[#allocation28_spill] sm:$0xff] %v12352_v30  ;;  %v938_v2 = vmul.f32 1.442695, %v894_v12  ;;  %v12354_v33 = vmul.f32 0.5, %v239_v35  ;;  %11077 = vpow2.f32 %v942_v34  ;;  %vm385_vm0 = vcmp.ge.f32.partialorder %v353_v53, 0.0 }
 0x113   :  { %v481_v51 = vmul.f32 0.3275911, %v449_v11  ;;  %v563_v46 = vmul.f32 1.0614054, %v12266_v1  ;;  %v12357_v50 = vpop.eup %11067  ;;  %v865_v39 = vsub.f32 0.0, %v449_v11  ;;  %vm383_vm1 = vcmp.ge.f32.partialorder %v351_v14, 0.0 }
 0x114   :  { %17272 = vst [vmem:[#allocation29_spill] sm:$0xff] %v12354_v33  ;;  %v594_v8 = vadd.f32 -1.4531521, %v562_v18  ;;  %v566_v48 = vmul.f32 1.0614054, %v12276_v56  ;;  %11079 = vrcp.f32 %v510_v32  ;;  %v12360_v19 = vmul.f32 0.5, %v231_v47 }
 0x115   :  { %v447_v17 = vand.u32 2147483647, %v351_v14  ;;  %v595_v15 = vadd.f32 -1.4531521, %v563_v46  ;;  %11081 = vpow2.f32 %v938_v2  ;;  %v12363_v35 = vsel %vm385_vm0, 1.0, %v17258_v61 }
 0x116   :  { %17273 = vst [vmem:[#allocation30_spill] sm:$0xff] %v12360_v19  ;;  %17274 = vst [vmem:[#allocation31_spill] sm:$0xff] %v12363_v35  ;;  %v626_v53 = vmul.f32 %v12205_v23, %v594_v8  ;;  %v567_v34 = vmul.f32 1.0614054, %v12314_v7  ;;  %v513_v12 = vadd.f32 1.0, %v481_v51  ;;  %v12368_v33 = vsel %vm383_vm1, 1.0, %v17258_v61 }
 0x117   :  { %17275 = vst [vmem:[#allocation32_spill] sm:$0xff] %v12368_v33  ;;  %v627_v18 = vmul.f32 %v12266_v1, %v595_v15  ;;  %v598_v9 = vadd.f32 -1.4531521, %v566_v48  ;;  %v897_v32 = vmul.f32 %v865_v39, %v449_v11  ;;  %v568_v14 = vmul.f32 1.0614054, %v12272_v44 }
 0x118   :  { %v658_v47 = vadd.f32 1.4214138, %v626_v53  ;;  %v599_v19 = vadd.f32 -1.4531521, %v567_v34  ;;  %v12372_v2 = vpop.eup %11069  ;;  %v479_v46 = vmul.f32 0.3275911, %v447_v17  ;;  %11083 = vrcp.f32 %v513_v12 }
 0x119   :  { %17276 = vst [vmem:[#allocation33_spill] sm:$0xff] %v12372_v2  ;;  %v863_v35 = vsub.f32 0.0, %v447_v17  ;;  %v659_v30 = vadd.f32 1.4214138, %v627_v18  ;;  %v630_v8 = vmul.f32 %v12276_v56, %v598_v9  ;;  %v12375_v55 = vpop.eup %11071  ;;  %v569_v15 = vmul.f32 1.0614054, %v12298_v26 }
 0x11a   :  { %v690_v51 = vmul.f32 %v12205_v23, %v658_v47  ;;  %v631_v33 = vmul.f32 %v12314_v7, %v599_v19  ;;  %v600_v11 = vadd.f32 -1.4531521, %v568_v14  ;;  %v12380_v39 = vpop.eup %11073  ;;  %v12384_v34 = vmul.f32 0.5, %v12189_v63 }
 0x11b   :  { %v691_v48 = vmul.f32 %v12266_v1, %v659_v30  ;;  %v662_v53 = vadd.f32 1.4214138, %v630_v8  ;;  %v12386_v18 = vpop.eup %11075  ;;  %v601_v42 = vadd.f32 -1.4531521, %v569_v15  ;;  %v944_v4 = vmul.f32 1.442695, %v897_v32 }
 0x11c   :  { %17277 = vst [vmem:[#allocation34_spill] sm:$0xff] %v12384_v34  ;;  %17278 = vst [vmem:[#allocation35_spill] sm:$0xff] %v12386_v18  ;;  %v722_v9 = vadd.f32 -0.28449672, %v690_v51  ;;  %v663_v2 = vadd.f32 1.4214138, %v631_v33  ;;  %v632_v47 = vmul.f32 %v12272_v44, %v600_v11  ;;  %v12389_v19 = vpop.eup %11077  ;;  %v895_v11 = vmul.f32 %v863_v35, %v447_v17 }
 0x11d   :  { %17279 = vst [vmem:[#allocation36_spill] sm:$0xff] %v12389_v19  ;;  %v723_v14 = vadd.f32 -0.28449672, %v691_v48  ;;  %v694_v43 = vmul.f32 %v12276_v56, %v662_v53  ;;  %v12393_v12 = vmul.f32 0.70710677, %v12189_v63  ;;  %v633_v34 = vmul.f32 %v12298_v26, %v601_v42 }
 0x11e   :  { %v754_v30 = vmul.f32 %v12205_v23, %v722_v9  ;;  %v695_v8 = vmul.f32 %v12314_v7, %v663_v2  ;;  %v664_v51 = vadd.f32 1.4214138, %v632_v47  ;;  %v12398_v33 = vpop.eup %11079  ;;  %v511_v15 = vadd.f32 1.0, %v479_v46 }
 0x11f   :  { %v755_v19 = vmul.f32 %v12266_v1, %v723_v14  ;;  %v726_v32 = vadd.f32 -0.28449672, %v694_v43  ;;  %v12401_v48 = vpop.eup %11081  ;;  %v665_v63 = vadd.f32 1.4214138, %v633_v34  ;;  %11085 = vpow2.f32 %v944_v4 }
 0x120   :  { %v786_v53 = vadd.f32 0.2548296, %v754_v30  ;;  %v727_v18 = vadd.f32 -0.28449672, %v695_v8  ;;  %v696_v37 = vmul.f32 %v12272_v44, %v664_v51  ;;  %v12406_v42 = vand.u32 2147483647, %v12393_v12 }
 0x121   :  { %v787_v9 = vadd.f32 0.2548296, %v755_v19  ;;  %v758_v2 = vmul.f32 %v12276_v56, %v726_v32  ;;  %v697_v43 = vmul.f32 %v12298_v26, %v665_v63  ;;  %11087 = vrcp.f32 %v511_v15 }
 0x122   :  { %v818_v46 = vmul.f32 %v12205_v23, %v786_v53  ;;  %v759_v17 = vmul.f32 %v12314_v7, %v727_v18  ;;  %v728_v35 = vadd.f32 -0.28449672, %v696_v37  ;;  %v12411_v47 = vmul.f32 1.442695, %v895_v11  ;;  %v12417_v23 = vpop.eup %11083 }
 0x123   :  { %v819_v34 = vmul.f32 %v12266_v1, %v787_v9  ;;  %v790_v14 = vadd.f32 0.2548296, %v758_v2  ;;  %v729_v30 = vadd.f32 -0.28449672, %v697_v43  ;;  %vm388_vm2 = vcmp.ge.f32.partialorder %v12393_v12, 0.0 }
 0x124   :  { %v978_v4 = vmul.f32 %v12235_v0, %v818_v46  ;;  %v791_v19 = vadd.f32 0.2548296, %v759_v17  ;;  %v760_v8 = vmul.f32 %v12272_v44, %v728_v35  ;;  %v484_v51 = vmul.f32 0.3275911, %v12406_v42 }
 0x125   :  { %v979_v18 = vmul.f32 %v12268_v28, %v819_v34  ;;  %v822_v37 = vmul.f32 %v12276_v56, %v790_v14  ;;  %v570_v15 = vmul.f32 1.0614054, %v12338_v21  ;;  %v761_v0 = vmul.f32 %v12298_v26, %v729_v30 }
 0x126   :  { %v1010_v1 = vsub.f32 1.0, %v978_v4  ;;  %v823_v11 = vmul.f32 %v12314_v7, %v791_v19  ;;  %v792_v32 = vadd.f32 0.2548296, %v760_v8  ;;  %v868_v9 = vsub.f32 0.0, %v12406_v42 }
 0x127   :  { %v1011_v53 = vsub.f32 1.0, %v979_v18  ;;  %v982_v63 = vmul.f32 %v12295_v10, %v822_v37  ;;  %v571_v2 = vmul.f32 1.0614054, %v12375_v55  ;;  %v793_v46 = vadd.f32 0.2548296, %v761_v0 }
 0x128   :  { %v1042_v28 = vmul.f32 %v1010_v1, %v12173_v52  ;;  %v983_v56 = vmul.f32 %v12320_v58, %v823_v11  ;;  %v824_v17 = vmul.f32 %v12272_v44, %v792_v32  ;;  %v602_v35 = vadd.f32 -1.4531521, %v570_v15 }
 0x129   :  { %v1043_v43 = vmul.f32 %v1011_v53, %v12184_v57  ;;  %v1014_v7 = vsub.f32 1.0, %v982_v63  ;;  %v603_v34 = vadd.f32 -1.4531521, %v571_v2  ;;  %v825_v10 = vmul.f32 %v12298_v26, %v793_v46  ;;  %v12434_v30 = vpop.eup %11085 }
 0x12a   :  { %v1074_v14 = vadd.f32 1.0, %v1042_v28  ;;  %v1015_v4 = vsub.f32 1.0, %v983_v56  ;;  %v984_v19 = vmul.f32 %v12287_v41, %v824_v17  ;;  %v634_v58 = vmul.f32 %v12338_v21, %v602_v35 }
 0x12b   :  { %v1075_v8 = vadd.f32 1.0, %v1043_v43  ;;  %v1046_v52 = vmul.f32 %v1014_v7, %v12216_v36  ;;  %v635_v44 = vmul.f32 %v12375_v55, %v603_v34  ;;  %v985_v37 = vmul.f32 %v12306_v29, %v825_v10  ;;  %v12442_v1 = vpop.eup %11087 }
 0x12c   :  { %v1106_v57 = vmul.f32 %v1074_v14, %v12148_v22  ;;  %v1047_v18 = vmul.f32 %v1015_v4, %v12256_v59  ;;  %v1016_v15 = vsub.f32 1.0, %v984_v19  ;;  %v666_v11 = vadd.f32 1.4214138, %v634_v58 }
 0x12d   :  { %v1107_v41 = vmul.f32 %v1075_v8, %v12166_v49  ;;  %v1078_v26 = vadd.f32 1.0, %v1046_v52  ;;  %v667_v0 = vadd.f32 1.4214138, %v635_v44  ;;  %v1017_v36 = vsub.f32 1.0, %v985_v37 }
 0x12e   :  { %v1079_v32 = vadd.f32 1.0, %v1047_v18  ;;  %v1048_v53 = vmul.f32 %v1016_v15, %v12208_v24  ;;  %v244_v63 = vadd.f32 %v12146_v16, %v12138_v62  ;;  %v12451_v59 = vsel %vm388_vm2, 1.0, %v17258_v61 }
 0x12f   :  { %v1138_v22 = vpack.c.bf16 %v1107_v41, %v1106_v57  ;;  %v698_v29 = vmul.f32 %v12338_v21, %v666_v11  ;;  %v699_v49 = vmul.f32 %v12375_v55, %v667_v0  ;;  %v1110_v2 = vmul.f32 %v1078_v26, %v12195_v6 }
 0x130   :  { %v1111_v28 = vmul.f32 %v1079_v32, %v12237_v3  ;;  %v1049_v56 = vmul.f32 %v1017_v36, %v12221_v40  ;;  %v1080_v24 = vadd.f32 1.0, %v1048_v53  ;;  %v900_v16 = vmul.f32 %v868_v9, %v12406_v42 }
 0x131   :  { %10034 = vmatprep.mubr.bf16.mxu1 %v1138_v22  ;;  %v730_v46 = vadd.f32 -0.28449672, %v698_v29  ;;  %v731_v17 = vadd.f32 -0.28449672, %v699_v49  ;;  %v354_v43 = vmul.f32 0.70710677, %v244_v63  ;;  %v17280_v12 = vpack.c.bf16 %v12330_v45, %v12325_v60 }
 0x132   :  { %v1140_v7 = vpack.c.bf16 %v1111_v28, %v1110_v2  ;;  %v1081_v35 = vadd.f32 1.0, %v1049_v56  ;;  %v516_v34 = vadd.f32 1.0, %v484_v51  ;;  %v572_v6 = vmul.f32 1.0614054, %v12327_v38 }
 0x133   :  { %10035 = vmatmul.mubr.bf16.vlgmr.msra.gmra.mrb[16].mxu1 %v17280_v12  ;;  %v762_v3 = vmul.f32 %v12338_v21, %v730_v46  ;;  %v763_v40 = vmul.f32 %v12375_v55, %v731_v17  ;;  %v450_v14 = vand.u32 2147483647, %v354_v43  ;;  %v255_v42 = vadd.f32 %v12150_v25, %v12138_v62 }
 0x134   :  { %10038 = vmatprep.mubr.bf16.mxu1 %v1140_v7  ;;  %v1112_v9 = vmul.f32 %v1080_v24, %v12193_v5  ;;  %v1113_v4 = vmul.f32 %v1081_v35, %v12210_v27  ;;  %v573_v60 = vmul.f32 1.0614054, %v12357_v50  ;;  %v604_v45 = vadd.f32 -1.4531521, %v572_v6  ;;  %v10915_v35 = vld [vmem:[%s17064_s3 + $0x40] sm:$0xff]   ;;  %v17281_v6 = vld [vmem:[#allocation19_spill] sm:$0xff] }
 0x135   :  { %11089 = vpow2.f32 %v12411_v47  ;;  %v950_v51 = vmul.f32 1.442695, %v900_v16  ;;  %v794_v10 = vadd.f32 0.2548296, %v762_v3  ;;  %v795_v19 = vadd.f32 0.2548296, %v763_v40  ;;  %10066 = vmatprep.subr.bf16.mxu0 %v10915_v35 }
 0x136   :  { %v1141_v8 = vpack.c.bf16 %v1113_v4, %v1112_v9  ;;  %v866_v52 = vsub.f32 0.0, %v450_v14  ;;  %v605_v58 = vadd.f32 -1.4531521, %v573_v60  ;;  %v636_v44 = vmul.f32 %v12327_v38, %v604_v45  ;;  %v17282_v40 = vld [vmem:[#allocation22_spill] sm:$0xff]  ;;  %v10916_v9 = vld [vmem:[%s17064_s3 + $0x80] sm:$0xff]   ;;  %10067 = vmatpush3.bf16.msra.mxu0 %v10915_v35 }
 0x137   :  { %11091 = vrcp.f32 %v516_v34  ;;  %v826_v25 = vmul.f32 %v12338_v21, %v794_v10  ;;  %v827_v5 = vmul.f32 %v12375_v55, %v795_v19  ;;  %v482_v57 = vmul.f32 0.3275911, %v450_v14  ;;  %v10917_v4 = vld [vmem:[%s17064_s3 + $0x48] sm:$0xff]   ;;  %10114 = vmatprep.subr.bf16.mxu1 %v10916_v9 }
 0x138   :  { %v637_v27 = vmul.f32 %v12357_v50, %v605_v58  ;;  %v668_v18 = vadd.f32 1.4214138, %v636_v44  ;;  %v357_v37 = vmul.f32 0.70710677, %v255_v42  ;;  %v247_v47 = vadd.f32 %v12152_v31, %v12138_v62  ;;  %v10918_v60 = vld [vmem:[%s17064_s3 + $0x88] sm:$0xff]   ;;  %10115 = vmatpush3.bf16.msra.mxu1 %v10916_v9  ;;  %10068 = vmatprep.subr.bf16.mxu0 %v10917_v4  ;;  %v17289_v9 = vld [vmem:[#allocation7_spill] sm:$0xff] }
 0x139   :  { %v986_v15 = vmul.f32 %v12349_v13, %v826_v25  ;;  %v987_v41 = vmul.f32 %v12380_v39, %v827_v5  ;;  %vm386_vm3 = vcmp.ge.f32.partialorder %v354_v43, 0.0  ;;  %v898_v26 = vmul.f32 %v866_v52, %v450_v14  ;;  %v17283_v5 = vld [vmem:[#allocation27_spill] sm:$0xff]  ;;  %10116 = vmatprep.subr.bf16.mxu1 %v10918_v60 }
 0x13a   :  { %11093 = vpow2.f32 %v950_v51  ;;  %v12479_v11 = vmul.f32 0.5, %v244_v63  ;;  %v669_v21 = vadd.f32 1.4214138, %v637_v27  ;;  %v700_v55 = vmul.f32 %v12327_v38, %v668_v18  ;;  %v10919_v18 = vld [vmem:[%s17064_s3 + $0x50] sm:$0xff]   ;;  %10069 = vmatpush3.bf16.msra.mxu0 %v10917_v4 }
 0x13b   :  { %10039 = vmatmul.mubr.bf16.gmra.mrb[20].mxu1 %v1141_v8  ;;  %v1018_v0 = vsub.f32 1.0, %v986_v15  ;;  %v1019_v32 = vsub.f32 1.0, %v987_v41  ;;  %v514_v36 = vadd.f32 1.0, %v482_v57  ;;  %v453_v53 = vand.u32 2147483647, %v357_v37  ;;  %v17284_v15 = vld [vmem:[#allocation35_spill] sm:$0xff]  ;;  %10070 = vmatprep.subr.bf16.mxu0 %v10919_v18 }
 0x13c   :  { %v12483_v22 = vsel %vm386_vm3, 1.0, %v17258_v61  ;;  %v701_v31 = vmul.f32 %v12357_v50, %v669_v21  ;;  %v732_v13 = vadd.f32 -0.28449672, %v700_v55  ;;  %v355_v39 = vmul.f32 0.70710677, %v247_v47  ;;  %v17286_v55 = vld [vmem:[#allocation33_spill] sm:$0xff]  ;;  %10117 = vmatpush3.bf16.msra.mxu1 %v10918_v60 }
 0x13d   :  { %v1050_v29 = vmul.f32 %v1018_v0, %v12291_v20  ;;  %v1051_v49 = vmul.f32 %v1019_v32, %v12318_v54  ;;  %v946_v63 = vmul.f32 1.442695, %v898_v26  ;;  %v12488_v2 = vmul.f32 0.5, %v255_v42  ;;  %v17285_v26 = vld [vmem:[#allocation6_spill] sm:$0xff] }
 0x13e   :  { %v733_v28 = vadd.f32 -0.28449672, %v701_v31  ;;  %v764_v56 = vmul.f32 %v12327_v38, %v732_v13  ;;  %vm389_vm4 = vcmp.ge.f32.partialorder %v357_v37, 0.0  ;;  %v869_v24 = vsub.f32 0.0, %v453_v53  ;;  %v10920_v37 = vld [vmem:[%s17064_s3 + $0x90] sm:$0xff]   ;;  %10071 = vmatpush3.bf16.msra.mxu0 %v10919_v18  ;;  %v10924_v18 = vld [vmem:[%s17064_s3 + $0xa0] sm:$0xff]  }
 0x13f   :  { %v12491_v16 = vpop.eup %11089  ;;  %v1082_v46 = vadd.f32 1.0, %v1050_v29  ;;  %v1083_v17 = vadd.f32 1.0, %v1051_v49  ;;  %11095 = vrcp.f32 %v514_v36  ;;  %v485_v43 = vmul.f32 0.3275911, %v453_v53  ;;  %10118 = vmatprep.subr.bf16.mxu1 %v10920_v37 }
 0x140   :  { %v765_v12 = vmul.f32 %v12357_v50, %v733_v28  ;;  %v796_v7 = vadd.f32 0.2548296, %v764_v56  ;;  %v12494_v20 = vmul.f32 0.5, %v247_v47  ;;  %v12496_v54 = vand.u32 2147483647, %v355_v39  ;;  %10119 = vmatpush3.bf16.msra.mxu1 %v10920_v37 }
 0x141   :  { %v12501_v34 = vpop.eup %11091  ;;  %v1114_v3 = vmul.f32 %v1082_v46, %v17281_v6  ;;  %v1115_v14 = vmul.f32 %v1083_v17, %v17282_v40  ;;  %v12506_v42 = vsel %vm389_vm4, 1.0, %v17258_v61  ;;  %vm387_vm5 = vcmp.ge.f32.partialorder %v355_v39, 0.0  ;;  %v10922_v46 = vld [vmem:[%s17064_s3 + $0x98] sm:$0xff]   ;;  %v17288_v6 = vld [vmem:[#allocation23_spill] sm:$0xff] }
 0x142   :  { %11097 = vpow2.f32 %v946_v63  ;;  %v797_v45 = vadd.f32 0.2548296, %v765_v12  ;;  %v828_v51 = vmul.f32 %v12327_v38, %v796_v7  ;;  %v901_v10 = vmul.f32 %v869_v24, %v453_v53  ;;  %v17287_v63 = vld [vmem:[#allocation18_spill] sm:$0xff]  ;;  %v10921_v24 = vld [vmem:[%s17064_s3 + $0x58] sm:$0xff]   ;;  %10120 = vmatprep.subr.bf16.mxu1 %v10922_v46 }
 0x143   :  { %v1142_v19 = vpack.c.bf16 %v1115_v14, %v1114_v3  ;;  %v517_v8 = vadd.f32 1.0, %v485_v43  ;;  %v574_v52 = vmul.f32 1.0614054, %v12398_v33  ;;  %v575_v58 = vmul.f32 1.0614054, %v12442_v1  ;;  %10072 = vmatprep.subr.bf16.mxu0 %v10921_v24 }
 0x144   :  { %v12520_v44 = vpop.eup %11093  ;;  %v829_v25 = vmul.f32 %v12357_v50, %v797_v45  ;;  %v988_v57 = vmul.f32 %v17283_v5, %v828_v51  ;;  %v12526_v27 = vsel %vm387_vm5, 1.0, %v17258_v61  ;;  %v483_v38 = vmul.f32 0.3275911, %v12496_v54  ;;  %v17290_v5 = vld [vmem:[#allocation16_spill] sm:$0xff]  ;;  %10073 = vmatpush3.bf16.msra.mxu0 %v10921_v24  ;;  %10121 = vmatpush3.bf16.msra.mxu1 %v10922_v46 }
 0x145   :  { %10042 = vmatprep.mubr.bf16.mxu1 %v1142_v19  ;;  %v606_v50 = vadd.f32 -1.4531521, %v574_v52  ;;  %v607_v47 = vadd.f32 -1.4531521, %v575_v58  ;;  %v576_v41 = vmul.f32 1.0614054, %v17284_v15  ;;  %v12538_v21 = vadd.f32 %v17285_v26, %v12138_v62  ;;  %10122 = vmatprep.subr.bf16.mxu1 %v10924_v18 }
 0x146   :  { %v989_v0 = vmul.f32 %v17286_v55, %v829_v25  ;;  %v1020_v32 = vsub.f32 1.0, %v988_v57  ;;  %v952_v36 = vmul.f32 1.442695, %v901_v10  ;;  %v577_v53 = vmul.f32 1.0614054, %v12417_v23  ;;  %v10923_v25 = vld [vmem:[%s17064_s3 + $0x60] sm:$0xff]  }
 0x147   :  { %v867_v31 = vsub.f32 0.0, %v12496_v54  ;;  %v638_v13 = vmul.f32 %v12398_v33, %v606_v50  ;;  %v639_v39 = vmul.f32 %v12442_v1, %v607_v47  ;;  %v608_v29 = vadd.f32 -1.4531521, %v576_v41  ;;  %v17291_v41 = vld [vmem:[#allocation21_spill] sm:$0xff]  ;;  %10074 = vmatprep.subr.bf16.mxu0 %v10923_v25 }
 0x148   :  { %v1021_v49 = vsub.f32 1.0, %v989_v0  ;;  %v1052_v28 = vmul.f32 %v1020_v32, %v17287_v63  ;;  %11099 = vrcp.f32 %v517_v8  ;;  %v609_v56 = vadd.f32 -1.4531521, %v577_v53  ;;  %10075 = vmatpush3.bf16.msra.mxu0 %v10923_v25  ;;  %10123 = vmatpush3.bf16.msra.mxu1 %v10924_v18 }
 0x149   :  { %v12552_v17 = vpop.eup %11095  ;;  %v670_v43 = vadd.f32 1.4214138, %v638_v13  ;;  %v671_v12 = vadd.f32 1.4214138, %v639_v39  ;;  %v640_v7 = vmul.f32 %v17284_v15, %v608_v29  ;;  %v360_v35 = vmul.f32 0.70710677, %v12538_v21 }
 0x14a   :  { %v1053_v3 = vmul.f32 %v1021_v49, %v17288_v6  ;;  %v1084_v40 = vadd.f32 1.0, %v1052_v28  ;;  %v641_v14 = vmul.f32 %v12417_v23, %v609_v56  ;;  %v12560_v4 = vadd.f32 %v17289_v9, %v12138_v62  ;;  %v10925_v29 = vld [vmem:[%s17064_s3 + $0x68] sm:$0xff]  }
 0x14b   :  { %v899_v60 = vmul.f32 %v867_v31, %v12496_v54  ;;  %v702_v45 = vmul.f32 %v12398_v33, %v670_v43  ;;  %v703_v51 = vmul.f32 %v12442_v1, %v671_v12  ;;  %v672_v10 = vadd.f32 1.4214138, %v640_v7  ;;  %v10926_v56 = vld [vmem:[%s17064_s3 + $0xa8] sm:$0xff]   ;;  %10076 = vmatprep.subr.bf16.mxu0 %v10925_v29 }
 0x14c   :  { %v12565_v19 = vpop.eup %11097  ;;  %v1085_v8 = vadd.f32 1.0, %v1053_v3  ;;  %11101 = vpow2.f32 %v952_v36  ;;  %v515_v52 = vadd.f32 1.0, %v483_v38  ;;  %v673_v58 = vadd.f32 1.4214138, %v641_v14  ;;  %10124 = vmatprep.subr.bf16.mxu1 %v10926_v56  ;;  %10077 = vmatpush3.bf16.msra.mxu0 %v10925_v29  ;;  %v17298_v29 = vld [vmem:[#allocation31_spill] sm:$0xff] }
 0x14d   :  { %v1116_v54 = vmul.f32 %v1084_v40, %v17290_v5  ;;  %v734_v57 = vadd.f32 -0.28449672, %v702_v45  ;;  %v735_v50 = vadd.f32 -0.28449672, %v703_v51  ;;  %v704_v47 = vmul.f32 %v17284_v15, %v672_v10  ;;  %10125 = vmatpush3.bf16.msra.mxu1 %v10926_v56 }
 0x14e   :  { %v1117_v38 = vmul.f32 %v1085_v8, %v17291_v41  ;;  %v705_v37 = vmul.f32 %v12417_v23, %v673_v58  ;;  %v456_v26 = vand.u32 2147483647, %v360_v35  ;;  %v358_v55 = vmul.f32 0.70710677, %v12560_v4  ;;  %v17295_v41 = vld [vmem:[#allocation32_spill] sm:$0xff] }
 0x14f   :  { %v948_v0 = vmul.f32 1.442695, %v899_v60  ;;  %v766_v32 = vmul.f32 %v12398_v33, %v734_v57  ;;  %v767_v36 = vmul.f32 %v12442_v1, %v735_v50  ;;  %v736_v53 = vadd.f32 -0.28449672, %v704_v47  ;;  %v17292_v60 = vld [vmem:[#allocation8_spill] sm:$0xff] }
 0x150   :  { %v1143_v31 = vpack.c.bf16 %v1117_v38, %v1116_v54  ;;  %11103 = vrcp.f32 %v515_v52  ;;  %v737_v13 = vadd.f32 -0.28449672, %v705_v37  ;;  %v872_v39 = vsub.f32 0.0, %v456_v26  ;;  %v17293_v54 = vld [vmem:[#allocation36_spill] sm:$0xff]  ;;  %v17296_v37 = vld [vmem:[#allocation9_spill] sm:$0xff] }
 0x151   :  { %v798_v49 = vadd.f32 0.2548296, %v766_v32  ;;  %v799_v63 = vadd.f32 0.2548296, %v767_v36  ;;  %v768_v28 = vmul.f32 %v17284_v15, %v736_v53  ;;  %vm392_vm6 = vcmp.ge.f32.partialorder %v360_v35, 0.0 }
 0x152   :  { %v12587_v24 = vpop.eup %11099  ;;  %10043 = vmatmul.mubr.bf16.gmra.mrb[24].mxu1 %v1143_v31  ;;  %v769_v46 = vmul.f32 %v12417_v23, %v737_v13  ;;  %v12591_v43 = vmul.f32 0.5, %v12538_v21  ;;  %v488_v12 = vmul.f32 0.3275911, %v456_v26  ;;  %v454_v7 = vand.u32 2147483647, %v358_v55  ;;  %v17297_v31 = vld [vmem:[#allocation25_spill] sm:$0xff] }
 0x153   :  { %11105 = vpow2.f32 %v948_v0  ;;  %v830_v6 = vmul.f32 %v12398_v33, %v798_v49  ;;  %v831_v35 = vmul.f32 %v12442_v1, %v799_v63  ;;  %v800_v3 = vadd.f32 0.2548296, %v768_v28 }
 0x154   :  { %v801_v40 = vadd.f32 0.2548296, %v769_v46  ;;  %v12596_v14 = vsel %vm392_vm6, 1.0, %v17258_v61  ;;  %v904_v9 = vmul.f32 %v872_v39, %v456_v26  ;;  %v271_v45 = vadd.f32 %v17292_v60, %v12138_v62  ;;  %v17299_v46 = vld [vmem:[#allocation26_spill] sm:$0xff] }
 0x155   :  { %v990_v21 = vmul.f32 %v12401_v48, %v830_v6  ;;  %v991_v51 = vmul.f32 %v12491_v16, %v831_v35  ;;  %v832_v33 = vmul.f32 %v17284_v15, %v800_v3  ;;  %vm390_vm7 = vcmp.ge.f32.partialorder %v358_v55, 0.0  ;;  %v17300_v6 = vld [vmem:[#allocation30_spill] sm:$0xff] }
 0x156   :  { %v12603_v1 = vpop.eup %11101  ;;  %v833_v10 = vmul.f32 %v12417_v23, %v801_v40  ;;  %v520_v8 = vadd.f32 1.0, %v488_v12  ;;  %v12607_v52 = vmul.f32 0.5, %v12560_v4  ;;  %v486_v58 = vmul.f32 0.3275911, %v454_v7  ;;  %v17294_v23 = vld [vmem:[#allocation28_spill] sm:$0xff] }
 0x157   :  { %v1022_v25 = vsub.f32 1.0, %v990_v21  ;;  %v1023_v5 = vsub.f32 1.0, %v991_v51  ;;  %v992_v57 = vmul.f32 %v17293_v54, %v832_v33  ;;  %v870_v48 = vsub.f32 0.0, %v454_v7  ;;  %v17301_v51 = vld [vmem:[#allocation10_spill] sm:$0xff] }
 0x158   :  { %v993_v16 = vmul.f32 %v12434_v30, %v833_v10  ;;  %v958_v15 = vmul.f32 1.442695, %v904_v9  ;;  %v12612_v50 = vsel %vm390_vm7, 1.0, %v17258_v61  ;;  %v361_v47 = vmul.f32 0.70710677, %v271_v45 }
 0x159   :  { %v1054_v18 = vmul.f32 %v1022_v25, %v17294_v23  ;;  %v1055_v4 = vmul.f32 %v1023_v5, %v17295_v41  ;;  %v1024_v38 = vsub.f32 1.0, %v992_v57  ;;  %v263_v26 = vadd.f32 %v17296_v37, %v12138_v62  ;;  %v17303_v5 = vld [vmem:[#allocation29_spill] sm:$0xff] }
 0x15a   :  { %v12618_v55 = vpop.eup %11103  ;;  %v1025_v0 = vsub.f32 1.0, %v993_v16  ;;  %11107 = vrcp.f32 %v520_v8  ;;  %v518_v32 = vadd.f32 1.0, %v486_v58  ;;  %v457_v30 = vand.u32 2147483647, %v361_v47  ;;  %v17302_v58 = vld [vmem:[#allocation24_spill] sm:$0xff] }
 0x15b   :  { %v1086_v36 = vadd.f32 1.0, %v1054_v18  ;;  %v1087_v53 = vadd.f32 1.0, %v1055_v4  ;;  %v1056_v13 = vmul.f32 %v1024_v38, %v17297_v31  ;;  %v902_v39 = vmul.f32 %v870_v48, %v454_v7  ;;  %v17304_v18 = vld [vmem:[#allocation11_spill] sm:$0xff]  ;;  %v17305_v4 = vld [vmem:[#allocation12_spill] sm:$0xff] }
 0x15c   :  { %v1057_v49 = vmul.f32 %v1025_v0, %v17298_v29  ;;  %11109 = vpow2.f32 %v958_v15  ;;  %v489_v63 = vmul.f32 0.3275911, %v457_v30  ;;  %v873_v28 = vsub.f32 0.0, %v457_v30 }
 0x15d   :  { %v12622_v56 = vpop.eup %11105  ;;  %v1118_v12 = vmul.f32 %v1086_v36, %v17299_v46  ;;  %v1119_v35 = vmul.f32 %v1087_v53, %v17300_v6  ;;  %v1088_v3 = vadd.f32 1.0, %v1056_v13  ;;  %v359_v40 = vmul.f32 0.70710677, %v263_v26  ;;  %v17308_v6 = vld [vmem:[#allocation13_spill] sm:$0xff] }
 0x15e   :  { %v1089_v9 = vadd.f32 1.0, %v1057_v49  ;;  %v12626_v60 = vmul.f32 0.5, %v271_v45  ;;  %v905_v21 = vmul.f32 %v873_v28, %v457_v30  ;;  %v284_v7 = vadd.f32 %v17301_v51, %v12138_v62 }
 0x15f   :  { %v1144_v33 = vpack.c.bf16 %v1119_v35, %v1118_v12  ;;  %11111 = vrcp.f32 %v518_v32  ;;  %v954_v10 = vmul.f32 1.442695, %v902_v39  ;;  %v455_v8 = vand.u32 2147483647, %v359_v40 }
 0x160   :  { %v1120_v25 = vmul.f32 %v1088_v3, %v17302_v58  ;;  %v1121_v54 = vmul.f32 %v1089_v9, %v17303_v5  ;;  %vm393_vm8 = vcmp.ge.f32.partialorder %v361_v47, 0.0  ;;  %v521_v57 = vadd.f32 1.0, %v489_v63 }
 0x161   :  { %10046 = vmatprep.mubr.bf16.mxu1 %v1144_v33  ;;  %vm391_vm9 = vcmp.ge.f32.partialorder %v359_v40, 0.0  ;;  %v487_v48 = vmul.f32 0.3275911, %v455_v8  ;;  %v871_v16 = vsub.f32 0.0, %v455_v8  ;;  %v364_v45 = vmul.f32 0.70710677, %v284_v7 }
 0x162   :  { %v1145_v15 = vpack.c.bf16 %v1121_v54, %v1120_v25  ;;  %v960_v23 = vmul.f32 1.442695, %v905_v21  ;;  %v276_v41 = vadd.f32 %v17304_v18, %v12138_v62  ;;  %v287_v38 = vadd.f32 %v17305_v4, %v12138_v62 }
 0x163   :  { %11113 = vpow2.f32 %v954_v10  ;;  %v12636_v37 = vmul.f32 0.5, %v263_v26  ;;  %v903_v0 = vmul.f32 %v871_v16, %v455_v8  ;;  %v460_v32 = vand.u32 2147483647, %v364_v45 }
 0x164   :  { %v12638_v30 = vpop.eup %11107  ;;  %10047 = vmatmul.mubr.bf16.gmra.mrb[28].mxu1 %v1145_v15  ;;  %v12642_v36 = vsel %vm393_vm8, 1.0, %v17258_v61  ;;  %11115 = vrcp.f32 %v521_v57  ;;  %vm396_vm10 = vcmp.ge.f32.partialorder %v364_v45, 0.0  ;;  %v362_v53 = vmul.f32 0.70710677, %v276_v41  ;;  %v17311_v57 = vld [vmem:[#allocation14_spill] sm:$0xff]  ;;  %v17313_v15 = vld [vmem:[#allocation15_spill] sm:$0xff] }
 0x165   :  { %v12646_v31 = vsel %vm391_vm9, 1.0, %v17258_v61  ;;  %v519_v13 = vadd.f32 1.0, %v487_v48  ;;  %v492_v39 = vmul.f32 0.3275911, %v460_v32  ;;  %v876_v26 = vsub.f32 0.0, %v460_v32 }
 0x166   :  { %v12648_v29 = vpop.eup %11109  ;;  %11117 = vpow2.f32 %v960_v23  ;;  %v12650_v49 = vmul.f32 0.5, %v284_v7  ;;  %v458_v63 = vand.u32 2147483647, %v362_v53  ;;  %v365_v28 = vmul.f32 0.70710677, %v287_v38 }
 0x167   :  { %v956_v47 = vmul.f32 1.442695, %v903_v0  ;;  %v12653_v46 = vsel %vm396_vm10, 1.0, %v17258_v61  ;;  %v908_v12 = vmul.f32 %v876_v26, %v460_v32  ;;  %v279_v35 = vadd.f32 %v17308_v6, %v12138_v62 }
 0x168   :  { %17306 = vst [vmem:[#allocation19_spill] sm:$0xff] %v12650_v49  ;;  %17307 = vst [vmem:[#allocation22_spill] sm:$0xff] %v12653_v46  ;;  %v12657_v3 = vmul.f32 0.5, %v276_v41  ;;  %v490_v40 = vmul.f32 0.3275911, %v458_v63  ;;  %v874_v9 = vsub.f32 0.0, %v458_v63  ;;  %11119 = vrcp.f32 %v519_v13 }
 0x169   :  { %v461_v21 = vand.u32 2147483647, %v365_v28  ;;  %v12659_v51 = vpop.eup %11111  ;;  %v524_v7 = vadd.f32 1.0, %v492_v39  ;;  %vm394_vm11 = vcmp.ge.f32.partialorder %v362_v53, 0.0  ;;  %v12661_v33 = vmul.f32 0.5, %v287_v38 }
 0x16a   :  { %17309 = vst [vmem:[#allocation27_spill] sm:$0xff] %v12657_v3  ;;  %v966_v10 = vmul.f32 1.442695, %v908_v12  ;;  %v906_v8 = vmul.f32 %v874_v9, %v458_v63  ;;  %vm397_vm12 = vcmp.ge.f32.partialorder %v365_v28, 0.0  ;;  %v522_v25 = vadd.f32 1.0, %v490_v40  ;;  %v17318_v28 = vld [vmem:[#allocation17_spill] sm:$0xff] }
 0x16b   :  { %17310 = vst [vmem:[#allocation35_spill] sm:$0xff] %v12661_v33  ;;  %v877_v58 = vsub.f32 0.0, %v461_v21  ;;  %v493_v5 = vmul.f32 0.3275911, %v461_v21  ;;  %v363_v54 = vmul.f32 0.70710677, %v279_v35  ;;  %v12665_v48 = vadd.f32 %v17311_v57, %v12138_v62 }
 0x16c   :  { %11121 = vpow2.f32 %v956_v47  ;;  %v962_v16 = vmul.f32 1.442695, %v906_v8  ;;  %v292_v23 = vadd.f32 %v17313_v15, %v12138_v62  ;;  %v12673_v41 = vsel %vm394_vm11, 1.0, %v17258_v61 }
 0x16d   :  { %17312 = vst [vmem:[#allocation6_spill] sm:$0xff] %v12665_v48  ;;  %v909_v45 = vmul.f32 %v877_v58, %v461_v21  ;;  %v12669_v18 = vpop.eup %11113  ;;  %11123 = vrcp.f32 %v524_v7  ;;  %17314 = vst [vmem:[#allocation33_spill] sm:$0xff] %v12673_v41  ;;  %v459_v4 = vand.u32 2147483647, %v363_v54  ;;  %v368_v38 = vmul.f32 0.70710677, %v12665_v48 }
 0x16e   :  { %v12676_v0 = vpop.eup %11115  ;;  %11125 = vpow2.f32 %v966_v10  ;;  %v12680_v32 = vsel %vm397_vm12, 1.0, %v17258_v61  ;;  %v12682_v13 = vmul.f32 0.5, %v279_v35  ;;  %vm395_vm13 = vcmp.ge.f32.partialorder %v363_v54, 0.0  ;;  %v17320_v35 = vld [vmem:[#allocation20_spill] sm:$0xff] }
 0x16f   :  { %17315 = vst [vmem:[#allocation18_spill] sm:$0xff] %v12680_v32  ;;  %11127 = vrcp.f32 %v522_v25  ;;  %v525_v39 = vadd.f32 1.0, %v493_v5  ;;  %v491_v26 = vmul.f32 0.3275911, %v459_v4  ;;  %v875_v63 = vsub.f32 0.0, %v459_v4 }
 0x170   :  { %17316 = vst [vmem:[#allocation23_spill] sm:$0xff] %v12682_v13  ;;  %v12684_v53 = vpop.eup %11117  ;;  %11129 = vpow2.f32 %v962_v16  ;;  %v968_v47 = vmul.f32 1.442695, %v909_v45  ;;  %v464_v12 = vand.u32 2147483647, %v368_v38  ;;  %v12687_v40 = vsel %vm395_vm13, 1.0, %v17258_v61 }
 0x171   :  { %v366_v6 = vmul.f32 0.70710677, %v292_v23  ;;  %17317 = vst [vmem:[#allocation7_spill] sm:$0xff] %v12687_v40  ;;  %v907_v9 = vmul.f32 %v875_v63, %v459_v4  ;;  %v12691_v21 = vadd.f32 %v17318_v28, %v12138_v62  ;;  %v12695_v7 = vadd.f32 %v17320_v35, %v12138_v62 }
 0x172   :  { %v523_v10 = vadd.f32 1.0, %v491_v26  ;;  %v496_v8 = vmul.f32 0.3275911, %v464_v12  ;;  %v880_v58 = vsub.f32 0.0, %v464_v12  ;;  %v12697_v5 = vpop.eup %11119  ;;  %11131 = vrcp.f32 %v525_v39 }
 0x173   :  { %17319 = vst [vmem:[#allocation16_spill] sm:$0xff] %v12691_v21  ;;  %17321 = vst [vmem:[#allocation21_spill] sm:$0xff] %v12695_v7  ;;  %v462_v25 = vand.u32 2147483647, %v366_v6  ;;  %v964_v54 = vmul.f32 1.442695, %v907_v9  ;;  %11133 = vpow2.f32 %v968_v47 }
 0x174   :  { %vm400_vm14 = vcmp.ge.f32.partialorder %v368_v38, 0.0  ;;  %v12699_v57 = vmul.f32 0.5, %v292_v23  ;;  %v528_v16 = vadd.f32 1.0, %v496_v8  ;;  %v912_v45 = vmul.f32 %v880_v58, %v464_v12 }
 0x175   :  { %v494_v15 = vmul.f32 0.3275911, %v462_v25  ;;  %v878_v4 = vsub.f32 0.0, %v462_v25  ;;  %vm398_vm15 = vcmp.ge.f32.partialorder %v366_v6, 0.0  ;;  %v12702_v62 = vmul.f32 0.70710677, %v12691_v21 }
 0x176   :  { %17322 = vst [vmem:[#allocation8_spill] sm:$0xff] %v12699_v57  ;;  %v367_v26 = vmul.f32 0.70710677, %v12695_v7  ;;  %v12705_v63 = vpop.eup %11121  ;;  %11135 = vrcp.f32 %v523_v10  ;;  %v974_v28 = vmul.f32 1.442695, %v912_v45  ;;  %v12711_v23 = vsel %vm400_vm14, 1.0, %v17258_v61 }
 0x177   :  { %v526_v39 = vadd.f32 1.0, %v494_v15  ;;  %v910_v9 = vmul.f32 %v878_v4, %v462_v25  ;;  %v12707_v35 = vpop.eup %11123  ;;  %11137 = vpow2.f32 %v964_v54  ;;  %17323 = vst [vmem:[#allocation36_spill] sm:$0xff] %v12711_v23  ;;  %v465_v47 = vand.u32 2147483647, %v12702_v62 }
 0x178   :  { %v463_v12 = vand.u32 2147483647, %v367_v26  ;;  %v12714_v6 = vpop.eup %11125  ;;  %11139 = vrcp.f32 %v528_v16  ;;  %v12717_v8 = vsel %vm398_vm15, 1.0, %v17258_v61  ;;  %vm399_vm0 = vcmp.ge.f32.partialorder %v367_v26, 0.0 }
 0x179   :  { %17324 = vst [vmem:[#allocation28_spill] sm:$0xff] %v12714_v6  ;;  %17325 = vst [vmem:[#allocation32_spill] sm:$0xff] %v12717_v8  ;;  %v970_v10 = vmul.f32 1.442695, %v910_v9  ;;  %v12719_v58 = vpop.eup %11127  ;;  %11141 = vpow2.f32 %v974_v28  ;;  %v497_v25 = vmul.f32 0.3275911, %v465_v47 }
 0x17a   :  { %v881_v54 = vsub.f32 0.0, %v465_v47  ;;  %v495_v45 = vmul.f32 0.3275911, %v463_v12  ;;  %v12721_v38 = vpop.eup %11129  ;;  %11143 = vrcp.f32 %v526_v39  ;;  %v879_v15 = vsub.f32 0.0, %v463_v12 }
 0x17b   :  { %v578_v4 = vmul.f32 1.0614054, %v12552_v17  ;;  %v579_v21 = vmul.f32 1.0614054, %v12618_v55  ;;  %v529_v16 = vadd.f32 1.0, %v497_v25  ;;  %11145 = vpow2.f32 %v970_v10 }
 0x17c   :  { %v913_v23 = vmul.f32 %v881_v54, %v465_v47  ;;  %v527_v48 = vadd.f32 1.0, %v495_v45  ;;  %v580_v9 = vmul.f32 1.0614054, %v12501_v34  ;;  %v911_v57 = vmul.f32 %v879_v15, %v463_v12  ;;  %v12727_v7 = vpop.eup %11131 }
 0x17d   :  { %v610_v33 = vadd.f32 -1.4531521, %v578_v4  ;;  %v611_v49 = vadd.f32 -1.4531521, %v579_v21  ;;  %v581_v28 = vmul.f32 1.0614054, %v12587_v24  ;;  %11147 = vrcp.f32 %v529_v16  ;;  %v12736_v54 = vpop.eup %11133 }
 0x17e   :  { %v12731_v39 = vsel %vm399_vm0, 1.0, %v17258_v61  ;;  %v612_v8 = vadd.f32 -1.4531521, %v580_v9  ;;  %v582_v13 = vmul.f32 1.0614054, %v12659_v51  ;;  %17327 = vst [vmem:[#allocation25_spill] sm:$0xff] %v12736_v54  ;;  %11149 = vrcp.f32 %v527_v48 }
 0x17f   :  { %17326 = vst [vmem:[#allocation9_spill] sm:$0xff] %v12731_v39  ;;  %v976_v47 = vmul.f32 1.442695, %v913_v23  ;;  %v642_v25 = vmul.f32 %v12552_v17, %v610_v33  ;;  %v643_v12 = vmul.f32 %v12618_v55, %v611_v49  ;;  %v972_v21 = vmul.f32 1.442695, %v911_v57 }
 0x180   :  { %v613_v45 = vadd.f32 -1.4531521, %v581_v28  ;;  %v644_v15 = vmul.f32 %v12501_v34, %v612_v8  ;;  %v583_v10 = vmul.f32 1.0614054, %v12697_v5  ;;  %v12740_v26 = vpop.eup %11135  ;;  %v614_v61 = vadd.f32 -1.4531521, %v582_v13 }
 0x181   :  { %v674_v4 = vadd.f32 1.4214138, %v642_v25  ;;  %v675_v9 = vadd.f32 1.4214138, %v643_v12  ;;  %v12742_v16 = vpop.eup %11137  ;;  %v584_v39 = vmul.f32 1.0614054, %v12638_v30  ;;  %11151 = vpow2.f32 %v976_v47 }
 0x182   :  { %v645_v33 = vmul.f32 %v12587_v24, %v613_v45  ;;  %v676_v23 = vadd.f32 1.4214138, %v644_v15  ;;  %v615_v49 = vadd.f32 -1.4531521, %v583_v10  ;;  %v12746_v57 = vpop.eup %11139  ;;  %v646_v32 = vmul.f32 %v12659_v51, %v614_v61 }
 0x183   :  { %v706_v8 = vmul.f32 %v12552_v17, %v674_v4  ;;  %v707_v28 = vmul.f32 %v12618_v55, %v675_v9  ;;  %v585_v48 = vmul.f32 1.0614054, %v12676_v0  ;;  %v12752_v25 = vpop.eup %11141  ;;  %v616_v15 = vadd.f32 -1.4531521, %v584_v39 }
 0x184   :  { %17328 = vst [vmem:[#allocation31_spill] sm:$0xff] %v12752_v25  ;;  %v677_v13 = vadd.f32 1.4214138, %v645_v33  ;;  %v708_v12 = vmul.f32 %v12501_v34, %v676_v23  ;;  %v647_v45 = vmul.f32 %v12697_v5, %v615_v49  ;;  %v12756_v10 = vpop.eup %11143  ;;  %v678_v4 = vadd.f32 1.4214138, %v646_v32 }
 0x185   :  { %v738_v3 = vadd.f32 -0.28449672, %v706_v8  ;;  %v739_v46 = vadd.f32 -0.28449672, %v707_v28  ;;  %v617_v54 = vadd.f32 -1.4531521, %v585_v48  ;;  %v648_v49 = vmul.f32 %v12638_v30, %v616_v15  ;;  %v12763_v39 = vpop.eup %11145 }
 0x186   :  { %v709_v9 = vmul.f32 %v12587_v24, %v677_v13  ;;  %v740_v40 = vadd.f32 -0.28449672, %v708_v12  ;;  %v679_v61 = vadd.f32 1.4214138, %v647_v45  ;;  %v710_v23 = vmul.f32 %v12659_v51, %v678_v4  ;;  %17329 = vst [vmem:[#allocation26_spill] sm:$0xff] %v12763_v39  ;;  %v10927_v28 = vld [vmem:[%s17064_s3 + $0x70] sm:$0xff]  }
 0x187   :  { %v770_v41 = vmul.f32 %v12552_v17, %v738_v3  ;;  %v771_v33 = vmul.f32 %v12618_v55, %v739_v46  ;;  %v649_v8 = vmul.f32 %v12676_v0, %v617_v54  ;;  %v10928_v46 = vld [vmem:[%s17064_s3 + $0xb0] sm:$0xff]   ;;  %v12774_v3 = vpop.eup %11147  ;;  %11153 = vpow2.f32 %v972_v21  ;;  %10078 = vmatprep.subr.bf16.mxu0 %v10927_v28  ;;  %v10930_v21 = vld [vmem:[%s17064_s3 + $0xb8] sm:$0xff]  }
 0x188   :  { %v741_v25 = vadd.f32 -0.28449672, %v709_v9  ;;  %v772_v47 = vmul.f32 %v12501_v34, %v740_v40  ;;  %v711_v32 = vmul.f32 %v12697_v5, %v679_v61  ;;  %v742_v12 = vadd.f32 -0.28449672, %v710_v23  ;;  %10126 = vmatprep.subr.bf16.mxu1 %v10928_v46  ;;  %v12777_v54 = vpop.eup %11149  ;;  %10079 = vmatpush3.bf16.msra.mxu0 %v10927_v28 }
 0x189   :  { %v802_v48 = vadd.f32 0.2548296, %v770_v41  ;;  %v803_v13 = vadd.f32 0.2548296, %v771_v33  ;;  %v680_v4 = vadd.f32 1.4214138, %v648_v49  ;;  %10127 = vmatpush3.bf16.msra.mxu1 %v10928_v46 }
 0x18a   :  { %v773_v40 = vmul.f32 %v12587_v24, %v741_v25  ;;  %v804_v45 = vadd.f32 0.2548296, %v772_v47  ;;  %v743_v15 = vadd.f32 -0.28449672, %v711_v32  ;;  %v774_v39 = vmul.f32 %v12659_v51, %v742_v12  ;;  %v10929_v41 = vld [vmem:[%s17064_s3 + $0x78] sm:$0xff]   ;;  %10128 = vmatprep.subr.bf16.mxu1 %v10930_v21 }
 0x18b   :  { %v834_v9 = vmul.f32 %v12552_v17, %v802_v48  ;;  %v835_v61 = vmul.f32 %v12618_v55, %v803_v13  ;;  %v681_v6 = vadd.f32 1.4214138, %v649_v8  ;;  %v712_v55 = vmul.f32 %v12638_v30, %v680_v4  ;;  %10080 = vmatprep.subr.bf16.mxu0 %v10929_v41 }
 0x18c   :  { %v805_v25 = vadd.f32 0.2548296, %v773_v40  ;;  %v836_v33 = vmul.f32 %v12501_v34, %v804_v45  ;;  %v775_v17 = vmul.f32 %v12697_v5, %v743_v15  ;;  %v806_v47 = vadd.f32 0.2548296, %v774_v39  ;;  %v12796_v34 = vpop.eup %11151  ;;  %10081 = vmatpush3.bf16.msra.mxu0 %v10929_v41 }
 0x18d   :  { %v994_v23 = vmul.f32 %v12565_v19, %v834_v9  ;;  %v995_v49 = vmul.f32 %v12622_v56, %v835_v61  ;;  %v713_v32 = vmul.f32 %v12676_v0, %v681_v6  ;;  %v744_v48 = vadd.f32 -0.28449672, %v712_v55  ;;  %10129 = vmatpush3.bf16.msra.mxu1 %v10930_v21 }
 0x18e   :  { %v837_v8 = vmul.f32 %v12587_v24, %v805_v25  ;;  %v996_v28 = vmul.f32 %v12520_v44, %v836_v33  ;;  %v807_v46 = vadd.f32 0.2548296, %v775_v17  ;;  %v838_v40 = vmul.f32 %v12659_v51, %v806_v47  ;;  %v17330_v47 = vld [vmem:[#allocation34_spill] sm:$0xff] }
 0x18f   :  { %v1026_v13 = vsub.f32 1.0, %v994_v23  ;;  %v1027_v12 = vsub.f32 1.0, %v995_v49  ;;  %v745_v19 = vadd.f32 -0.28449672, %v713_v32  ;;  %v776_v24 = vmul.f32 %v12638_v30, %v744_v48 }
 0x190   :  { %v997_v56 = vmul.f32 %v12603_v1, %v837_v8  ;;  %v1028_v6 = vsub.f32 1.0, %v996_v28  ;;  %v839_v39 = vmul.f32 %v12697_v5, %v807_v46  ;;  %v998_v15 = vmul.f32 %v12669_v18, %v838_v40 }
 0x191   :  { %v1058_v44 = vmul.f32 %v1026_v13, %v12483_v22  ;;  %v1059_v45 = vmul.f32 %v1027_v12, %v12526_v27  ;;  %v777_v4 = vmul.f32 %v12676_v0, %v745_v19  ;;  %v808_v41 = vadd.f32 0.2548296, %v776_v24  ;;  %v12808_v1 = vpop.eup %11153 }
 0x192   :  { %v1029_v9 = vsub.f32 1.0, %v997_v56  ;;  %v1060_v51 = vmul.f32 %v1028_v6, %v12451_v59  ;;  %v999_v61 = vmul.f32 %v12705_v63, %v839_v39  ;;  %v1030_v25 = vsub.f32 1.0, %v998_v15 }
 0x193   :  { %v1090_v21 = vadd.f32 1.0, %v1058_v44  ;;  %v1091_v5 = vadd.f32 1.0, %v1059_v45  ;;  %v809_v33 = vadd.f32 0.2548296, %v777_v4  ;;  %v840_v18 = vmul.f32 %v12638_v30, %v808_v41 }
 0x194   :  { %v1061_v22 = vmul.f32 %v1029_v9, %v12506_v42  ;;  %v1092_v17 = vadd.f32 1.0, %v1060_v51  ;;  %v1031_v27 = vsub.f32 1.0, %v999_v61  ;;  %v1062_v59 = vmul.f32 %v1030_v25, %v12612_v50 }
 0x195   :  { %v1122_v55 = vmul.f32 %v1090_v21, %v12479_v11  ;;  %v1123_v23 = vmul.f32 %v1091_v5, %v12494_v20  ;;  %v841_v63 = vmul.f32 %v12676_v0, %v809_v33  ;;  %v1000_v28 = vmul.f32 %v12648_v29, %v840_v18 }
 0x196   :  { %v1093_v49 = vadd.f32 1.0, %v1061_v22  ;;  %v1124_v32 = vmul.f32 %v1092_v17, %v17330_v47  ;;  %v1063_v8 = vmul.f32 %v1031_v27, %v12646_v31  ;;  %v1094_v46 = vadd.f32 1.0, %v1062_v59 }
 0x197   :  { %v1146_v42 = vpack.c.bf16 %v1123_v23, %v1122_v55  ;;  %v1001_v48 = vmul.f32 %v12684_v53, %v841_v63  ;;  %v586_v30 = vmul.f32 1.0614054, %v12719_v58  ;;  %v1032_v13 = vsub.f32 1.0, %v1000_v28 }
 0x198   :  { %v1125_v11 = vmul.f32 %v1093_v49, %v12488_v2  ;;  %v1095_v20 = vadd.f32 1.0, %v1063_v8  ;;  %v587_v50 = vmul.f32 1.0614054, %v12740_v26  ;;  %v1126_v0 = vmul.f32 %v1094_v46, %v12607_v52 }
 0x199   :  { %10050 = vmatprep.mubr.bf16.mxu1 %v1146_v42  ;;  %v1033_v12 = vsub.f32 1.0, %v1001_v48  ;;  %v618_v40 = vadd.f32 -1.4531521, %v586_v30  ;;  %v588_v31 = vmul.f32 1.0614054, %v12707_v35  ;;  %v1064_v53 = vmul.f32 %v1032_v13, %v12596_v14 }
 0x19a   :  { %v1147_v29 = vpack.c.bf16 %v1125_v11, %v1124_v32  ;;  %v1127_v19 = vmul.f32 %v1095_v20, %v12636_v37  ;;  %v619_v56 = vadd.f32 -1.4531521, %v587_v50  ;;  %v589_v39 = vmul.f32 1.0614054, %v12727_v7 }
 0x19b   :  { %v1065_v6 = vmul.f32 %v1033_v12, %v12642_v36  ;;  %v650_v2 = vmul.f32 %v12719_v58, %v618_v40  ;;  %v620_v24 = vadd.f32 -1.4531521, %v588_v31  ;;  %v1096_v52 = vadd.f32 1.0, %v1064_v53 }
 0x19c   :  { %10051 = vmatmul.mubr.bf16.gmra.mrb[32].mxu1 %v1147_v29  ;;  %v1148_v44 = vpack.c.bf16 %v1127_v19, %v1126_v0  ;;  %v651_v45 = vmul.f32 %v12740_v26, %v619_v56  ;;  %v590_v15 = vmul.f32 1.0614054, %v12756_v10  ;;  %v621_v37 = vadd.f32 -1.4531521, %v589_v39 }
 0x19d   :  { %v1097_v4 = vadd.f32 1.0, %v1065_v6  ;;  %v682_v9 = vadd.f32 1.4214138, %v650_v2  ;;  %v652_v14 = vmul.f32 %v12707_v35, %v620_v24  ;;  %v1128_v36 = vmul.f32 %v1096_v52, %v12591_v43 }
 0x19e   :  { %10054 = vmatprep.mubr.bf16.mxu1 %v1148_v44  ;;  %v683_v51 = vadd.f32 1.4214138, %v651_v45  ;;  %v591_v61 = vmul.f32 1.0614054, %v12777_v54  ;;  %v622_v41 = vadd.f32 -1.4531521, %v590_v15  ;;  %v653_v25 = vmul.f32 %v12727_v7, %v621_v37 }
 0x19f   :  { %v1129_v21 = vmul.f32 %v1097_v4, %v12626_v60  ;;  %v714_v5 = vmul.f32 %v12719_v58, %v682_v9  ;;  %v684_v33 = vadd.f32 1.4214138, %v652_v14  ;;  %v592_v18 = vmul.f32 1.0614054, %v12746_v57 }
 0x1a0   :  { %v715_v22 = vmul.f32 %v12740_v26, %v683_v51  ;;  %v623_v17 = vadd.f32 -1.4531521, %v591_v61  ;;  %v654_v27 = vmul.f32 %v12756_v10, %v622_v41  ;;  %v685_v23 = vadd.f32 1.4214138, %v653_v25  ;;  %v17331_v51 = vld [vmem:[#allocation28_spill] sm:$0xff]  ;;  %v17332_v25 = vld [vmem:[#allocation33_spill] sm:$0xff] }
 0x1a1   :  { %v1149_v55 = vpack.c.bf16 %v1129_v21, %v1128_v36  ;;  %v746_v43 = vadd.f32 -0.28449672, %v714_v5  ;;  %v716_v59 = vmul.f32 %v12707_v35, %v684_v33  ;;  %v593_v47 = vmul.f32 1.0614054, %v12774_v3 }
 0x1a2   :  { %v747_v63 = vadd.f32 -0.28449672, %v715_v22  ;;  %v655_v60 = vmul.f32 %v12777_v54, %v623_v17  ;;  %v686_v49 = vadd.f32 1.4214138, %v654_v27  ;;  %v717_v8 = vmul.f32 %v12727_v7, %v685_v23  ;;  %v17333_v22 = vld [vmem:[#allocation25_spill] sm:$0xff] }
 0x1a3   :  { %v778_v32 = vmul.f32 %v12719_v58, %v746_v43  ;;  %v748_v28 = vadd.f32 -0.28449672, %v716_v59  ;;  %v624_v42 = vadd.f32 -1.4531521, %v592_v18  ;;  %v625_v11 = vadd.f32 -1.4531521, %v593_v47 }
 0x1a4   :  { %10055 = vmatmul.mubr.bf16.gmra.mrb[36].mxu1 %v1149_v55  ;;  %v779_v46 = vmul.f32 %v12740_v26, %v747_v63  ;;  %v687_v48 = vadd.f32 1.4214138, %v655_v60  ;;  %v718_v30 = vmul.f32 %v12756_v10, %v686_v49  ;;  %v749_v13 = vadd.f32 -0.28449672, %v717_v8  ;;  %v17334_v18 = vld [vmem:[#allocation7_spill] sm:$0xff]  ;;  %v17336_v49 = vld [vmem:[#allocation22_spill] sm:$0xff] }
 0x1a5   :  { %v810_v20 = vadd.f32 0.2548296, %v778_v32  ;;  %v780_v50 = vmul.f32 %v12707_v35, %v748_v28  ;;  %v656_v0 = vmul.f32 %v12746_v57, %v624_v42  ;;  %v657_v29 = vmul.f32 %v12774_v3, %v625_v11 }
 0x1a6   :  { %v811_v12 = vadd.f32 0.2548296, %v779_v46  ;;  %v719_v40 = vmul.f32 %v12777_v54, %v687_v48  ;;  %v750_v31 = vadd.f32 -0.28449672, %v718_v30  ;;  %v781_v53 = vmul.f32 %v12727_v7, %v749_v13  ;;  %v17337_v46 = vld [vmem:[#allocation27_spill] sm:$0xff]  ;;  %v17338_v30 = vld [vmem:[#allocation18_spill] sm:$0xff] }
 0x1a7   :  { %v842_v19 = vmul.f32 %v12719_v58, %v810_v20  ;;  %v812_v56 = vadd.f32 0.2548296, %v780_v50  ;;  %v688_v6 = vadd.f32 1.4214138, %v656_v0  ;;  %v689_v44 = vadd.f32 1.4214138, %v657_v29 }
 0x1a8   :  { %v843_v2 = vmul.f32 %v12740_v26, %v811_v12  ;;  %v751_v39 = vadd.f32 -0.28449672, %v719_v40  ;;  %v782_v24 = vmul.f32 %v12756_v10, %v750_v31  ;;  %v813_v45 = vadd.f32 0.2548296, %v781_v53  ;;  %v17339_v13 = vld [vmem:[#allocation23_spill] sm:$0xff]  ;;  %v17340_v12 = vld [vmem:[#allocation32_spill] sm:$0xff] }
 0x1a9   :  { %v1002_v52 = vmul.f32 %v12721_v38, %v842_v19  ;;  %v844_v15 = vmul.f32 %v12707_v35, %v812_v56  ;;  %v720_v4 = vmul.f32 %v12746_v57, %v688_v6  ;;  %vm401_vm1 = vcmp.ge.f32.partialorder %v12702_v62, 0.0  ;;  %v17341_v29 = vld [vmem:[#allocation21_spill] sm:$0xff]  ;;  %v17343_v6 = vld [vmem:[#allocation31_spill] sm:$0xff] }
 0x1aa   :  { %v1003_v58 = vmul.f32 %v12742_v16, %v843_v2  ;;  %v783_v9 = vmul.f32 %v12777_v54, %v751_v39  ;;  %v814_v37 = vadd.f32 0.2548296, %v782_v24  ;;  %v721_v26 = vmul.f32 %v12774_v3, %v689_v44  ;;  %v17344_v24 = vld [vmem:[#allocation9_spill] sm:$0xff] }
 0x1ab   :  { %v1034_v14 = vsub.f32 1.0, %v1002_v52  ;;  %v845_v36 = vmul.f32 %v12727_v7, %v813_v45  ;;  %v1004_v61 = vmul.f32 %v17331_v51, %v844_v15  ;;  %v752_v38 = vadd.f32 -0.28449672, %v720_v4  ;;  %v17335_v7 = vld [vmem:[#allocation26_spill] sm:$0xff]  ;;  %v17346_v4 = vld [vmem:[#allocation35_spill] sm:$0xff] }
 0x1ac   :  { %v1035_v41 = vsub.f32 1.0, %v1003_v58  ;;  %v815_v21 = vadd.f32 0.2548296, %v783_v9  ;;  %v846_v35 = vmul.f32 %v12756_v10, %v814_v37  ;;  %v753_v5 = vadd.f32 -0.28449672, %v721_v26  ;;  %v17347_v37 = vld [vmem:[#allocation8_spill] sm:$0xff] }
 0x1ad   :  { %v1066_v33 = vmul.f32 %v1034_v14, %v17332_v25  ;;  %v1005_v16 = vmul.f32 %v17333_v22, %v845_v36  ;;  %v1036_v17 = vsub.f32 1.0, %v1004_v61  ;;  %v784_v27 = vmul.f32 %v12746_v57, %v752_v38  ;;  %v17348_v36 = vld [vmem:[#allocation6_spill] sm:$0xff]  ;;  %v17349_v38 = vld [vmem:[#allocation36_spill] sm:$0xff] }
 0x1ae   :  { %v1067_v55 = vmul.f32 %v1035_v41, %v17334_v18  ;;  %v847_v43 = vmul.f32 %v12777_v54, %v815_v21  ;;  %v1006_v23 = vmul.f32 %v17335_v7, %v846_v35  ;;  %v785_v59 = vmul.f32 %v12774_v3, %v753_v5  ;;  %v17350_v21 = vld [vmem:[#allocation16_spill] sm:$0xff] }
 0x1af   :  { %v1098_v63 = vadd.f32 1.0, %v1066_v33  ;;  %v1037_v60 = vsub.f32 1.0, %v1005_v16  ;;  %v1068_v10 = vmul.f32 %v1036_v17, %v17336_v49  ;;  %v816_v47 = vadd.f32 0.2548296, %v784_v27  ;;  %v17351_v27 = vld [vmem:[#allocation5_spill] sm:$0xff] }
 0x1b0   :  { %v1099_v32 = vadd.f32 1.0, %v1067_v55  ;;  %v1007_v8 = vmul.f32 %v12808_v1, %v847_v43  ;;  %v1038_v28 = vsub.f32 1.0, %v1006_v23  ;;  %v817_v42 = vadd.f32 0.2548296, %v785_v59  ;;  %v17342_v1 = vld [vmem:[#allocation19_spill] sm:$0xff] }
 0x1b1   :  { %v1130_v48 = vmul.f32 %v1098_v63, %v17337_v46  ;;  %v1069_v11 = vmul.f32 %v1037_v60, %v17338_v30  ;;  %v1100_v20 = vadd.f32 1.0, %v1068_v10  ;;  %v848_v54 = vmul.f32 %v12746_v57, %v816_v47  ;;  %v12898_v55 = vld [vmem:[%s17065_s2] sm:$0x1f] }
 0x1b2   :  { %v1131_v50 = vmul.f32 %v1099_v32, %v17339_v13  ;;  %v1039_v0 = vsub.f32 1.0, %v1007_v8  ;;  %v1070_v40 = vmul.f32 %v1038_v28, %v17340_v12  ;;  %v849_v31 = vmul.f32 %v12774_v3, %v817_v42 }
 0x1b3   :  { %v335_v19 = vmul.f32 0.5, %v17341_v29  ;;  %v1101_v53 = vadd.f32 1.0, %v1069_v11  ;;  %v1132_v56 = vmul.f32 %v1100_v20, %v17342_v1  ;;  %v1008_v2 = vmul.f32 %v17343_v6, %v848_v54 }
 0x1b4   :  { %v1150_v39 = vpack.c.bf16 %v1131_v50, %v1130_v48  ;;  %v1071_v44 = vmul.f32 %v1039_v0, %v17344_v24  ;;  %v1102_v52 = vadd.f32 1.0, %v1070_v40  ;;  %v1009_v57 = vmul.f32 %v12796_v34, %v849_v31 }
 0x1b5   :  { %v17345_v45 = vmov -1.0   ;;  %v1133_v58 = vmul.f32 %v1101_v53, %v17346_v4  ;;  %v1040_v3 = vsub.f32 1.0, %v1008_v2  ;;  %v336_v51 = vmul.f32 0.5, %v17348_v36 }
 0x1b6   :  { %v433_v15 = vsel %vm401_vm1, 1.0, %v17345_v45  ;;  %10058 = vmatprep.mubr.bf16.mxu1 %v1150_v39  ;;  %v1103_v9 = vadd.f32 1.0, %v1071_v44  ;;  %v1134_v26 = vmul.f32 %v1102_v52, %v17347_v37  ;;  %v1041_v14 = vsub.f32 1.0, %v1009_v57 }
 0x1b7   :  { %v1151_v61 = vpack.c.bf16 %v1133_v58, %v1132_v56  ;;  %v1072_v41 = vmul.f32 %v1040_v3, %v17349_v38  ;;  %v337_v35 = vmul.f32 0.5, %v17350_v21  ;;  %v17084_v18 = vsub.s32 1, %v17351_v27 }
 0x1b8   :  { %v1135_v34 = vmul.f32 %v1103_v9, %v335_v19  ;;  %v1073_v5 = vmul.f32 %v1041_v14, %v433_v15  ;;  %vm2733_vm2 = vcmask 261120   ;;  %vm3682_vm3 = vcmask 523520  }
 0x1b9   :  { %10059 = vmatmul.mubr.bf16.gmra.mrb[40].mxu1 %v1151_v61  ;;  %v1104_v62 = vadd.f32 1.0, %v1072_v41  ;;  %v12903_v43 = vrot.slane %v12898_v55, %v17084_v18  ;;  %vm4213_vm4 = vcmask 785920   ;;  %vm4744_vm5 = vcmask 1048320  }
 0x1ba   :  { %v1152_v25 = vpack.c.bf16 %v1135_v34, %v1134_v26  ;;  %v1105_v33 = vadd.f32 1.0, %v1073_v5 }
 0x1bb   :  { %v1136_v22 = vmul.f32 %v1104_v62, %v336_v51 }
 0x1bc   :  { %10062 = vmatprep.mubr.bf16.mxu1 %v1152_v25  ;;  %v1137_v16 = vmul.f32 %v1105_v33, %v337_v35 }
 0x1be   :  { %v1153_v17 = vpack.c.bf16 %v1137_v16, %v1136_v22  ;;  %v10931_v16 = vld [vmem:[%s17066_s4] ss:$12 sps:$4 sm:$0xff]  }
 0x1c1   :  { %10063 = vmatmul.mubr.bf16.gmra.mrb[44].mxu1 %v1153_v17 }
 0x206   :  { %v10036_v7 = vpop.f32.mrb[16].mxu1 }
 0x207   :  { %v1256_v23 = vpop.f32.mrb[17].mxu1  ;;  %v1265_v63 = vadd.f32 %v10036_v7, %v12903_v43  ;;  %v10933_v7 = vld [vmem:[%s17066_s4 + $0x4] ss:$12 sps:$4 sm:$0xff]  }
 0x208   :  { %v10037_v59 = vpop.f32.mrb[18].mxu1  ;;  %v1257_v10 = vadd.f32 %v1256_v23, %v12903_v43  ;;  %2259 = vmatprep.subr.bf16.mxu0 %v10933_v7 }
 0x209   :  { %v1268_v60 = vadd.f32 %v10037_v59, %v12903_v43  ;;  %v1259_v49 = vpop.f32.mrb[19].mxu1  ;;  %v10934_v59 = vld [vmem:[%s17066_s4 + $0x8] ss:$12 sps:$4 sm:$0xff]  }
 0x20a   :  { %v1260_v47 = vadd.f32 %v1259_v49, %v12903_v43  ;;  %10162 = vmatprep.subr.bf16.mxu1 %v10934_v59  ;;  %v10937_v49 = vld [vmem:[%s17066_s4 + $0x1c] ss:$12 sps:$4 sm:$0xff]  }
 0x20b   :  { %v1384_v32 = vpack.c.bf16 %v1268_v60, %v1265_v63  ;;  %v10935_v60 = vld [vmem:[%s17066_s4 + $0x18] ss:$12 sps:$4 sm:$0xff]  }
 0x20c   :  { %v1383_v8 = vpack.c.bf16 %v1260_v47, %v1257_v10  ;;  %v10938_v10 = vld [vmem:[%s17066_s4 + $0x20] ss:$12 sps:$4 sm:$0xff]   ;;  %v10939_v47 = vld [vmem:[%s17066_s4 + $0x30] ss:$12 sps:$4 sm:$0xff]  }
 0x20e   :  { %v10040_v28 = vpop.f32.mrb[20].mxu1  ;;  %10082 = vmatprep.mubr.bf16.mxu0 %v1383_v8  ;;  %10130 = vmatprep.mubr.bf16.mxu1 %v1383_v8  ;;  %v10942_v8 = vld [vmem:[%s17066_s4 + $0x38] ss:$12 sps:$4 sm:$0xff]  }
 0x20f   :  { %v1272_v42 = vpop.f32.mrb[21].mxu1  ;;  %10083 = vmatmul.mubr.bf16.vlgmr.msra.gmra.mrb[16].mxu0 %v1384_v32  ;;  %10131 = vmatmul.mubr.bf16.vlgmr.msra.gmra.mrb[48].mxu1 %v1384_v32  ;;  %v1281_v48 = vadd.f32 %v10040_v28, %v12903_v43  ;;  %v10941_v32 = vld [vmem:[%s17066_s4 + $0x34] ss:$12 sps:$4 sm:$0xff]  }
 0x210   :  { %v10041_v46 = vpop.f32.mrb[22].mxu1  ;;  %v1273_v20 = vadd.f32 %v1272_v42, %v12903_v43  ;;  %2260 = vmatpush1.bf16.msra.mxu0 %v10931_v16  ;;  %10163 = vmatpush3.bf16.msra.mxu1 %v10934_v59 }
 0x211   :  { %v1284_v30 = vadd.f32 %v10041_v46, %v12903_v43  ;;  %v1275_v11 = vpop.f32.mrb[23].mxu1  ;;  %2261 = vmatprep.subr.bf16.mxu0 %v10937_v49  ;;  %10164 = vmatprep.subr.bf16.mxu1 %v10938_v10 }
 0x212   :  { %v1276_v54 = vadd.f32 %v1275_v11, %v12903_v43 }
 0x213   :  { %v1386_v13 = vpack.c.bf16 %v1284_v30, %v1281_v48 }
 0x214   :  { %v1385_v50 = vpack.c.bf16 %v1276_v54, %v1273_v20  ;;  %2262 = vmatpush1.bf16.msra.mxu0 %v10935_v60  ;;  %10165 = vmatpush3.bf16.msra.mxu1 %v10938_v10 }
 0x215   :  { %2263 = vmatprep.subr.bf16.mxu0 %v10941_v32  ;;  %10166 = vmatprep.subr.bf16.mxu1 %v10942_v8 }
 0x216   :  { %10086 = vmatprep.mubr.bf16.mxu0 %v1385_v50  ;;  %10134 = vmatprep.mubr.bf16.mxu1 %v1385_v50 }
 0x217   :  { %10087 = vmatmul.mubr.bf16.gmra.mrb[20].mxu0 %v1386_v13  ;;  %10135 = vmatmul.mubr.bf16.gmra.mrb[52].mxu1 %v1386_v13 }
 0x218   :  { %2264 = vmatpush1.bf16.msra.mxu0 %v10939_v47  ;;  %10167 = vmatpush3.bf16.msra.mxu1 %v10942_v8 }
 0x225   :  { %v10044_v0 = vpop.f32.mrb[24].mxu1 }
 0x226   :  { %v1288_v12 = vpop.f32.mrb[25].mxu1  ;;  %v1297_v31 = vadd.f32 %v10044_v0, %v12903_v43 }
 0x227   :  { %v10045_v40 = vpop.f32.mrb[26].mxu1  ;;  %v1289_v53 = vadd.f32 %v1288_v12, %v12903_v43  ;;  %v10945_v12 = vld [vmem:[%s17066_s4 + $0x4c] ss:$12 sps:$4 sm:$0xff]  }
 0x228   :  { %v1300_v29 = vadd.f32 %v10045_v40, %v12903_v43  ;;  %v1291_v19 = vpop.f32.mrb[27].mxu1  ;;  %2265 = vmatprep.subr.bf16.mxu0 %v10945_v12 }
 0x229   :  { %v1292_v1 = vadd.f32 %v1291_v19, %v12903_v43  ;;  %v10946_v19 = vld [vmem:[%s17066_s4 + $0x50] ss:$12 sps:$4 sm:$0xff]  }
 0x22a   :  { %v1388_v56 = vpack.c.bf16 %v1300_v29, %v1297_v31  ;;  %v10943_v29 = vld [vmem:[%s17066_s4 + $0x48] ss:$12 sps:$4 sm:$0xff]   ;;  %10168 = vmatprep.subr.bf16.mxu1 %v10946_v19 }
 0x22b   :  { %v1387_v6 = vpack.c.bf16 %v1292_v1, %v1289_v53  ;;  %2266 = vmatpush1.bf16.msra.mxu0 %v10943_v29  ;;  %10169 = vmatpush3.bf16.msra.mxu1 %v10946_v19 }
 0x22d   :  { %10090 = vmatprep.mubr.bf16.mxu0 %v1387_v6  ;;  %10138 = vmatprep.mubr.bf16.mxu1 %v1387_v6 }
 0x22e   :  { %10091 = vmatmul.mubr.bf16.gmra.mrb[24].mxu0 %v1388_v56  ;;  %10139 = vmatmul.mubr.bf16.gmra.mrb[56].mxu1 %v1388_v56 }
 0x237   :  { %v10048_v2 = vpop.f32.mrb[28].mxu1 }
 0x238   :  { %v1304_v39 = vpop.f32.mrb[29].mxu1  ;;  %v1313_v44 = vadd.f32 %v10048_v2, %v12903_v43 }
 0x239   :  { %v10049_v24 = vpop.f32.mrb[30].mxu1  ;;  %v1305_v15 = vadd.f32 %v1304_v39, %v12903_v43  ;;  %v10949_v39 = vld [vmem:[%s17066_s4 + $0x64] ss:$12 sps:$4 sm:$0xff]  }
 0x23a   :  { %v1316_v52 = vadd.f32 %v10049_v24, %v12903_v43  ;;  %v1307_v57 = vpop.f32.mrb[31].mxu1  ;;  %2267 = vmatprep.subr.bf16.mxu0 %v10949_v39 }
 0x23b   :  { %v1308_v4 = vadd.f32 %v1307_v57, %v12903_v43 }
 0x23c   :  { %v1390_v58 = vpack.c.bf16 %v1316_v52, %v1313_v44  ;;  %v10947_v44 = vld [vmem:[%s17066_s4 + $0x60] ss:$12 sps:$4 sm:$0xff]   ;;  %v10950_v52 = vld [vmem:[%s17066_s4 + $0x68] ss:$12 sps:$4 sm:$0xff]  }
 0x23d   :  { %v1389_v3 = vpack.c.bf16 %v1308_v4, %v1305_v15  ;;  %2268 = vmatpush1.bf16.msra.mxu0 %v10947_v44  ;;  %10170 = vmatprep.subr.bf16.mxu1 %v10950_v52  ;;  %v10951_v15 = vld [vmem:[%s17066_s4 + $0x78] ss:$12 sps:$4 sm:$0xff]   ;;  %v10954_v4 = vld [vmem:[%s17066_s4 + $0x80] ss:$12 sps:$4 sm:$0xff]  }
 0x23e   :  { %10171 = vmatpush3.bf16.msra.mxu1 %v10950_v52 }
 0x23f   :  { %10142 = vmatprep.mubr.bf16.mxu1 %v1389_v3  ;;  %10094 = vmatprep.mubr.bf16.mxu0 %v1389_v3  ;;  %v10955_v3 = vld [vmem:[%s17066_s4 + $0x90] ss:$12 sps:$4 sm:$0xff]  }
 0x240   :  { %10143 = vmatmul.mubr.bf16.gmra.mrb[60].mxu1 %v1390_v58  ;;  %10095 = vmatmul.mubr.bf16.gmra.mrb[28].mxu0 %v1390_v58  ;;  %v10957_v58 = vld [vmem:[%s17066_s4 + $0x94] ss:$12 sps:$4 sm:$0xff]  }
 0x241   :  { %10172 = vmatprep.subr.bf16.mxu1 %v10954_v4 }
 0x242   :  { %10173 = vmatpush3.bf16.msra.mxu1 %v10954_v4 }
 0x26f   :  { %v10052_v9 = vpop.f32.mrb[32].mxu1 }
 0x270   :  { %v1329_v37 = vadd.f32 %v10052_v9, %v12903_v43  ;;  %v1320_v26 = vpop.f32.mrb[33].mxu1  ;;  %v10958_v9 = vld [vmem:[%s17066_s4 + $0x98] ss:$12 sps:$4 sm:$0xff]  }
 0x271   :  { %v1321_v14 = vadd.f32 %v1320_v26, %v12903_v43  ;;  %v10053_v36 = vpop.f32.mrb[34].mxu1  ;;  %10174 = vmatprep.subr.bf16.mxu1 %v10958_v9  ;;  %v10959_v26 = vld [vmem:[%s17066_s4 + $0xa8] ss:$12 sps:$4 sm:$0xff]  }
 0x272   :  { %v1332_v51 = vadd.f32 %v10053_v36, %v12903_v43  ;;  %v1323_v61 = vpop.f32.mrb[35].mxu1  ;;  %10175 = vmatpush3.bf16.msra.mxu1 %v10958_v9  ;;  %v17085_v36 = vmov 0  }
 0x273   :  { %v1324_v38 = vadd.f32 %v1323_v61, %v12903_v43 }
 0x274   :  { %v1392_v41 = vpack.c.bf16 %v1332_v51, %v1329_v37  ;;  %v10961_v37 = vld [vmem:[%s17066_s4 + $0xac] ss:$12 sps:$4 sm:$0xff]   ;;  %v1648_v51 = vsub.s32 3, %v17351_v27 }
 0x275   :  { %v1391_v21 = vpack.c.bf16 %v1324_v38, %v1321_v14  ;;  %v10962_v14 = vld [vmem:[%s17066_s4 + $0xb0] ss:$12 sps:$4 sm:$0xff]  }
 0x276   :  { %10176 = vmatprep.subr.bf16.mxu1 %v10962_v14  ;;  %v13012_v61 = vrot.slane %v12898_v55, %v1648_v51 }
 0x277   :  { %10146 = vmatprep.mubr.bf16.mxu1 %v1391_v21  ;;  %v10056_v35 = vpop.f32.mrb[36].mxu1  ;;  %10098 = vmatprep.mubr.bf16.mxu0 %v1391_v21 }
 0x278   :  { %10147 = vmatmul.mubr.bf16.gmra.mrb[64].mxu1 %v1392_v41  ;;  %v1345_v34 = vadd.f32 %v10056_v35, %v12903_v43  ;;  %v1336_v5 = vpop.f32.mrb[37].mxu1  ;;  %10099 = vmatmul.mubr.bf16.gmra.mrb[32].mxu0 %v1392_v41 }
 0x279   :  { %v1337_v62 = vadd.f32 %v1336_v5, %v12903_v43  ;;  %v10057_v25 = vpop.f32.mrb[38].mxu1  ;;  %10177 = vmatpush3.bf16.msra.mxu1 %v10962_v14 }
 0x27a   :  { %v1348_v33 = vadd.f32 %v10057_v25, %v12903_v43  ;;  %v1339_v22 = vpop.f32.mrb[39].mxu1 }
 0x27b   :  { %v1340_v17 = vadd.f32 %v1339_v22, %v12903_v43 }
 0x27c   :  { %v1394_v23 = vpack.c.bf16 %v1348_v33, %v1345_v34 }
 0x27d   :  { %v1393_v63 = vpack.c.bf16 %v1340_v17, %v1337_v62 }
 0x27f   :  { %10150 = vmatprep.mubr.bf16.mxu1 %v1393_v63  ;;  %10102 = vmatprep.mubr.bf16.mxu0 %v1393_v63 }
 0x280   :  { %10151 = vmatmul.mubr.bf16.gmra.mrb[68].mxu1 %v1394_v23  ;;  %10103 = vmatmul.mubr.bf16.gmra.mrb[36].mxu0 %v1394_v23 }
 0x28c   :  { %v10060_v28 = vpop.f32.mrb[40].mxu1 }
 0x28d   :  { %v1361_v42 = vadd.f32 %v10060_v28, %v12903_v43  ;;  %v1352_v46 = vpop.f32.mrb[41].mxu1 }
 0x28e   :  { %v1353_v48 = vadd.f32 %v1352_v46, %v12903_v43  ;;  %v10061_v30 = vpop.f32.mrb[42].mxu1 }
 0x28f   :  { %v1364_v11 = vadd.f32 %v10061_v30, %v12903_v43  ;;  %v1355_v20 = vpop.f32.mrb[43].mxu1 }
 0x290   :  { %v1356_v54 = vadd.f32 %v1355_v20, %v12903_v43 }
 0x291   :  { %v1396_v13 = vpack.c.bf16 %v1364_v11, %v1361_v42 }
 0x292   :  { %v1395_v50 = vpack.c.bf16 %v1356_v54, %v1353_v48 }
 0x294   :  { %10154 = vmatprep.mubr.bf16.mxu1 %v1395_v50  ;;  %v10064_v0 = vpop.f32.mrb[44].mxu1  ;;  %10106 = vmatprep.mubr.bf16.mxu0 %v1395_v50 }
 0x295   :  { %10155 = vmatmul.mubr.bf16.gmra.mrb[72].mxu1 %v1396_v13  ;;  %v1377_v40 = vadd.f32 %v10064_v0, %v12903_v43  ;;  %v1368_v31 = vpop.f32.mrb[45].mxu1  ;;  %10107 = vmatmul.mubr.bf16.gmra.mrb[40].mxu0 %v1396_v13 }
 0x296   :  { %v1369_v53 = vadd.f32 %v1368_v31, %v12903_v43  ;;  %v10065_v1 = vpop.f32.mrb[46].mxu1 }
 0x297   :  { %v1380_v56 = vadd.f32 %v10065_v1, %v12903_v43  ;;  %v1371_v6 = vpop.f32.mrb[47].mxu1 }
 0x298   :  { %v1372_v2 = vadd.f32 %v1371_v6, %v12903_v43  ;;  %v10953_v43 = vld [vmem:[%s17066_s4 + $0x7c] ss:$12 sps:$4 sm:$0xff]   ;;  %s11928_s4 = smov 96  }
 0x299   :  { %v1398_v24 = vpack.c.bf16 %v1380_v56, %v1377_v40  ;;  %2269 = vmatprep.subr.bf16.mxu0 %v10953_v43 }
 0x29a   :  { %v1397_v57 = vpack.c.bf16 %v1372_v2, %v1369_v53  ;;  %2270 = vmatpush1.bf16.msra.mxu0 %v10951_v15 }
 0x29b   :  { %2271 = vmatprep.subr.bf16.mxu0 %v10957_v58 }
 0x29c   :  { %10158 = vmatprep.mubr.bf16.mxu1 %v1397_v57  ;;  %10110 = vmatprep.mubr.bf16.mxu0 %v1397_v57  ;;  %v1418_v57 = vsub.s32 2, %v17351_v27 }
 0x29d   :  { %10159 = vmatmul.mubr.bf16.gmra.mrb[76].mxu1 %v1398_v24  ;;  %10111 = vmatmul.mubr.bf16.gmra.mrb[44].mxu0 %v1398_v24 }
 0x29e   :  { %2272 = vmatpush1.bf16.msra.mxu0 %v10955_v3  ;;  %2291 = vmatprep.mubr.bf16.mxu0 %v17085_v36  ;;  %v13040_v4 = vrot.slane %v12898_v55, %v1418_v57 }
 0x29f   :  { %2273 = vmatprep.subr.bf16.mxu0 %v10961_v37 }
 0x2a2   :  { %2274 = vmatpush1.bf16.msra.mxu0 %v10959_v26 }
 0x2e2   :  { %v13014_v38 = vpop.f32.mrb[16].mxu0  ;;  %v10132_v41 = vpop.f32.mrb[48].mxu1 }
 0x2e3   :  { %v1741_v21 = vadd.f32 %v10132_v41, %v13012_v61  ;;  %v13017_v35 = vpop.f32.mrb[17].mxu0  ;;  %v1732_v34 = vpop.f32.mrb[49].mxu1  ;;  %v1511_v51 = vadd.f32 %v13014_v38, %v13040_v4 }
 0x2e4   :  { %v1733_v5 = vadd.f32 %v1732_v34, %v13012_v61  ;;  %v13020_v62 = vpop.f32.mrb[18].mxu0  ;;  %v10133_v25 = vpop.f32.mrb[50].mxu1  ;;  %v1503_v34 = vadd.f32 %v13017_v35, %v13040_v4 }
 0x2e5   :  { %v1861_v33 = vsub.f32 0.0, %v1741_v21  ;;  %v1744_v22 = vadd.f32 %v10133_v25, %v13012_v61  ;;  %v13023_v16 = vpop.f32.mrb[19].mxu0  ;;  %v1735_v17 = vpop.f32.mrb[51].mxu1  ;;  %v1514_v55 = vadd.f32 %v13020_v62, %v13040_v4 }
 0x2e6   :  { %v1859_v7 = vsub.f32 0.0, %v1733_v5  ;;  %v1736_v23 = vadd.f32 %v1735_v17, %v13012_v61 }
 0x2e7   :  { %v1895_v59 = vmul.f32 1.442695, %v1861_v33  ;;  %v1862_v63 = vsub.f32 0.0, %v1744_v22  ;;  %v1506_v22 = vadd.f32 %v13023_v16, %v13040_v4 }
 0x2e8   :  { %v1891_v60 = vmul.f32 1.442695, %v1859_v7  ;;  %v1860_v49 = vsub.f32 0.0, %v1736_v23 }
 0x2e9   :  { %11155 = vpow2.f32 %v1895_v59  ;;  %v1897_v10 = vmul.f32 1.442695, %v1862_v63 }
 0x2ea   :  { %11157 = vpow2.f32 %v1891_v60  ;;  %v1893_v47 = vmul.f32 1.442695, %v1860_v49  ;;  %v13026_v32 = vpop.f32.mrb[20].mxu0  ;;  %v10136_v8 = vpop.f32.mrb[52].mxu1 }
 0x2eb   :  { %11159 = vpow2.f32 %v1897_v10  ;;  %v1757_v28 = vadd.f32 %v10136_v8, %v13012_v61  ;;  %v13029_v42 = vpop.f32.mrb[21].mxu0  ;;  %v1748_v46 = vpop.f32.mrb[53].mxu1 }
 0x2ec   :  { %11161 = vpow2.f32 %v1893_v47  ;;  %v1749_v48 = vadd.f32 %v1748_v46, %v13012_v61  ;;  %v13032_v30 = vpop.f32.mrb[22].mxu0  ;;  %v10137_v11 = vpop.f32.mrb[54].mxu1 }
 0x2ed   :  { %v1865_v20 = vsub.f32 0.0, %v1757_v28  ;;  %v1760_v54 = vadd.f32 %v10137_v11, %v13012_v61  ;;  %v13035_v13 = vpop.f32.mrb[23].mxu0  ;;  %v1751_v50 = vpop.f32.mrb[55].mxu1 }
 0x2ee   :  { %v1863_v0 = vsub.f32 0.0, %v1749_v48  ;;  %v1752_v12 = vadd.f32 %v1751_v50, %v13012_v61 }
 0x2ef   :  { %v1903_v40 = vmul.f32 1.442695, %v1865_v20  ;;  %v1866_v31 = vsub.f32 0.0, %v1760_v54  ;;  %v1527_v54 = vadd.f32 %v13026_v32, %v13040_v4 }
 0x2f0   :  { %v1899_v29 = vmul.f32 1.442695, %v1863_v0  ;;  %v1864_v19 = vsub.f32 0.0, %v1752_v12 }
 0x2f1   :  { %11163 = vpow2.f32 %v1903_v40  ;;  %v1905_v53 = vmul.f32 1.442695, %v1866_v31  ;;  %v1519_v31 = vadd.f32 %v13029_v42, %v13040_v4 }
 0x2f2   :  { %11165 = vpow2.f32 %v1899_v29  ;;  %v1901_v1 = vmul.f32 1.442695, %v1864_v19 }
 0x2f3   :  { %v11156_v56 = vpop.eup %11155  ;;  %11167 = vpow2.f32 %v1905_v53 }
 0x2f4   :  { %v11158_v6 = vpop.eup %11157  ;;  %v1957_v2 = vadd.f32 1.0, %v11156_v56  ;;  %11169 = vpow2.f32 %v1901_v1  ;;  %v1530_v1 = vadd.f32 %v13032_v30, %v13040_v4 }
 0x2f5   :  { %v11160_v39 = vpop.eup %11159  ;;  %v1955_v24 = vadd.f32 1.0, %v11158_v6 }
 0x2f6   :  { %v11162_v44 = vpop.eup %11161  ;;  %11171 = vrcp.f32 %v1957_v2  ;;  %v1958_v52 = vadd.f32 1.0, %v11160_v39  ;;  %v1522_v2 = vadd.f32 %v13035_v13, %v13040_v4 }
 0x2f7   :  { %11173 = vrcp.f32 %v1955_v24  ;;  %v1956_v43 = vadd.f32 1.0, %v11162_v44 }
 0x2f8   :  { %11175 = vrcp.f32 %v1958_v52 }
 0x2f9   :  { %11177 = vrcp.f32 %v1956_v43 }
 0x2fb   :  { %v11164_v15 = vpop.eup %11163 }
 0x2fc   :  { %v11166_v58 = vpop.eup %11165  ;;  %v1961_v3 = vadd.f32 1.0, %v11164_v15 }
 0x2fd   :  { %v11168_v9 = vpop.eup %11167  ;;  %v1959_v37 = vadd.f32 1.0, %v11166_v58 }
 0x2fe   :  { %v11170_v26 = vpop.eup %11169  ;;  %11179 = vrcp.f32 %v1961_v3  ;;  %v1962_v14 = vadd.f32 1.0, %v11168_v9 }
 0x2ff   :  { %11181 = vrcp.f32 %v1959_v37  ;;  %v1960_v41 = vadd.f32 1.0, %v11170_v26 }
 0x300   :  { %v11172_v21 = vpop.eup %11171  ;;  %11183 = vrcp.f32 %v1962_v14 }
 0x301   :  { %v11174_v5 = vpop.eup %11173  ;;  %11185 = vrcp.f32 %v1960_v41  ;;  %v13048_v25 = vmul.f32 %v11172_v21, %v1511_v51  ;;  %v13052_v17 = vpop.f32.mrb[24].mxu0 }
 0x302   :  { %v11176_v33 = vpop.eup %11175  ;;  %v10140_v38 = vpop.f32.mrb[56].mxu1  ;;  %v13054_v7 = vmul.f32 %v11174_v5, %v1503_v34 }
 0x303   :  { %17352 = vst [vmem:[#allocation30_spill] sm:$0xff] %v13048_v25  ;;  %v11178_v23 = vpop.eup %11177  ;;  %v1773_v35 = vadd.f32 %v10140_v38, %v13012_v61  ;;  %v13057_v59 = vpop.f32.mrb[25].mxu0  ;;  %v13059_v60 = vmul.f32 %v11176_v33, %v1514_v55 }
 0x304   :  { %17353 = vst [vmem:[#allocation10_spill] sm:$0xff] %v13054_v7  ;;  %v1764_v63 = vpop.f32.mrb[57].mxu1  ;;  %v13062_v49 = vpop.f32.mrb[26].mxu0  ;;  %v13064_v47 = vmul.f32 %v11178_v23, %v1506_v22 }
 0x305   :  { %17354 = vst [vmem:[#allocation24_spill] sm:$0xff] %v13059_v60  ;;  %v1765_v62 = vadd.f32 %v1764_v63, %v13012_v61  ;;  %v10141_v10 = vpop.f32.mrb[58].mxu1  ;;  %v1869_v16 = vsub.f32 0.0, %v1773_v35  ;;  %v13067_v28 = vpop.f32.mrb[27].mxu0  ;;  %v2084_v12 = vpack.c.bf16 %v13059_v60, %v13048_v25 }
 0x306   :  { %17355 = vst [vmem:[#allocation29_spill] sm:$0xff] %v13064_v47  ;;  %v1776_v8 = vadd.f32 %v10141_v10, %v13012_v61  ;;  %v1767_v46 = vpop.f32.mrb[59].mxu1  ;;  %v2083_v20 = vpack.c.bf16 %v13064_v47, %v13054_v7 }
 0x307   :  { %v1867_v48 = vsub.f32 0.0, %v1765_v62  ;;  %v1768_v11 = vadd.f32 %v1767_v46, %v13012_v61  ;;  %v1911_v50 = vmul.f32 1.442695, %v1869_v16 }
 0x308   :  { %v1870_v0 = vsub.f32 0.0, %v1776_v8  ;;  %v11180_v40 = vpop.eup %11179  ;;  %2292 = vmatmul.mubr.bf16.vlgmr.msra.gmra.mrb[48].mxu0 %v2083_v20  ;;  %10178 = vmatprep.mubr.bf16.mxu1 %v2083_v20  ;;  %v1543_v20 = vadd.f32 %v13052_v17, %v13040_v4 }
 0x309   :  { %v1907_v29 = vmul.f32 1.442695, %v1867_v48  ;;  %v1868_v19 = vsub.f32 0.0, %v1768_v11  ;;  %v11182_v53 = vpop.eup %11181  ;;  %11187 = vpow2.f32 %v1911_v50  ;;  %10179 = vmatmul.mubr.bf16.vlgmr.msra.gmra.mrb[80].mxu1 %v2084_v12  ;;  %2301 = vmatprep.mubr.bf16.mxu0 %v17085_v36  ;;  %v13081_v32 = vmul.f32 %v11180_v40, %v1527_v54 }
 0x30a   :  { %v1913_v56 = vmul.f32 1.442695, %v1870_v0  ;;  %v11184_v6 = vpop.eup %11183  ;;  %v13085_v39 = vmul.f32 %v11182_v53, %v1519_v31  ;;  %v1535_v50 = vadd.f32 %v13057_v59, %v13040_v4 }
 0x30b   :  { %17356 = vst [vmem:[#allocation11_spill] sm:$0xff] %v13081_v32  ;;  %11189 = vpow2.f32 %v1907_v29  ;;  %v1909_v42 = vmul.f32 1.442695, %v1868_v19  ;;  %v11186_v24 = vpop.eup %11185  ;;  %v13087_v44 = vmul.f32 %v11184_v6, %v1530_v1  ;;  %v1538_v29 = vadd.f32 %v13067_v28, %v13040_v4 }
 0x30c   :  { %17357 = vst [vmem:[#allocation12_spill] sm:$0xff] %v13085_v39  ;;  %11191 = vpow2.f32 %v1913_v56  ;;  %v13089_v30 = vmul.f32 %v11186_v24, %v1522_v2 }
 0x30d   :  { %17358 = vst [vmem:[#allocation13_spill] sm:$0xff] %v13087_v44  ;;  %11193 = vpow2.f32 %v1909_v42  ;;  %v2086_v57 = vpack.c.bf16 %v13087_v44, %v13081_v32 }
 0x30e   :  { %17359 = vst [vmem:[#allocation14_spill] sm:$0xff] %v13089_v30  ;;  %v2085_v52 = vpack.c.bf16 %v13089_v30, %v13085_v39 }
 0x310   :  { %2302 = vmatmul.mubr.bf16.gmra.mrb[52].mxu0 %v2084_v12  ;;  %10182 = vmatprep.mubr.bf16.mxu1 %v2085_v52  ;;  %v1546_v12 = vadd.f32 %v13062_v49, %v13040_v4 }
 0x311   :  { %10183 = vmatmul.mubr.bf16.gmra.mrb[84].mxu1 %v2086_v57  ;;  %2311 = vmatprep.mubr.bf16.mxu0 %v17085_v36 }
 0x313   :  { %v11188_v13 = vpop.eup %11187  ;;  %v10144_v58 = vpop.f32.mrb[60].mxu1 }
 0x314   :  { %v1965_v15 = vadd.f32 1.0, %v11188_v13  ;;  %v13096_v3 = vpop.f32.mrb[28].mxu0  ;;  %v1789_v26 = vadd.f32 %v10144_v58, %v13012_v61  ;;  %v1780_v14 = vpop.f32.mrb[61].mxu1 }
 0x315   :  { %v11190_v43 = vpop.eup %11189  ;;  %v13099_v51 = vpop.f32.mrb[29].mxu0  ;;  %v1781_v34 = vadd.f32 %v1780_v14, %v13012_v61  ;;  %v1559_v13 = vadd.f32 %v13096_v3, %v13040_v4 }
 0x316   :  { %v11192_v9 = vpop.eup %11191  ;;  %v1963_v37 = vadd.f32 1.0, %v11190_v43  ;;  %11195 = vrcp.f32 %v1965_v15  ;;  %v10145_v5 = vpop.f32.mrb[62].mxu1  ;;  %v1873_v22 = vsub.f32 0.0, %v1789_v26  ;;  %v1551_v15 = vadd.f32 %v13099_v51, %v13040_v4 }
 0x317   :  { %v11194_v41 = vpop.eup %11193  ;;  %v1966_v21 = vadd.f32 1.0, %v11192_v9  ;;  %v10097_v55 = vpop.f32.mrb[30].mxu0  ;;  %v1792_v38 = vadd.f32 %v10145_v5, %v13012_v61  ;;  %v1871_v63 = vsub.f32 0.0, %v1781_v34 }
 0x318   :  { %11197 = vrcp.f32 %v1963_v37  ;;  %v1964_v33 = vadd.f32 1.0, %v11194_v41  ;;  %v1783_v23 = vpop.f32.mrb[63].mxu1  ;;  %v1553_v35 = vpop.f32.mrb[31].mxu0  ;;  %2312 = vmatmul.mubr.bf16.gmra.mrb[56].mxu0 %v2085_v52  ;;  %v1919_v10 = vmul.f32 1.442695, %v1873_v22  ;;  %v1562_v37 = vadd.f32 %v10097_v55, %v13040_v4 }
 0x319   :  { %11199 = vrcp.f32 %v1966_v21  ;;  %v1784_v62 = vadd.f32 %v1783_v23, %v13012_v61  ;;  %v1874_v16 = vsub.f32 0.0, %v1792_v38  ;;  %2321 = vmatprep.mubr.bf16.mxu0 %v17085_v36  ;;  %v1915_v8 = vmul.f32 1.442695, %v1871_v63 }
 0x31a   :  { %11201 = vrcp.f32 %v1964_v33  ;;  %v1554_v41 = vadd.f32 %v1553_v35, %v13040_v4 }
 0x31b   :  { %v1872_v46 = vsub.f32 0.0, %v1784_v62  ;;  %11203 = vpow2.f32 %v1919_v10  ;;  %v1921_v48 = vmul.f32 1.442695, %v1874_v16 }
 0x31c   :  { %11205 = vpow2.f32 %v1915_v8 }
 0x31d   :  { %v1917_v11 = vmul.f32 1.442695, %v1872_v46  ;;  %11207 = vpow2.f32 %v1921_v48 }
 0x31f   :  { %11209 = vpow2.f32 %v1917_v11 }
 0x320   :  { %v11196_v54 = vpop.eup %11195  ;;  %2322 = vmatmul.mubr.bf16.gmra.mrb[60].mxu0 %v2086_v57 }
 0x321   :  { %v13111_v40 = vmul.f32 %v11196_v54, %v1543_v20  ;;  %2331 = vmatprep.mubr.bf16.mxu0 %v17085_v36 }
 0x322   :  { %v11198_v0 = vpop.eup %11197 }
 0x323   :  { %17360 = vst [vmem:[#allocation15_spill] sm:$0xff] %v13111_v40  ;;  %v11200_v31 = vpop.eup %11199  ;;  %v13116_v19 = vmul.f32 %v11198_v0, %v1535_v50 }
 0x324   :  { %v11202_v17 = vpop.eup %11201  ;;  %v13118_v53 = vmul.f32 %v11200_v31, %v1546_v12 }
 0x325   :  { %17361 = vst [vmem:[#allocation17_spill] sm:$0xff] %v13116_v19  ;;  %v13120_v1 = vmul.f32 %v11202_v17, %v1538_v29  ;;  %v11204_v59 = vpop.eup %11203 }
 0x326   :  { %17362 = vst [vmem:[#allocation20_spill] sm:$0xff] %v13118_v53  ;;  %v11206_v56 = vpop.eup %11205  ;;  %v1969_v6 = vadd.f32 1.0, %v11204_v59  ;;  %v2088_v24 = vpack.c.bf16 %v13118_v53, %v13111_v40 }
 0x327   :  { %17363 = vst [vmem:[#allocation34_spill] sm:$0xff] %v13120_v1  ;;  %v2087_v49 = vpack.c.bf16 %v13120_v1, %v13116_v19  ;;  %v11208_v2 = vpop.eup %11207  ;;  %v1967_v42 = vadd.f32 1.0, %v11206_v56 }
 0x328   :  { %11211 = vrcp.f32 %v1969_v6  ;;  %v1970_v28 = vadd.f32 1.0, %v11208_v2 }
 0x329   :  { %v11210_v52 = vpop.eup %11209  ;;  %10186 = vmatprep.mubr.bf16.mxu1 %v2087_v49  ;;  %2332 = vmatmul.mubr.bf16.gmra.mrb[64].mxu0 %v2087_v49  ;;  %11213 = vrcp.f32 %v1967_v42 }
 0x32a   :  { %v1968_v57 = vadd.f32 1.0, %v11210_v52  ;;  %10187 = vmatmul.mubr.bf16.gmra.mrb[88].mxu1 %v2088_v24  ;;  %2341 = vmatprep.mubr.bf16.mxu0 %v17085_v36  ;;  %11215 = vrcp.f32 %v1970_v28 }
 0x32c   :  { %11217 = vrcp.f32 %v1968_v57 }
 0x331   :  { %2342 = vmatmul.mubr.bf16.gmra.mrb[68].mxu0 %v2088_v24 }
 0x332   :  { %2351 = vmatprep.mubr.bf16.mxu0 %v17085_v36  ;;  %v11212_v43 = vpop.eup %11211 }
 0x333   :  { %v11214_v58 = vpop.eup %11213  ;;  %v13132_v9 = vmul.f32 %v11212_v43, %v1559_v13 }
 0x334   :  { %v11216_v26 = vpop.eup %11215  ;;  %v13135_v14 = vmul.f32 %v11214_v58, %v1551_v15 }
 0x335   :  { %17364 = vst [vmem:[#allocation28_spill] sm:$0xff] %v13132_v9  ;;  %v13138_v34 = vmul.f32 %v11216_v26, %v1562_v37 }
 0x336   :  { %17365 = vst [vmem:[#allocation33_spill] sm:$0xff] %v13135_v14  ;;  %v11218_v21 = vpop.eup %11217 }
 0x337   :  { %17366 = vst [vmem:[#allocation25_spill] sm:$0xff] %v13138_v34  ;;  %v13140_v3 = vmul.f32 %v11218_v21, %v1554_v41  ;;  %v2090_v51 = vpack.c.bf16 %v13138_v34, %v13132_v9 }
 0x339   :  { %17367 = vst [vmem:[#allocation7_spill] sm:$0xff] %v13140_v3  ;;  %v2089_v5 = vpack.c.bf16 %v13140_v3, %v13135_v14 }
 0x33b   :  { %10190 = vmatprep.mubr.bf16.mxu1 %v2089_v5  ;;  %2352 = vmatmul.mubr.bf16.gmra.mrb[72].mxu0 %v2089_v5 }
 0x33c   :  { %10191 = vmatmul.mubr.bf16.gmra.mrb[92].mxu1 %v2090_v51  ;;  %2361 = vmatprep.mubr.bf16.mxu0 %v17085_v36 }
 0x343   :  { %2362 = vmatmul.mubr.bf16.gmra.mrb[76].mxu0 %v2090_v51 }
 0x344   :  { %2371 = vmatprep.mubr.bf16.mxu0 %v17085_v36 }
 0x34b   :  { %v10148_v55 = vpop.f32.mrb[64].mxu1  ;;  %v13148_v33 = vpop.f32.mrb[32].mxu0 }
 0x34c   :  { %v1805_v22 = vadd.f32 %v10148_v55, %v13012_v61  ;;  %v1796_v38 = vpop.f32.mrb[65].mxu1  ;;  %v13151_v23 = vpop.f32.mrb[33].mxu0 }
 0x34d   :  { %v1797_v35 = vadd.f32 %v1796_v38, %v13012_v61  ;;  %v10149_v63 = vpop.f32.mrb[66].mxu1  ;;  %v13154_v62 = vpop.f32.mrb[34].mxu0 }
 0x34e   :  { %v1877_v10 = vsub.f32 0.0, %v1805_v22  ;;  %v1808_v16 = vadd.f32 %v10149_v63, %v13012_v61  ;;  %v1799_v8 = vpop.f32.mrb[67].mxu1  ;;  %v13157_v46 = vpop.f32.mrb[35].mxu0 }
 0x34f   :  { %v1875_v48 = vsub.f32 0.0, %v1797_v35  ;;  %v1800_v11 = vadd.f32 %v1799_v8, %v13012_v61 }
 0x350   :  { %v1927_v20 = vmul.f32 1.442695, %v1877_v10  ;;  %v1878_v54 = vsub.f32 0.0, %v1808_v16 }
 0x351   :  { %v1923_v50 = vmul.f32 1.442695, %v1875_v48  ;;  %v1876_v0 = vsub.f32 0.0, %v1800_v11 }
 0x352   :  { %11219 = vpow2.f32 %v1927_v20  ;;  %v1929_v12 = vmul.f32 1.442695, %v1878_v54  ;;  %v1575_v54 = vadd.f32 %v13148_v33, %v13040_v4 }
 0x353   :  { %11221 = vpow2.f32 %v1923_v50  ;;  %v1925_v31 = vmul.f32 1.442695, %v1876_v0  ;;  %v10152_v29 = vpop.f32.mrb[68].mxu1  ;;  %v13160_v17 = vpop.f32.mrb[36].mxu0 }
 0x354   :  { %11223 = vpow2.f32 %v1929_v12  ;;  %v1821_v59 = vadd.f32 %v10152_v29, %v13012_v61  ;;  %v1812_v56 = vpop.f32.mrb[69].mxu1  ;;  %v13163_v6 = vpop.f32.mrb[37].mxu0  ;;  %v1567_v12 = vadd.f32 %v13151_v23, %v13040_v4  ;;  %v1578_v29 = vadd.f32 %v13154_v62, %v13040_v4 }
 0x355   :  { %11225 = vpow2.f32 %v1925_v31  ;;  %v1813_v49 = vadd.f32 %v1812_v56, %v13012_v61  ;;  %v10153_v2 = vpop.f32.mrb[70].mxu1  ;;  %v13166_v42 = vpop.f32.mrb[38].mxu0 }
 0x356   :  { %v1881_v24 = vsub.f32 0.0, %v1821_v59  ;;  %v1824_v52 = vadd.f32 %v10153_v2, %v13012_v61  ;;  %v1815_v28 = vpop.f32.mrb[71].mxu1  ;;  %v13169_v57 = vpop.f32.mrb[39].mxu0  ;;  %v1570_v2 = vadd.f32 %v13157_v46, %v13040_v4 }
 0x357   :  { %v1879_v13 = vsub.f32 0.0, %v1813_v49  ;;  %v1816_v43 = vadd.f32 %v1815_v28, %v13012_v61 }
 0x358   :  { %v1935_v15 = vmul.f32 1.442695, %v1881_v24  ;;  %v1882_v58 = vsub.f32 0.0, %v1824_v52 }
 0x359   :  { %v1931_v37 = vmul.f32 1.442695, %v1879_v13  ;;  %v1880_v26 = vsub.f32 0.0, %v1816_v43 }
 0x35a   :  { %11227 = vpow2.f32 %v1935_v15  ;;  %v1937_v41 = vmul.f32 1.442695, %v1882_v58 }
 0x35b   :  { %11229 = vpow2.f32 %v1931_v37  ;;  %v1933_v21 = vmul.f32 1.442695, %v1880_v26 }
 0x35c   :  { %v11220_v5 = vpop.eup %11219  ;;  %11231 = vpow2.f32 %v1937_v41 }
 0x35d   :  { %v11222_v51 = vpop.eup %11221  ;;  %v1973_v55 = vadd.f32 1.0, %v11220_v5  ;;  %11233 = vpow2.f32 %v1933_v21 }
 0x35e   :  { %v11224_v22 = vpop.eup %11223  ;;  %v1971_v38 = vadd.f32 1.0, %v11222_v51 }
 0x35f   :  { %v11226_v35 = vpop.eup %11225  ;;  %11235 = vrcp.f32 %v1973_v55  ;;  %v1974_v63 = vadd.f32 1.0, %v11224_v22 }
 0x360   :  { %11237 = vrcp.f32 %v1971_v38  ;;  %v1972_v10 = vadd.f32 1.0, %v11226_v35 }
 0x361   :  { %11239 = vrcp.f32 %v1974_v63 }
 0x362   :  { %11241 = vrcp.f32 %v1972_v10 }
 0x364   :  { %v11228_v16 = vpop.eup %11227 }
 0x365   :  { %v11230_v8 = vpop.eup %11229  ;;  %v1977_v48 = vadd.f32 1.0, %v11228_v16  ;;  %v1591_v16 = vadd.f32 %v13160_v17, %v13040_v4 }
 0x366   :  { %v11232_v11 = vpop.eup %11231  ;;  %v1975_v20 = vadd.f32 1.0, %v11230_v8 }
 0x367   :  { %v11234_v50 = vpop.eup %11233  ;;  %11243 = vrcp.f32 %v1977_v48  ;;  %v1978_v0 = vadd.f32 1.0, %v11232_v11  ;;  %v1583_v11 = vadd.f32 %v13163_v6, %v13040_v4 }
 0x368   :  { %11245 = vrcp.f32 %v1975_v20  ;;  %v1976_v31 = vadd.f32 1.0, %v11234_v50  ;;  %v10156_v59 = vpop.f32.mrb[72].mxu1  ;;  %v13178_v56 = vpop.f32.mrb[40].mxu0 }
 0x369   :  { %v11236_v49 = vpop.eup %11235  ;;  %11247 = vrcp.f32 %v1978_v0  ;;  %v1837_v33 = vadd.f32 %v10156_v59, %v13012_v61  ;;  %v1828_v24 = vpop.f32.mrb[73].mxu1 }
 0x36a   :  { %v13183_v52 = vpop.f32.mrb[41].mxu0  ;;  %v11238_v28 = vpop.eup %11237  ;;  %11249 = vrcp.f32 %v1976_v31  ;;  %v13185_v23 = vmul.f32 %v11236_v49, %v1575_v54  ;;  %v1829_v13 = vadd.f32 %v1828_v24, %v13012_v61  ;;  %v1594_v54 = vadd.f32 %v13166_v42, %v13040_v4 }
 0x36b   :  { %v10157_v62 = vpop.f32.mrb[74].mxu1  ;;  %v13188_v43 = vpop.f32.mrb[42].mxu0  ;;  %v13190_v58 = vmul.f32 %v11238_v28, %v1567_v12  ;;  %v1885_v37 = vsub.f32 0.0, %v1837_v33  ;;  %v1586_v31 = vadd.f32 %v13169_v57, %v13040_v4 }
 0x36c   :  { %17368 = vst [vmem:[#allocation26_spill] sm:$0xff] %v13185_v23  ;;  %v11240_v15 = vpop.eup %11239  ;;  %v1840_v46 = vadd.f32 %v10157_v62, %v13012_v61  ;;  %v1831_v26 = vpop.f32.mrb[75].mxu1  ;;  %v1883_v51 = vsub.f32 0.0, %v1829_v13 }
 0x36d   :  { %17369 = vst [vmem:[#allocation22_spill] sm:$0xff] %v13190_v58  ;;  %v13193_v41 = vpop.f32.mrb[43].mxu0  ;;  %v11242_v21 = vpop.eup %11241  ;;  %v13195_v5 = vmul.f32 %v11240_v15, %v1578_v29  ;;  %v1832_v55 = vadd.f32 %v1831_v26, %v13012_v61  ;;  %v1943_v38 = vmul.f32 1.442695, %v1885_v37 }
 0x36e   :  { %v13198_v22 = vmul.f32 %v11242_v21, %v1570_v2  ;;  %v1886_v35 = vsub.f32 0.0, %v1840_v46  ;;  %v1939_v63 = vmul.f32 1.442695, %v1883_v51 }
 0x36f   :  { %17370 = vst [vmem:[#allocation27_spill] sm:$0xff] %v13195_v5  ;;  %v1884_v10 = vsub.f32 0.0, %v1832_v55  ;;  %11251 = vpow2.f32 %v1943_v38  ;;  %v2092_v50 = vpack.c.bf16 %v13195_v5, %v13185_v23 }
 0x370   :  { %17371 = vst [vmem:[#allocation18_spill] sm:$0xff] %v13198_v22  ;;  %v1945_v8 = vmul.f32 1.442695, %v1886_v35  ;;  %v2091_v48 = vpack.c.bf16 %v13198_v22, %v13190_v58  ;;  %11253 = vpow2.f32 %v1939_v63  ;;  %v10160_v0 = vpop.f32.mrb[76].mxu1  ;;  %v13210_v12 = vpop.f32.mrb[44].mxu0 }
 0x371   :  { %v1941_v20 = vmul.f32 1.442695, %v1884_v10  ;;  %v11244_v17 = vpop.eup %11243  ;;  %v1853_v29 = vadd.f32 %v10160_v0, %v13012_v61  ;;  %v1844_v6 = vpop.f32.mrb[77].mxu1 }
 0x372   :  { %11255 = vpow2.f32 %v1945_v8  ;;  %2372 = vmatmul.mubr.bf16.gmra.mrb[80].mxu0 %v2091_v48  ;;  %10194 = vmatprep.mubr.bf16.mxu1 %v2091_v48  ;;  %v13215_v59 = vpop.f32.mrb[45].mxu0  ;;  %v11246_v49 = vpop.eup %11245  ;;  %v13217_v42 = vmul.f32 %v11244_v17, %v1591_v16  ;;  %v1845_v2 = vadd.f32 %v1844_v6, %v13012_v61 }
 0x373   :  { %11257 = vpow2.f32 %v1941_v20  ;;  %2381 = vmatprep.mubr.bf16.mxu0 %v17085_v36  ;;  %v10161_v33 = vpop.f32.mrb[78].mxu1  ;;  %10195 = vmatmul.mubr.bf16.gmra.mrb[96].mxu1 %v2092_v50  ;;  %v13221_v24 = vpop.f32.mrb[46].mxu0  ;;  %v13223_v57 = vmul.f32 %v11246_v49, %v1583_v11  ;;  %v1889_v13 = vsub.f32 0.0, %v1853_v29 }
 0x374   :  { %17372 = vst [vmem:[#allocation23_spill] sm:$0xff] %v13217_v42  ;;  %v11248_v28 = vpop.eup %11247  ;;  %v1856_v62 = vadd.f32 %v10161_v33, %v13012_v61  ;;  %v1847_v15 = vpop.f32.mrb[79].mxu1  ;;  %v1887_v21 = vsub.f32 0.0, %v1845_v2 }
 0x375   :  { %17373 = vst [vmem:[#allocation32_spill] sm:$0xff] %v13223_v57  ;;  %v13226_v37 = vpop.f32.mrb[47].mxu0  ;;  %v11250_v46 = vpop.eup %11249  ;;  %v13228_v26 = vmul.f32 %v11248_v28, %v1594_v54  ;;  %v1848_v51 = vadd.f32 %v1847_v15, %v13012_v61  ;;  %v1951_v38 = vmul.f32 1.442695, %v1889_v13  ;;  %v1607_v13 = vadd.f32 %v13178_v56, %v13040_v4 }
 0x376   :  { %v13231_v55 = vmul.f32 %v11250_v46, %v1586_v31  ;;  %v1890_v35 = vsub.f32 0.0, %v1856_v62  ;;  %v1947_v63 = vmul.f32 1.442695, %v1887_v21  ;;  %v1599_v46 = vadd.f32 %v13183_v52, %v13040_v4 }
 0x377   :  { %17374 = vst [vmem:[#allocation21_spill] sm:$0xff] %v13228_v26  ;;  %v1888_v10 = vsub.f32 0.0, %v1848_v51  ;;  %11259 = vpow2.f32 %v1951_v38  ;;  %v2094_v11 = vpack.c.bf16 %v13228_v26, %v13217_v42  ;;  %v1610_v51 = vadd.f32 %v13188_v43, %v13040_v4 }
 0x378   :  { %17375 = vst [vmem:[#allocation19_spill] sm:$0xff] %v13231_v55  ;;  %v1953_v16 = vmul.f32 1.442695, %v1890_v35  ;;  %v2093_v8 = vpack.c.bf16 %v13231_v55, %v13223_v57  ;;  %11261 = vpow2.f32 %v1947_v63  ;;  %v1602_v35 = vadd.f32 %v13193_v41, %v13040_v4 }
 0x379   :  { %v1949_v48 = vmul.f32 1.442695, %v1888_v10  ;;  %v11252_v20 = vpop.eup %11251  ;;  %v1623_v43 = vadd.f32 %v13210_v12, %v13040_v4 }
 0x37a   :  { %2382 = vmatmul.mubr.bf16.gmra.mrb[84].mxu0 %v2092_v50  ;;  %11263 = vpow2.f32 %v1953_v16  ;;  %10198 = vmatprep.mubr.bf16.mxu1 %v2093_v8  ;;  %v11254_v61 = vpop.eup %11253  ;;  %v1981_v54 = vadd.f32 1.0, %v11252_v20  ;;  %v1615_v20 = vadd.f32 %v13215_v59, %v13040_v4 }
 0x37b   :  { %11265 = vpow2.f32 %v1949_v48  ;;  %2391 = vmatprep.mubr.bf16.mxu0 %v17085_v36  ;;  %10199 = vmatmul.mubr.bf16.gmra.mrb[100].mxu1 %v2094_v11  ;;  %v1979_v17 = vadd.f32 1.0, %v11254_v61  ;;  %v1626_v61 = vadd.f32 %v13221_v24, %v13040_v4 }
 0x37c   :  { %v11256_v0 = vpop.eup %11255  ;;  %11267 = vrcp.f32 %v1981_v54 }
 0x37d   :  { %v11258_v31 = vpop.eup %11257  ;;  %v1982_v29 = vadd.f32 1.0, %v11256_v0  ;;  %11269 = vrcp.f32 %v1979_v17  ;;  %v1618_v0 = vadd.f32 %v13226_v37, %v13040_v4 }
 0x37e   :  { %v1980_v6 = vadd.f32 1.0, %v11258_v31 }
 0x37f   :  { %11271 = vrcp.f32 %v1982_v29 }
 0x380   :  { %11273 = vrcp.f32 %v1980_v6 }
 0x381   :  { %v11260_v49 = vpop.eup %11259 }
 0x382   :  { %2392 = vmatmul.mubr.bf16.gmra.mrb[88].mxu0 %v2093_v8  ;;  %v11262_v50 = vpop.eup %11261  ;;  %v1985_v2 = vadd.f32 1.0, %v11260_v49 }
 0x383   :  { %2401 = vmatprep.mubr.bf16.mxu0 %v17085_v36  ;;  %v1983_v28 = vadd.f32 1.0, %v11262_v50 }
 0x384   :  { %v11264_v33 = vpop.eup %11263  ;;  %11275 = vrcp.f32 %v1985_v2 }
 0x385   :  { %v11266_v62 = vpop.eup %11265  ;;  %v1986_v15 = vadd.f32 1.0, %v11264_v33  ;;  %11277 = vrcp.f32 %v1983_v28 }
 0x386   :  { %v1984_v21 = vadd.f32 1.0, %v11266_v62  ;;  %v11268_v38 = vpop.eup %11267 }
 0x387   :  { %11279 = vrcp.f32 %v1986_v15  ;;  %v11270_v63 = vpop.eup %11269  ;;  %v13247_v10 = vmul.f32 %v11268_v38, %v1607_v13 }
 0x388   :  { %11281 = vrcp.f32 %v1984_v21  ;;  %v13249_v16 = vmul.f32 %v11270_v63, %v1599_v46 }
 0x389   :  { %17376 = vst [vmem:[#allocation31_spill] sm:$0xff] %v13247_v10  ;;  %v11272_v56 = vpop.eup %11271 }
 0x38a   :  { %17377 = vst [vmem:[#allocation9_spill] sm:$0xff] %v13249_v16  ;;  %v11274_v8 = vpop.eup %11273  ;;  %v13251_v48 = vmul.f32 %v11272_v56, %v1610_v51  ;;  %2402 = vmatmul.mubr.bf16.gmra.mrb[92].mxu0 %v2094_v11 }
 0x38b   :  { %v13253_v52 = vmul.f32 %v11274_v8, %v1602_v35  ;;  %2411 = vmatprep.mubr.bf16.mxu0 %v17085_v36 }
 0x38c   :  { %17378 = vst [vmem:[#allocation35_spill] sm:$0xff] %v13251_v48  ;;  %v2096_v54 = vpack.c.bf16 %v13251_v48, %v13247_v10 }
 0x38d   :  { %17379 = vst [vmem:[#allocation8_spill] sm:$0xff] %v13253_v52  ;;  %v2095_v41 = vpack.c.bf16 %v13253_v52, %v13249_v16 }
 0x38e   :  { %v11276_v11 = vpop.eup %11275 }
 0x38f   :  { %10202 = vmatprep.mubr.bf16.mxu1 %v2095_v41  ;;  %v11278_v17 = vpop.eup %11277  ;;  %v13268_v31 = vmul.f32 %v11276_v11, %v1623_v43 }
 0x390   :  { %10203 = vmatmul.mubr.bf16.gmra.mrb[104].mxu1 %v2096_v54  ;;  %v13270_v29 = vmul.f32 %v11278_v17, %v1615_v20 }
 0x391   :  { %17380 = vst [vmem:[#allocation6_spill] sm:$0xff] %v13268_v31  ;;  %v11280_v12 = vpop.eup %11279 }
 0x392   :  { %17381 = vst [vmem:[#allocation36_spill] sm:$0xff] %v13270_v29  ;;  %v11282_v6 = vpop.eup %11281  ;;  %2412 = vmatmul.mubr.bf16.gmra.mrb[96].mxu0 %v2095_v41  ;;  %v13272_v59 = vmul.f32 %v11280_v12, %v1626_v61 }
 0x393   :  { %2421 = vmatprep.mubr.bf16.mxu0 %v17085_v36  ;;  %v13275_v24 = vmul.f32 %v11282_v6, %v1618_v0 }
 0x394   :  { %17382 = vst [vmem:[#allocation16_spill] sm:$0xff] %v13272_v59  ;;  %v2098_v49 = vpack.c.bf16 %v13272_v59, %v13268_v31 }
 0x395   :  { %17383 = vst [vmem:[#allocation37_spill] sm:$0xff] %v13275_v24  ;;  %v2097_v4 = vpack.c.bf16 %v13275_v24, %v13270_v29 }
 0x397   :  { %10206 = vmatprep.mubr.bf16.mxu1 %v2097_v4 }
 0x398   :  { %10207 = vmatmul.mubr.bf16.gmra.mrb[108].mxu1 %v2098_v49 }
 0x39a   :  { %2422 = vmatmul.mubr.bf16.gmra.mrb[100].mxu0 %v2096_v54 }
 0x39b   :  { %2431 = vmatprep.mubr.bf16.mxu0 %v17085_v36 }
 0x3a2   :  { %2432 = vmatmul.mubr.bf16.gmra.mrb[104].mxu0 %v2097_v4 }
 0x3a3   :  { %2441 = vmatprep.mubr.bf16.mxu0 %v17085_v36 }
 0x3aa   :  { %2442 = vmatmul.mubr.bf16.gmra.mrb[108].mxu0 %v2098_v49 }
 0x3db   :  { %v2293_v37 = vpop.f32.mrb[48].mxu0 }
 0x3dc   :  { %v2295_v50 = vpop.f32.mrb[49].mxu0  ;;  %v10180_v2 = vpop.f32.mrb[80].mxu1 }
 0x3dd   :  { %v2297_v33 = vpop.f32.mrb[50].mxu0  ;;  %v2486_v28 = vpop.f32.mrb[81].mxu1 }
 0x3de   :  { %v13283_v13 = vpack.c.bf16 %v2297_v33, %v2293_v37  ;;  %v2299_v62 = vpop.f32.mrb[51].mxu0  ;;  %v10181_v15 = vpop.f32.mrb[82].mxu1 }
 0x3df   :  { %v13285_v46 = vpack.c.bf16 %v2299_v62, %v2295_v50  ;;  %v13287_v21 = vpack.c.bf16 %v10181_v15, %v10180_v2  ;;  %v2489_v51 = vpop.f32.mrb[83].mxu1 }
 0x3e0   :  { %17384 = vst [vmem:[#allocation38_spill] sm:$0xff] %v13283_v13  ;;  %v13289_v38 = vpack.c.bf16 %v2489_v51, %v2486_v28  ;;  %10226 = vmatprep.mubr.msk.bf16.mxu1 %vm2733_vm2, %v13283_v13 }
 0x3e1   :  { %17385 = vst [vmem:[#allocation39_spill] sm:$0xff] %v13287_v21  ;;  %3176 = vrot.lane.b32.xlu0 %v13285_v46, %s11928_s4  ;;  %10838 = vmatprep.subr.msk.bf16.mxu1 %vm2733_vm2, %v13285_v46  ;;  %v2759_v35 = vsel %vm2733_vm2, %v13285_v46, 0 }
 0x3e2   :  { %17386 = vst [vmem:[#allocation40_spill] sm:$0xff] %v13289_v38  ;;  %10211 = vmatpush3.bf16.xpose.msra.mxu1 %v2759_v35 }
 0x3e3   :  { %v2303_v63 = vpop.f32.mrb[52].mxu0 }
 0x3e4   :  { %v2305_v56 = vpop.f32.mrb[53].mxu0  ;;  %v10184_v8 = vpop.f32.mrb[84].mxu1 }
 0x3e5   :  { %v2307_v43 = vpop.f32.mrb[54].mxu0  ;;  %v2502_v41 = vpop.f32.mrb[85].mxu1 }
 0x3e6   :  { %v13299_v20 = vpack.c.bf16 %v2307_v43, %v2303_v63  ;;  %v2309_v61 = vpop.f32.mrb[55].mxu0  ;;  %v10185_v54 = vpop.f32.mrb[86].mxu1 }
 0x3e7   :  { %v13301_v11 = vpack.c.bf16 %v2309_v61, %v2305_v56  ;;  %v13303_v0 = vpack.c.bf16 %v10185_v54, %v10184_v8  ;;  %v2505_v17 = vpop.f32.mrb[87].mxu1 }
 0x3e8   :  { %17387 = vst [vmem:[#allocation41_spill] sm:$0xff] %v13299_v20  ;;  %v13305_v12 = vpack.c.bf16 %v2505_v17, %v2502_v41 }
 0x3e9   :  { %17388 = vst [vmem:[#allocation42_spill] sm:$0xff] %v13303_v0  ;;  %3178 = vrot.lane.b32.xlu0 %v13301_v11, %s11928_s4  ;;  %10839 = vmatprep.subr.msk.bf16.mxu1 %vm2733_vm2, %v13301_v11  ;;  %v2762_v6 = vsel %vm2733_vm2, %v13301_v11, 0 }
 0x3ea   :  { %17389 = vst [vmem:[#allocation43_spill] sm:$0xff] %v13305_v12  ;;  %10213 = vmatpush3.bf16.xpose.msra.mxu1 %v2762_v6 }
 0x3eb   :  { %v2313_v49 = vpop.f32.mrb[56].mxu0 }
 0x3ec   :  { %v2315_v4 = vpop.f32.mrb[57].mxu0 }
 0x3ed   :  { %v2317_v37 = vpop.f32.mrb[58].mxu0 }
 0x3ee   :  { %v13313_v50 = vpack.c.bf16 %v2317_v37, %v2313_v49  ;;  %v2319_v2 = vpop.f32.mrb[59].mxu0 }
 0x3ef   :  { %v13315_v33 = vpack.c.bf16 %v2319_v2, %v2315_v4 }
 0x3f0   :  { %17390 = vst [vmem:[#allocation44_spill] sm:$0xff] %v13313_v50 }
 0x3f1   :  { %3180 = vrot.lane.b32.xlu1 %v13315_v33, %s11928_s4  ;;  %10840 = vmatprep.subr.msk.bf16.mxu1 %vm2733_vm2, %v13315_v33  ;;  %v2765_v28 = vsel %vm2733_vm2, %v13315_v33, 0 }
 0x3f2   :  { %10215 = vmatpush3.bf16.xpose.msra.mxu1 %v2765_v28 }
 0x3f3   :  { %v2323_v62 = vpop.f32.mrb[60].mxu0 }
 0x3f4   :  { %v2325_v15 = vpop.f32.mrb[61].mxu0 }
 0x3f5   :  { %v2327_v51 = vpop.f32.mrb[62].mxu0 }
 0x3f6   :  { %v13323_v35 = vpack.c.bf16 %v2327_v51, %v2323_v62  ;;  %v2329_v63 = vpop.f32.mrb[63].mxu0 }
 0x3f7   :  { %v13325_v56 = vpack.c.bf16 %v2329_v63, %v2325_v15 }
 0x3f8   :  { %17391 = vst [vmem:[#allocation45_spill] sm:$0xff] %v13323_v35 }
 0x3f9   :  { %17392 = vst [vmem:[#allocation46_spill] sm:$0xff] %v13325_v56  ;;  %3182 = vrot.lane.b32.xlu1 %v13325_v56, %s11928_s4  ;;  %10841 = vmatprep.subr.msk.bf16.mxu1 %vm2733_vm2, %v13325_v56  ;;  %v2768_v8 = vsel %vm2733_vm2, %v13325_v56, 0 }
 0x3fa   :  { %10217 = vmatpush3.bf16.xpose.msra.mxu1 %v2768_v8 }
 0x3fc   :  { %v2333_v43 = vpop.f32.mrb[64].mxu0 }
 0x3fd   :  { %v10188_v41 = vpop.f32.mrb[88].mxu1  ;;  %v2335_v61 = vpop.f32.mrb[65].mxu0 }
 0x3fe   :  { %v2518_v54 = vpop.f32.mrb[89].mxu1  ;;  %v2337_v17 = vpop.f32.mrb[66].mxu0 }
 0x3ff   :  { %v10189_v6 = vpop.f32.mrb[90].mxu1  ;;  %v13333_v49 = vpack.c.bf16 %v2337_v17, %v2333_v43  ;;  %v2339_v4 = vpop.f32.mrb[67].mxu0 }
 0x400   :  { %v13335_v37 = vpack.c.bf16 %v10189_v6, %v10188_v41  ;;  %v2521_v2 = vpop.f32.mrb[91].mxu1  ;;  %v13337_v28 = vpack.c.bf16 %v2339_v4, %v2335_v61 }
 0x401   :  { %17393 = vst [vmem:[#allocation47_spill] sm:$0xff] %v13333_v49  ;;  %v13339_v62 = vpack.c.bf16 %v2521_v2, %v2518_v54 }
 0x402   :  { %17394 = vst [vmem:[#allocation48_spill] sm:$0xff] %v13335_v37  ;;  %3184 = vrot.lane.b32.xlu0 %v13337_v28, %s11928_s4  ;;  %10842 = vmatprep.subr.msk.bf16.mxu1 %vm2733_vm2, %v13337_v28  ;;  %v2771_v15 = vsel %vm2733_vm2, %v13337_v28, 0 }
 0x403   :  { %17395 = vst [vmem:[#allocation49_spill] sm:$0xff] %v13339_v62  ;;  %10219 = vmatpush3.bf16.xpose.msra.mxu1 %v2771_v15 }
 0x404   :  { %v2343_v51 = vpop.f32.mrb[68].mxu0 }
 0x405   :  { %v2345_v63 = vpop.f32.mrb[69].mxu0 }
 0x406   :  { %v2347_v8 = vpop.f32.mrb[70].mxu0 }
 0x407   :  { %v13347_v43 = vpack.c.bf16 %v2347_v8, %v2343_v51  ;;  %v2349_v41 = vpop.f32.mrb[71].mxu0 }
 0x408   :  { %v13349_v61 = vpack.c.bf16 %v2349_v41, %v2345_v63 }
 0x409   :  { %17396 = vst [vmem:[#allocation50_spill] sm:$0xff] %v13347_v43 }
 0x40a   :  { %3186 = vrot.lane.b32.xlu1 %v13349_v61, %s11928_s4  ;;  %10843 = vmatprep.subr.msk.bf16.mxu1 %vm2733_vm2, %v13349_v61  ;;  %v2774_v54 = vsel %vm2733_vm2, %v13349_v61, 0 }
 0x40b   :  { %10221 = vmatpush3.bf16.xpose.msra.mxu1 %v2774_v54 }
 0x40e   :  { %v2353_v17 = vpop.f32.mrb[72].mxu0 }
 0x40f   :  { %v10192_v6 = vpop.f32.mrb[92].mxu1  ;;  %v2355_v4 = vpop.f32.mrb[73].mxu0 }
 0x410   :  { %v2534_v2 = vpop.f32.mrb[93].mxu1  ;;  %v2357_v15 = vpop.f32.mrb[74].mxu0 }
 0x411   :  { %v10193_v51 = vpop.f32.mrb[94].mxu1  ;;  %v13357_v8 = vpack.c.bf16 %v2357_v15, %v2353_v17  ;;  %v2359_v63 = vpop.f32.mrb[75].mxu0 }
 0x412   :  { %v13359_v41 = vpack.c.bf16 %v10193_v51, %v10192_v6  ;;  %v2537_v18 = vpop.f32.mrb[95].mxu1  ;;  %v13361_v36 = vpack.c.bf16 %v2359_v63, %v2355_v4 }
 0x413   :  { %17397 = vst [vmem:[#allocation51_spill] sm:$0xff] %v13357_v8  ;;  %v13363_v45 = vpack.c.bf16 %v2537_v18, %v2534_v2 }
 0x414   :  { %17398 = vst [vmem:[#allocation52_spill] sm:$0xff] %v13359_v41  ;;  %17399 = vst [vmem:[#allocation53_spill] sm:$0xff] %v13361_v36  ;;  %3188 = vrot.lane.b32.xlu0 %v13361_v36, %s11928_s4  ;;  %10844 = vmatprep.subr.msk.bf16.mxu1 %vm2733_vm2, %v13361_v36  ;;  %v2777_v54 = vsel %vm2733_vm2, %v13361_v36, 0 }
 0x415   :  { %17400 = vst [vmem:[#allocation54_spill] sm:$0xff] %v13363_v45  ;;  %10223 = vmatpush3.bf16.xpose.msra.mxu1 %v2777_v54 }
 0x416   :  { %v2363_v17 = vpop.f32.mrb[76].mxu0 }
 0x417   :  { %v2365_v15 = vpop.f32.mrb[77].mxu0 }
 0x418   :  { %3152 = vrot.lane.b32.xlu0 %v13283_v13, %s11928_s4  ;;  %v2367_v6 = vpop.f32.mrb[78].mxu0 }
 0x419   :  { %v13373_v4 = vpack.c.bf16 %v2367_v6, %v2363_v17  ;;  %v2369_v18 = vpop.f32.mrb[79].mxu0 }
 0x41a   :  { %v13375_v2 = vpack.c.bf16 %v2369_v18, %v2365_v15 }
 0x41b   :  { %17401 = vst [vmem:[#allocation55_spill] sm:$0xff] %v13373_v4 }
 0x41c   :  { %17402 = vst [vmem:[#allocation56_spill] sm:$0xff] %v13375_v2  ;;  %3154 = vrot.lane.b32.xlu0 %v13299_v20, %s11928_s4  ;;  %3190 = vrot.lane.b32.xlu1 %v13375_v2, %s11928_s4  ;;  %v2780_v51 = vsel %vm2733_vm2, %v13375_v2, 0 }
 0x41d   :  { %10845 = vmatprep.subr.msk.bf16.mxu1 %vm2733_vm2, %v13375_v2 }
 0x41e   :  { %10225 = vmatpush3.bf16.xpose.msra.mxu1 %v2780_v51 }
 0x41f   :  { %10242 = vmatprep.subr.bf16.mxu1 %v13289_v38 }
 0x420   :  { %3719 = vrot.lane.b32.xlu0 %v13315_v33, %s11929_s18  ;;  %3715 = vrot.lane.b32.xlu1 %v13285_v46, %s11929_s18 }
 0x424   :  { %3723 = vrot.lane.b32.xlu0 %v13337_v28, %s11929_s18  ;;  %3717 = vrot.lane.b32.xlu1 %v13301_v11, %s11929_s18 }
 0x425   :  { %10227 = vmatmul.mubr.msk.bf16.vlgmr.msra.gmra.mrb[112].mxu1 %vm2733_vm2, %v13299_v20 }
 0x426   :  { %10230 = vmatprep.mubr.msk.bf16.mxu1 %vm2733_vm2, %v13313_v50  ;;  %10243 = vmatpush3.bf16.msra.mxu1 %v13289_v38 }
 0x427   :  { %10244 = vmatprep.subr.bf16.mxu1 %v13287_v21 }
 0x428   :  { %3158 = vrot.lane.b32.xlu0 %v13323_v35, %s11928_s4  ;;  %3721 = vrot.lane.b32.xlu1 %v13325_v56, %s11929_s18 }
 0x42a   :  { %10245 = vmatpush3.bf16.msra.mxu1 %v13287_v21 }
 0x42b   :  { %10246 = vmatprep.subr.bf16.mxu1 %v13305_v12 }
 0x42c   :  { %3160 = vrot.lane.b32.xlu0 %v13333_v49, %s11928_s4  ;;  %3156 = vrot.lane.b32.xlu1 %v13313_v50, %s11928_s4 }
 0x42d   :  { %10231 = vmatmul.mubr.msk.bf16.gmra.mrb[116].mxu1 %vm2733_vm2, %v13323_v35 }
 0x42e   :  { %10234 = vmatprep.mubr.msk.bf16.mxu1 %vm2733_vm2, %v13333_v49  ;;  %10247 = vmatpush3.bf16.msra.mxu1 %v13305_v12 }
 0x42f   :  { %10248 = vmatprep.subr.bf16.mxu1 %v13303_v0 }
 0x430   :  { %3727 = vrot.lane.b32.xlu0 %v13361_v36, %s11929_s18  ;;  %3725 = vrot.lane.b32.xlu1 %v13349_v61, %s11929_s18 }
 0x432   :  { %10249 = vmatpush3.bf16.msra.mxu1 %v13303_v0 }
 0x433   :  { %10250 = vmatprep.subr.bf16.mxu1 %v13339_v62 }
 0x434   :  { %3166 = vrot.lane.b32.xlu0 %v13373_v4, %s11928_s4  ;;  %3162 = vrot.lane.b32.xlu1 %v13347_v43, %s11928_s4 }
 0x435   :  { %10235 = vmatmul.mubr.msk.bf16.gmra.mrb[120].mxu1 %vm2733_vm2, %v13347_v43 }
 0x436   :  { %10238 = vmatprep.mubr.msk.bf16.mxu1 %vm2733_vm2, %v13357_v8  ;;  %10251 = vmatpush3.bf16.msra.mxu1 %v13339_v62 }
 0x437   :  { %10252 = vmatprep.subr.bf16.mxu1 %v13335_v37 }
 0x438   :  { %3699 = vrot.lane.b32.xlu0 %v13283_v13, %s11929_s18  ;;  %3164 = vrot.lane.b32.xlu1 %v13357_v8, %s11928_s4 }
 0x43a   :  { %10253 = vmatpush3.bf16.msra.mxu1 %v13335_v37 }
 0x43b   :  { %10254 = vmatprep.subr.bf16.mxu1 %v13363_v45 }
 0x43c   :  { %3703 = vrot.lane.b32.xlu0 %v13313_v50, %s11929_s18  ;;  %3729 = vrot.lane.b32.xlu1 %v13375_v2, %s11929_s18 }
 0x43d   :  { %10239 = vmatmul.mubr.msk.bf16.gmra.mrb[124].mxu1 %vm2733_vm2, %v13373_v4 }
 0x43e   :  { %10255 = vmatpush3.bf16.msra.mxu1 %v13363_v45 }
 0x43f   :  { %10256 = vmatprep.subr.bf16.mxu1 %v13359_v41 }
 0x440   :  { %3707 = vrot.lane.b32.xlu0 %v13333_v49, %s11929_s18  ;;  %3701 = vrot.lane.b32.xlu1 %v13299_v20, %s11929_s18 }
 0x442   :  { %10257 = vmatpush3.bf16.msra.mxu1 %v13359_v41 }
 0x444   :  { %3711 = vrot.lane.b32.xlu0 %v13357_v8, %s11929_s18  ;;  %3705 = vrot.lane.b32.xlu1 %v13323_v35, %s11929_s18 }
 0x445   :  { %v2373_v63 = vpop.f32.mrb[80].mxu0 }
 0x446   :  { %v2375_v54 = vpop.f32.mrb[81].mxu0  ;;  %v10196_v17 = vpop.f32.mrb[96].mxu1 }
 0x447   :  { %v2377_v15 = vpop.f32.mrb[82].mxu0  ;;  %v2550_v6 = vpop.f32.mrb[97].mxu1 }
 0x448   :  { %v13455_v18 = vpack.c.bf16 %v2377_v15, %v2373_v63  ;;  %v2379_v51 = vpop.f32.mrb[83].mxu0  ;;  %v10197_v24 = vpop.f32.mrb[98].mxu1  ;;  %3499 = vrot.lane.b32.xlu0 %v13287_v21, %s11928_s4  ;;  %3709 = vrot.lane.b32.xlu1 %v13347_v43, %s11929_s18 }
 0x449   :  { %v13461_v29 = vpack.c.bf16 %v2379_v51, %v2375_v54  ;;  %v13463_v59 = vpack.c.bf16 %v10197_v24, %v10196_v17  ;;  %v2553_v31 = vpop.f32.mrb[99].mxu1 }
 0x44a   :  { %17403 = vst [vmem:[#allocation57_spill] sm:$0xff] %v13455_v18  ;;  %v13465_v52 = vpack.c.bf16 %v2553_v31, %v2550_v6 }
 0x44b   :  { %17404 = vst [vmem:[#allocation58_spill] sm:$0xff] %v13461_v29  ;;  %17405 = vst [vmem:[#allocation59_spill] sm:$0xff] %v13463_v59 }
 0x44c   :  { %17406 = vst [vmem:[#allocation60_spill] sm:$0xff] %v13465_v52  ;;  %3501 = vrot.lane.b32.xlu0 %v13305_v12, %s11928_s4  ;;  %3713 = vrot.lane.b32.xlu1 %v13373_v4, %s11929_s18 }
 0x44d   :  { %v2383_v63 = vpop.f32.mrb[84].mxu0 }
 0x44e   :  { %v2385_v15 = vpop.f32.mrb[85].mxu0  ;;  %v10200_v16 = vpop.f32.mrb[100].mxu1 }
 0x44f   :  { %v2387_v48 = vpop.f32.mrb[86].mxu0  ;;  %v2566_v10 = vpop.f32.mrb[101].mxu1 }
 0x450   :  { %v13471_v55 = vpack.c.bf16 %v2387_v48, %v2383_v63  ;;  %v2389_v54 = vpop.f32.mrb[87].mxu0  ;;  %v10201_v51 = vpop.f32.mrb[102].mxu1  ;;  %3505 = vrot.lane.b32.xlu0 %v13339_v62, %s11928_s4  ;;  %3497 = vrot.lane.b32.xlu1 %v13289_v38, %s11928_s4 }
 0x451   :  { %v13477_v31 = vpack.c.bf16 %v2389_v54, %v2385_v15  ;;  %v13479_v24 = vpack.c.bf16 %v10201_v51, %v10200_v16  ;;  %v2569_v17 = vpop.f32.mrb[103].mxu1 }
 0x452   :  { %17407 = vst [vmem:[#allocation61_spill] sm:$0xff] %v13471_v55  ;;  %v13481_v6 = vpack.c.bf16 %v2569_v17, %v2566_v10 }
 0x453   :  { %17408 = vst [vmem:[#allocation62_spill] sm:$0xff] %v13477_v31  ;;  %17409 = vst [vmem:[#allocation63_spill] sm:$0xff] %v13479_v24  ;;  %v3177_v48 = vpop.permute.xlu0 %3176 }
 0x454   :  { %17410 = vst [vmem:[#allocation64_spill] sm:$0xff] %v13481_v6  ;;  %3509 = vrot.lane.b32.xlu0 %v13363_v45, %s11928_s4  ;;  %3503 = vrot.lane.b32.xlu1 %v13303_v0, %s11928_s4  ;;  %v3217_v57 = vsel %vm2733_vm2, %v3177_v48, 0 }
 0x455   :  { %v2393_v63 = vpop.f32.mrb[88].mxu0  ;;  %10846 = vmatprep.subr.msk.bf16.mxu0 %vm2733_vm2, %v3177_v48 }
 0x456   :  { %v2395_v26 = vpop.f32.mrb[89].mxu0  ;;  %10275 = vmatpush3.bf16.xpose.msra.mxu0 %v3217_v57 }
 0x457   :  { %v2397_v15 = vpop.f32.mrb[90].mxu0 }
 0x458   :  { %v13489_v16 = vpack.c.bf16 %v2397_v15, %v2393_v63  ;;  %v2399_v54 = vpop.f32.mrb[91].mxu0  ;;  %4028 = vrot.lane.b32.xlu0 %v13289_v38, %s11929_s18  ;;  %3507 = vrot.lane.b32.xlu1 %v13335_v37, %s11928_s4 }
 0x459   :  { %v13495_v10 = vpack.c.bf16 %v2399_v54, %v2395_v26 }
 0x45a   :  { %17411 = vst [vmem:[#allocation65_spill] sm:$0xff] %v13489_v16 }
 0x45b   :  { %17412 = vst [vmem:[#allocation66_spill] sm:$0xff] %v13495_v10  ;;  %v3179_v51 = vpop.permute.xlu0 %3178 }
 0x45c   :  { %4032 = vrot.lane.b32.xlu0 %v13305_v12, %s11929_s18  ;;  %3511 = vrot.lane.b32.xlu1 %v13359_v41, %s11928_s4  ;;  %v3220_v17 = vsel %vm2733_vm2, %v3179_v51, 0 }
 0x45d   :  { %v2403_v57 = vpop.f32.mrb[92].mxu0  ;;  %10847 = vmatprep.subr.msk.bf16.mxu0 %vm2733_vm2, %v3179_v51 }
 0x45e   :  { %v2405_v48 = vpop.f32.mrb[93].mxu0  ;;  %10277 = vmatpush3.bf16.xpose.msra.mxu0 %v3220_v17 }
 0x45f   :  { %v2407_v63 = vpop.f32.mrb[94].mxu0 }
 0x460   :  { %v13503_v15 = vpack.c.bf16 %v2407_v63, %v2403_v57  ;;  %v2409_v42 = vpop.f32.mrb[95].mxu0  ;;  %4040 = vrot.lane.b32.xlu0 %v13363_v45, %s11929_s18  ;;  %4030 = vrot.lane.b32.xlu1 %v13287_v21, %s11929_s18 }
 0x461   :  { %v13509_v26 = vpack.c.bf16 %v2409_v42, %v2405_v48 }
 0x462   :  { %17413 = vst [vmem:[#allocation67_spill] sm:$0xff] %v13503_v15 }
 0x463   :  { %17414 = vst [vmem:[#allocation68_spill] sm:$0xff] %v13509_v26  ;;  %v10204_v54 = vpop.f32.mrb[104].mxu1  ;;  %v3181_v51 = vpop.permute.xlu1 %3180 }
 0x464   :  { %v2582_v22 = vpop.f32.mrb[105].mxu1  ;;  %4034 = vrot.lane.b32.xlu1 %v13303_v0, %s11929_s18  ;;  %10848 = vmatprep.subr.msk.bf16.mxu0 %vm2733_vm2, %v3181_v51  ;;  %v3223_v57 = vsel %vm2733_vm2, %v3181_v51, 0 }
 0x465   :  { %v2413_v58 = vpop.f32.mrb[96].mxu0  ;;  %v10205_v17 = vpop.f32.mrb[106].mxu1 }
 0x466   :  { %v2415_v63 = vpop.f32.mrb[97].mxu0  ;;  %v13515_v5 = vpack.c.bf16 %v10205_v17, %v10204_v54  ;;  %v2585_v23 = vpop.f32.mrb[107].mxu1  ;;  %10279 = vmatpush3.bf16.xpose.msra.mxu0 %v3223_v57 }
 0x467   :  { %v2417_v27 = vpop.f32.mrb[98].mxu0  ;;  %v13517_v42 = vpack.c.bf16 %v2585_v23, %v2582_v22 }
 0x468   :  { %17415 = vst [vmem:[#allocation69_spill] sm:$0xff] %v13515_v5  ;;  %v13519_v48 = vpack.c.bf16 %v2417_v27, %v2413_v58  ;;  %v2419_v3 = vpop.f32.mrb[99].mxu0  ;;  %4036 = vrot.lane.b32.xlu1 %v13339_v62, %s11929_s18 }
 0x469   :  { %17416 = vst [vmem:[#allocation70_spill] sm:$0xff] %v13517_v42  ;;  %v13523_v14 = vpack.c.bf16 %v2419_v3, %v2415_v63 }
 0x46a   :  { %17417 = vst [vmem:[#allocation71_spill] sm:$0xff] %v13519_v48 }
 0x46b   :  { %17418 = vst [vmem:[#allocation72_spill] sm:$0xff] %v13523_v14  ;;  %v10208_v34 = vpop.f32.mrb[108].mxu1  ;;  %v3183_v54 = vpop.permute.xlu1 %3182 }
 0x46c   :  { %v2598_v9 = vpop.f32.mrb[109].mxu1  ;;  %4038 = vrot.lane.b32.xlu1 %v13335_v37, %s11929_s18  ;;  %10849 = vmatprep.subr.msk.bf16.mxu0 %vm2733_vm2, %v3183_v54  ;;  %v3226_v23 = vsel %vm2733_vm2, %v3183_v54, 0 }
 0x46d   :  { %v2423_v51 = vpop.f32.mrb[100].mxu0  ;;  %v10209_v17 = vpop.f32.mrb[110].mxu1 }
 0x46e   :  { %v2425_v27 = vpop.f32.mrb[101].mxu0  ;;  %v13529_v58 = vpack.c.bf16 %v10209_v17, %v10208_v34  ;;  %v2601_v22 = vpop.f32.mrb[111].mxu1  ;;  %10281 = vmatpush3.bf16.xpose.msra.mxu0 %v3226_v23 }
 0x46f   :  { %v2427_v57 = vpop.f32.mrb[102].mxu0  ;;  %v13531_v3 = vpack.c.bf16 %v2601_v22, %v2598_v9 }
 0x470   :  { %17419 = vst [vmem:[#allocation73_spill] sm:$0xff] %v13529_v58  ;;  %v13533_v63 = vpack.c.bf16 %v2427_v57, %v2423_v51  ;;  %v2429_v1 = vpop.f32.mrb[103].mxu0  ;;  %4042 = vrot.lane.b32.xlu1 %v13359_v41, %s11929_s18 }
 0x471   :  { %17420 = vst [vmem:[#allocation74_spill] sm:$0xff] %v13531_v3  ;;  %v13537_v19 = vpack.c.bf16 %v2429_v1, %v2425_v27 }
 0x472   :  { %17421 = vst [vmem:[#allocation75_spill] sm:$0xff] %v13533_v63 }
 0x473   :  { %17422 = vst [vmem:[#allocation76_spill] sm:$0xff] %v13537_v19 }
 0x474   :  { %4246 = vrot.lane.b32.xlu1 %v13285_v46, %s11930_s19  ;;  %v3185_v54 = vpop.permute.xlu0 %3184 }
 0x475   :  { %v2433_v34 = vpop.f32.mrb[104].mxu0  ;;  %10850 = vmatprep.subr.msk.bf16.mxu0 %vm2733_vm2, %v3185_v54  ;;  %v3229_v17 = vsel %vm2733_vm2, %v3185_v54, 0 }
 0x476   :  { %v2435_v9 = vpop.f32.mrb[105].mxu0  ;;  %10283 = vmatpush3.bf16.xpose.msra.mxu0 %v3229_v17 }
 0x477   :  { %v2437_v51 = vpop.f32.mrb[106].mxu0 }
 0x478   :  { %v13543_v23 = vpack.c.bf16 %v2437_v51, %v2433_v34  ;;  %v2439_v22 = vpop.f32.mrb[107].mxu0  ;;  %4248 = vrot.lane.b32.xlu1 %v13301_v11, %s11930_s19 }
 0x479   :  { %v13547_v1 = vpack.c.bf16 %v2439_v22, %v2435_v9 }
 0x47a   :  { %17423 = vst [vmem:[#allocation77_spill] sm:$0xff] %v13543_v23 }
 0x47b   :  { %17424 = vst [vmem:[#allocation78_spill] sm:$0xff] %v13547_v1 }
 0x47c   :  { %v3187_v27 = vpop.permute.xlu1 %3186 }
 0x47d   :  { %v2443_v57 = vpop.f32.mrb[108].mxu0  ;;  %10851 = vmatprep.subr.msk.bf16.mxu0 %vm2733_vm2, %v3187_v27  ;;  %v3232_v46 = vsel %vm2733_vm2, %v3187_v27, 0 }
 0x47e   :  { %v2445_v53 = vpop.f32.mrb[109].mxu0  ;;  %10285 = vmatpush3.bf16.xpose.msra.mxu0 %v3232_v46 }
 0x47f   :  { %v2447_v54 = vpop.f32.mrb[110].mxu0 }
 0x480   :  { %v13551_v40 = vpack.c.bf16 %v2447_v54, %v2443_v57  ;;  %v2449_v17 = vpop.f32.mrb[111].mxu0 }
 0x481   :  { %v13553_v34 = vpack.c.bf16 %v2449_v17, %v2445_v53 }
 0x482   :  { %17425 = vst [vmem:[#allocation79_spill] sm:$0xff] %v13551_v40 }
 0x483   :  { %17426 = vst [vmem:[#allocation80_spill] sm:$0xff] %v13553_v34 }
 0x486   :  { %v3189_v51 = vpop.permute.xlu0 %3188 }
 0x487   :  { %10852 = vmatprep.subr.msk.bf16.mxu0 %vm2733_vm2, %v3189_v51  ;;  %v3235_v11 = vsel %vm2733_vm2, %v3189_v51, 0 }
 0x488   :  { %10287 = vmatpush3.bf16.xpose.msra.mxu0 %v3235_v11 }
 0x48a   :  { %v3153_v9 = vpop.permute.xlu0 %3152 }
 0x48b   :  { %10290 = vmatprep.mubr.msk.bf16.mxu0 %vm2733_vm2, %v3153_v9 }
 0x48e   :  { %v3155_v22 = vpop.permute.xlu0 %3154  ;;  %v3191_v30 = vpop.permute.xlu1 %3190 }
 0x48f   :  { %10853 = vmatprep.subr.msk.bf16.mxu0 %vm2733_vm2, %v3191_v30  ;;  %v3238_v27 = vsel %vm2733_vm2, %v3191_v30, 0 }
 0x490   :  { %10289 = vmatpush3.bf16.xpose.msra.mxu0 %v3238_v27 }
 0x492   :  { %v3720_v57 = vpop.permute.xlu0 %3719  ;;  %v3716_v46 = vpop.permute.xlu1 %3715 }
 0x493   :  { %10854 = vmatprep.subr.msk.bf16.mxu0 %vm2733_vm2, %v3716_v46  ;;  %v3756_v17 = vsel %vm2733_vm2, %v3716_v46, 0 }
 0x496   :  { %v3724_v53 = vpop.permute.xlu0 %3723  ;;  %v3718_v54 = vpop.permute.xlu1 %3717 }
 0x497   :  { %10291 = vmatmul.mubr.msk.bf16.vlgmr.msra.gmra.mrb[112].mxu0 %vm2733_vm2, %v3155_v22  ;;  %v3759_v30 = vsel %vm2733_vm2, %v3718_v54, 0 }
 0x498   :  { %10339 = vmatpush3.bf16.xpose.msra.mxu0 %v3756_v17  ;;  %v3762_v17 = vsel %vm2733_vm2, %v3720_v57, 0 }
 0x499   :  { %10855 = vmatprep.subr.msk.bf16.mxu0 %vm2733_vm2, %v3718_v54 }
 0x49a   :  { %v3159_v51 = vpop.permute.xlu0 %3158  ;;  %v3722_v11 = vpop.permute.xlu1 %3721 }
 0x49e   :  { %v3161_v9 = vpop.permute.xlu0 %3160  ;;  %v3157_v39 = vpop.permute.xlu1 %3156 }
 0x49f   :  { %10294 = vmatprep.mubr.msk.bf16.mxu0 %vm2733_vm2, %v3157_v39 }
 0x4a0   :  { %10295 = vmatmul.mubr.msk.bf16.gmra.mrb[116].mxu0 %vm2733_vm2, %v3159_v51 }
 0x4a1   :  { %10341 = vmatpush3.bf16.xpose.msra.mxu0 %v3759_v30  ;;  %10298 = vmatprep.mubr.msk.bf16.mxu0 %vm2733_vm2, %v3161_v9  ;;  %v3765_v9 = vsel %vm2733_vm2, %v3722_v11, 0 }
 0x4a2   :  { %10856 = vmatprep.subr.msk.bf16.mxu0 %vm2733_vm2, %v3720_v57  ;;  %v3726_v22 = vpop.permute.xlu1 %3725  ;;  %v3728_v27 = vpop.permute.xlu0 %3727 }
 0x4a3   :  { %v3771_v32 = vsel %vm2733_vm2, %v3726_v22, 0 }
 0x4a6   :  { %v3163_v46 = vpop.permute.xlu1 %3162  ;;  %v3167_v44 = vpop.permute.xlu0 %3166 }
 0x4a8   :  { %10299 = vmatmul.mubr.msk.bf16.gmra.mrb[120].mxu0 %vm2733_vm2, %v3163_v46  ;;  %v3768_v46 = vsel %vm2733_vm2, %v3724_v53, 0 }
 0x4a9   :  { %10343 = vmatpush3.bf16.xpose.msra.mxu0 %v3762_v17 }
 0x4aa   :  { %10857 = vmatprep.subr.msk.bf16.mxu0 %vm2733_vm2, %v3722_v11  ;;  %v3165_v39 = vpop.permute.xlu1 %3164  ;;  %v3700_v51 = vpop.permute.xlu0 %3699  ;;  %v3774_v11 = vsel %vm2733_vm2, %v3728_v27, 0 }
 0x4ab   :  { %10302 = vmatprep.mubr.msk.bf16.mxu0 %vm2733_vm2, %v3165_v39 }
 0x4ae   :  { %v3730_v54 = vpop.permute.xlu1 %3729 }
 0x4b0   :  { %10303 = vmatmul.mubr.msk.bf16.gmra.mrb[124].mxu0 %vm2733_vm2, %v3167_v44 }
 0x4b1   :  { %10345 = vmatpush3.bf16.xpose.msra.mxu0 %v3765_v9  ;;  %10354 = vmatprep.mubr.msk.bf16.mxu0 %vm2733_vm2, %v3700_v51  ;;  %v3704_v51 = vpop.permute.xlu0 %3703 }
 0x4b2   :  { %10858 = vmatprep.subr.msk.bf16.mxu0 %vm2733_vm2, %v3724_v53  ;;  %v3702_v30 = vpop.permute.xlu1 %3701  ;;  %v3777_v53 = vsel %vm2733_vm2, %v3730_v54, 0 }
 0x4b6   :  { %v3706_v57 = vpop.permute.xlu1 %3705 }
 0x4b9   :  { %10347 = vmatpush3.bf16.xpose.msra.mxu0 %v3768_v46 }
 0x4ba   :  { %10859 = vmatprep.subr.msk.bf16.mxu0 %vm2733_vm2, %v3726_v22  ;;  %v3710_v17 = vpop.permute.xlu1 %3709 }
 0x4be   :  { %v3714_v39 = vpop.permute.xlu1 %3713 }
 0x4c1   :  { %10349 = vmatpush3.bf16.xpose.msra.mxu0 %v3771_v32  ;;  %v3708_v32 = vpop.permute.xlu0 %3707 }
 0x4c2   :  { %10860 = vmatprep.subr.msk.bf16.mxu0 %vm2733_vm2, %v3728_v27  ;;  %v13581_v44 = vpop.permute.xlu1 %3497 }
 0x4c3   :  { %10306 = vmatprep.subr.bf16.mxu1 %v13581_v44 }
 0x4c5   :  { %v3712_v22 = vpop.permute.xlu0 %3711 }
 0x4c6   :  { %v13642_v25 = vpop.permute.xlu1 %3503 }
 0x4c9   :  { %10351 = vmatpush3.bf16.xpose.msra.mxu0 %v3774_v11  ;;  %v13648_v58 = vpop.permute.xlu0 %3499 }
 0x4ca   :  { %10861 = vmatprep.subr.msk.bf16.mxu0 %vm2733_vm2, %v3730_v54  ;;  %v13644_v24 = vpop.permute.xlu1 %3507 }
 0x4cd   :  { %v13652_v5 = vpop.permute.xlu0 %3501 }
 0x4ce   :  { %v13646_v59 = vpop.permute.xlu1 %3511 }
 0x4d1   :  { %10353 = vmatpush3.bf16.xpose.msra.mxu0 %v3777_v53  ;;  %v13656_v6 = vpop.permute.xlu0 %3505 }
 0x4d2   :  { %v13650_v3 = vpop.permute.xlu1 %4030 }
 0x4d3   :  { %17427 = vst [vmem:[#allocation81_spill] sm:$0xff] %v13650_v3 }
 0x4d5   :  { %v13671_v15 = vpop.permute.xlu0 %3509 }
 0x4d6   :  { %v13654_v42 = vpop.permute.xlu1 %4034 }
 0x4d7   :  { %17428 = vst [vmem:[#allocation82_spill] sm:$0xff] %v13654_v42 }
 0x4d8   :  { %10355 = vmatmul.mubr.msk.bf16.vlgmr.msra.gmra.mrb[128].mxu0 %vm2733_vm2, %v3702_v30 }
 0x4d9   :  { %10358 = vmatprep.mubr.msk.bf16.mxu0 %vm2733_vm2, %v3704_v51  ;;  %v13683_v19 = vpop.permute.xlu0 %4028 }
 0x4da   :  { %v13665_v63 = vpop.permute.xlu1 %4036 }
 0x4db   :  { %17429 = vst [vmem:[#allocation83_spill] sm:$0xff] %v13665_v63 }
 0x4dd   :  { %v13694_v10 = vpop.permute.xlu0 %4032 }
 0x4de   :  { %v13674_v16 = vpop.permute.xlu1 %4038  ;;  %17432 = vst [vmem:[#allocation86_spill] sm:$0xff] %v13694_v10 }
 0x4df   :  { %17430 = vst [vmem:[#allocation84_spill] sm:$0xff] %v13674_v16 }
 0x4e0   :  { %10359 = vmatmul.mubr.msk.bf16.gmra.mrb[132].mxu0 %vm2733_vm2, %v3706_v57 }
 0x4e1   :  { %10362 = vmatprep.mubr.msk.bf16.mxu0 %vm2733_vm2, %v3708_v32  ;;  %v13707_v37 = vpop.permute.xlu0 %4040 }
 0x4e2   :  { %v13689_v18 = vpop.permute.xlu1 %4042  ;;  %17434 = vst [vmem:[#allocation88_spill] sm:$0xff] %v13707_v37 }
 0x4e3   :  { %17431 = vst [vmem:[#allocation85_spill] sm:$0xff] %v13689_v18 }
 0x4e6   :  { %v13704_v45 = vpop.permute.xlu1 %4246 }
 0x4e7   :  { %17433 = vst [vmem:[#allocation87_spill] sm:$0xff] %v13704_v45 }
 0x4e8   :  { %10363 = vmatmul.mubr.msk.bf16.gmra.mrb[136].mxu0 %vm2733_vm2, %v3710_v17 }
 0x4e9   :  { %10366 = vmatprep.mubr.msk.bf16.mxu0 %vm2733_vm2, %v3712_v22 }
 0x4ea   :  { %v13715_v12 = vpop.permute.xlu1 %4248 }
 0x4eb   :  { %17435 = vst [vmem:[#allocation89_spill] sm:$0xff] %v13715_v12 }
 0x4f0   :  { %10367 = vmatmul.mubr.msk.bf16.gmra.mrb[140].mxu0 %vm2733_vm2, %v3714_v39 }
 0x4f8   :  { %v13594_v27 = vpop.f32.mrb[112].mxu1 }
 0x4f9   :  { %2883 = vmax.xlane.f32.xlu0 %v13594_v27  ;;  %v13597_v54 = vpop.f32.mrb[113].mxu1 }
 0x4fa   :  { %v13599_v9 = vpop.f32.mrb[114].mxu1 }
 0x4fb   :  { %v13601_v30 = vpop.f32.mrb[115].mxu1 }
 0x4fc   :  { %2881 = vmax.xlane.f32.xlu1 %v13601_v30 }
 0x4fd   :  { %2879 = vmax.xlane.f32.xlu0 %v13597_v54 }
 0x500   :  { %v13605_v57 = vpop.f32.mrb[116].mxu1 }
 0x501   :  { %2885 = vmax.xlane.f32.xlu0 %v13599_v9  ;;  %2891 = vmax.xlane.f32.xlu1 %v13605_v57  ;;  %v13609_v46 = vpop.f32.mrb[117].mxu1 }
 0x502   :  { %v13611_v17 = vpop.f32.mrb[118].mxu1 }
 0x503   :  { %v13613_v39 = vpop.f32.mrb[119].mxu1 }
 0x505   :  { %2887 = vmax.xlane.f32.xlu1 %v13609_v46  ;;  %2893 = vmax.xlane.f32.xlu0 %v13611_v17 }
 0x508   :  { %v13617_v11 = vpop.f32.mrb[120].mxu1 }
 0x509   :  { %2889 = vmax.xlane.f32.xlu0 %v13613_v39  ;;  %2899 = vmax.xlane.f32.xlu1 %v13617_v11  ;;  %v13621_v53 = vpop.f32.mrb[121].mxu1 }
 0x50a   :  { %v13623_v51 = vpop.f32.mrb[122].mxu1 }
 0x50b   :  { %v13625_v32 = vpop.f32.mrb[123].mxu1 }
 0x50d   :  { %2895 = vmax.xlane.f32.xlu1 %v13621_v53  ;;  %2901 = vmax.xlane.f32.xlu0 %v13623_v51 }
 0x510   :  { %v13629_v22 = vpop.f32.mrb[124].mxu1 }
 0x511   :  { %2897 = vmax.xlane.f32.xlu0 %v13625_v32  ;;  %2907 = vmax.xlane.f32.xlu1 %v13629_v22  ;;  %v13633_v47 = vpop.f32.mrb[125].mxu1 }
 0x512   :  { %v13635_v7 = vpop.f32.mrb[126].mxu1 }
 0x513   :  { %v13637_v60 = vpop.f32.mrb[127].mxu1 }
 0x515   :  { %2903 = vmax.xlane.f32.xlu1 %v13633_v47  ;;  %2909 = vmax.xlane.f32.xlu0 %v13635_v7 }
 0x519   :  { %2905 = vmax.xlane.f32.xlu0 %v13637_v60 }
 0x56a   :  { %v13658_v52 = vpop.f32.mrb[112].mxu0 }
 0x56b   :  { %3341 = vmax.xlane.f32.xlu1 %v13658_v52  ;;  %v13661_v40 = vpop.f32.mrb[113].mxu0 }
 0x56c   :  { %v13663_v23 = vpop.f32.mrb[114].mxu0 }
 0x56d   :  { %3343 = vmax.xlane.f32.xlu0 %v13663_v23  ;;  %v13668_v48 = vpop.f32.mrb[115].mxu0 }
 0x56f   :  { %3337 = vmax.xlane.f32.xlu1 %v13661_v40 }
 0x571   :  { %3339 = vmax.xlane.f32.xlu0 %v13668_v48 }
 0x573   :  { %v13676_v55 = vpop.f32.mrb[116].mxu0 }
 0x574   :  { %3349 = vmax.xlane.f32.xlu1 %v13676_v55  ;;  %v13679_v34 = vpop.f32.mrb[117].mxu0 }
 0x575   :  { %v13681_v1 = vpop.f32.mrb[118].mxu0 }
 0x576   :  { %3351 = vmax.xlane.f32.xlu0 %v13681_v1  ;;  %v13686_v14 = vpop.f32.mrb[119].mxu0 }
 0x578   :  { %3345 = vmax.xlane.f32.xlu1 %v13679_v34 }
 0x57a   :  { %3347 = vmax.xlane.f32.xlu0 %v13686_v14 }
 0x57b   :  { %v13692_v26 = vpop.f32.mrb[120].mxu0 }
 0x57c   :  { %3357 = vmax.xlane.f32.xlu1 %v13692_v26  ;;  %v13697_v31 = vpop.f32.mrb[121].mxu0 }
 0x57d   :  { %v13699_v29 = vpop.f32.mrb[122].mxu0 }
 0x57e   :  { %3359 = vmax.xlane.f32.xlu0 %v13699_v29  ;;  %v13702_v41 = vpop.f32.mrb[123].mxu0 }
 0x580   :  { %3353 = vmax.xlane.f32.xlu1 %v13697_v31 }
 0x582   :  { %3355 = vmax.xlane.f32.xlu0 %v13702_v41 }
 0x583   :  { %v13710_v0 = vpop.f32.mrb[124].mxu0 }
 0x584   :  { %3365 = vmax.xlane.f32.xlu1 %v13710_v0  ;;  %v13713_v62 = vpop.f32.mrb[125].mxu0 }
 0x585   :  { %v13717_v21 = vpop.f32.mrb[126].mxu0 }
 0x586   :  { %v2884_v38 = vpop.xlane.xlu0 %2883  ;;  %3367 = vmax.xlane.f32.xlu0 %v13717_v21  ;;  %v13720_v8 = vpop.f32.mrb[127].mxu0 }
 0x587   :  { %v2913_v4 = vsub.f32 %v13594_v27, %v2884_v38 }
 0x588   :  { %3361 = vmax.xlane.f32.xlu1 %v13713_v62 }
 0x589   :  { %v2931_v49 = vmul.f32 1.442695, %v2913_v4  ;;  %v2882_v43 = vpop.xlane.xlu1 %2881 }
 0x58a   :  { %v2880_v2 = vpop.xlane.xlu0 %2879  ;;  %3363 = vmax.xlane.f32.xlu0 %v13720_v8  ;;  %v2912_v50 = vsub.f32 %v13601_v30, %v2882_v43 }
 0x58b   :  { %11283 = vpow2.f32 %v2931_v49  ;;  %v2911_v35 = vsub.f32 %v13597_v54, %v2880_v2 }
 0x58c   :  { %v2929_v4 = vmul.f32 1.442695, %v2912_v50 }
 0x58d   :  { %v2927_v12 = vmul.f32 1.442695, %v2911_v35 }
 0x58e   :  { %v2886_v20 = vpop.xlane.xlu0 %2885  ;;  %v2892_v45 = vpop.xlane.xlu1 %2891 }
 0x58f   :  { %11285 = vpow2.f32 %v2927_v12  ;;  %v2914_v13 = vsub.f32 %v13599_v9, %v2886_v20  ;;  %v2917_v38 = vsub.f32 %v13605_v57, %v2892_v45 }
 0x591   :  { %v2933_v27 = vmul.f32 1.442695, %v2914_v13  ;;  %v2939_v18 = vmul.f32 1.442695, %v2917_v38 }
 0x592   :  { %v2888_v36 = vpop.xlane.xlu1 %2887  ;;  %v2894_v37 = vpop.xlane.xlu0 %2893 }
 0x593   :  { %11287 = vpow2.f32 %v2933_v27  ;;  %v2915_v49 = vsub.f32 %v13609_v46, %v2888_v36  ;;  %v2918_v2 = vsub.f32 %v13611_v17, %v2894_v37 }
 0x594   :  { %11289 = vpow2.f32 %v2939_v18 }
 0x595   :  { %v13731_v35 = vpop.eup %11283  ;;  %v2935_v43 = vmul.f32 1.442695, %v2915_v49  ;;  %11291 = vpow2.f32 %v2929_v4  ;;  %v2941_v45 = vmul.f32 1.442695, %v2918_v2 }
 0x596   :  { %v2890_v12 = vpop.xlane.xlu0 %2889  ;;  %v2900_v54 = vpop.xlane.xlu1 %2899  ;;  %2963 = vadd.xlane.f32.xlu1 %v13731_v35 }
 0x597   :  { %11293 = vpow2.f32 %v2935_v43  ;;  %v2916_v13 = vsub.f32 %v13613_v39, %v2890_v12  ;;  %v2921_v20 = vsub.f32 %v13617_v11, %v2900_v54 }
 0x598   :  { %11295 = vpow2.f32 %v2941_v45 }
 0x599   :  { %v13736_v50 = vpop.eup %11285  ;;  %v2947_v36 = vmul.f32 1.442695, %v2921_v20  ;;  %v2937_v9 = vmul.f32 1.442695, %v2916_v13 }
 0x59a   :  { %v2896_v37 = vpop.xlane.xlu1 %2895  ;;  %v2902_v18 = vpop.xlane.xlu0 %2901  ;;  %2959 = vadd.xlane.f32.xlu1 %v13736_v50 }
 0x59b   :  { %v2919_v30 = vsub.f32 %v13621_v53, %v2896_v37  ;;  %v2922_v57 = vsub.f32 %v13623_v51, %v2902_v18  ;;  %11297 = vpow2.f32 %v2947_v36 }
 0x59c   :  { %11299 = vpow2.f32 %v2937_v9 }
 0x59d   :  { %v13741_v46 = vpop.eup %11287  ;;  %v2943_v17 = vmul.f32 1.442695, %v2919_v30  ;;  %v2949_v38 = vmul.f32 1.442695, %v2922_v57 }
 0x59e   :  { %v13743_v39 = vpop.eup %11289  ;;  %v2898_v11 = vpop.xlane.xlu0 %2897  ;;  %2965 = vadd.xlane.f32.xlu0 %v13741_v46 }
 0x59f   :  { %11301 = vpow2.f32 %v2943_v17  ;;  %v2920_v27 = vsub.f32 %v13625_v32, %v2898_v11  ;;  %2971 = vadd.xlane.f32.xlu1 %v13743_v39  ;;  %v13748_v4 = vpop.eup %11291  ;;  %v2908_v42 = vpop.xlane.xlu1 %2907 }
 0x5a0   :  { %11303 = vpow2.f32 %v2949_v38  ;;  %v2925_v10 = vsub.f32 %v13629_v22, %v2908_v42 }
 0x5a1   :  { %v13750_v53 = vpop.eup %11293  ;;  %v2945_v51 = vmul.f32 1.442695, %v2920_v27 }
 0x5a2   :  { %2961 = vadd.xlane.f32.xlu0 %v13748_v4  ;;  %v13754_v49 = vpop.eup %11295  ;;  %v2910_v43 = vpop.xlane.xlu0 %2909 }
 0x5a3   :  { %2967 = vadd.xlane.f32.xlu1 %v13750_v53  ;;  %11305 = vpow2.f32 %v2945_v51  ;;  %v2926_v54 = vsub.f32 %v13635_v7, %v2910_v43  ;;  %v2904_v3 = vpop.xlane.xlu1 %2903 }
 0x5a4   :  { %v2923_v56 = vsub.f32 %v13633_v47, %v2904_v3 }
 0x5a5   :  { %v13756_v2 = vpop.eup %11297  ;;  %v2957_v18 = vmul.f32 1.442695, %v2926_v54 }
 0x5a6   :  { %2973 = vadd.xlane.f32.xlu0 %v13754_v49  ;;  %v13760_v32 = vpop.eup %11299  ;;  %v2906_v13 = vpop.xlane.xlu0 %2905 }
 0x5a7   :  { %2979 = vadd.xlane.f32.xlu1 %v13756_v2  ;;  %v2924_v30 = vsub.f32 %v13637_v60, %v2906_v13  ;;  %11307 = vpow2.f32 %v2957_v18 }
 0x5a9   :  { %v13762_v12 = vpop.eup %11301  ;;  %v2953_v57 = vmul.f32 1.442695, %v2924_v30 }
 0x5aa   :  { %2969 = vadd.xlane.f32.xlu0 %v13760_v32  ;;  %v13771_v36 = vpop.eup %11303 }
 0x5ab   :  { %2975 = vadd.xlane.f32.xlu1 %v13762_v12  ;;  %v13767_v45 = vpop.f32.mrb[128].mxu0  ;;  %11309 = vpow2.f32 %v2953_v57 }
 0x5ac   :  { %v13769_v20 = vpop.f32.mrb[129].mxu0 }
 0x5ad   :  { %v13773_v9 = vpop.f32.mrb[130].mxu0  ;;  %v13780_v7 = vpop.eup %11305 }
 0x5ae   :  { %2981 = vadd.xlane.f32.xlu0 %v13771_v36  ;;  %v13776_v37 = vpop.f32.mrb[131].mxu0 }
 0x5af   :  { %3880 = vmax.xlane.f32.xlu1 %v13767_v45 }
 0x5b1   :  { %v13798_v43 = vpop.eup %11307 }
 0x5b2   :  { %2977 = vadd.xlane.f32.xlu0 %v13780_v7  ;;  %17437 = vst [vmem:[#allocation91_spill] sm:$0xff] %v13798_v43 }
 0x5b3   :  { %3876 = vmax.xlane.f32.xlu1 %v13769_v20  ;;  %v13784_v17 = vpop.f32.mrb[132].mxu0 }
 0x5b4   :  { %v13786_v11 = vpop.f32.mrb[133].mxu0 }
 0x5b5   :  { %v13788_v38 = vpop.f32.mrb[134].mxu0  ;;  %v13805_v18 = vpop.eup %11309 }
 0x5b6   :  { %3882 = vmax.xlane.f32.xlu0 %v13773_v9  ;;  %v13791_v27 = vpop.f32.mrb[135].mxu0  ;;  %17440 = vst [vmem:[#allocation94_spill] sm:$0xff] %v13805_v18 }
 0x5ba   :  { %3878 = vmax.xlane.f32.xlu0 %v13776_v37 }
 0x5bb   :  { %v13794_v60 = vpop.f32.mrb[136].mxu0 }
 0x5bc   :  { %v13796_v51 = vpop.f32.mrb[137].mxu0 }
 0x5bd   :  { %17436 = vst [vmem:[#allocation90_spill] sm:$0xff] %v13796_v51  ;;  %v13800_v54 = vpop.f32.mrb[138].mxu0 }
 0x5be   :  { %17438 = vst [vmem:[#allocation92_spill] sm:$0xff] %v13800_v54  ;;  %2989 = vadd.xlane.f32.xlu0 %v13798_v43  ;;  %v13803_v13 = vpop.f32.mrb[139].mxu0  ;;  %v2951_v43 = vmul.f32 1.442695, %v2923_v56 }
 0x5bf   :  { %17439 = vst [vmem:[#allocation93_spill] sm:$0xff] %v13803_v13 }
 0x5c2   :  { %2985 = vadd.xlane.f32.xlu0 %v13805_v18 }
 0x5c3   :  { %v13808_v30 = vpop.f32.mrb[140].mxu0 }
 0x5c4   :  { %4250 = vrot.lane.b32.xlu1 %v13315_v33, %s11930_s19  ;;  %v13812_v57 = vpop.f32.mrb[141].mxu0  ;;  %v2955_v33 = vmul.f32 1.442695, %v2925_v10 }
 0x5c5   :  { %17441 = vst [vmem:[#allocation95_spill] sm:$0xff] %v13812_v57  ;;  %v13814_v16 = vpop.f32.mrb[142].mxu0 }
 0x5c6   :  { %3890 = vmax.xlane.f32.xlu0 %v13788_v38  ;;  %v13817_v63 = vpop.f32.mrb[143].mxu0  ;;  %11311 = vpow2.f32 %v2955_v33 }
 0x5c7   :  { %17442 = vst [vmem:[#allocation96_spill] sm:$0xff] %v13817_v63  ;;  %11313 = vpow2.f32 %v2951_v43 }
 0x5ca   :  { %3886 = vmax.xlane.f32.xlu0 %v13791_v27 }
 0x5ce   :  { %3896 = vmax.xlane.f32.xlu0 %v13794_v60 }
 0x5d0   :  { %v13827_v18 = vpop.eup %11311 }
 0x5d2   :  { %3892 = vmax.xlane.f32.xlu0 %v13796_v51  ;;  %v13830_v51 = vpop.eup %11313 }
 0x5d6   :  { %3898 = vmax.xlane.f32.xlu0 %v13800_v54 }
 0x5da   :  { %3894 = vmax.xlane.f32.xlu0 %v13803_v13 }
 0x5de   :  { %3902 = vmax.xlane.f32.xlu0 %v13817_v63 }
 0x5e8   :  { %2987 = vadd.xlane.f32.xlu1 %v13827_v18 }
 0x5ec   :  { %2983 = vadd.xlane.f32.xlu1 %v13830_v51 }
 0x5f0   :  { %3888 = vmax.xlane.f32.xlu1 %v13784_v17 }
 0x5f4   :  { %3884 = vmax.xlane.f32.xlu1 %v13786_v11 }
 0x5f8   :  { %3904 = vmax.xlane.f32.xlu1 %v13808_v30  ;;  %v3342_v47 = vpop.xlane.xlu1 %3341 }
 0x5f9   :  { %v3371_v56 = vsub.f32 %v13658_v52, %v3342_v47 }
 0x5fa   :  { %v3344_v10 = vpop.xlane.xlu0 %3343 }
 0x5fb   :  { %v3389_v42 = vmul.f32 1.442695, %v3371_v56  ;;  %v3372_v3 = vsub.f32 %v13663_v23, %v3344_v10 }
 0x5fc   :  { %3900 = vmax.xlane.f32.xlu1 %v13812_v57  ;;  %v3338_v22 = vpop.xlane.xlu1 %3337 }
 0x5fd   :  { %11315 = vpow2.f32 %v3389_v42  ;;  %v3391_v43 = vmul.f32 1.442695, %v3372_v3  ;;  %v3369_v33 = vsub.f32 %v13661_v40, %v3338_v22 }
 0x5fe   :  { %v3340_v63 = vpop.xlane.xlu0 %3339 }
 0x5ff   :  { %v3385_v13 = vmul.f32 1.442695, %v3369_v33  ;;  %v3370_v54 = vsub.f32 %v13668_v48, %v3340_v63  ;;  %11317 = vpow2.f32 %v3391_v43 }
 0x600   :  { %3906 = vmax.xlane.f32.xlu1 %v13814_v16 }
 0x601   :  { %11319 = vpow2.f32 %v3385_v13  ;;  %v3387_v52 = vmul.f32 1.442695, %v3370_v54  ;;  %v3350_v47 = vpop.xlane.xlu1 %3349 }
 0x602   :  { %v3375_v56 = vsub.f32 %v13676_v55, %v3350_v47 }
 0x603   :  { %v3352_v23 = vpop.xlane.xlu0 %3351  ;;  %11321 = vpow2.f32 %v3387_v52 }
 0x604   :  { %v3397_v10 = vmul.f32 1.442695, %v3375_v56  ;;  %v3376_v42 = vsub.f32 %v13681_v1, %v3352_v23 }
 0x605   :  { %v3346_v57 = vpop.xlane.xlu1 %3345 }
 0x606   :  { %v3373_v40 = vsub.f32 %v13679_v34, %v3346_v57  ;;  %11323 = vpow2.f32 %v3397_v10  ;;  %v3399_v55 = vmul.f32 1.442695, %v3376_v42 }
 0x607   :  { %v13845_v3 = vpop.eup %11315  ;;  %v3348_v22 = vpop.xlane.xlu0 %3347 }
 0x608   :  { %v3393_v48 = vmul.f32 1.442695, %v3373_v40  ;;  %v3374_v63 = vsub.f32 %v13686_v14, %v3348_v22  ;;  %3421 = vadd.xlane.f32.xlu0 %v13845_v3 }
 0x609   :  { %v3358_v54 = vpop.xlane.xlu1 %3357  ;;  %v13849_v13 = vpop.eup %11317 }
 0x60a   :  { %11325 = vpow2.f32 %v3393_v48  ;;  %v3395_v43 = vmul.f32 1.442695, %v3374_v63  ;;  %v3379_v33 = vsub.f32 %v13692_v26, %v3358_v54 }
 0x60b   :  { %v13852_v1 = vpop.eup %11319  ;;  %v3360_v34 = vpop.xlane.xlu0 %3359 }
 0x60c   :  { %11327 = vpow2.f32 %v3395_v43  ;;  %3417 = vadd.xlane.f32.xlu1 %v13852_v1  ;;  %3423 = vadd.xlane.f32.xlu0 %v13849_v13  ;;  %v3405_v14 = vmul.f32 1.442695, %v3379_v33  ;;  %v3380_v52 = vsub.f32 %v13699_v29, %v3360_v34 }
 0x60d   :  { %v3354_v57 = vpop.xlane.xlu1 %3353  ;;  %11329 = vpow2.f32 %v3399_v55  ;;  %v13858_v56 = vpop.eup %11321 }
 0x60e   :  { %v3377_v47 = vsub.f32 %v13697_v31, %v3354_v57  ;;  %11331 = vpow2.f32 %v3405_v14  ;;  %v3407_v40 = vmul.f32 1.442695, %v3380_v52 }
 0x60f   :  { %v3356_v23 = vpop.xlane.xlu0 %3355 }
 0x610   :  { %v3401_v10 = vmul.f32 1.442695, %v3377_v47  ;;  %v3378_v26 = vsub.f32 %v13702_v41, %v3356_v23  ;;  %3419 = vadd.xlane.f32.xlu0 %v13858_v56  ;;  %v13863_v63 = vpop.eup %11323 }
 0x611   :  { %v3366_v42 = vpop.xlane.xlu1 %3365 }
 0x612   :  { %11333 = vpow2.f32 %v3401_v10  ;;  %v3403_v22 = vmul.f32 1.442695, %v3378_v26  ;;  %v3383_v48 = vsub.f32 %v13710_v0, %v3366_v42 }
 0x613   :  { %v3368_v29 = vpop.xlane.xlu0 %3367 }
 0x614   :  { %v13865_v54 = vpop.eup %11325  ;;  %11335 = vpow2.f32 %v3403_v22  ;;  %3429 = vadd.xlane.f32.xlu0 %v13863_v63  ;;  %v3413_v31 = vmul.f32 1.442695, %v3383_v48  ;;  %v3384_v43 = vsub.f32 %v13717_v21, %v3368_v29 }
 0x615   :  { %v3362_v55 = vpop.xlane.xlu1 %3361  ;;  %3425 = vadd.xlane.f32.xlu1 %v13865_v54  ;;  %11337 = vpow2.f32 %v3407_v40 }
 0x616   :  { %v13869_v41 = vpop.eup %11327  ;;  %v3381_v33 = vsub.f32 %v13713_v62, %v3362_v55  ;;  %11339 = vpow2.f32 %v3413_v31  ;;  %v3415_v52 = vmul.f32 1.442695, %v3384_v43 }
 0x617   :  { %v3364_v0 = vpop.xlane.xlu0 %3363  ;;  %v13873_v34 = vpop.eup %11329 }
 0x618   :  { %v3409_v14 = vmul.f32 1.442695, %v3381_v33  ;;  %v3382_v57 = vsub.f32 %v13720_v8, %v3364_v0  ;;  %3427 = vadd.xlane.f32.xlu0 %v13869_v41  ;;  %v13878_v23 = vpop.eup %11331 }
 0x619   :  { %3431 = vadd.xlane.f32.xlu1 %v13873_v34  ;;  %17443 = vst [vmem:[#allocation97_spill] sm:$0xff] %v13878_v23 }
 0x61a   :  { %11341 = vpow2.f32 %v3409_v14  ;;  %v3411_v47 = vmul.f32 1.442695, %v3382_v57 }
 0x61c   :  { %v13880_v10 = vpop.eup %11333  ;;  %11343 = vpow2.f32 %v3411_v47  ;;  %3437 = vadd.xlane.f32.xlu0 %v13878_v23 }
 0x61d   :  { %3433 = vadd.xlane.f32.xlu1 %v13880_v10  ;;  %11345 = vpow2.f32 %v3415_v52 }
 0x61e   :  { %v13884_v21 = vpop.eup %11335 }
 0x61f   :  { %v13886_v62 = vpop.eup %11337 }
 0x620   :  { %17444 = vst [vmem:[#allocation98_spill] sm:$0xff] %v13886_v62  ;;  %3435 = vadd.xlane.f32.xlu0 %v13884_v21  ;;  %v13890_v8 = vpop.eup %11339 }
 0x621   :  { %3439 = vadd.xlane.f32.xlu1 %v13886_v62  ;;  %17445 = vst [vmem:[#allocation99_spill] sm:$0xff] %v13890_v8 }
 0x623   :  { %v2964_v26 = vpop.xlane.xlu1 %2963 }
 0x624   :  { %v13892_v42 = vpop.eup %11341  ;;  %3445 = vadd.xlane.f32.xlu0 %v13890_v8 }
 0x625   :  { %17446 = vst [vmem:[#allocation100_spill] sm:$0xff] %v13892_v42  ;;  %3441 = vadd.xlane.f32.xlu1 %v13892_v42 }
 0x626   :  { %v13896_v40 = vpop.eup %11343 }
 0x627   :  { %17447 = vst [vmem:[#allocation101_spill] sm:$0xff] %v13896_v40  ;;  %v2960_v22 = vpop.xlane.xlu1 %2959  ;;  %v13898_v48 = vpop.eup %11345 }
 0x628   :  { %17448 = vst [vmem:[#allocation102_spill] sm:$0xff] %v13898_v48  ;;  %3443 = vadd.xlane.f32.xlu0 %v13896_v40 }
 0x629   :  { %3447 = vadd.xlane.f32.xlu1 %v13898_v48 }
 0x62b   :  { %v2966_v29 = vpop.xlane.xlu0 %2965 }
 0x62c   :  { %v2972_v31 = vpop.xlane.xlu1 %2971  ;;  %11347 = vrcp.f32 %v2966_v29 }
 0x62d   :  { %11349 = vrcp.f32 %v2960_v22 }
 0x62e   :  { %11351 = vrcp.f32 %v2964_v26 }
 0x62f   :  { %v2962_v55 = vpop.xlane.xlu0 %2961 }
 0x630   :  { %v2968_v43 = vpop.xlane.xlu1 %2967  ;;  %11353 = vrcp.f32 %v2962_v55 }
 0x633   :  { %v2974_v33 = vpop.xlane.xlu0 %2973 }
 0x634   :  { %v2980_v0 = vpop.xlane.xlu1 %2979  ;;  %11355 = vrcp.f32 %v2974_v33 }
 0x635   :  { %11357 = vrcp.f32 %v2968_v43 }
 0x636   :  { %v11348_v14 = vpop.eup %11347  ;;  %11359 = vrcp.f32 %v2972_v31 }
 0x637   :  { %v2970_v57 = vpop.xlane.xlu0 %2969  ;;  %v11350_v52 = vpop.eup %11349  ;;  %v3010_v40 = vmul.f32 %v11348_v14, %v13741_v46 }
 0x638   :  { %v2976_v47 = vpop.xlane.xlu1 %2975  ;;  %11361 = vrcp.f32 %v2970_v57  ;;  %v11352_v8 = vpop.eup %11351  ;;  %v3007_v26 = vmul.f32 %v11350_v52, %v13736_v50 }
 0x639   :  { %v3009_v55 = vmul.f32 %v11352_v8, %v13731_v35 }
 0x63a   :  { %v11354_v48 = vpop.eup %11353 }
 0x63b   :  { %v2982_v29 = vpop.xlane.xlu0 %2981  ;;  %v3008_v22 = vmul.f32 %v11354_v48, %v13748_v4  ;;  %v3024_v33 = vpack.c.bf16 %v3010_v40, %v3009_v55 }
 0x63c   :  { %v3881_v42 = vpop.xlane.xlu1 %3880  ;;  %11363 = vrcp.f32 %v2982_v29 }
 0x63d   :  { %v3910_v43 = vsub.f32 %v13767_v45, %v3881_v42  ;;  %v3023_v31 = vpack.c.bf16 %v3008_v22, %v3007_v26  ;;  %11365 = vrcp.f32 %v2976_v47 }
 0x63e   :  { %v11356_v62 = vpop.eup %11355  ;;  %11367 = vrcp.f32 %v2980_v0 }
 0x63f   :  { %v3928_v57 = vmul.f32 1.442695, %v3910_v43  ;;  %10258 = vmatprep.mubr.bf16.mxu1 %v3023_v31  ;;  %v2978_v23 = vpop.xlane.xlu0 %2977  ;;  %v11358_v46 = vpop.eup %11357  ;;  %v3014_v45 = vmul.f32 %v11356_v62, %v13754_v49 }
 0x640   :  { %11369 = vrcp.f32 %v2978_v23  ;;  %v3877_v14 = vpop.xlane.xlu1 %3876  ;;  %10259 = vmatmul.mubr.bf16.vlgmr.msra.gmra.mrb[128].mxu1 %v3024_v33  ;;  %v11360_v50 = vpop.eup %11359  ;;  %v3011_v40 = vmul.f32 %v11358_v46, %v13750_v53 }
 0x641   :  { %11371 = vpow2.f32 %v3928_v57  ;;  %v3908_v35 = vsub.f32 %v13769_v20, %v3877_v14  ;;  %10307 = vmatpush3.bf16.msra.mxu1 %v13581_v44  ;;  %v3013_v0 = vmul.f32 %v11360_v50, %v13743_v39 }
 0x642   :  { %v11362_v4 = vpop.eup %11361  ;;  %10308 = vmatprep.subr.bf16.mxu1 %v13648_v58 }
 0x643   :  { %v3924_v8 = vmul.f32 1.442695, %v3908_v35  ;;  %v3883_v42 = vpop.xlane.xlu0 %3882  ;;  %v3012_v48 = vmul.f32 %v11362_v4, %v13760_v32  ;;  %v3026_v52 = vpack.c.bf16 %v3014_v45, %v3013_v0 }
 0x644   :  { %v3911_v23 = vsub.f32 %v13773_v9, %v3883_v42 }
 0x645   :  { %11373 = vpow2.f32 %v3924_v8  ;;  %10309 = vmatpush3.bf16.msra.mxu1 %v13648_v58  ;;  %v3025_v20 = vpack.c.bf16 %v3012_v48, %v3011_v40 }
 0x646   :  { %v3930_v44 = vmul.f32 1.442695, %v3911_v23  ;;  %10310 = vmatprep.subr.bf16.mxu1 %v13652_v5  ;;  %v11364_v47 = vpop.eup %11363 }
 0x647   :  { %10262 = vmatprep.mubr.bf16.mxu1 %v3025_v20  ;;  %v3879_v49 = vpop.xlane.xlu0 %3878  ;;  %v11366_v62 = vpop.eup %11365  ;;  %v3018_v58 = vmul.f32 %v11364_v47, %v13771_v36 }
 0x648   :  { %11375 = vpow2.f32 %v3930_v44  ;;  %v3909_v53 = vsub.f32 %v13776_v37, %v3879_v49  ;;  %10263 = vmatmul.mubr.bf16.gmra.mrb[132].mxu1 %v3026_v52  ;;  %v11368_v32 = vpop.eup %11367  ;;  %v3015_v26 = vmul.f32 %v11366_v62, %v13762_v12  ;;  %v17449_v44 = vld [vmem:[#allocation94_spill] sm:$0xff] }
 0x649   :  { %10311 = vmatpush3.bf16.msra.mxu1 %v13652_v5  ;;  %v3017_v37 = vmul.f32 %v11368_v32, %v13756_v2 }
 0x64a   :  { %v11370_v39 = vpop.eup %11369  ;;  %v3926_v9 = vmul.f32 1.442695, %v3909_v53  ;;  %10312 = vmatprep.subr.bf16.mxu1 %v13642_v25  ;;  %v17451_v53 = vld [vmem:[#allocation90_spill] sm:$0xff] }
 0x64b   :  { %v13921_v29 = vpop.eup %11371  ;;  %v3016_v22 = vmul.f32 %v11370_v39, %v13780_v7  ;;  %v3028_v55 = vpack.c.bf16 %v3018_v58, %v3017_v37 }
 0x64c   :  { %11377 = vpow2.f32 %v3926_v9  ;;  %3960 = vadd.xlane.f32.xlu0 %v13921_v29 }
 0x64d   :  { %10313 = vmatpush3.bf16.msra.mxu1 %v13642_v25  ;;  %v3027_v5 = vpack.c.bf16 %v3016_v22, %v3015_v26 }
 0x64e   :  { %10314 = vmatprep.subr.bf16.mxu1 %v13656_v6 }
 0x64f   :  { %v13929_v43 = vpop.eup %11373  ;;  %10266 = vmatprep.mubr.bf16.mxu1 %v3027_v5 }
 0x650   :  { %3956 = vadd.xlane.f32.xlu1 %v13929_v43  ;;  %10267 = vmatmul.mubr.bf16.gmra.mrb[136].mxu1 %v3028_v55  ;;  %v17453_v55 = vld [vmem:[#allocation93_spill] sm:$0xff] }
 0x651   :  { %10315 = vmatpush3.bf16.msra.mxu1 %v13656_v6  ;;  %v2990_v6 = vpop.xlane.xlu0 %2989 }
 0x652   :  { %v13933_v12 = vpop.eup %11375  ;;  %10316 = vmatprep.subr.bf16.mxu1 %v13644_v24 }
 0x654   :  { %3962 = vadd.xlane.f32.xlu1 %v13933_v12 }
 0x655   :  { %10317 = vmatpush3.bf16.msra.mxu1 %v13644_v24  ;;  %v2986_v2 = vpop.xlane.xlu0 %2985  ;;  %v13948_v24 = vpop.permute.xlu1 %4250 }
 0x656   :  { %v13938_v25 = vpop.eup %11377  ;;  %10318 = vmatprep.subr.bf16.mxu1 %v13671_v15 }
 0x657   :  { %3958 = vadd.xlane.f32.xlu0 %v13938_v25 }
 0x659   :  { %10319 = vmatpush3.bf16.msra.mxu1 %v13671_v15  ;;  %v3891_v36 = vpop.xlane.xlu0 %3890 }
 0x65a   :  { %10320 = vmatprep.subr.bf16.mxu1 %v13646_v59  ;;  %v3915_v33 = vsub.f32 %v13788_v38, %v3891_v36 }
 0x65d   :  { %10321 = vmatpush3.bf16.msra.mxu1 %v13646_v59  ;;  %v3887_v7 = vpop.xlane.xlu0 %3886 }
 0x65e   :  { %10370 = vmatprep.subr.bf16.mxu1 %v13683_v19  ;;  %v3913_v4 = vsub.f32 %v13791_v27, %v3887_v7  ;;  %v17450_v27 = vld [vmem:[#allocation91_spill] sm:$0xff] }
 0x660   :  { %v3934_v23 = vmul.f32 1.442695, %v3913_v4 }
 0x661   :  { %v3897_v15 = vpop.xlane.xlu0 %3896 }
 0x665   :  { %v3893_v14 = vpop.xlane.xlu0 %3892 }
 0x666   :  { %v3916_v32 = vsub.f32 %v17451_v53, %v3893_v14 }
 0x669   :  { %v3899_v0 = vpop.xlane.xlu0 %3898 }
 0x66d   :  { %4254 = vrot.lane.b32.xlu0 %v13337_v28, %s11930_s19  ;;  %v3938_v28 = vmul.f32 1.442695, %v3915_v33 }
 0x671   :  { %4256 = vrot.lane.b32.xlu0 %v13349_v61, %s11930_s19 }
 0x675   :  { %v2988_v31 = vpop.xlane.xlu1 %2987 }
 0x676   :  { %11379 = vrcp.f32 %v2988_v31 }
 0x677   :  { %11381 = vrcp.f32 %v2986_v2 }
 0x678   :  { %11383 = vrcp.f32 %v2990_v6 }
 0x679   :  { %v2984_v59 = vpop.xlane.xlu1 %2983 }
 0x67a   :  { %11385 = vrcp.f32 %v2984_v59 }
 0x67d   :  { %v3889_v57 = vpop.xlane.xlu1 %3888 }
 0x67e   :  { %v3914_v46 = vsub.f32 %v13784_v17, %v3889_v57  ;;  %v3918_v17 = vsub.f32 %v13794_v60, %v3897_v15  ;;  %v3940_v60 = vmul.f32 1.442695, %v3916_v32 }
 0x680   :  { %v3936_v50 = vmul.f32 1.442695, %v3914_v46  ;;  %v11380_v35 = vpop.eup %11379  ;;  %v17454_v46 = vld [vmem:[#allocation95_spill] sm:$0xff] }
 0x681   :  { %v3885_v61 = vpop.xlane.xlu1 %3884  ;;  %v11382_v45 = vpop.eup %11381  ;;  %v3021_v38 = vmul.f32 %v11380_v35, %v13827_v18 }
 0x682   :  { %11387 = vpow2.f32 %v3936_v50  ;;  %v3912_v8 = vsub.f32 %v13786_v11, %v3885_v61  ;;  %v11384_v42 = vpop.eup %11383  ;;  %v3020_v52 = vmul.f32 %v11382_v45, %v17449_v44  ;;  %v3944_v11 = vmul.f32 1.442695, %v3918_v17  ;;  %v3895_v18 = vpop.xlane.xlu0 %3894 }
 0x683   :  { %11389 = vpow2.f32 %v3938_v28  ;;  %v3022_v47 = vmul.f32 %v11384_v42, %v17450_v27  ;;  %v3917_v6 = vsub.f32 %v17453_v55, %v3895_v18 }
 0x684   :  { %v11386_v40 = vpop.eup %11385  ;;  %v3932_v48 = vmul.f32 1.442695, %v3912_v8 }
 0x685   :  { %v3019_v20 = vmul.f32 %v11386_v40, %v13830_v51  ;;  %v3030_v62 = vpack.c.bf16 %v3022_v47, %v3021_v38  ;;  %v3905_v39 = vpop.xlane.xlu1 %3904  ;;  %v17452_v51 = vld [vmem:[#allocation92_spill] sm:$0xff]  ;;  %v3942_v31 = vmul.f32 1.442695, %v3917_v6  ;;  %v17455_v40 = vld [vmem:[#allocation46_spill] sm:$0xff] }
 0x686   :  { %11391 = vpow2.f32 %v3932_v48  ;;  %v3919_v58 = vsub.f32 %v17452_v51, %v3899_v0  ;;  %v13972_v2 = vpop.xlane.xlu0 %3902  ;;  %v3922_v36 = vsub.f32 %v13808_v30, %v3905_v39 }
 0x687   :  { %v3029_v49 = vpack.c.bf16 %v3020_v52, %v3019_v20  ;;  %11393 = vpow2.f32 %v3934_v23 }
 0x688   :  { %11395 = vpow2.f32 %v3944_v11  ;;  %v3946_v5 = vmul.f32 1.442695, %v3919_v58  ;;  %v3952_v33 = vmul.f32 1.442695, %v3922_v36  ;;  %v17456_v58 = vld [vmem:[#allocation81_spill] sm:$0xff] }
 0x689   :  { %10270 = vmatprep.mubr.bf16.mxu1 %v3029_v49  ;;  %v3901_v22 = vpop.xlane.xlu1 %3900  ;;  %11397 = vpow2.f32 %v3940_v60 }
 0x68a   :  { %10271 = vmatmul.mubr.bf16.gmra.mrb[140].mxu1 %v3030_v62  ;;  %11399 = vpow2.f32 %v3946_v5  ;;  %v3920_v14 = vsub.f32 %v17454_v46, %v3901_v22  ;;  %v17458_v46 = vld [vmem:[#allocation86_spill] sm:$0xff] }
 0x68b   :  { %11401 = vpow2.f32 %v3942_v31 }
 0x68c   :  { %v13962_v9 = vpop.eup %11387  ;;  %11403 = vpow2.f32 %v3952_v33  ;;  %v3948_v4 = vmul.f32 1.442695, %v3920_v14 }
 0x68d   :  { %3968 = vadd.xlane.f32.xlu1 %v13962_v9  ;;  %v13966_v26 = vpop.eup %11389  ;;  %v3907_v15 = vpop.xlane.xlu1 %3906 }
 0x68e   :  { %v3923_v35 = vsub.f32 %v13814_v16, %v3907_v15 }
 0x690   :  { %v13968_v37 = vpop.eup %11391  ;;  %3970 = vadd.xlane.f32.xlu0 %v13966_v26  ;;  %v3954_v8 = vmul.f32 1.442695, %v3923_v35 }
 0x691   :  { %3964 = vadd.xlane.f32.xlu1 %v13968_v37  ;;  %v13976_v7 = vpop.eup %11393 }
 0x692   :  { %v13979_v57 = vpop.eup %11395 }
 0x693   :  { %v13983_v30 = vpop.eup %11397 }
 0x694   :  { %3966 = vadd.xlane.f32.xlu0 %v13976_v7  ;;  %v13987_v45 = vpop.eup %11399 }
 0x695   :  { %v3422_v59 = vpop.xlane.xlu0 %3421  ;;  %v13992_v16 = vpop.eup %11401 }
 0x696   :  { %v13994_v38 = vpop.eup %11403 }
 0x698   :  { %3976 = vadd.xlane.f32.xlu0 %v13979_v57 }
 0x699   :  { %v3418_v28 = vpop.xlane.xlu1 %3417  ;;  %v3424_v50 = vpop.xlane.xlu0 %3423 }
 0x69a   :  { %11405 = vrcp.f32 %v3424_v50 }
 0x69b   :  { %11407 = vrcp.f32 %v3418_v28 }
 0x69c   :  { %3972 = vadd.xlane.f32.xlu0 %v13983_v30  ;;  %11409 = vrcp.f32 %v3422_v59  ;;  %v17457_v59 = vld [vmem:[#allocation96_spill] sm:$0xff] }
 0x69d   :  { %v3420_v61 = vpop.xlane.xlu0 %3419  ;;  %v3921_v33 = vsub.f32 %v17457_v59, %v13972_v2  ;;  %v17459_v2 = vld [vmem:[#allocation82_spill] sm:$0xff]  ;;  %v17478_v59 = vld [vmem:[#allocation47_spill] sm:$0xff] }
 0x69e   :  { %11411 = vrcp.f32 %v3420_v61 }
 0x69f   :  { %11413 = vpow2.f32 %v3948_v4  ;;  %v3950_v50 = vmul.f32 1.442695, %v3921_v33 }
 0x6a0   :  { %3978 = vadd.xlane.f32.xlu0 %v13987_v45  ;;  %11415 = vpow2.f32 %v3954_v8  ;;  %v17460_v8 = vld [vmem:[#allocation97_spill] sm:$0xff] }
 0x6a1   :  { %v3430_v42 = vpop.xlane.xlu0 %3429 }
 0x6a2   :  { %4252 = vrot.lane.b32.xlu1 %v17455_v40, %s11930_s19  ;;  %v3426_v48 = vpop.xlane.xlu1 %3425  ;;  %v17461_v40 = vld [vmem:[#allocation98_spill] sm:$0xff] }
 0x6a3   :  { %11417 = vrcp.f32 %v3426_v48 }
 0x6a4   :  { %3974 = vadd.xlane.f32.xlu0 %v13992_v16  ;;  %v11406_v23 = vpop.eup %11405  ;;  %11419 = vrcp.f32 %v3430_v42 }
 0x6a5   :  { %v3428_v17 = vpop.xlane.xlu0 %3427  ;;  %v11408_v0 = vpop.eup %11407  ;;  %v3468_v27 = vmul.f32 %v11406_v23, %v13849_v13 }
 0x6a6   :  { %11421 = vrcp.f32 %v3428_v17  ;;  %v3432_v20 = vpop.xlane.xlu1 %3431  ;;  %v11410_v44 = vpop.eup %11409  ;;  %v3465_v49 = vmul.f32 %v11408_v0, %v13852_v1  ;;  %v17462_v17 = vld [vmem:[#allocation83_spill] sm:$0xff] }
 0x6a7   :  { %11423 = vrcp.f32 %v3432_v20  ;;  %v3467_v11 = vmul.f32 %v11410_v44, %v13845_v3 }
 0x6a8   :  { %v11412_v52 = vpop.eup %11411  ;;  %3984 = vadd.xlane.f32.xlu0 %v13994_v38 }
 0x6a9   :  { %v3438_v47 = vpop.xlane.xlu0 %3437  ;;  %v3466_v62 = vmul.f32 %v11412_v52, %v13858_v56  ;;  %v14002_v32 = vpop.eup %11413  ;;  %v3482_v18 = vpack.c.bf16 %v3468_v27, %v3467_v11  ;;  %v17463_v52 = vld [vmem:[#allocation84_spill] sm:$0xff]  ;;  %v17466_v11 = vld [vmem:[#allocation99_spill] sm:$0xff] }
 0x6aa   :  { %v3434_v53 = vpop.xlane.xlu1 %3433  ;;  %v14005_v60 = vpop.eup %11415  ;;  %v17464_v27 = vld [vmem:[#allocation100_spill] sm:$0xff] }
 0x6ab   :  { %v3481_v39 = vpack.c.bf16 %v3466_v62, %v3465_v49  ;;  %11425 = vrcp.f32 %v3434_v53  ;;  %v17465_v49 = vld [vmem:[#allocation101_spill] sm:$0xff] }
 0x6ac   :  { %3980 = vadd.xlane.f32.xlu0 %v14002_v32  ;;  %11427 = vrcp.f32 %v3438_v47 }
 0x6ad   :  { %10322 = vmatprep.mubr.bf16.mxu1 %v3481_v39  ;;  %v3436_v13 = vpop.xlane.xlu0 %3435  ;;  %v11418_v51 = vpop.eup %11417  ;;  %v17467_v39 = vld [vmem:[#allocation102_spill] sm:$0xff] }
 0x6ae   :  { %11429 = vrcp.f32 %v3436_v13  ;;  %v3440_v1 = vpop.xlane.xlu1 %3439  ;;  %10323 = vmatmul.mubr.bf16.vlgmr.msra.gmra.mrb[144].mxu1 %v3482_v18  ;;  %v11420_v56 = vpop.eup %11419  ;;  %v3469_v55 = vmul.f32 %v11418_v51, %v13865_v54  ;;  %v17468_v51 = vld [vmem:[#allocation88_spill] sm:$0xff] }
 0x6af   :  { %11431 = vrcp.f32 %v3440_v1  ;;  %10371 = vmatpush3.bf16.msra.mxu1 %v13683_v19  ;;  %v3471_v31 = vmul.f32 %v11420_v56, %v13863_v63 }
 0x6b0   :  { %v11422_v3 = vpop.eup %11421  ;;  %3986 = vadd.xlane.f32.xlu0 %v14005_v60  ;;  %10372 = vmatprep.subr.bf16.mxu1 %v17456_v58 }
 0x6b1   :  { %v11424_v22 = vpop.eup %11423  ;;  %v3446_v5 = vpop.xlane.xlu0 %3445  ;;  %v3470_v6 = vmul.f32 %v11422_v3, %v13869_v41  ;;  %v17469_v3 = vld [vmem:[#allocation53_spill] sm:$0xff] }
 0x6b2   :  { %v3442_v36 = vpop.xlane.xlu1 %3441  ;;  %v3472_v15 = vmul.f32 %v11424_v22, %v13873_v34  ;;  %v17471_v22 = vld [vmem:[#allocation38_spill] sm:$0xff] }
 0x6b3   :  { %10373 = vmatpush3.bf16.msra.mxu1 %v17456_v58  ;;  %v3483_v19 = vpack.c.bf16 %v3470_v6, %v3469_v55  ;;  %11433 = vrcp.f32 %v3442_v36  ;;  %v17470_v58 = vld [vmem:[#allocation85_spill] sm:$0xff]  ;;  %v17474_v6 = vld [vmem:[#allocation44_spill] sm:$0xff] }
 0x6b4   :  { %10374 = vmatprep.subr.bf16.mxu1 %v17458_v46  ;;  %v3484_v14 = vpack.c.bf16 %v3472_v15, %v3471_v31  ;;  %11435 = vrcp.f32 %v3446_v5  ;;  %v17472_v5 = vld [vmem:[#allocation87_spill] sm:$0xff]  ;;  %v17473_v55 = vld [vmem:[#allocation41_spill] sm:$0xff]  ;;  %v17476_v31 = vld [vmem:[#allocation56_spill] sm:$0xff] }
 0x6b5   :  { %10326 = vmatprep.mubr.bf16.mxu1 %v3483_v19  ;;  %v3444_v54 = vpop.xlane.xlu0 %3443  ;;  %v11426_v28 = vpop.eup %11425  ;;  %v17475_v36 = vld [vmem:[#allocation45_spill] sm:$0xff]  ;;  %v17477_v15 = vld [vmem:[#allocation50_spill] sm:$0xff]  ;;  %v17479_v19 = vld [vmem:[#allocation55_spill] sm:$0xff] }
 0x6b6   :  { %11437 = vrcp.f32 %v3444_v54  ;;  %v3448_v41 = vpop.xlane.xlu1 %3447  ;;  %10327 = vmatmul.mubr.bf16.gmra.mrb[148].mxu1 %v3484_v14  ;;  %v11428_v63 = vpop.eup %11427  ;;  %v3473_v4 = vmul.f32 %v11426_v28, %v13880_v10  ;;  %v17481_v28 = vld [vmem:[#allocation40_spill] sm:$0xff] }
 0x6b7   :  { %11439 = vrcp.f32 %v3448_v41  ;;  %10375 = vmatpush3.bf16.msra.mxu1 %v17458_v46  ;;  %v3475_v42 = vmul.f32 %v11428_v63, %v17460_v8  ;;  %v17480_v46 = vld [vmem:[#allocation51_spill] sm:$0xff] }
 0x6b8   :  { %v11430_v34 = vpop.eup %11429  ;;  %10376 = vmatprep.subr.bf16.mxu1 %v17459_v2  ;;  %11441 = vpow2.f32 %v3950_v50  ;;  %v17482_v41 = vld [vmem:[#allocation39_spill] sm:$0xff] }
 0x6b9   :  { %v11432_v35 = vpop.eup %11431  ;;  %v3474_v61 = vmul.f32 %v11430_v34, %v13884_v21  ;;  %v17483_v50 = vld [vmem:[#allocation43_spill] sm:$0xff]  ;;  %v17484_v34 = vld [vmem:[#allocation49_spill] sm:$0xff] }
 0x6ba   :  { %v3476_v48 = vmul.f32 %v11432_v35, %v17461_v40  ;;  %v17486_v35 = vld [vmem:[#allocation48_spill] sm:$0xff] }
 0x6bb   :  { %10377 = vmatpush3.bf16.msra.mxu1 %v17459_v2  ;;  %v3485_v23 = vpack.c.bf16 %v3474_v61, %v3473_v4  ;;  %v17485_v2 = vld [vmem:[#allocation42_spill] sm:$0xff] }
 0x6bc   :  { %10378 = vmatprep.subr.bf16.mxu1 %v17462_v17  ;;  %v3486_v0 = vpack.c.bf16 %v3476_v48, %v3475_v42  ;;  %v17487_v42 = vld [vmem:[#allocation54_spill] sm:$0xff] }
 0x6bd   :  { %10330 = vmatprep.mubr.bf16.mxu1 %v3485_v23  ;;  %v11434_v20 = vpop.eup %11433  ;;  %v17488_v23 = vld [vmem:[#allocation52_spill] sm:$0xff] }
 0x6be   :  { %10331 = vmatmul.mubr.bf16.gmra.mrb[152].mxu1 %v3486_v0  ;;  %v11436_v44 = vpop.eup %11435  ;;  %v3477_v47 = vmul.f32 %v11434_v20, %v17464_v27 }
 0x6bf   :  { %10379 = vmatpush3.bf16.msra.mxu1 %v17462_v17  ;;  %v3479_v53 = vmul.f32 %v11436_v44, %v17466_v11 }
 0x6c0   :  { %v11438_v10 = vpop.eup %11437  ;;  %10380 = vmatprep.subr.bf16.mxu1 %v17463_v52 }
 0x6c1   :  { %v11440_v21 = vpop.eup %11439  ;;  %v3478_v62 = vmul.f32 %v11438_v10, %v17465_v49 }
 0x6c2   :  { %v3480_v18 = vmul.f32 %v11440_v21, %v17467_v39  ;;  %v14034_v56 = vpop.eup %11441  ;;  %v17489_v21 = vld [vmem:[#allocation89_spill] sm:$0xff] }
 0x6c3   :  { %10381 = vmatpush3.bf16.msra.mxu1 %v17463_v52  ;;  %v3487_v13 = vpack.c.bf16 %v3478_v62, %v3477_v47  ;;  %v4287_v52 = vsel %vm2733_vm2, %v17472_v5, 0 }
 0x6c4   :  { %10382 = vmatprep.subr.bf16.mxu1 %v17468_v51  ;;  %v3488_v1 = vpack.c.bf16 %v3480_v18, %v3479_v53 }
 0x6c5   :  { %10334 = vmatprep.mubr.bf16.mxu1 %v3487_v13 }
 0x6c6   :  { %3982 = vadd.xlane.f32.xlu1 %v14034_v56  ;;  %4258 = vrot.lane.b32.xlu0 %v17469_v3, %s11930_s19 }
 0x6c7   :  { %10335 = vmatmul.mubr.bf16.gmra.mrb[156].mxu1 %v3488_v1 }
 0x6c8   :  { %10383 = vmatpush3.bf16.msra.mxu1 %v17468_v51 }
 0x6c9   :  { %10384 = vmatprep.subr.bf16.mxu1 %v17470_v58 }
 0x6ca   :  { %4230 = vrot.lane.b32.xlu0 %v17471_v22, %s11930_s19 }
 0x6cc   :  { %10385 = vmatpush3.bf16.msra.mxu1 %v17470_v58 }
 0x6cd   :  { %10862 = vmatprep.subr.msk.bf16.mxu1 %vm2733_vm2, %v17472_v5 }
 0x6ce   :  { %4232 = vrot.lane.b32.xlu0 %v17473_v55, %s11930_s19 }
 0x6d2   :  { %4234 = vrot.lane.b32.xlu0 %v17474_v6, %s11930_s19 }
 0x6d6   :  { %4236 = vrot.lane.b32.xlu0 %v17475_v36, %s11930_s19 }
 0x6d7   :  { %4260 = vrot.lane.b32.xlu1 %v17476_v31, %s11930_s19 }
 0x6d9   :  { %v3961_v14 = vpop.xlane.xlu0 %3960 }
 0x6da   :  { %4240 = vrot.lane.b32.xlu0 %v17477_v15, %s11930_s19 }
 0x6db   :  { %4238 = vrot.lane.b32.xlu1 %v17478_v59, %s11930_s19 }
 0x6dd   :  { %v3957_v33 = vpop.xlane.xlu1 %3956 }
 0x6de   :  { %4244 = vrot.lane.b32.xlu0 %v17479_v19, %s11930_s19 }
 0x6df   :  { %4242 = vrot.lane.b32.xlu1 %v17480_v46, %s11930_s19 }
 0x6e1   :  { %v3963_v54 = vpop.xlane.xlu1 %3962 }
 0x6e2   :  { %11443 = vrcp.f32 %v3963_v54  ;;  %4559 = vrot.lane.b32.xlu0 %v17481_v28, %s11930_s19 }
 0x6e3   :  { %11445 = vrcp.f32 %v3957_v33  ;;  %4561 = vrot.lane.b32.xlu1 %v17482_v41, %s11930_s19 }
 0x6e4   :  { %11447 = vrcp.f32 %v3961_v14  ;;  %v3959_v63 = vpop.xlane.xlu0 %3958 }
 0x6e5   :  { %11449 = vrcp.f32 %v3959_v63 }
 0x6e6   :  { %4563 = vrot.lane.b32.xlu0 %v17483_v50, %s11930_s19 }
 0x6e7   :  { %4567 = vrot.lane.b32.xlu1 %v17484_v34, %s11930_s19 }
 0x6ea   :  { %4565 = vrot.lane.b32.xlu0 %v17485_v2, %s11930_s19 }
 0x6eb   :  { %4569 = vrot.lane.b32.xlu1 %v17486_v35, %s11930_s19 }
 0x6ec   :  { %v11444_v4 = vpop.eup %11443 }
 0x6ed   :  { %v11446_v61 = vpop.eup %11445  ;;  %v4007_v48 = vmul.f32 %v11444_v4, %v13933_v12  ;;  %v4290_v12 = vsel %vm2733_vm2, %v17489_v21, 0 }
 0x6ee   :  { %v11448_v8 = vpop.eup %11447  ;;  %4571 = vrot.lane.b32.xlu0 %v17487_v42, %s11930_s19  ;;  %v4004_v17 = vmul.f32 %v11446_v61, %v13929_v43  ;;  %v4255_v43 = vpop.permute.xlu0 %4254 }
 0x6ef   :  { %v11450_v40 = vpop.eup %11449  ;;  %4573 = vrot.lane.b32.xlu1 %v17488_v23, %s11930_s19  ;;  %v4006_v20 = vmul.f32 %v11448_v8, %v13921_v29  ;;  %v4293_v29 = vsel %vm2733_vm2, %v13948_v24, 0  ;;  %v4299_v19 = vsel %vm2733_vm2, %v4255_v43, 0 }
 0x6f0   :  { %v4005_v0 = vmul.f32 %v11450_v40, %v13938_v25 }
 0x6f1   :  { %v4021_v10 = vpack.c.bf16 %v4007_v48, %v4006_v20 }
 0x6f2   :  { %v4020_v44 = vpack.c.bf16 %v4005_v0, %v4004_v17  ;;  %v4257_v62 = vpop.permute.xlu0 %4256 }
 0x6f4   :  { %10386 = vmatprep.mubr.bf16.mxu1 %v4020_v44 }
 0x6f5   :  { %10387 = vmatmul.mubr.bf16.vlgmr.msra.gmra.mrb[160].mxu1 %v4021_v10 }
 0x6f6   :  { %10403 = vmatpush3.bf16.xpose.msra.mxu1 %v4287_v52 }
 0x6f7   :  { %10863 = vmatprep.subr.msk.bf16.mxu1 %vm2733_vm2, %v17489_v21 }
 0x6fe   :  { %10405 = vmatpush3.bf16.xpose.msra.mxu1 %v4290_v12 }
 0x6ff   :  { %10864 = vmatprep.subr.msk.bf16.mxu1 %vm2733_vm2, %v13948_v24 }
 0x706   :  { %10407 = vmatpush3.bf16.xpose.msra.mxu1 %v4293_v29 }
 0x713   :  { %v10260_v25 = vpop.f32.mrb[128].mxu1 }
 0x714   :  { %3130 = vst.msk [vmem:[#allocation3 + $0x10] sm:$0xff] %vm2733_vm2, %v10260_v25  ;;  %v3065_v27 = vpop.f32.mrb[129].mxu1 }
 0x715   :  { %3128 = vst.msk [vmem:[#allocation3] sm:$0xff] %vm2733_vm2, %v3065_v27  ;;  %v10261_v47 = vpop.f32.mrb[130].mxu1 }
 0x716   :  { %3131 = vst.msk [vmem:[#allocation3 + $0x18] sm:$0xff] %vm2733_vm2, %v10261_v47  ;;  %v3068_v49 = vpop.f32.mrb[131].mxu1 }
 0x717   :  { %3129 = vst.msk [vmem:[#allocation3 + $0x8] sm:$0xff] %vm2733_vm2, %v3068_v49 }
 0x71a   :  { %v3969_v11 = vpop.xlane.xlu1 %3968 }
 0x71b   :  { %v10264_v53 = vpop.f32.mrb[132].mxu1 }
 0x71c   :  { %3134 = vst.msk [vmem:[#allocation3 + $0x30] sm:$0xff] %vm2733_vm2, %v10264_v53  ;;  %v3081_v24 = vpop.f32.mrb[133].mxu1 }
 0x71d   :  { %3132 = vst.msk [vmem:[#allocation3 + $0x20] sm:$0xff] %vm2733_vm2, %v3081_v24  ;;  %v10265_v39 = vpop.f32.mrb[134].mxu1  ;;  %v3971_v18 = vpop.xlane.xlu0 %3970 }
 0x71e   :  { %3135 = vst.msk [vmem:[#allocation3 + $0x38] sm:$0xff] %vm2733_vm2, %v10265_v39  ;;  %v3965_v13 = vpop.xlane.xlu1 %3964  ;;  %v3084_v51 = vpop.f32.mrb[135].mxu1  ;;  %11451 = vrcp.f32 %v3971_v18 }
 0x71f   :  { %3133 = vst.msk [vmem:[#allocation3 + $0x28] sm:$0xff] %vm2733_vm2, %v3084_v51  ;;  %11453 = vrcp.f32 %v3965_v13 }
 0x720   :  { %11455 = vrcp.f32 %v3969_v11 }
 0x721   :  { %v3967_v1 = vpop.xlane.xlu0 %3966 }
 0x722   :  { %v4253_v3 = vpop.permute.xlu1 %4252  ;;  %11457 = vrcp.f32 %v3967_v1 }
 0x723   :  { %10865 = vmatprep.subr.msk.bf16.mxu1 %vm2733_vm2, %v4253_v3  ;;  %v10268_v58 = vpop.f32.mrb[136].mxu1  ;;  %v4296_v22 = vsel %vm2733_vm2, %v4253_v3, 0 }
 0x724   :  { %3138 = vst.msk [vmem:[#allocation3 + $0x50] sm:$0xff] %vm2733_vm2, %v10268_v58  ;;  %10409 = vmatpush3.bf16.xpose.msra.mxu1 %v4296_v22  ;;  %v3097_v5 = vpop.f32.mrb[137].mxu1 }
 0x725   :  { %3136 = vst.msk [vmem:[#allocation3 + $0x40] sm:$0xff] %vm2733_vm2, %v3097_v5  ;;  %10866 = vmatprep.subr.msk.bf16.mxu1 %vm2733_vm2, %v4255_v43  ;;  %v10269_v55 = vpop.f32.mrb[138].mxu1  ;;  %v3977_v6 = vpop.xlane.xlu0 %3976  ;;  %v17490_v43 = vld [vmem:[#allocation58_spill] sm:$0xff] }
 0x726   :  { %3139 = vst.msk [vmem:[#allocation3 + $0x58] sm:$0xff] %vm2733_vm2, %v10269_v55  ;;  %v3100_v36 = vpop.f32.mrb[139].mxu1 }
 0x727   :  { %3137 = vst.msk [vmem:[#allocation3 + $0x48] sm:$0xff] %vm2733_vm2, %v3100_v36 }
 0x728   :  { %v11452_v31 = vpop.eup %11451 }
 0x729   :  { %v3973_v15 = vpop.xlane.xlu0 %3972  ;;  %v11454_v59 = vpop.eup %11453  ;;  %v4011_v14 = vmul.f32 %v11452_v31, %v13966_v26  ;;  %v4302_v26 = vsel %vm2733_vm2, %v4257_v62, 0 }
 0x72a   :  { %v11456_v33 = vpop.eup %11455  ;;  %v4008_v28 = vmul.f32 %v11454_v59, %v13968_v37  ;;  %v17492_v59 = vld [vmem:[#allocation66_spill] sm:$0xff] }
 0x72b   :  { %v4010_v63 = vmul.f32 %v11456_v33, %v13962_v9 }
 0x72c   :  { %v11458_v46 = vpop.eup %11457  ;;  %10411 = vmatpush3.bf16.xpose.msra.mxu1 %v4299_v19  ;;  %v5082_v19 = vsel %vm2733_vm2, %v17492_v59, 0 }
 0x72d   :  { %10867 = vmatprep.subr.msk.bf16.mxu1 %vm2733_vm2, %v4257_v62  ;;  %v3979_v54 = vpop.xlane.xlu0 %3978  ;;  %v4009_v41 = vmul.f32 %v11458_v46, %v13976_v7  ;;  %v4023_v34 = vpack.c.bf16 %v4011_v14, %v4010_v63  ;;  %v17493_v46 = vld [vmem:[#allocation68_spill] sm:$0xff] }
 0x72e   :  { %11459 = vrcp.f32 %v3979_v54 }
 0x72f   :  { %v4022_v50 = vpack.c.bf16 %v4009_v41, %v4008_v28  ;;  %11461 = vrcp.f32 %v3973_v15  ;;  %v5085_v41 = vsel %vm2733_vm2, %v17493_v46, 0 }
 0x730   :  { %11463 = vrcp.f32 %v3977_v6  ;;  %v17491_v6 = vld [vmem:[#allocation62_spill] sm:$0xff] }
 0x731   :  { %10390 = vmatprep.mubr.bf16.mxu1 %v4022_v50  ;;  %v3975_v2 = vpop.xlane.xlu0 %3974  ;;  %v5079_v31 = vsel %vm2733_vm2, %v17491_v6, 0  ;;  %v17494_v50 = vld [vmem:[#allocation57_spill] sm:$0xff] }
 0x732   :  { %11465 = vrcp.f32 %v3975_v2  ;;  %10391 = vmatmul.mubr.bf16.gmra.mrb[164].mxu1 %v4023_v34  ;;  %v17495_v34 = vld [vmem:[#allocation72_spill] sm:$0xff] }
 0x734   :  { %10413 = vmatpush3.bf16.xpose.msra.mxu1 %v4302_v26 }
 0x735   :  { %v3985_v35 = vpop.xlane.xlu0 %3984 }
 0x738   :  { %v11460_v4 = vpop.eup %11459 }
 0x739   :  { %v3981_v61 = vpop.xlane.xlu0 %3980  ;;  %v11462_v37 = vpop.eup %11461  ;;  %v4015_v9 = vmul.f32 %v11460_v4, %v13987_v45  ;;  %v5088_v4 = vsel %vm2733_vm2, %v17495_v34, 0 }
 0x73a   :  { %v11464_v8 = vpop.eup %11463  ;;  %v4012_v40 = vmul.f32 %v11462_v37, %v13983_v30  ;;  %v17496_v37 = vld [vmem:[#allocation76_spill] sm:$0xff] }
 0x73b   :  { %v4014_v23 = vmul.f32 %v11464_v8, %v13979_v57 }
 0x73c   :  { %v11466_v7 = vpop.eup %11465 }
 0x73d   :  { %v3987_v42 = vpop.xlane.xlu0 %3986  ;;  %v4013_v48 = vmul.f32 %v11466_v7, %v13992_v16  ;;  %v4025_v0 = vpack.c.bf16 %v4015_v9, %v4014_v23 }
 0x73e   :  { %11467 = vrcp.f32 %v3987_v42  ;;  %v5091_v42 = vsel %vm2733_vm2, %v17496_v37, 0 }
 0x73f   :  { %v4024_v17 = vpack.c.bf16 %v4013_v48, %v4012_v40  ;;  %11469 = vrcp.f32 %v3981_v61  ;;  %v17497_v48 = vld [vmem:[#allocation78_spill] sm:$0xff] }
 0x740   :  { %11471 = vrcp.f32 %v3985_v35 }
 0x741   :  { %10394 = vmatprep.mubr.bf16.mxu1 %v4024_v17  ;;  %v4259_v20 = vpop.permute.xlu0 %4258 }
 0x742   :  { %10395 = vmatmul.mubr.bf16.gmra.mrb[168].mxu1 %v4025_v0  ;;  %10868 = vmatprep.subr.msk.bf16.mxu1 %vm2733_vm2, %v4259_v20  ;;  %v4305_v44 = vsel %vm2733_vm2, %v4259_v20, 0  ;;  %v5094_v0 = vsel %vm2733_vm2, %v17497_v48, 0 }
 0x743   :  { %10415 = vmatpush3.bf16.xpose.msra.mxu1 %v4305_v44 }
 0x745   :  { %v4231_v10 = vpop.permute.xlu0 %4230 }
 0x748   :  { %v11468_v25 = vpop.eup %11467 }
 0x749   :  { %v4233_v52 = vpop.permute.xlu0 %4232  ;;  %v11470_v47 = vpop.eup %11469  ;;  %v4019_v39 = vmul.f32 %v11468_v25, %v14005_v60 }
 0x74a   :  { %v11472_v49 = vpop.eup %11471  ;;  %v4016_v51 = vmul.f32 %v11470_v47, %v14002_v32 }
 0x74b   :  { %v4018_v58 = vmul.f32 %v11472_v49, %v13994_v38  ;;  %v5076_v38 = vsel %vm2733_vm2, %v17490_v43, 0 }
 0x74d   :  { %v4235_v45 = vpop.permute.xlu0 %4234  ;;  %v4027_v5 = vpack.c.bf16 %v4019_v39, %v4018_v58 }
 0x751   :  { %v4237_v21 = vpop.permute.xlu0 %4236 }
 0x753   :  { %v3983_v30 = vpop.xlane.xlu1 %3982 }
 0x754   :  { %11473 = vrcp.f32 %v3983_v30  ;;  %v17502_v30 = vld [vmem:[#allocation67_spill] sm:$0xff] }
 0x755   :  { %v14120_v57 = vpop.permute.xlu0 %4240 }
 0x757   :  { %v4261_v16 = vpop.permute.xlu1 %4260 }
 0x758   :  { %10869 = vmatprep.subr.msk.bf16.mxu1 %vm2733_vm2, %v4261_v16  ;;  %v4308_v12 = vsel %vm2733_vm2, %v4261_v16, 0  ;;  %v17504_v16 = vld [vmem:[#allocation75_spill] sm:$0xff] }
 0x759   :  { %10417 = vmatpush3.bf16.xpose.msra.mxu1 %v4308_v12  ;;  %v14124_v29 = vpop.permute.xlu0 %4244  ;;  %v17505_v12 = vld [vmem:[#allocation77_spill] sm:$0xff] }
 0x75a   :  { %10870 = vmatprep.subr.msk.bf16.mxu1 %vm2733_vm2, %v17490_v43 }
 0x75b   :  { %v4239_v27 = vpop.permute.xlu1 %4238 }
 0x75d   :  { %v10272_v62 = vpop.f32.mrb[140].mxu1  ;;  %v4560_v11 = vpop.permute.xlu0 %4559 }
 0x75e   :  { %v11474_v53 = vpop.eup %11473  ;;  %3142 = vst.msk [vmem:[#allocation3 + $0x70] sm:$0xff] %vm2733_vm2, %v10272_v62  ;;  %v3113_v24 = vpop.f32.mrb[141].mxu1  ;;  %10434 = vmatprep.subr.bf16.mxu0 %v4560_v11 }
 0x75f   :  { %3140 = vst.msk [vmem:[#allocation3 + $0x60] sm:$0xff] %vm2733_vm2, %v3113_v24  ;;  %v10273_v18 = vpop.f32.mrb[142].mxu1  ;;  %v4243_v13 = vpop.permute.xlu1 %4242  ;;  %10435 = vmatpush3.bf16.msra.mxu0 %v4560_v11  ;;  %v4017_v1 = vmul.f32 %v11474_v53, %v14034_v56 }
 0x760   :  { %3143 = vst.msk [vmem:[#allocation3 + $0x78] sm:$0xff] %vm2733_vm2, %v10273_v18  ;;  %v3116_v3 = vpop.f32.mrb[143].mxu1 }
 0x761   :  { %3141 = vst.msk [vmem:[#allocation3 + $0x68] sm:$0xff] %vm2733_vm2, %v3116_v3  ;;  %v4026_v22 = vpack.c.bf16 %v4017_v1, %v4016_v51  ;;  %v4564_v55 = vpop.permute.xlu0 %4563 }
 0x763   :  { %v4562_v60 = vpop.permute.xlu1 %4561  ;;  %10398 = vmatprep.mubr.bf16.mxu1 %v4026_v22 }
 0x764   :  { %10399 = vmatmul.mubr.bf16.gmra.mrb[172].mxu1 %v4027_v5  ;;  %10436 = vmatprep.subr.bf16.mxu0 %v4562_v60 }
 0x765   :  { %10418 = vmatprep.mubr.msk.bf16.mxu1 %vm2733_vm2, %v4231_v10  ;;  %10437 = vmatpush3.bf16.msra.mxu0 %v4562_v60  ;;  %v4566_v32 = vpop.permute.xlu0 %4565  ;;  %v17499_v10 = vld [vmem:[#allocation80_spill] sm:$0xff] }
 0x766   :  { %10438 = vmatprep.subr.bf16.mxu0 %v4564_v55 }
 0x767   :  { %v4568_v56 = vpop.permute.xlu1 %4567 }
 0x769   :  { %10439 = vmatpush3.bf16.msra.mxu0 %v4564_v55  ;;  %v4572_v15 = vpop.permute.xlu0 %4571 }
 0x76a   :  { %10440 = vmatprep.subr.bf16.mxu0 %v4566_v32 }
 0x76b   :  { %v4570_v36 = vpop.permute.xlu1 %4569 }
 0x76c   :  { %10419 = vmatmul.mubr.msk.bf16.vlgmr.msra.gmra.mrb[176].mxu1 %vm2733_vm2, %v4233_v52  ;;  %v5097_v52 = vsel %vm2733_vm2, %v17499_v10, 0 }
 0x76d   :  { %10499 = vmatpush3.bf16.xpose.msra.mxu1 %v5076_v38  ;;  %10422 = vmatprep.mubr.msk.bf16.mxu1 %vm2733_vm2, %v4235_v45  ;;  %v17500_v45 = vld [vmem:[#allocation61_spill] sm:$0xff] }
 0x76e   :  { %10441 = vmatpush3.bf16.msra.mxu0 %v4566_v32  ;;  %10871 = vmatprep.subr.msk.bf16.mxu1 %vm2733_vm2, %v17491_v6 }
 0x76f   :  { %10442 = vmatprep.subr.bf16.mxu0 %v4568_v56  ;;  %v4574_v33 = vpop.permute.xlu1 %4573 }
 0x772   :  { %10443 = vmatpush3.bf16.msra.mxu0 %v4568_v56 }
 0x773   :  { %10444 = vmatprep.subr.bf16.mxu0 %v4570_v36 }
 0x774   :  { %10423 = vmatmul.mubr.msk.bf16.gmra.mrb[180].mxu1 %vm2733_vm2, %v4237_v21  ;;  %v17501_v21 = vld [vmem:[#allocation65_spill] sm:$0xff] }
 0x775   :  { %10501 = vmatpush3.bf16.xpose.msra.mxu1 %v5079_v31  ;;  %10426 = vmatprep.mubr.msk.bf16.mxu1 %vm2733_vm2, %v4239_v27 }
 0x776   :  { %10445 = vmatpush3.bf16.msra.mxu0 %v4570_v36  ;;  %10872 = vmatprep.subr.msk.bf16.mxu1 %vm2733_vm2, %v17492_v59 }
 0x777   :  { %10446 = vmatprep.subr.bf16.mxu0 %v4572_v15 }
 0x77a   :  { %10447 = vmatpush3.bf16.msra.mxu0 %v4572_v15 }
 0x77b   :  { %10448 = vmatprep.subr.bf16.mxu0 %v4574_v33 }
 0x77c   :  { %10427 = vmatmul.mubr.msk.bf16.gmra.mrb[184].mxu1 %vm2733_vm2, %v14120_v57  ;;  %v17503_v57 = vld [vmem:[#allocation71_spill] sm:$0xff] }
 0x77d   :  { %10503 = vmatpush3.bf16.xpose.msra.mxu1 %v5082_v19  ;;  %10430 = vmatprep.mubr.msk.bf16.mxu1 %vm2733_vm2, %v4243_v13 }
 0x77e   :  { %10449 = vmatpush3.bf16.msra.mxu0 %v4574_v33  ;;  %10873 = vmatprep.subr.msk.bf16.mxu1 %vm2733_vm2, %v17493_v46 }
 0x781   :  { %v14156_v14 = vpop.f32.mrb[144].mxu1 }
 0x782   :  { %v14158_v54 = vpop.f32.mrb[145].mxu1 }
 0x783   :  { %v14160_v28 = vpop.f32.mrb[146].mxu1 }
 0x784   :  { %10431 = vmatmul.mubr.msk.bf16.gmra.mrb[188].mxu1 %vm2733_vm2, %v14124_v29  ;;  %v14166_v63 = vpop.f32.mrb[147].mxu1  ;;  %v17506_v29 = vld [vmem:[#allocation79_spill] sm:$0xff] }
 0x785   :  { %10505 = vmatpush3.bf16.xpose.msra.mxu1 %v5085_v41  ;;  %10514 = vmatprep.mubr.msk.bf16.mxu1 %vm2733_vm2, %v17494_v50 }
 0x786   :  { %10874 = vmatprep.subr.msk.bf16.mxu1 %vm2733_vm2, %v17495_v34 }
 0x789   :  { %v14172_v2 = vpop.f32.mrb[148].mxu1 }
 0x78a   :  { %v14174_v26 = vpop.f32.mrb[149].mxu1 }
 0x78b   :  { %v14176_v35 = vpop.f32.mrb[150].mxu1 }
 0x78c   :  { %v14180_v61 = vpop.f32.mrb[151].mxu1 }
 0x78d   :  { %10507 = vmatpush3.bf16.xpose.msra.mxu1 %v5088_v4 }
 0x78e   :  { %10875 = vmatprep.subr.msk.bf16.mxu1 %vm2733_vm2, %v17496_v37 }
 0x791   :  { %v14184_v8 = vpop.f32.mrb[152].mxu1 }
 0x792   :  { %v14186_v7 = vpop.f32.mrb[153].mxu1 }
 0x793   :  { %v14188_v9 = vpop.f32.mrb[154].mxu1 }
 0x794   :  { %v14192_v40 = vpop.f32.mrb[155].mxu1 }
 0x795   :  { %10509 = vmatpush3.bf16.xpose.msra.mxu1 %v5091_v42 }
 0x796   :  { %10876 = vmatprep.subr.msk.bf16.mxu1 %vm2733_vm2, %v17497_v48 }
 0x79a   :  { %v14196_v23 = vpop.f32.mrb[156].mxu1 }
 0x79b   :  { %17498 = vst [vmem:[#allocation94_spill] sm:$0xff] %v14196_v23  ;;  %v14198_v17 = vpop.f32.mrb[157].mxu1 }
 0x79c   :  { %v14202_v20 = vpop.f32.mrb[158].mxu1 }
 0x79d   :  { %10511 = vmatpush3.bf16.xpose.msra.mxu1 %v5094_v0  ;;  %v14204_v44 = vpop.f32.mrb[159].mxu1 }
 0x79e   :  { %10877 = vmatprep.subr.msk.bf16.mxu1 %vm2733_vm2, %v17499_v10 }
 0x7a5   :  { %10513 = vmatpush3.bf16.xpose.msra.mxu1 %v5097_v52 }
 0x7ac   :  { %10515 = vmatmul.mubr.msk.bf16.vlgmr.msra.gmra.mrb[192].mxu1 %vm2733_vm2, %v17500_v45 }
 0x7ad   :  { %10518 = vmatprep.mubr.msk.bf16.mxu1 %vm2733_vm2, %v17501_v21 }
 0x7b4   :  { %10519 = vmatmul.mubr.msk.bf16.gmra.mrb[196].mxu1 %vm2733_vm2, %v17502_v30 }
 0x7b5   :  { %10522 = vmatprep.mubr.msk.bf16.mxu1 %vm2733_vm2, %v17503_v57 }
 0x7bc   :  { %10523 = vmatmul.mubr.msk.bf16.gmra.mrb[200].mxu1 %vm2733_vm2, %v17504_v16 }
 0x7bd   :  { %10526 = vmatprep.mubr.msk.bf16.mxu1 %vm2733_vm2, %v17505_v12 }
 0x7c4   :  { %10527 = vmatmul.mubr.msk.bf16.gmra.mrb[204].mxu1 %vm2733_vm2, %v17506_v29 }
 0x7c8   :  { %v14224_v25 = vpop.f32.mrb[160].mxu1 }
 0x7c9   :  { %v4086_v27 = vpop.f32.mrb[161].mxu1 }
 0x7ca   :  { %v14226_v47 = vpop.f32.mrb[162].mxu1 }
 0x7cb   :  { %v14228_v49 = vpop.f32.mrb[163].mxu1 }
 0x805   :  { %v14230_v62 = vpop.f32.mrb[164].mxu1 }
 0x806   :  { %v14232_v11 = vpop.f32.mrb[165].mxu1 }
 0x807   :  { %v14234_v53 = vpop.f32.mrb[166].mxu1 }
 0x808   :  { %v14236_v24 = vpop.f32.mrb[167].mxu1 }
 0x815   :  { %v14238_v39 = vpop.f32.mrb[168].mxu1 }
 0x816   :  { %v14240_v18 = vpop.f32.mrb[169].mxu1 }
 0x817   :  { %v14242_v13 = vpop.f32.mrb[170].mxu1 }
 0x818   :  { %v14244_v51 = vpop.f32.mrb[171].mxu1 }
 0x837   :  { %v14246_v1 = vpop.f32.mrb[172].mxu1 }
 0x838   :  { %17507 = vst [vmem:[#allocation91_spill] sm:$0xff] %v14246_v1  ;;  %v14248_v3 = vpop.f32.mrb[173].mxu1 }
 0x839   :  { %17508 = vst [vmem:[#allocation90_spill] sm:$0xff] %v14248_v3  ;;  %v14250_v58 = vpop.f32.mrb[174].mxu1 }
 0x83a   :  { %v14252_v22 = vpop.f32.mrb[175].mxu1 }
 0x83f   :  { %v10420_v5 = vpop.f32.mrb[176].mxu1 }
 0x840   :  { %4411 = vmax.xlane.f32.xlu0 %v10420_v5  ;;  %v4344_v55 = vpop.f32.mrb[177].mxu1 }
 0x841   :  { %4407 = vmax.xlane.f32.xlu1 %v4344_v55  ;;  %v10421_v60 = vpop.f32.mrb[178].mxu1 }
 0x842   :  { %v14254_v32 = vpop.f32.mrb[179].mxu1 }
 0x844   :  { %4409 = vmax.xlane.f32.xlu0 %v14254_v32 }
 0x845   :  { %4413 = vmax.xlane.f32.xlu1 %v10421_v60 }
 0x847   :  { %v10424_v56 = vpop.f32.mrb[180].mxu1 }
 0x848   :  { %4419 = vmax.xlane.f32.xlu0 %v10424_v56  ;;  %v14257_v38 = vpop.f32.mrb[181].mxu1 }
 0x849   :  { %v14259_v36 = vpop.f32.mrb[182].mxu1 }
 0x84a   :  { %4421 = vmax.xlane.f32.xlu1 %v14259_v36  ;;  %v14262_v31 = vpop.f32.mrb[183].mxu1 }
 0x84c   :  { %4415 = vmax.xlane.f32.xlu0 %v14257_v38 }
 0x84e   :  { %4417 = vmax.xlane.f32.xlu1 %v14262_v31 }
 0x84f   :  { %v14266_v15 = vpop.f32.mrb[184].mxu1 }
 0x850   :  { %4427 = vmax.xlane.f32.xlu0 %v14266_v15  ;;  %v14269_v33 = vpop.f32.mrb[185].mxu1 }
 0x851   :  { %v14271_v19 = vpop.f32.mrb[186].mxu1 }
 0x852   :  { %4429 = vmax.xlane.f32.xlu1 %v14271_v19  ;;  %v14274_v41 = vpop.f32.mrb[187].mxu1 }
 0x854   :  { %4423 = vmax.xlane.f32.xlu0 %v14269_v33 }
 0x856   :  { %4425 = vmax.xlane.f32.xlu1 %v14274_v41 }
 0x857   :  { %v14278_v4 = vpop.f32.mrb[188].mxu1 }
 0x858   :  { %4435 = vmax.xlane.f32.xlu0 %v14278_v4  ;;  %v14281_v42 = vpop.f32.mrb[189].mxu1 }
 0x859   :  { %v14283_v0 = vpop.f32.mrb[190].mxu1 }
 0x85a   :  { %v14285_v52 = vpop.f32.mrb[191].mxu1 }
 0x85c   :  { %4431 = vmax.xlane.f32.xlu0 %v14281_v42 }
 0x867   :  { %4165 = vrot.lane.b32.xlu1 %v4086_v27, %s11929_s18 }
 0x872   :  { %3634 = vrot.lane.b32.xlu0 %v14158_v54, %s11930_s19 }
 0x87f   :  { %v14291_v12 = vpop.f32.mrb[192].mxu1 }
 0x880   :  { %v14293_v57 = vpop.f32.mrb[193].mxu1 }
 0x881   :  { %v14295_v21 = vpop.f32.mrb[194].mxu1 }
 0x882   :  { %v14297_v45 = vpop.f32.mrb[195].mxu1 }
 0x887   :  { %v14299_v50 = vpop.f32.mrb[196].mxu1 }
 0x888   :  { %17509 = vst [vmem:[#allocation92_spill] sm:$0xff] %v14299_v50  ;;  %v14301_v10 = vpop.f32.mrb[197].mxu1 }
 0x889   :  { %v14303_v37 = vpop.f32.mrb[198].mxu1 }
 0x88a   :  { %17510 = vst [vmem:[#allocation93_spill] sm:$0xff] %v14303_v37  ;;  %v14305_v34 = vpop.f32.mrb[199].mxu1 }
 0x88b   :  { %17511 = vst [vmem:[#allocation95_spill] sm:$0xff] %v14305_v34  ;;  %4437 = vmax.xlane.f32.xlu1 %v14283_v0 }
 0x88f   :  { %v14308_v27 = vpop.f32.mrb[200].mxu1  ;;  %4433 = vmax.xlane.f32.xlu1 %v14285_v52 }
 0x890   :  { %17512 = vst [vmem:[#allocation46_spill] sm:$0xff] %v14308_v27  ;;  %v14311_v54 = vpop.f32.mrb[201].mxu1 }
 0x891   :  { %17513 = vst [vmem:[#allocation81_spill] sm:$0xff] %v14311_v54  ;;  %v14313_v29 = vpop.f32.mrb[202].mxu1 }
 0x892   :  { %17514 = vst [vmem:[#allocation96_spill] sm:$0xff] %v14313_v29  ;;  %v14315_v16 = vpop.f32.mrb[203].mxu1 }
 0x893   :  { %17515 = vst [vmem:[#allocation86_spill] sm:$0xff] %v14315_v16 }
 0x897   :  { %v14317_v30 = vpop.f32.mrb[204].mxu1 }
 0x898   :  { %17516 = vst [vmem:[#allocation82_spill] sm:$0xff] %v14317_v30  ;;  %v14319_v48 = vpop.f32.mrb[205].mxu1 }
 0x899   :  { %17517 = vst [vmem:[#allocation97_spill] sm:$0xff] %v14319_v48  ;;  %v14321_v46 = vpop.f32.mrb[206].mxu1 }
 0x89a   :  { %17518 = vst [vmem:[#allocation98_spill] sm:$0xff] %v14321_v46  ;;  %v14323_v59 = vpop.f32.mrb[207].mxu1 }
 0x89b   :  { %17519 = vst [vmem:[#allocation83_spill] sm:$0xff] %v14323_v59 }
 0x8a0   :  { %3636 = vrot.lane.b32.xlu1 %v14166_v63, %s11930_s19 }
 0x8cd   :  { %v4412_v27 = vpop.xlane.xlu0 %4411 }
 0x8ce   :  { %v4441_v50 = vsub.f32 %v10420_v5, %v4412_v27  ;;  %v4408_v6 = vpop.xlane.xlu1 %4407 }
 0x8cf   :  { %v4439_v34 = vsub.f32 %v4344_v55, %v4408_v6 }
 0x8d0   :  { %v4459_v54 = vmul.f32 1.442695, %v4441_v50 }
 0x8d1   :  { %v4410_v43 = vpop.xlane.xlu0 %4409  ;;  %v4455_v29 = vmul.f32 1.442695, %v4439_v34 }
 0x8d2   :  { %11475 = vpow2.f32 %v4459_v54  ;;  %v4414_v1 = vpop.xlane.xlu1 %4413  ;;  %v4440_v30 = vsub.f32 %v14254_v32, %v4410_v43 }
 0x8d3   :  { %v4442_v16 = vsub.f32 %v10421_v60, %v4414_v1  ;;  %11477 = vpow2.f32 %v4455_v29 }
 0x8d4   :  { %v4457_v3 = vmul.f32 1.442695, %v4440_v30 }
 0x8d5   :  { %v4461_v48 = vmul.f32 1.442695, %v4442_v16  ;;  %v4420_v23 = vpop.xlane.xlu0 %4419 }
 0x8d6   :  { %v4445_v46 = vsub.f32 %v10424_v56, %v4420_v23 }
 0x8d7   :  { %v4422_v59 = vpop.xlane.xlu1 %4421  ;;  %11479 = vpow2.f32 %v4461_v48 }
 0x8d8   :  { %v4467_v37 = vmul.f32 1.442695, %v4445_v46  ;;  %v4446_v63 = vsub.f32 %v14259_v36, %v4422_v59 }
 0x8d9   :  { %v4416_v5 = vpop.xlane.xlu0 %4415 }
 0x8da   :  { %11481 = vpow2.f32 %v4467_v37  ;;  %v4443_v6 = vsub.f32 %v14257_v38, %v4416_v5  ;;  %v4469_v16 = vmul.f32 1.442695, %v4446_v63 }
 0x8db   :  { %v4418_v50 = vpop.xlane.xlu1 %4417  ;;  %11483 = vpow2.f32 %v4457_v3 }
 0x8dc   :  { %v14330_v34 = vpop.eup %11475  ;;  %v4463_v1 = vmul.f32 1.442695, %v4443_v6  ;;  %v4444_v43 = vsub.f32 %v14262_v31, %v4418_v50 }
 0x8dd   :  { %4491 = vadd.xlane.f32.xlu1 %v14330_v34  ;;  %v4428_v23 = vpop.xlane.xlu0 %4427  ;;  %v14335_v30 = vpop.eup %11477 }
 0x8de   :  { %11485 = vpow2.f32 %v4463_v1  ;;  %v4465_v46 = vmul.f32 1.442695, %v4444_v43  ;;  %v4449_v48 = vsub.f32 %v14266_v15, %v4428_v23 }
 0x8df   :  { %v4430_v59 = vpop.xlane.xlu1 %4429  ;;  %11487 = vpow2.f32 %v4469_v16 }
 0x8e0   :  { %11489 = vpow2.f32 %v4465_v46  ;;  %v4475_v29 = vmul.f32 1.442695, %v4449_v48  ;;  %v4450_v38 = vsub.f32 %v14271_v19, %v4430_v59 }
 0x8e1   :  { %4487 = vadd.xlane.f32.xlu1 %v14335_v30  ;;  %v4424_v37 = vpop.xlane.xlu0 %4423  ;;  %v14339_v3 = vpop.eup %11479 }
 0x8e2   :  { %v4447_v55 = vsub.f32 %v14269_v33, %v4424_v37  ;;  %11491 = vpow2.f32 %v4475_v29  ;;  %v14385_v37 = vld [vmem:[%s17064_s3 + $0xc0] sm:$0xff]  }
 0x8e3   :  { %v4426_v60 = vpop.xlane.xlu1 %4425  ;;  %10466 = vmatprep.subr.bf16.mxu0 %v14385_v37 }
 0x8e4   :  { %v14341_v32 = vpop.eup %11481  ;;  %v4448_v56 = vsub.f32 %v14274_v41, %v4426_v60  ;;  %v4471_v31 = vmul.f32 1.442695, %v4447_v55  ;;  %v4477_v41 = vmul.f32 1.442695, %v4450_v38 }
 0x8e5   :  { %4493 = vadd.xlane.f32.xlu1 %v14339_v3  ;;  %4499 = vadd.xlane.f32.xlu0 %v14341_v32  ;;  %v4436_v36 = vpop.xlane.xlu0 %4435  ;;  %v14348_v33 = vpop.eup %11483 }
 0x8e6   :  { %v4473_v15 = vmul.f32 1.442695, %v4448_v56  ;;  %v4453_v27 = vsub.f32 %v14278_v4, %v4436_v36 }
 0x8e7   :  { %v4166_v43 = vpop.permute.xlu1 %4165 }
 0x8e8   :  { %v14350_v54 = vpop.eup %11485  ;;  %11493 = vpow2.f32 %v4473_v15  ;;  %v4483_v63 = vmul.f32 1.442695, %v4453_v27 }
 0x8e9   :  { %4489 = vadd.xlane.f32.xlu1 %v14348_v33  ;;  %4495 = vadd.xlane.f32.xlu0 %v14350_v54  ;;  %v4432_v19 = vpop.xlane.xlu0 %4431  ;;  %11495 = vpow2.f32 %v4471_v31  ;;  %v14355_v6 = vpop.eup %11487 }
 0x8ea   :  { %v4451_v5 = vsub.f32 %v14281_v42, %v4432_v19  ;;  %v14357_v50 = vpop.eup %11489  ;;  %11497 = vpow2.f32 %v4483_v63 }
 0x8eb   :  { %11499 = vpow2.f32 %v4477_v41 }
 0x8ec   :  { %v4479_v4 = vmul.f32 1.442695, %v4451_v5  ;;  %v14363_v42 = vpop.eup %11491 }
 0x8ed   :  { %4497 = vadd.xlane.f32.xlu1 %v14357_v50  ;;  %4501 = vadd.xlane.f32.xlu0 %v14355_v6  ;;  %v3635_v1 = vpop.permute.xlu0 %3634 }
 0x8ee   :  { %3683 = vst.msk [vmem:[#allocation3] sm:$0xff] %vm3682_vm3, %v3635_v1  ;;  %11501 = vpow2.f32 %v4479_v4 }
 0x8ef   :  { %4214 = vst.msk [vmem:[#allocation3] sm:$0xff] %vm4213_vm4, %v4166_v43  ;;  %v10965_v43 = vld [vmem:[%s17064_s3 + $0xd0] sm:$0xff]  }
 0x8f1   :  { %4507 = vadd.xlane.f32.xlu0 %v14363_v42 }
 0x8f2   :  { %v14366_v16 = vpop.eup %11493 }
 0x8f3   :  { %4505 = vadd.xlane.f32.xlu1 %v14366_v16  ;;  %v14369_v23 = vpop.eup %11495 }
 0x8f4   :  { %v14372_v46 = vpop.eup %11497 }
 0x8f5   :  { %4503 = vadd.xlane.f32.xlu0 %v14369_v23  ;;  %v14375_v48 = vpop.eup %11499 }
 0x8f7   :  { %4515 = vadd.xlane.f32.xlu1 %v14372_v46 }
 0x8f8   :  { %v14378_v59 = vpop.eup %11501 }
 0x8f9   :  { %4509 = vadd.xlane.f32.xlu0 %v14375_v48 }
 0x8fb   :  { %4511 = vadd.xlane.f32.xlu1 %v14378_v59 }
 0x8fd   :  { %5196 = vmax.xlane.f32.xlu0 %v14293_v57 }
 0x90c   :  { %4167 = vrot.lane.b32.xlu1 %v14228_v49, %s11929_s18 }
 0x918   :  { %v4438_v29 = vpop.xlane.xlu1 %4437 }
 0x919   :  { %v4454_v55 = vsub.f32 %v14283_v0, %v4438_v29 }
 0x91b   :  { %v4485_v60 = vmul.f32 1.442695, %v4454_v55 }
 0x91c   :  { %v4434_v56 = vpop.xlane.xlu1 %4433 }
 0x91d   :  { %11503 = vpow2.f32 %v4485_v60  ;;  %v4452_v38 = vsub.f32 %v14285_v52, %v4434_v56 }
 0x91f   :  { %v4481_v36 = vmul.f32 1.442695, %v4452_v38 }
 0x920   :  { %v3637_v31 = vpop.permute.xlu1 %3636 }
 0x921   :  { %11505 = vpow2.f32 %v4481_v36  ;;  %3684 = vst.msk [vmem:[#allocation3 + $0x8] sm:$0xff] %vm3682_vm3, %v3637_v31 }
 0x927   :  { %v14393_v15 = vpop.eup %11503 }
 0x928   :  { %4517 = vadd.xlane.f32.xlu0 %v14393_v15 }
 0x92b   :  { %v14396_v27 = vpop.eup %11505 }
 0x92c   :  { %4513 = vadd.xlane.f32.xlu0 %v14396_v27 }
 0x930   :  { %5198 = vmax.xlane.f32.xlu1 %v14297_v45 }
 0x934   :  { %5202 = vmax.xlane.f32.xlu1 %v14295_v21 }
 0x942   :  { %3638 = vrot.lane.b32.xlu0 %v14156_v14, %s11930_s19 }
 0x945   :  { %3640 = vrot.lane.b32.xlu1 %v14160_v28, %s11930_s19 }
 0x949   :  { %4171 = vrot.lane.b32.xlu1 %v14226_v47, %s11929_s18 }
 0x94d   :  { %3644 = vrot.lane.b32.xlu1 %v14180_v61, %s11930_s19 }
 0x951   :  { %4175 = vrot.lane.b32.xlu1 %v14236_v24, %s11929_s18 }
 0x955   :  { %3648 = vrot.lane.b32.xlu1 %v14176_v35, %s11930_s19 }
 0x959   :  { %4179 = vrot.lane.b32.xlu1 %v14234_v53, %s11929_s18 }
 0x95d   :  { %3652 = vrot.lane.b32.xlu1 %v14192_v40, %s11930_s19 }
 0x961   :  { %5200 = vmax.xlane.f32.xlu0 %v14291_v12  ;;  %4183 = vrot.lane.b32.xlu1 %v14244_v51, %s11929_s18 }
 0x965   :  { %3656 = vrot.lane.b32.xlu1 %v14188_v9, %s11930_s19 }
 0x969   :  { %4187 = vrot.lane.b32.xlu1 %v14242_v13, %s11929_s18 }
 0x96a   :  { %v4492_v14 = vpop.xlane.xlu1 %4491 }
 0x96d   :  { %3660 = vrot.lane.b32.xlu1 %v14204_v44, %s11930_s19 }
 0x96e   :  { %v4488_v28 = vpop.xlane.xlu1 %4487 }
 0x971   :  { %4191 = vrot.lane.b32.xlu1 %v14252_v22, %s11929_s18 }
 0x972   :  { %v4494_v35 = vpop.xlane.xlu1 %4493  ;;  %v4500_v61 = vpop.xlane.xlu0 %4499 }
 0x973   :  { %11507 = vrcp.f32 %v4494_v35  ;;  %v17522_v35 = vld [vmem:[#allocation94_spill] sm:$0xff] }
 0x974   :  { %11509 = vrcp.f32 %v4488_v28 }
 0x975   :  { %3664 = vrot.lane.b32.xlu1 %v14202_v20, %s11930_s19  ;;  %11511 = vrcp.f32 %v4492_v14  ;;  %v10967_v14 = vld [vmem:[%s17064_s3 + $0xe0] sm:$0xff]  }
 0x976   :  { %v4490_v9 = vpop.xlane.xlu1 %4489  ;;  %v4496_v40 = vpop.xlane.xlu0 %4495 }
 0x977   :  { %11513 = vrcp.f32 %v4490_v9  ;;  %4169 = vrot.lane.b32.xlu0 %v14224_v25, %s11929_s18  ;;  %v17525_v9 = vld [vmem:[#allocation91_spill] sm:$0xff] }
 0x978   :  { %11515 = vrcp.f32 %v4496_v40  ;;  %v17526_v40 = vld [vmem:[#allocation96_spill] sm:$0xff] }
 0x979   :  { %4195 = vrot.lane.b32.xlu1 %v14250_v58, %s11929_s18 }
 0x97a   :  { %v4498_v44 = vpop.xlane.xlu1 %4497  ;;  %v4502_v47 = vpop.xlane.xlu0 %4501 }
 0x97b   :  { %11517 = vrcp.f32 %v4498_v44  ;;  %3642 = vrot.lane.b32.xlu0 %v14174_v26, %s11930_s19  ;;  %v17527_v44 = vld [vmem:[#allocation83_spill] sm:$0xff] }
 0x97c   :  { %11519 = vrcp.f32 %v4502_v47  ;;  %v17528_v47 = vld [vmem:[#allocation98_spill] sm:$0xff] }
 0x97d   :  { %v11508_v49 = vpop.eup %11507  ;;  %11521 = vrcp.f32 %v4500_v61  ;;  %v17524_v61 = vld [vmem:[#allocation86_spill] sm:$0xff] }
 0x97e   :  { %v4508_v20 = vpop.xlane.xlu0 %4507  ;;  %v11510_v53 = vpop.eup %11509  ;;  %v4538_v51 = vmul.f32 %v11508_v49, %v14339_v3  ;;  %v10964_v3 = vld [vmem:[%s17064_s3 + $0xc8] sm:$0xff]  }
 0x97f   :  { %4173 = vrot.lane.b32.xlu0 %v14232_v11, %s11929_s18  ;;  %v11512_v24 = vpop.eup %11511  ;;  %v4535_v22 = vmul.f32 %v11510_v53, %v14335_v30 }
 0x980   :  { %v4506_v25 = vpop.xlane.xlu1 %4505  ;;  %v4537_v52 = vmul.f32 %v11512_v24, %v14330_v34 }
 0x981   :  { %v11514_v13 = vpop.eup %11513  ;;  %11523 = vrcp.f32 %v4506_v25 }
 0x982   :  { %v4504_v58 = vpop.xlane.xlu0 %4503  ;;  %v4536_v0 = vmul.f32 %v11514_v13, %v14348_v33  ;;  %v11516_v26 = vpop.eup %11515  ;;  %v4552_v41 = vpack.c.bf16 %v4538_v51, %v4537_v52 }
 0x983   :  { %11525 = vrcp.f32 %v4504_v58  ;;  %3646 = vrot.lane.b32.xlu0 %v14172_v2, %s11930_s19  ;;  %v4539_v5 = vmul.f32 %v11516_v26, %v14350_v54  ;;  %v17529_v58 = vld [vmem:[#allocation58_spill] sm:$0xff] }
 0x984   :  { %v14444_v63 = vpop.xlane.xlu1 %4515  ;;  %v4551_v11 = vpack.c.bf16 %v4536_v0, %v4535_v22  ;;  %11527 = vrcp.f32 %v4508_v20 }
 0x985   :  { %v11518_v19 = vpop.eup %11517 }
 0x986   :  { %v11520_v30 = vpop.eup %11519  ;;  %10450 = vmatprep.mubr.bf16.mxu0 %v4551_v11  ;;  %v4510_v33 = vpop.xlane.xlu0 %4509  ;;  %v4540_v34 = vmul.f32 %v11518_v19, %v14357_v50  ;;  %v17530_v19 = vld [vmem:[#allocation95_spill] sm:$0xff] }
 0x987   :  { %11529 = vrcp.f32 %v4510_v33  ;;  %10451 = vmatmul.mubr.bf16.vlgmr.msra.gmra.mrb[144].mxu0 %v4552_v41  ;;  %4177 = vrot.lane.b32.xlu0 %v14230_v62, %s11929_s18  ;;  %v11522_v2 = vpop.eup %11521  ;;  %v4542_v29 = vmul.f32 %v11520_v30, %v14355_v6  ;;  %v10966_v6 = vld [vmem:[%s17064_s3 + $0xd8] sm:$0xff]   ;;  %v17531_v41 = vld [vmem:[#allocation62_spill] sm:$0xff] }
 0x988   :  { %10467 = vmatpush3.bf16.msra.mxu0 %v14385_v37  ;;  %v4512_v4 = vpop.xlane.xlu1 %4511  ;;  %v4553_v1 = vpack.c.bf16 %v4540_v34, %v4539_v5  ;;  %v4541_v62 = vmul.f32 %v11522_v2, %v14341_v32  ;;  %v17534_v2 = vld [vmem:[#allocation46_spill] sm:$0xff] }
 0x989   :  { %10468 = vmatprep.subr.bf16.mxu0 %v10964_v3 }
 0x98a   :  { %10454 = vmatprep.mubr.bf16.mxu0 %v4553_v1  ;;  %v14458_v54 = vpop.xlane.xlu0 %5196  ;;  %v4554_v56 = vpack.c.bf16 %v4542_v29, %v4541_v62  ;;  %v17536_v29 = vld [vmem:[#allocation82_spill] sm:$0xff] }
 0x98b   :  { %v11524_v50 = vpop.eup %11523  ;;  %v5228_v55 = vsub.f32 %v14293_v57, %v14458_v54  ;;  %3650 = vrot.lane.b32.xlu0 %v14186_v7, %s11930_s19 }
 0x98c   :  { %10469 = vmatpush3.bf16.msra.mxu0 %v10964_v3  ;;  %v4168_v37 = vpop.permute.xlu1 %4167  ;;  %v4544_v36 = vmul.f32 %v11524_v50, %v14366_v16 }
 0x98d   :  { %v11526_v60 = vpop.eup %11525  ;;  %4215 = vst.msk [vmem:[#allocation3 + $0x8] sm:$0xff] %vm4213_vm4, %v4168_v37  ;;  %10470 = vmatprep.subr.bf16.mxu0 %v10965_v43 }
 0x98e   :  { %v4543_v38 = vmul.f32 %v11526_v60, %v14369_v23  ;;  %v11528_v31 = vpop.eup %11527 }
 0x98f   :  { %10455 = vmatmul.mubr.bf16.gmra.mrb[148].mxu0 %v4554_v56  ;;  %4181 = vrot.lane.b32.xlu0 %v14240_v18, %s11929_s18  ;;  %v4545_v28 = vmul.f32 %v11528_v31, %v14363_v42  ;;  %v10968_v18 = vld [vmem:[%s17064_s3 + $0xe8] sm:$0xff]   ;;  %v10969_v42 = vld [vmem:[%s17064_s3 + $0xf0] sm:$0xff]  }
 0x990   :  { %10471 = vmatpush3.bf16.msra.mxu0 %v10965_v43  ;;  %v4555_v7 = vpack.c.bf16 %v4544_v36, %v4543_v38 }
 0x991   :  { %v11530_v32 = vpop.eup %11529  ;;  %10472 = vmatprep.subr.bf16.mxu0 %v10966_v6 }
 0x992   :  { %10458 = vmatprep.mubr.bf16.mxu0 %v4555_v7  ;;  %v4546_v23 = vmul.f32 %v11530_v32, %v14375_v48  ;;  %v17520_v48 = vld [vmem:[#allocation90_spill] sm:$0xff] }
 0x993   :  { %3654 = vrot.lane.b32.xlu0 %v14184_v8, %s11930_s19  ;;  %v10970_v8 = vld [vmem:[%s17064_s3 + $0xf8] sm:$0xff]  }
 0x994   :  { %10473 = vmatpush3.bf16.msra.mxu0 %v10966_v6  ;;  %v4556_v16 = vpack.c.bf16 %v4546_v23, %v4545_v28  ;;  %v5244_v23 = vmul.f32 1.442695, %v5228_v55 }
 0x995   :  { %10474 = vmatprep.subr.bf16.mxu0 %v10967_v14 }
 0x997   :  { %10459 = vmatmul.mubr.bf16.gmra.mrb[152].mxu0 %v4556_v16  ;;  %4185 = vrot.lane.b32.xlu0 %v14238_v39, %s11929_s18  ;;  %v17521_v39 = vld [vmem:[#allocation93_spill] sm:$0xff] }
 0x998   :  { %10475 = vmatpush3.bf16.msra.mxu0 %v10967_v14 }
 0x999   :  { %10476 = vmatprep.subr.bf16.mxu0 %v10968_v18 }
 0x99b   :  { %3658 = vrot.lane.b32.xlu0 %v14198_v17, %s11930_s19  ;;  %v17523_v17 = vld [vmem:[#allocation60_spill] sm:$0xff] }
 0x99c   :  { %10477 = vmatpush3.bf16.msra.mxu0 %v10968_v18 }
 0x99d   :  { %5204 = vmax.xlane.f32.xlu1 %v14301_v10  ;;  %10478 = vmatprep.subr.bf16.mxu0 %v10969_v42 }
 0x99f   :  { %4189 = vrot.lane.b32.xlu0 %v17520_v48, %s11929_s18 }
 0x9a0   :  { %10479 = vmatpush3.bf16.msra.mxu0 %v10969_v42 }
 0x9a1   :  { %5210 = vmax.xlane.f32.xlu1 %v17521_v39  ;;  %10480 = vmatprep.subr.bf16.mxu0 %v10970_v8 }
 0x9a3   :  { %3662 = vrot.lane.b32.xlu0 %v17522_v35, %s11930_s19 }
 0x9a4   :  { %10481 = vmatpush3.bf16.msra.mxu0 %v10970_v8 }
 0x9a5   :  { %10530 = vmatprep.subr.bf16.mxu0 %v17523_v17  ;;  %5214 = vmax.xlane.f32.xlu1 %v17524_v61 }
 0x9a7   :  { %4193 = vrot.lane.b32.xlu0 %v17525_v9, %s11929_s18 }
 0x9a9   :  { %5218 = vmax.xlane.f32.xlu1 %v17526_v40 }
 0x9ad   :  { %5222 = vmax.xlane.f32.xlu1 %v17527_v44 }
 0x9b1   :  { %5226 = vmax.xlane.f32.xlu1 %v17528_v47 }
 0x9b5   :  { %v4518_v49 = vpop.xlane.xlu0 %4517 }
 0x9b6   :  { %11531 = vrcp.f32 %v4518_v49 }
 0x9b7   :  { %11533 = vrcp.f32 %v4512_v4  ;;  %v17535_v4 = vld [vmem:[#allocation97_spill] sm:$0xff] }
 0x9b8   :  { %11535 = vrcp.f32 %v14444_v63 }
 0x9b9   :  { %v4514_v20 = vpop.xlane.xlu0 %4513 }
 0x9ba   :  { %11537 = vrcp.f32 %v4514_v20 }
 0x9bd   :  { %v3639_v53 = vpop.permute.xlu0 %3638  ;;  %v5199_v24 = vpop.xlane.xlu1 %5198 }
 0x9be   :  { %3685 = vst.msk [vmem:[#allocation3 + $0x10] sm:$0xff] %vm3682_vm3, %v3639_v53  ;;  %v5229_v50 = vsub.f32 %v14297_v45, %v5199_v24 }
 0x9c0   :  { %v11532_v25 = vpop.eup %11531  ;;  %v5246_v60 = vmul.f32 1.442695, %v5229_v50 }
 0x9c1   :  { %v5203_v13 = vpop.xlane.xlu1 %5202  ;;  %v11534_v51 = vpop.eup %11533  ;;  %v4550_v26 = vmul.f32 %v11532_v25, %v14393_v15  ;;  %v17532_v15 = vld [vmem:[#allocation92_spill] sm:$0xff] }
 0x9c2   :  { %5493 = vrot.lane.b32.xlu1 %v17529_v58, %s11928_s4  ;;  %v11536_v22 = vpop.eup %11535  ;;  %v4547_v11 = vmul.f32 %v11534_v51, %v14378_v59  ;;  %v5231_v1 = vsub.f32 %v14295_v21, %v5203_v13 }
 0x9c3   :  { %v4549_v3 = vmul.f32 %v11536_v22, %v14372_v46 }
 0x9c4   :  { %v11538_v0 = vpop.eup %11537  ;;  %v5250_v62 = vmul.f32 1.442695, %v5231_v1 }
 0x9c5   :  { %v3641_v52 = vpop.permute.xlu1 %3640  ;;  %v4548_v63 = vmul.f32 %v11538_v0, %v14396_v27  ;;  %v4558_v33 = vpack.c.bf16 %v4550_v26, %v4549_v3  ;;  %v17533_v27 = vld [vmem:[#allocation81_spill] sm:$0xff] }
 0x9c6   :  { %3686 = vst.msk [vmem:[#allocation3 + $0x18] sm:$0xff] %vm3682_vm3, %v3641_v52  ;;  %5206 = vmax.xlane.f32.xlu0 %v17530_v19  ;;  %5495 = vrot.lane.b32.xlu1 %v17531_v41, %s11928_s4  ;;  %11539 = vpow2.f32 %v5250_v62 }
 0x9c7   :  { %v4557_v30 = vpack.c.bf16 %v4548_v63, %v4547_v11  ;;  %11541 = vpow2.f32 %v5246_v60 }
 0x9c9   :  { %10462 = vmatprep.mubr.bf16.mxu0 %v4557_v30  ;;  %v4172_v5 = vpop.permute.xlu1 %4171 }
 0x9ca   :  { %4217 = vst.msk [vmem:[#allocation3 + $0x18] sm:$0xff] %vm4213_vm4, %v4172_v5  ;;  %10463 = vmatmul.mubr.bf16.gmra.mrb[156].mxu0 %v4558_v33  ;;  %5208 = vmax.xlane.f32.xlu0 %v17532_v15 }
 0x9cd   :  { %v3645_v59 = vpop.permute.xlu1 %3644 }
 0x9ce   :  { %3688 = vst.msk [vmem:[#allocation3 + $0x28] sm:$0xff] %vm3682_vm3, %v3645_v59  ;;  %5212 = vmax.xlane.f32.xlu0 %v17533_v27 }
 0x9d0   :  { %v14533_v21 = vpop.eup %11539 }
 0x9d1   :  { %v4176_v34 = vpop.permute.xlu1 %4175  ;;  %v14537_v45 = vpop.eup %11541 }
 0x9d2   :  { %4219 = vst.msk [vmem:[#allocation3 + $0x28] sm:$0xff] %vm4213_vm4, %v4176_v34  ;;  %5216 = vmax.xlane.f32.xlu0 %v17534_v2 }
 0x9d5   :  { %v3649_v46 = vpop.permute.xlu1 %3648 }
 0x9d6   :  { %3690 = vst.msk [vmem:[#allocation3 + $0x38] sm:$0xff] %vm3682_vm3, %v3649_v46  ;;  %5220 = vmax.xlane.f32.xlu0 %v17535_v4 }
 0x9d9   :  { %v4180_v43 = vpop.permute.xlu1 %4179 }
 0x9da   :  { %4221 = vst.msk [vmem:[#allocation3 + $0x38] sm:$0xff] %vm4213_vm4, %v4180_v43  ;;  %5224 = vmax.xlane.f32.xlu0 %v17536_v29 }
 0x9dd   :  { %v3653_v37 = vpop.permute.xlu1 %3652 }
 0x9de   :  { %3692 = vst.msk [vmem:[#allocation3 + $0x48] sm:$0xff] %vm3682_vm3, %v3653_v37 }
 0x9e1   :  { %v4184_v56 = vpop.permute.xlu1 %4183 }
 0x9e2   :  { %4223 = vst.msk [vmem:[#allocation3 + $0x48] sm:$0xff] %vm4213_vm4, %v4184_v56 }
 0x9e5   :  { %v3657_v6 = vpop.permute.xlu1 %3656 }
 0x9e6   :  { %3694 = vst.msk [vmem:[#allocation3 + $0x58] sm:$0xff] %vm3682_vm3, %v3657_v6 }
 0x9e9   :  { %v4188_v38 = vpop.permute.xlu1 %4187 }
 0x9ea   :  { %4225 = vst.msk [vmem:[#allocation3 + $0x58] sm:$0xff] %vm4213_vm4, %v4188_v38  ;;  %5282 = vadd.xlane.f32.xlu1 %v14533_v21 }
 0x9ed   :  { %v3661_v36 = vpop.permute.xlu1 %3660 }
 0x9ee   :  { %3696 = vst.msk [vmem:[#allocation3 + $0x68] sm:$0xff] %vm3682_vm3, %v3661_v36  ;;  %v5201_v31 = vpop.xlane.xlu0 %5200  ;;  %5278 = vadd.xlane.f32.xlu1 %v14537_v45 }
 0x9ef   :  { %v5230_v7 = vsub.f32 %v14291_v12, %v5201_v31 }
 0x9f1   :  { %v5248_v32 = vmul.f32 1.442695, %v5230_v7  ;;  %v4192_v14 = vpop.permute.xlu1 %4191 }
 0x9f2   :  { %4227 = vst.msk [vmem:[#allocation3 + $0x68] sm:$0xff] %vm4213_vm4, %v4192_v14  ;;  %v4170_v28 = vpop.permute.xlu0 %4169 }
 0x9f3   :  { %11543 = vpow2.f32 %v5248_v32  ;;  %4216 = vst.msk [vmem:[#allocation3 + $0x10] sm:$0xff] %vm4213_vm4, %v4170_v28 }
 0x9f4   :  { %11545 = vpow2.f32 %v5244_v23 }
 0x9f5   :  { %v3665_v16 = vpop.permute.xlu1 %3664 }
 0x9f6   :  { %3698 = vst.msk [vmem:[#allocation3 + $0x78] sm:$0xff] %vm3682_vm3, %v3665_v16  ;;  %v3643_v18 = vpop.permute.xlu0 %3642 }
 0x9f7   :  { %3687 = vst.msk [vmem:[#allocation3 + $0x20] sm:$0xff] %vm3682_vm3, %v3643_v18 }
 0x9f9   :  { %v4196_v12 = vpop.permute.xlu1 %4195 }
 0x9fa   :  { %4229 = vst.msk [vmem:[#allocation3 + $0x78] sm:$0xff] %vm4213_vm4, %v4196_v12  ;;  %v4174_v42 = vpop.permute.xlu0 %4173 }
 0x9fb   :  { %4218 = vst.msk [vmem:[#allocation3 + $0x20] sm:$0xff] %vm4213_vm4, %v4174_v42 }
 0x9fd   :  { %v14551_v8 = vpop.eup %11543 }
 0x9fe   :  { %v3647_v57 = vpop.permute.xlu0 %3646  ;;  %5280 = vadd.xlane.f32.xlu0 %v14551_v8  ;;  %v14555_v54 = vpop.eup %11545 }
 0x9ff   :  { %3689 = vst.msk [vmem:[#allocation3 + $0x30] sm:$0xff] %vm3682_vm3, %v3647_v57 }
 0xa02   :  { %v4178_v55 = vpop.permute.xlu0 %4177  ;;  %5276 = vadd.xlane.f32.xlu0 %v14555_v54 }
 0xa03   :  { %4220 = vst.msk [vmem:[#allocation3 + $0x30] sm:$0xff] %vm4213_vm4, %v4178_v55 }
 0xa06   :  { %v3651_v48 = vpop.permute.xlu0 %3650 }
 0xa07   :  { %3691 = vst.msk [vmem:[#allocation3 + $0x40] sm:$0xff] %vm3682_vm3, %v3651_v48 }
 0xa0a   :  { %v4182_v35 = vpop.permute.xlu0 %4181 }
 0xa0b   :  { %4222 = vst.msk [vmem:[#allocation3 + $0x40] sm:$0xff] %vm4213_vm4, %v4182_v35 }
 0xa0e   :  { %v3655_v9 = vpop.permute.xlu0 %3654 }
 0xa0f   :  { %3693 = vst.msk [vmem:[#allocation3 + $0x50] sm:$0xff] %vm3682_vm3, %v3655_v9 }
 0xa12   :  { %v4186_v49 = vpop.permute.xlu0 %4185 }
 0xa13   :  { %4224 = vst.msk [vmem:[#allocation3 + $0x50] sm:$0xff] %vm4213_vm4, %v4186_v49 }
 0xa16   :  { %v3659_v20 = vpop.permute.xlu0 %3658 }
 0xa17   :  { %3695 = vst.msk [vmem:[#allocation3 + $0x60] sm:$0xff] %vm3682_vm3, %v3659_v20 }
 0xa1a   :  { %v4190_v53 = vpop.permute.xlu0 %4189 }
 0xa1b   :  { %4226 = vst.msk [vmem:[#allocation3 + $0x60] sm:$0xff] %vm4213_vm4, %v4190_v53 }
 0xa1e   :  { %v3663_v24 = vpop.permute.xlu0 %3662 }
 0xa1f   :  { %3697 = vst.msk [vmem:[#allocation3 + $0x70] sm:$0xff] %vm3682_vm3, %v3663_v24 }
 0xa22   :  { %v4194_v25 = vpop.permute.xlu0 %4193 }
 0xa23   :  { %4228 = vst.msk [vmem:[#allocation3 + $0x70] sm:$0xff] %vm4213_vm4, %v4194_v25 }
 0xa2a   :  { %v5205_v51 = vpop.xlane.xlu1 %5204 }
 0xa2b   :  { %v5232_v0 = vsub.f32 %v14301_v10, %v5205_v51  ;;  %v17537_v51 = vld [vmem:[#allocation66_spill] sm:$0xff] }
 0xa2d   :  { %v5252_v3 = vmul.f32 1.442695, %v5232_v0 }
 0xa2e   :  { %v5211_v31 = vpop.xlane.xlu1 %5210 }
 0xa2f   :  { %v5235_v23 = vsub.f32 %v17521_v39, %v5211_v31 }
 0xa31   :  { %v5258_v42 = vmul.f32 1.442695, %v5235_v23 }
 0xa32   :  { %v5215_v32 = vpop.xlane.xlu1 %5214 }
 0xa33   :  { %v5237_v18 = vsub.f32 %v17524_v61, %v5215_v32 }
 0xa35   :  { %v5262_v57 = vmul.f32 1.442695, %v5237_v18 }
 0xa36   :  { %v5219_v28 = vpop.xlane.xlu1 %5218 }
 0xa3a   :  { %v5223_v12 = vpop.xlane.xlu1 %5222 }
 0xa3b   :  { %v5241_v55 = vsub.f32 %v17527_v44, %v5223_v12 }
 0xa3d   :  { %v5270_v35 = vmul.f32 1.442695, %v5241_v55 }
 0xa3e   :  { %v14622_v0 = vpop.xlane.xlu1 %5226 }
 0xa53   :  { %v5207_v13 = vpop.xlane.xlu0 %5206 }
 0xa54   :  { %v5233_v30 = vsub.f32 %v17530_v19, %v5207_v13 }
 0xa56   :  { %v5254_v59 = vmul.f32 1.442695, %v5233_v30 }
 0xa57   :  { %v5209_v22 = vpop.xlane.xlu0 %5208 }
 0xa58   :  { %v5234_v26 = vsub.f32 %v17532_v15, %v5209_v22 }
 0xa5a   :  { %v5256_v52 = vmul.f32 1.442695, %v5234_v26  ;;  %v10452_v11 = vpop.f32.mrb[144].mxu0 }
 0xa5b   :  { %v4617_v63 = vpop.f32.mrb[145].mxu0  ;;  %4700 = vrot.lane.b32.xlu0 %v10452_v11, %s11928_s4  ;;  %v5213_v7 = vpop.xlane.xlu0 %5212 }
 0xa5c   :  { %11547 = vpow2.f32 %v5256_v52  ;;  %v10453_v33 = vpop.f32.mrb[146].mxu0  ;;  %v14626_v52 = vpop.permute.xlu1 %5493 }
 0xa5d   :  { %v4620_v5 = vpop.f32.mrb[147].mxu0  ;;  %11549 = vpow2.f32 %v5252_v3  ;;  %v5236_v3 = vsub.f32 %v17533_v27, %v5213_v7 }
 0xa5e   :  { %11551 = vpow2.f32 %v5254_v59  ;;  %v5239_v59 = vsub.f32 %v17526_v40, %v5219_v28 }
 0xa5f   :  { %4696 = vrot.lane.b32.xlu0 %v4617_v63, %s11928_s4  ;;  %v5217_v14 = vpop.xlane.xlu0 %5216  ;;  %11553 = vpow2.f32 %v5258_v42 }
 0xa60   :  { %11555 = vpow2.f32 %v5262_v57  ;;  %v14629_v63 = vpop.permute.xlu1 %5495 }
 0xa61   :  { %11557 = vpow2.f32 %v5270_v35 }
 0xa62   :  { %v10456_v34 = vpop.f32.mrb[148].mxu0 }
 0xa63   :  { %v4633_v46 = vpop.f32.mrb[149].mxu0  ;;  %4708 = vrot.lane.b32.xlu0 %v10456_v34, %s11928_s4  ;;  %v14596_v16 = vpop.xlane.xlu0 %5220 }
 0xa64   :  { %v10457_v10 = vpop.f32.mrb[150].mxu0  ;;  %v5240_v35 = vsub.f32 %v17535_v4, %v14596_v16 }
 0xa65   :  { %v4636_v15 = vpop.f32.mrb[151].mxu0 }
 0xa66   :  { %v14573_v1 = vpop.eup %11547 }
 0xa67   :  { %4704 = vrot.lane.b32.xlu0 %v4633_v46, %s11928_s4  ;;  %5288 = vadd.xlane.f32.xlu1 %v14573_v1  ;;  %v14577_v19 = vpop.eup %11549  ;;  %v5225_v48 = vpop.xlane.xlu0 %5224 }
 0xa68   :  { %v14581_v60 = vpop.eup %11551  ;;  %v5242_v9 = vsub.f32 %v17536_v29, %v5225_v48 }
 0xa69   :  { %v14601_v20 = vpop.eup %11553 }
 0xa6a   :  { %v10460_v43 = vpop.f32.mrb[152].mxu0  ;;  %v5272_v49 = vmul.f32 1.442695, %v5242_v9  ;;  %v14605_v53 = vpop.eup %11555 }
 0xa6b   :  { %v4649_v50 = vpop.f32.mrb[153].mxu0  ;;  %4716 = vrot.lane.b32.xlu0 %v10460_v43, %s11928_s4  ;;  %5284 = vadd.xlane.f32.xlu1 %v14577_v19  ;;  %v14609_v61 = vpop.eup %11557 }
 0xa6c   :  { %v10461_v62 = vpop.f32.mrb[154].mxu0  ;;  %11559 = vpow2.f32 %v5272_v49  ;;  %v5268_v49 = vmul.f32 1.442695, %v5240_v35 }
 0xa6d   :  { %v4652_v37 = vpop.f32.mrb[155].mxu0 }
 0xa6f   :  { %4712 = vrot.lane.b32.xlu0 %v4649_v50, %s11928_s4  ;;  %5286 = vadd.xlane.f32.xlu1 %v14581_v60 }
 0xa76   :  { %v14614_v29 = vpop.eup %11559 }
 0xa77   :  { %v14632_v30 = vpop.xlane.xlu1 %5282 }
 0xa7b   :  { %v14636_v46 = vpop.xlane.xlu1 %5278 }
 0xa80   :  { %4702 = vrot.lane.b32.xlu1 %v10453_v33, %s11928_s4  ;;  %v5260_v33 = vmul.f32 1.442695, %v5236_v3 }
 0xa82   :  { %11561 = vpow2.f32 %v5260_v33  ;;  %v17539_v33 = vld [vmem:[#allocation78_spill] sm:$0xff] }
 0xa84   :  { %4698 = vrot.lane.b32.xlu1 %v4620_v5, %s11928_s4  ;;  %v5238_v5 = vsub.f32 %v17534_v2, %v5217_v14  ;;  %v17538_v14 = vld [vmem:[#allocation68_spill] sm:$0xff] }
 0xa86   :  { %v5264_v34 = vmul.f32 1.442695, %v5238_v5  ;;  %v17540_v5 = vld [vmem:[#allocation67_spill] sm:$0xff] }
 0xa88   :  { %4710 = vrot.lane.b32.xlu1 %v10457_v10, %s11928_s4  ;;  %v5266_v10 = vmul.f32 1.442695, %v5239_v59  ;;  %11563 = vpow2.f32 %v5264_v34  ;;  %v17541_v59 = vld [vmem:[#allocation75_spill] sm:$0xff] }
 0xa89   :  { %v17542_v34 = vld [vmem:[#allocation79_spill] sm:$0xff] }
 0xa8a   :  { %11565 = vpow2.f32 %v5266_v10  ;;  %v17543_v10 = vld [vmem:[#allocation64_spill] sm:$0xff] }
 0xa8b   :  { %v14603_v39 = vpop.xlane.xlu0 %5280  ;;  %11567 = vpow2.f32 %v5268_v49 }
 0xa8c   :  { %4706 = vrot.lane.b32.xlu1 %v4636_v15, %s11928_s4  ;;  %v14642_v50 = vpop.eup %11561 }
 0xa8f   :  { %v14611_v44 = vpop.xlane.xlu0 %5276 }
 0xa90   :  { %4718 = vrot.lane.b32.xlu1 %v10461_v62, %s11928_s4 }
 0xa92   :  { %v14647_v40 = vpop.eup %11563 }
 0xa94   :  { %4714 = vrot.lane.b32.xlu1 %v4652_v37, %s11928_s4  ;;  %v14650_v37 = vpop.eup %11565 }
 0xa9d   :  { %v10464_v56 = vpop.f32.mrb[156].mxu0 }
 0xa9e   :  { %v4665_v6 = vpop.f32.mrb[157].mxu0  ;;  %4724 = vrot.lane.b32.xlu0 %v10464_v56, %s11928_s4 }
 0xa9f   :  { %v10465_v38 = vpop.f32.mrb[158].mxu0 }
 0xaa0   :  { %v4668_v36 = vpop.f32.mrb[159].mxu0 }
 0xaa1   :  { %4722 = vrot.lane.b32.xlu1 %v4668_v36, %s11928_s4 }
 0xaa2   :  { %4720 = vrot.lane.b32.xlu0 %v4665_v6, %s11928_s4 }
 0xaa6   :  { %4726 = vrot.lane.b32.xlu0 %v10465_v38, %s11928_s4 }
 0xac5   :  { %5294 = vadd.xlane.f32.xlu0 %v14605_v53  ;;  %5290 = vadd.xlane.f32.xlu1 %v14601_v20 }
 0xac9   :  { %5302 = vadd.xlane.f32.xlu0 %v14609_v61 }
 0xacd   :  { %v4701_v24 = vpop.permute.xlu0 %4700  ;;  %5304 = vadd.xlane.f32.xlu0 %v14614_v29 }
 0xace   :  { %4747 = vst.msk [vmem:[#allocation3 + $0x10] sm:$0xff] %vm4744_vm5, %v4701_v24 }
 0xad1   :  { %v4697_v25 = vpop.permute.xlu0 %4696 }
 0xad2   :  { %4745 = vst.msk [vmem:[#allocation3] sm:$0xff] %vm4744_vm5, %v4697_v25 }
 0xad5   :  { %v4709_v13 = vpop.permute.xlu0 %4708  ;;  %v4763_v32 = vld [vmem:[#allocation3 + $0x10] sm:$0xff] }
 0xad6   :  { %4751 = vst.msk [vmem:[#allocation3 + $0x30] sm:$0xff] %vm4744_vm5, %v4709_v13  ;;  %5497 = vrot.lane.b32.xlu1 %v17537_v51, %s11928_s4 }
 0xad9   :  { %v4705_v22 = vpop.permute.xlu0 %4704  ;;  %v4761_v27 = vld [vmem:[#allocation3] sm:$0xff] }
 0xada   :  { %4749 = vst.msk [vmem:[#allocation3 + $0x20] sm:$0xff] %vm4744_vm5, %v4705_v22 }
 0xadd   :  { %v4717_v26 = vpop.permute.xlu0 %4716  ;;  %v4767_v48 = vld [vmem:[#allocation3 + $0x30] sm:$0xff] }
 0xade   :  { %4755 = vst.msk [vmem:[#allocation3 + $0x50] sm:$0xff] %vm4744_vm5, %v4717_v26  ;;  %v14667_v26 = vpop.eup %11567 }
 0xae1   :  { %v4713_v11 = vpop.permute.xlu0 %4712  ;;  %v4765_v57 = vld [vmem:[#allocation3 + $0x20] sm:$0xff] }
 0xae2   :  { %4753 = vst.msk [vmem:[#allocation3 + $0x40] sm:$0xff] %vm4744_vm5, %v4713_v11 }
 0xae5   :  { %v4771_v13 = vld [vmem:[#allocation3 + $0x50] sm:$0xff] }
 0xae9   :  { %v4769_v24 = vld [vmem:[#allocation3 + $0x40] sm:$0xff] }
 0xaf4   :  { %v14638_v15 = vpop.xlane.xlu1 %5288 }
 0xaf8   :  { %v14640_v43 = vpop.xlane.xlu1 %5284 }
 0xafa   :  { %5292 = vadd.xlane.f32.xlu1 %v14642_v50  ;;  %4777 = vxpose.xlu0.b32.start [1/16] %v4761_v27, 128  ;;  %v5243_v27 = vsub.f32 %v17528_v47, %v14622_v0 }
 0xafc   :  { %v14645_v2 = vpop.xlane.xlu1 %5286 }
 0xafe   :  { %5296 = vadd.xlane.f32.xlu1 %v14647_v40 }
 0xb00   :  { %v4703_v62 = vpop.permute.xlu1 %4702 }
 0xb01   :  { %4748 = vst.msk [vmem:[#allocation3 + $0x18] sm:$0xff] %vm4744_vm5, %v4703_v62  ;;  %v17544_v62 = vld [vmem:[#allocation70_spill] sm:$0xff] }
 0xb02   :  { %5298 = vadd.xlane.f32.xlu1 %v14650_v37 }
 0xb04   :  { %v4699_v56 = vpop.permute.xlu1 %4698 }
 0xb05   :  { %4746 = vst.msk [vmem:[#allocation3 + $0x8] sm:$0xff] %vm4744_vm5, %v4699_v56  ;;  %v5274_v56 = vmul.f32 1.442695, %v5243_v27  ;;  %v17557_v27 = vld [vmem:[#allocation77_spill] sm:$0xff] }
 0xb07   :  { %11569 = vpow2.f32 %v5274_v56 }
 0xb08   :  { %v4711_v6 = vpop.permute.xlu1 %4710  ;;  %v4764_v18 = vld [vmem:[#allocation3 + $0x18] sm:$0xff]  ;;  %11571 = vrcp.f32 %v14611_v44 }
 0xb09   :  { %4752 = vst.msk [vmem:[#allocation3 + $0x38] sm:$0xff] %vm4744_vm5, %v4711_v6  ;;  %v17545_v6 = vld [vmem:[#allocation69_spill] sm:$0xff]  ;;  %11573 = vrcp.f32 %v14636_v46 }
 0xb0a   :  { %11575 = vrcp.f32 %v14603_v39 }
 0xb0b   :  { %11577 = vrcp.f32 %v14645_v2 }
 0xb0c   :  { %v4707_v38 = vpop.permute.xlu1 %4706  ;;  %v4762_v36 = vld [vmem:[#allocation3 + $0x8] sm:$0xff]  ;;  %11579 = vrcp.f32 %v14632_v30 }
 0xb0d   :  { %4750 = vst.msk [vmem:[#allocation3 + $0x28] sm:$0xff] %vm4744_vm5, %v4707_v38  ;;  %4778 = vxpose.xlu0.b32.cont [2/16] %v4762_v36, 128  ;;  %v17546_v38 = vld [vmem:[#allocation74_spill] sm:$0xff]  ;;  %v17547_v36 = vld [vmem:[#allocation73_spill] sm:$0xff]  ;;  %11581 = vrcp.f32 %v14640_v43 }
 0xb10   :  { %v4725_v31 = vpop.permute.xlu0 %4724  ;;  %v4719_v7 = vpop.permute.xlu1 %4718  ;;  %v4768_v9 = vld [vmem:[#allocation3 + $0x38] sm:$0xff] }
 0xb11   :  { %4759 = vst.msk [vmem:[#allocation3 + $0x70] sm:$0xff] %vm4744_vm5, %v4725_v31  ;;  %4756 = vst.msk [vmem:[#allocation3 + $0x58] sm:$0xff] %vm4744_vm5, %v4719_v7  ;;  %4779 = vxpose.xlu0.b32.cont [3/16] %v4763_v32, 128  ;;  %v14694_v31 = vpop.eup %11569  ;;  %v17548_v32 = vld [vmem:[#allocation72_spill] sm:$0xff] }
 0xb13   :  { %5499 = vrot.lane.b32.xlu1 %v17538_v14, %s11928_s4 }
 0xb14   :  { %v4721_v28 = vpop.permute.xlu0 %4720  ;;  %v4715_v23 = vpop.permute.xlu1 %4714  ;;  %v4766_v55 = vld [vmem:[#allocation3 + $0x28] sm:$0xff] }
 0xb15   :  { %4757 = vst.msk [vmem:[#allocation3 + $0x60] sm:$0xff] %vm4744_vm5, %v4721_v28  ;;  %4754 = vst.msk [vmem:[#allocation3 + $0x48] sm:$0xff] %vm4744_vm5, %v4715_v23  ;;  %4780 = vxpose.xlu0.b32.cont [4/16] %v4764_v18, 128  ;;  %v17549_v23 = vld [vmem:[#allocation76_spill] sm:$0xff] }
 0xb18   :  { %v4727_v12 = vpop.permute.xlu0 %4726  ;;  %v4723_v42 = vpop.permute.xlu1 %4722  ;;  %v4772_v22 = vld [vmem:[#allocation3 + $0x58] sm:$0xff]  ;;  %v4775_v4 = vld [vmem:[#allocation3 + $0x70] sm:$0xff] }
 0xb19   :  { %4760 = vst.msk [vmem:[#allocation3 + $0x78] sm:$0xff] %vm4744_vm5, %v4727_v12  ;;  %4758 = vst.msk [vmem:[#allocation3 + $0x68] sm:$0xff] %vm4744_vm5, %v4723_v42  ;;  %4781 = vxpose.xlu0.b32.cont [5/16] %v4765_v57, 128  ;;  %v17550_v42 = vld [vmem:[#allocation80_spill] sm:$0xff] }
 0xb1c   :  { %v4770_v25 = vld [vmem:[#allocation3 + $0x48] sm:$0xff]  ;;  %v4773_v11 = vld [vmem:[#allocation3 + $0x60] sm:$0xff] }
 0xb1d   :  { %4782 = vxpose.xlu0.b32.cont [6/16] %v4766_v55, 128  ;;  %v17551_v55 = vld [vmem:[#allocation57_spill] sm:$0xff] }
 0xb20   :  { %v4774_v3 = vld [vmem:[#allocation3 + $0x68] sm:$0xff]  ;;  %v4776_v16 = vld [vmem:[#allocation3 + $0x78] sm:$0xff] }
 0xb21   :  { %4783 = vxpose.xlu0.b32.cont [7/16] %v4767_v48, 128 }
 0xb25   :  { %4784 = vxpose.xlu0.b32.cont [8/16] %v4768_v9, 128  ;;  %v17552_v9 = vld [vmem:[#allocation61_spill] sm:$0xff] }
 0xb29   :  { %4785 = vxpose.xlu0.b32.cont [9/16] %v4769_v24, 128  ;;  %v17553_v24 = vld [vmem:[#allocation59_spill] sm:$0xff] }
 0xb2d   :  { %4786 = vxpose.xlu0.b32.cont [10/16] %v4770_v25, 128  ;;  %v17554_v25 = vld [vmem:[#allocation65_spill] sm:$0xff] }
 0xb31   :  { %4787 = vxpose.xlu0.b32.cont [11/16] %v4771_v13, 128 }
 0xb35   :  { %4788 = vxpose.xlu0.b32.cont [12/16] %v4772_v22, 128 }
 0xb37   :  { %5300 = vadd.xlane.f32.xlu1 %v14667_v26 }
 0xb39   :  { %4789 = vxpose.xlu0.b32.cont [13/16] %v4773_v11, 128  ;;  %v17555_v11 = vld [vmem:[#allocation71_spill] sm:$0xff] }
 0xb3d   :  { %4790 = vxpose.xlu0.b32.cont [14/16] %v4774_v3, 128 }
 0xb41   :  { %4791 = vxpose.xlu0.b32.cont [15/16] %v4775_v4, 128  ;;  %v17556_v4 = vld [vmem:[#allocation63_spill] sm:$0xff] }
 0xb45   :  { %4792 = vxpose.xlu0.b32.end [16/16] %v4776_v16, 128 }
 0xb48   :  { %5505 = vrot.lane.b32.xlu1 %v17539_v33, %s11928_s4 }
 0xb4c   :  { %5475 = vrot.lane.b32.xlu1 %v17540_v5, %s11928_s4 }
 0xb50   :  { %5479 = vrot.lane.b32.xlu1 %v17541_v59, %s11928_s4 }
 0xb52   :  { %v14697_v47 = vpop.xlane.xlu0 %5294  ;;  %v5291_v16 = vpop.xlane.xlu1 %5290 }
 0xb53   :  { %11583 = vrcp.f32 %v5291_v16 }
 0xb54   :  { %5483 = vrot.lane.b32.xlu1 %v17542_v34, %s11928_s4 }
 0xb56   :  { %v14699_v0 = vpop.xlane.xlu0 %5302 }
 0xb58   :  { %5814 = vrot.lane.b32.xlu1 %v17523_v17, %s11928_s4 }
 0xb5a   :  { %v14701_v7 = vpop.xlane.xlu0 %5304 }
 0xb5c   :  { %5818 = vrot.lane.b32.xlu1 %v17543_v10, %s11928_s4 }
 0xb60   :  { %5822 = vrot.lane.b32.xlu1 %v17544_v62, %s11928_s4 }
 0xb64   :  { %5824 = vrot.lane.b32.xlu1 %v17545_v6, %s11928_s4 }
 0xb68   :  { %5826 = vrot.lane.b32.xlu1 %v17546_v38, %s11928_s4 }
 0xb6c   :  { %5828 = vrot.lane.b32.xlu1 %v17547_v36, %s11928_s4 }
 0xb70   :  { %6033 = vrot.lane.b32.xlu1 %v17531_v41, %s11929_s18 }
 0xb72   :  { %5306 = vadd.xlane.f32.xlu0 %v14694_v31 }
 0xb88   :  { %5501 = vrot.lane.b32.xlu0 %v17548_v32, %s11928_s4 }
 0xb89   :  { %v4793_v28 = vpop.trf.xlu0 }
 0xb8c   :  { %5503 = vrot.lane.b32.xlu0 %v17549_v23, %s11928_s4 }
 0xb8d   :  { %v4794_v18 = vpop.trf.xlu0 }
 0xb8e   :  { %v4809_v12 = vpack.c.bf16 %v4794_v18, %v4793_v28 }
 0xb90   :  { %5507 = vrot.lane.b32.xlu0 %v17550_v42, %s11928_s4  ;;  %10482 = vmatprep.mubr.bf16.mxu0 %v4809_v12  ;;  %v14730_v12 = vpop.permute.xlu1 %5497 }
 0xb91   :  { %v4795_v57 = vpop.trf.xlu0 }
 0xb94   :  { %5469 = vrot.lane.b32.xlu0 %v17551_v55, %s11928_s4 }
 0xb95   :  { %v4796_v48 = vpop.trf.xlu0 }
 0xb96   :  { %v4810_v35 = vpack.c.bf16 %v4796_v48, %v4795_v57  ;;  %v5293_v48 = vpop.xlane.xlu1 %5292 }
 0xb97   :  { %11585 = vrcp.f32 %v5293_v48 }
 0xb98   :  { %5471 = vrot.lane.b32.xlu0 %v17552_v9, %s11928_s4  ;;  %10483 = vmatmul.mubr.bf16.vlgmr.msra.gmra.mrb[160].mxu0 %v4810_v35  ;;  %11587 = vrcp.f32 %v14638_v15 }
 0xb99   :  { %10531 = vmatpush3.bf16.msra.mxu0 %v17523_v17  ;;  %v4797_v49 = vpop.trf.xlu0  ;;  %11589 = vrcp.f32 %v14697_v47 }
 0xb9a   :  { %10532 = vmatprep.subr.bf16.mxu0 %v17553_v24 }
 0xb9c   :  { %5473 = vrot.lane.b32.xlu0 %v17554_v25, %s11928_s4 }
 0xb9d   :  { %10533 = vmatpush3.bf16.msra.mxu0 %v17553_v24  ;;  %v4798_v13 = vpop.trf.xlu0 }
 0xb9e   :  { %10534 = vmatprep.subr.bf16.mxu0 %v17543_v10  ;;  %v4811_v22 = vpack.c.bf16 %v4798_v13, %v4797_v49  ;;  %v5297_v13 = vpop.xlane.xlu1 %5296 }
 0xba0   :  { %5477 = vrot.lane.b32.xlu0 %v17555_v11, %s11928_s4  ;;  %10486 = vmatprep.mubr.bf16.mxu0 %v4811_v22 }
 0xba1   :  { %10535 = vmatpush3.bf16.msra.mxu0 %v17543_v10  ;;  %v4799_v3 = vpop.trf.xlu0 }
 0xba2   :  { %10536 = vmatprep.subr.bf16.mxu0 %v17556_v4 }
 0xba4   :  { %5481 = vrot.lane.b32.xlu0 %v17557_v27, %s11928_s4 }
 0xba5   :  { %10537 = vmatpush3.bf16.msra.mxu0 %v17556_v4  ;;  %v4800_v56 = vpop.trf.xlu0 }
 0xba6   :  { %10538 = vmatprep.subr.bf16.mxu0 %v17544_v62  ;;  %v4812_v28 = vpack.c.bf16 %v4800_v56, %v4799_v3 }
 0xba8   :  { %5816 = vrot.lane.b32.xlu0 %v17553_v24, %s11928_s4  ;;  %10487 = vmatmul.mubr.bf16.gmra.mrb[164].mxu0 %v4812_v28  ;;  %v5299_v28 = vpop.xlane.xlu1 %5298 }
 0xba9   :  { %10539 = vmatpush3.bf16.msra.mxu0 %v17544_v62  ;;  %v4801_v18 = vpop.trf.xlu0  ;;  %11591 = vrcp.f32 %v5299_v28 }
 0xbaa   :  { %10540 = vmatprep.subr.bf16.mxu0 %v17545_v6 }
 0xbac   :  { %5820 = vrot.lane.b32.xlu0 %v17556_v4, %s11928_s4  ;;  %v14748_v44 = vpop.permute.xlu1 %5499 }
 0xbad   :  { %10541 = vmatpush3.bf16.msra.mxu0 %v17545_v6  ;;  %v4802_v57 = vpop.trf.xlu0 }
 0xbae   :  { %10542 = vmatprep.subr.bf16.mxu0 %v17546_v38  ;;  %v4813_v35 = vpack.c.bf16 %v4802_v57, %v4801_v18 }
 0xbb0   :  { %10490 = vmatprep.mubr.bf16.mxu0 %v4813_v35  ;;  %v11572_v35 = vpop.eup %11571 }
 0xbb1   :  { %10543 = vmatpush3.bf16.msra.mxu0 %v17546_v38  ;;  %v4803_v49 = vpop.trf.xlu0  ;;  %v5324_v46 = vmul.f32 %v11572_v35, %v14555_v54 }
 0xbb2   :  { %10544 = vmatprep.subr.bf16.mxu0 %v17547_v36 }
 0xbb5   :  { %10545 = vmatpush3.bf16.msra.mxu0 %v17547_v36  ;;  %v4804_v22 = vpop.trf.xlu0 }
 0xbb6   :  { %10878 = vmatprep.subr.msk.bf16.mxu0 %vm2733_vm2, %v14626_v52  ;;  %v4814_v3 = vpack.c.bf16 %v4804_v22, %v4803_v49  ;;  %v11574_v22 = vpop.eup %11573 }
 0xbb7   :  { %v5325_v39 = vmul.f32 %v11574_v22, %v14537_v45 }
 0xbb8   :  { %10491 = vmatmul.mubr.bf16.gmra.mrb[168].mxu0 %v4814_v3 }
 0xbb9   :  { %v4805_v56 = vpop.trf.xlu0  ;;  %v5340_v30 = vpack.c.bf16 %v5325_v39, %v5324_v46 }
 0xbbd   :  { %v4806_v18 = vpop.trf.xlu0 }
 0xbbe   :  { %v4815_v57 = vpack.c.bf16 %v4806_v18, %v4805_v56  ;;  %v11576_v56 = vpop.eup %11575 }
 0xbbf   :  { %v11578_v18 = vpop.eup %11577  ;;  %v5326_v16 = vmul.f32 %v11576_v56, %v14551_v8  ;;  %v5534_v8 = vsel %vm2733_vm2, %v14626_v52, 0 }
 0xbc0   :  { %10494 = vmatprep.mubr.bf16.mxu0 %v4815_v57  ;;  %v11580_v57 = vpop.eup %11579  ;;  %v5329_v35 = vmul.f32 %v11578_v18, %v14581_v60 }
 0xbc1   :  { %v4807_v49 = vpop.trf.xlu0  ;;  %v11582_v54 = vpop.eup %11581  ;;  %v5327_v45 = vmul.f32 %v11580_v57, %v14533_v21 }
 0xbc2   :  { %v5328_v15 = vmul.f32 %v11582_v54, %v14577_v19  ;;  %v11584_v47 = vpop.eup %11583 }
 0xbc3   :  { %v5341_v48 = vpack.c.bf16 %v5327_v45, %v5326_v16  ;;  %v11586_v22 = vpop.eup %11585  ;;  %v5331_v19 = vmul.f32 %v11584_v47, %v14601_v20 }
 0xbc4   :  { %v5301_v3 = vpop.xlane.xlu1 %5300  ;;  %v11588_v21 = vpop.eup %11587 }
 0xbc5   :  { %v4808_v41 = vpop.trf.xlu0  ;;  %11593 = vrcp.f32 %v5301_v3  ;;  %v11590_v28 = vpop.eup %11589 }
 0xbc6   :  { %v4816_v2 = vpack.c.bf16 %v4808_v41, %v4807_v49  ;;  %11595 = vrcp.f32 %v5297_v13  ;;  %v5342_v49 = vpack.c.bf16 %v5329_v35, %v5328_v15  ;;  %v5332_v13 = vmul.f32 %v11586_v22, %v14642_v50  ;;  %v11592_v39 = vpop.eup %11591 }
 0xbc7   :  { %11597 = vrcp.f32 %v14699_v0  ;;  %v5330_v0 = vmul.f32 %v11588_v21, %v14573_v1  ;;  %v5333_v3 = vmul.f32 %v11590_v28, %v14605_v53  ;;  %v5335_v1 = vmul.f32 %v11592_v39, %v14650_v37 }
 0xbc8   :  { %10495 = vmatmul.mubr.bf16.gmra.mrb[172].mxu0 %v4816_v2  ;;  %v14754_v43 = vpop.permute.xlu1 %5505  ;;  %v5540_v35 = vsel %vm2733_vm2, %v14730_v12, 0  ;;  %v5543_v37 = vsel %vm2733_vm2, %v14748_v44, 0  ;;  %11599 = vrcp.f32 %v14701_v7 }
 0xbc9   :  { %10546 = vmatprep.mubr.bf16.mxu0 %v5340_v30  ;;  %v5343_v52 = vpack.c.bf16 %v5331_v19, %v5330_v0  ;;  %v5344_v2 = vpack.c.bf16 %v5333_v3, %v5332_v13  ;;  %v5537_v30 = vsel %vm2733_vm2, %v14629_v63, 0  ;;  %v5552_v21 = vsel %vm2733_vm2, %v14754_v43, 0 }
 0xbcc   :  { %v14759_v41 = vpop.permute.xlu1 %5475 }
 0xbcf   :  { %v11594_v56 = vpop.eup %11593 }
 0xbd0   :  { %10547 = vmatmul.mubr.bf16.vlgmr.msra.gmra.mrb[176].mxu0 %v5341_v48  ;;  %v14765_v60 = vpop.permute.xlu1 %5479  ;;  %v11596_v57 = vpop.eup %11595  ;;  %v5336_v53 = vmul.f32 %v11594_v56, %v14667_v26 }
 0xbd1   :  { %10563 = vmatpush3.bf16.xpose.msra.mxu0 %v5534_v8  ;;  %10550 = vmatprep.mubr.bf16.mxu0 %v5342_v49  ;;  %v11598_v20 = vpop.eup %11597  ;;  %v5334_v50 = vmul.f32 %v11596_v57, %v14647_v40 }
 0xbd2   :  { %10879 = vmatprep.subr.msk.bf16.mxu0 %vm2733_vm2, %v14629_v63  ;;  %v5337_v54 = vmul.f32 %v11598_v20, %v14609_v61  ;;  %v11600_v45 = vpop.eup %11599  ;;  %v17559_v20 = vld [vmem:[#allocation24_spill] sm:$0xff] }
 0xbd3   :  { %v5345_v16 = vpack.c.bf16 %v5335_v1, %v5334_v50  ;;  %v5338_v47 = vmul.f32 %v11600_v45, %v14614_v29 }
 0xbd4   :  { %v14771_v46 = vpop.permute.xlu1 %5483  ;;  %v5346_v63 = vpack.c.bf16 %v5337_v54, %v5336_v53  ;;  %v17560_v53 = vld [vmem:[#allocation10_spill] sm:$0xff]  ;;  %v17561_v54 = vld [vmem:[#allocation29_spill] sm:$0xff] }
 0xbd8   :  { %10551 = vmatmul.mubr.bf16.gmra.mrb[180].mxu0 %v5343_v52  ;;  %v5815_v18 = vpop.permute.xlu1 %5814 }
 0xbd9   :  { %10565 = vmatpush3.bf16.xpose.msra.mxu0 %v5537_v30  ;;  %10554 = vmatprep.mubr.bf16.mxu0 %v5344_v2 }
 0xbda   :  { %10880 = vmatprep.subr.msk.bf16.mxu0 %vm2733_vm2, %v14730_v12  ;;  %10594 = vmatprep.subr.bf16.mxu1 %v5815_v18 }
 0xbdb   :  { %10595 = vmatpush3.bf16.msra.mxu1 %v5815_v18  ;;  %v17558_v18 = vld [vmem:[#allocation30_spill] sm:$0xff] }
 0xbdc   :  { %v5819_v13 = vpop.permute.xlu1 %5818 }
 0xbe0   :  { %10555 = vmatmul.mubr.bf16.gmra.mrb[184].mxu0 %v5345_v16  ;;  %v5823_v3 = vpop.permute.xlu1 %5822 }
 0xbe1   :  { %10567 = vmatpush3.bf16.xpose.msra.mxu0 %v5540_v35  ;;  %10558 = vmatprep.mubr.bf16.mxu0 %v5346_v63 }
 0xbe2   :  { %10881 = vmatprep.subr.msk.bf16.mxu0 %vm2733_vm2, %v14748_v44 }
 0xbe4   :  { %v5825_v52 = vpop.permute.xlu1 %5824 }
 0xbe8   :  { %v5827_v39 = vpop.permute.xlu1 %5826 }
 0xbe9   :  { %10569 = vmatpush3.bf16.xpose.msra.mxu0 %v5543_v37 }
 0xbec   :  { %v5829_v2 = vpop.permute.xlu1 %5828 }
 0xbff   :  { %v5307_v40 = vpop.xlane.xlu0 %5306 }
 0xc00   :  { %11601 = vrcp.f32 %v5307_v40 }
 0xc03   :  { %v5502_v61 = vpop.permute.xlu0 %5501 }
 0xc04   :  { %10882 = vmatprep.subr.msk.bf16.mxu0 %vm2733_vm2, %v5502_v61  ;;  %v5546_v26 = vsel %vm2733_vm2, %v5502_v61, 0  ;;  %v17562_v61 = vld [vmem:[#allocation11_spill] sm:$0xff] }
 0xc05   :  { %10571 = vmatpush3.bf16.xpose.msra.mxu0 %v5546_v26 }
 0xc07   :  { %v5504_v12 = vpop.permute.xlu0 %5503 }
 0xc08   :  { %10883 = vmatprep.subr.msk.bf16.mxu0 %vm2733_vm2, %v5504_v12  ;;  %v5549_v7 = vsel %vm2733_vm2, %v5504_v12, 0  ;;  %v17564_v12 = vld [vmem:[#allocation13_spill] sm:$0xff] }
 0xc0a   :  { %v11602_v15 = vpop.eup %11601 }
 0xc0b   :  { %v5508_v48 = vpop.permute.xlu0 %5507  ;;  %v5339_v44 = vmul.f32 %v11602_v15, %v14694_v31 }
 0xc0c   :  { %v5555_v28 = vsel %vm2733_vm2, %v5508_v48, 0 }
 0xc0d   :  { %10573 = vmatpush3.bf16.xpose.msra.mxu0 %v5549_v7  ;;  %v5347_v49 = vpack.c.bf16 %v5339_v44, %v5338_v47  ;;  %v17568_v44 = vld [vmem:[#allocation14_spill] sm:$0xff] }
 0xc0e   :  { %10884 = vmatprep.subr.msk.bf16.mxu0 %vm2733_vm2, %v14754_v43 }
 0xc0f   :  { %v5470_v22 = vpop.permute.xlu0 %5469  ;;  %10559 = vmatmul.mubr.bf16.gmra.mrb[188].mxu0 %v5347_v49 }
 0xc10   :  { %10578 = vmatprep.mubr.msk.bf16.mxu0 %vm2733_vm2, %v5470_v22 }
 0xc13   :  { %v5472_v8 = vpop.permute.xlu0 %5471 }
 0xc15   :  { %10575 = vmatpush3.bf16.xpose.msra.mxu0 %v5552_v21 }
 0xc16   :  { %10885 = vmatprep.subr.msk.bf16.mxu0 %vm2733_vm2, %v5508_v48  ;;  %v17566_v48 = vld [vmem:[#allocation12_spill] sm:$0xff] }
 0xc17   :  { %v5474_v29 = vpop.permute.xlu0 %5473 }
 0xc1b   :  { %v5478_v31 = vpop.permute.xlu0 %5477 }
 0xc1d   :  { %10577 = vmatpush3.bf16.xpose.msra.mxu0 %v5555_v28 }
 0xc1f   :  { %v5482_v19 = vpop.permute.xlu0 %5481 }
 0xc23   :  { %v5817_v0 = vpop.permute.xlu0 %5816 }
 0xc24   :  { %10579 = vmatmul.mubr.msk.bf16.vlgmr.msra.gmra.mrb[192].mxu0 %vm2733_vm2, %v5472_v8  ;;  %10596 = vmatprep.subr.bf16.mxu1 %v5817_v0 }
 0xc25   :  { %10582 = vmatprep.mubr.msk.bf16.mxu0 %vm2733_vm2, %v5474_v29  ;;  %10597 = vmatpush3.bf16.msra.mxu1 %v5817_v0 }
 0xc26   :  { %10598 = vmatprep.subr.bf16.mxu1 %v5819_v13 }
 0xc27   :  { %v5821_v43 = vpop.permute.xlu0 %5820 }
 0xc29   :  { %10599 = vmatpush3.bf16.msra.mxu1 %v5819_v13 }
 0xc2a   :  { %10600 = vmatprep.subr.bf16.mxu1 %v5821_v43 }
 0xc2c   :  { %10583 = vmatmul.mubr.msk.bf16.gmra.mrb[196].mxu0 %vm2733_vm2, %v14759_v41 }
 0xc2d   :  { %10586 = vmatprep.mubr.msk.bf16.mxu0 %vm2733_vm2, %v5478_v31  ;;  %10601 = vmatpush3.bf16.msra.mxu1 %v5821_v43  ;;  %v17570_v31 = vld [vmem:[#allocation15_spill] sm:$0xff] }
 0xc2e   :  { %10602 = vmatprep.subr.bf16.mxu1 %v5823_v3 }
 0xc31   :  { %10603 = vmatpush3.bf16.msra.mxu1 %v5823_v3  ;;  %v17574_v3 = vld [vmem:[#allocation17_spill] sm:$0xff] }
 0xc32   :  { %10604 = vmatprep.subr.bf16.mxu1 %v5825_v52 }
 0xc34   :  { %10587 = vmatmul.mubr.msk.bf16.gmra.mrb[200].mxu0 %vm2733_vm2, %v14765_v60 }
 0xc35   :  { %10590 = vmatprep.mubr.msk.bf16.mxu0 %vm2733_vm2, %v5482_v19  ;;  %10605 = vmatpush3.bf16.msra.mxu1 %v5825_v52  ;;  %v17572_v19 = vld [vmem:[#allocation20_spill] sm:$0xff]  ;;  %v17576_v52 = vld [vmem:[#allocation34_spill] sm:$0xff] }
 0xc36   :  { %10606 = vmatprep.subr.bf16.mxu1 %v5827_v39 }
 0xc39   :  { %10607 = vmatpush3.bf16.msra.mxu1 %v5827_v39 }
 0xc3a   :  { %10608 = vmatprep.subr.bf16.mxu1 %v5829_v2 }
 0xc3c   :  { %10591 = vmatmul.mubr.msk.bf16.gmra.mrb[204].mxu0 %vm2733_vm2, %v14771_v46 }
 0xc3d   :  { %10609 = vmatpush3.bf16.msra.mxu1 %v5829_v2 }
 0xc6b   :  { %v10484_v41 = vpop.f32.mrb[160].mxu0 }
 0xc6c   :  { %v4916_v56 = vpop.f32.mrb[161].mxu0  ;;  %v14814_v57 = vadd.f32 %v10484_v41, %v17558_v18 }
 0xc6d   :  { %v10485_v30 = vpop.f32.mrb[162].mxu0  ;;  %v14820_v50 = vadd.f32 %v4916_v56, %v17560_v53  ;;  %v17580_v53 = vld [vmem:[#allocation25_spill] sm:$0xff] }
 0xc6e   :  { %v14817_v1 = vadd.f32 %v10485_v30, %v17559_v20  ;;  %v4919_v60 = vpop.f32.mrb[163].mxu0  ;;  %v17578_v20 = vld [vmem:[#allocation28_spill] sm:$0xff] }
 0xc6f   :  { %v14823_v16 = vadd.f32 %v4919_v60, %v17561_v54 }
 0xc7b   :  { %v10488_v35 = vpop.f32.mrb[164].mxu0 }
 0xc7c   :  { %v4932_v37 = vpop.f32.mrb[165].mxu0  ;;  %v14830_v26 = vadd.f32 %v10488_v35, %v17562_v61  ;;  %v17584_v61 = vld [vmem:[#allocation7_spill] sm:$0xff] }
 0xc7d   :  { %v10489_v40 = vpop.f32.mrb[166].mxu0  ;;  %v14836_v47 = vadd.f32 %v4932_v37, %v17566_v48  ;;  %v17582_v37 = vld [vmem:[#allocation33_spill] sm:$0xff]  ;;  %v14930_v48 = vpop.permute.xlu1 %6033 }
 0xc7e   :  { %17563 = vst [vmem:[#allocation84_spill] sm:$0xff] %v14830_v26  ;;  %v14833_v45 = vadd.f32 %v10489_v40, %v17564_v12  ;;  %v4935_v15 = vpop.f32.mrb[167].mxu0 }
 0xc7f   :  { %17567 = vst [vmem:[#allocation101_spill] sm:$0xff] %v14836_v47  ;;  %v14839_v7 = vadd.f32 %v4935_v15, %v17568_v44 }
 0xc80   :  { %17565 = vst [vmem:[#allocation100_spill] sm:$0xff] %v14833_v45 }
 0xc81   :  { %17569 = vst [vmem:[#allocation99_spill] sm:$0xff] %v14839_v7 }
 0xc8b   :  { %v10492_v8 = vpop.f32.mrb[168].mxu0 }
 0xc8c   :  { %v4948_v21 = vpop.f32.mrb[169].mxu0  ;;  %v14846_v28 = vadd.f32 %v10492_v8, %v17570_v31 }
 0xc8d   :  { %v10493_v29 = vpop.f32.mrb[170].mxu0  ;;  %v14852_v43 = vadd.f32 %v4948_v21, %v17574_v3 }
 0xc8e   :  { %17571 = vst [vmem:[#allocation102_spill] sm:$0xff] %v14846_v28  ;;  %v14849_v13 = vadd.f32 %v10493_v29, %v17572_v19  ;;  %v4951_v0 = vpop.f32.mrb[171].mxu0 }
 0xc8f   :  { %17575 = vst [vmem:[#allocation53_spill] sm:$0xff] %v14852_v43  ;;  %v14855_v39 = vadd.f32 %v4951_v0, %v17576_v52 }
 0xc90   :  { %17573 = vst [vmem:[#allocation88_spill] sm:$0xff] %v14849_v13 }
 0xc91   :  { %17577 = vst [vmem:[#allocation85_spill] sm:$0xff] %v14855_v39 }
 0xc9b   :  { %v10496_v56 = vpop.f32.mrb[172].mxu0 }
 0xc9c   :  { %v4964_v30 = vpop.f32.mrb[173].mxu0  ;;  %v14862_v60 = vadd.f32 %v10496_v56, %v17578_v20 }
 0xc9d   :  { %v10497_v18 = vpop.f32.mrb[174].mxu0  ;;  %v14868_v40 = vadd.f32 %v4964_v30, %v17582_v37 }
 0xc9e   :  { %17579 = vst [vmem:[#allocation38_spill] sm:$0xff] %v14862_v60  ;;  %v14865_v54 = vadd.f32 %v10497_v18, %v17580_v53  ;;  %v4967_v35 = vpop.f32.mrb[175].mxu0 }
 0xc9f   :  { %17583 = vst [vmem:[#allocation41_spill] sm:$0xff] %v14868_v40  ;;  %v14871_v12 = vadd.f32 %v4967_v35, %v17584_v61 }
 0xca0   :  { %17581 = vst [vmem:[#allocation87_spill] sm:$0xff] %v14865_v54 }
 0xca1   :  { %17585 = vst [vmem:[#allocation44_spill] sm:$0xff] %v14871_v12 }
 0xca3   :  { %v10548_v44 = vpop.f32.mrb[176].mxu0 }
 0xca4   :  { %5447 = vst.msk [vmem:[#allocation3 + $0x10] sm:$0xff] %vm2733_vm2, %v10548_v44  ;;  %v5382_v8 = vpop.f32.mrb[177].mxu0 }
 0xca5   :  { %5445 = vst.msk [vmem:[#allocation3] sm:$0xff] %vm2733_vm2, %v5382_v8  ;;  %v10549_v21 = vpop.f32.mrb[178].mxu0 }
 0xca6   :  { %5448 = vst.msk [vmem:[#allocation3 + $0x18] sm:$0xff] %vm2733_vm2, %v10549_v21  ;;  %v5385_v29 = vpop.f32.mrb[179].mxu0 }
 0xca7   :  { %5446 = vst.msk [vmem:[#allocation3 + $0x8] sm:$0xff] %vm2733_vm2, %v5385_v29 }
 0xcab   :  { %v10552_v31 = vpop.f32.mrb[180].mxu0 }
 0xcac   :  { %5451 = vst.msk [vmem:[#allocation3 + $0x30] sm:$0xff] %vm2733_vm2, %v10552_v31  ;;  %v5398_v19 = vpop.f32.mrb[181].mxu0 }
 0xcad   :  { %5449 = vst.msk [vmem:[#allocation3 + $0x20] sm:$0xff] %vm2733_vm2, %v5398_v19  ;;  %v10553_v0 = vpop.f32.mrb[182].mxu0 }
 0xcae   :  { %5452 = vst.msk [vmem:[#allocation3 + $0x38] sm:$0xff] %vm2733_vm2, %v10553_v0  ;;  %v5401_v3 = vpop.f32.mrb[183].mxu0 }
 0xcaf   :  { %5450 = vst.msk [vmem:[#allocation3 + $0x28] sm:$0xff] %vm2733_vm2, %v5401_v3 }
 0xcb3   :  { %v10556_v52 = vpop.f32.mrb[184].mxu0 }
 0xcb4   :  { %5455 = vst.msk [vmem:[#allocation3 + $0x50] sm:$0xff] %vm2733_vm2, %v10556_v52  ;;  %v5414_v56 = vpop.f32.mrb[185].mxu0 }
 0xcb5   :  { %5453 = vst.msk [vmem:[#allocation3 + $0x40] sm:$0xff] %vm2733_vm2, %v5414_v56  ;;  %v10557_v30 = vpop.f32.mrb[186].mxu0 }
 0xcb6   :  { %5456 = vst.msk [vmem:[#allocation3 + $0x58] sm:$0xff] %vm2733_vm2, %v10557_v30  ;;  %v5417_v18 = vpop.f32.mrb[187].mxu0 }
 0xcb7   :  { %5454 = vst.msk [vmem:[#allocation3 + $0x48] sm:$0xff] %vm2733_vm2, %v5417_v18 }
 0xce2   :  { %v10560_v20 = vpop.f32.mrb[188].mxu0 }
 0xce3   :  { %5459 = vst.msk [vmem:[#allocation3 + $0x70] sm:$0xff] %vm2733_vm2, %v10560_v20  ;;  %v5430_v53 = vpop.f32.mrb[189].mxu0 }
 0xce4   :  { %5457 = vst.msk [vmem:[#allocation3 + $0x60] sm:$0xff] %vm2733_vm2, %v5430_v53  ;;  %v10561_v35 = vpop.f32.mrb[190].mxu0 }
 0xce5   :  { %5460 = vst.msk [vmem:[#allocation3 + $0x78] sm:$0xff] %vm2733_vm2, %v10561_v35  ;;  %v5433_v37 = vpop.f32.mrb[191].mxu0 }
 0xce6   :  { %5458 = vst.msk [vmem:[#allocation3 + $0x68] sm:$0xff] %vm2733_vm2, %v5433_v37 }
 0xcf7   :  { %v10580_v61 = vpop.f32.mrb[192].mxu0 }
 0xcf8   :  { %5658 = vmax.xlane.f32.xlu0 %v10580_v61  ;;  %v5591_v44 = vpop.f32.mrb[193].mxu0 }
 0xcf9   :  { %v10581_v8 = vpop.f32.mrb[194].mxu0 }
 0xcfa   :  { %v5594_v21 = vpop.f32.mrb[195].mxu0 }
 0xcfb   :  { %5656 = vmax.xlane.f32.xlu1 %v5594_v21 }
 0xcfc   :  { %5654 = vmax.xlane.f32.xlu0 %v5591_v44 }
 0xcff   :  { %v14893_v29 = vpop.f32.mrb[196].mxu0 }
 0xd00   :  { %5660 = vmax.xlane.f32.xlu0 %v10581_v8  ;;  %5666 = vmax.xlane.f32.xlu1 %v14893_v29  ;;  %v14896_v31 = vpop.f32.mrb[197].mxu0 }
 0xd01   :  { %v14898_v19 = vpop.f32.mrb[198].mxu0 }
 0xd02   :  { %v14900_v0 = vpop.f32.mrb[199].mxu0 }
 0xd04   :  { %5662 = vmax.xlane.f32.xlu1 %v14896_v31 }
 0xd07   :  { %v14903_v3 = vpop.f32.mrb[200].mxu0 }
 0xd08   :  { %5674 = vmax.xlane.f32.xlu1 %v14903_v3  ;;  %v14906_v52 = vpop.f32.mrb[201].mxu0 }
 0xd09   :  { %v14908_v56 = vpop.f32.mrb[202].mxu0 }
 0xd0a   :  { %v14910_v30 = vpop.f32.mrb[203].mxu0 }
 0xd0c   :  { %5670 = vmax.xlane.f32.xlu1 %v14906_v52 }
 0xd0f   :  { %v10592_v18 = vpop.f32.mrb[204].mxu0 }
 0xd10   :  { %5682 = vmax.xlane.f32.xlu1 %v10592_v18  ;;  %v14913_v20 = vpop.f32.mrb[205].mxu0 }
 0xd11   :  { %v14915_v53 = vpop.f32.mrb[206].mxu0 }
 0xd12   :  { %v14917_v35 = vpop.f32.mrb[207].mxu0 }
 0xd14   :  { %5678 = vmax.xlane.f32.xlu1 %v14913_v20 }
 0xd16   :  { %6031 = vrot.lane.b32.xlu0 %v17529_v58, %s11929_s18 }
 0xd25   :  { %6035 = vrot.lane.b32.xlu1 %v17537_v51, %s11929_s18 }
 0xd35   :  { %5668 = vmax.xlane.f32.xlu0 %v14898_v19 }
 0xd39   :  { %5664 = vmax.xlane.f32.xlu0 %v14900_v0 }
 0xd3d   :  { %5676 = vmax.xlane.f32.xlu0 %v14908_v56 }
 0xd41   :  { %5672 = vmax.xlane.f32.xlu0 %v14910_v30 }
 0xd45   :  { %5684 = vmax.xlane.f32.xlu0 %v14915_v53 }
 0xd49   :  { %5680 = vmax.xlane.f32.xlu0 %v14917_v35 }
 0xd85   :  { %v5659_v37 = vpop.xlane.xlu0 %5658 }
 0xd86   :  { %v5688_v15 = vsub.f32 %v10580_v61, %v5659_v37 }
 0xd88   :  { %v5706_v2 = vmul.f32 1.442695, %v5688_v15  ;;  %v5657_v22 = vpop.xlane.xlu1 %5656 }
 0xd89   :  { %v5655_v41 = vpop.xlane.xlu0 %5654  ;;  %v5687_v60 = vsub.f32 %v5594_v21, %v5657_v22 }
 0xd8a   :  { %11603 = vpow2.f32 %v5706_v2  ;;  %v5686_v49 = vsub.f32 %v5591_v44, %v5655_v41 }
 0xd8b   :  { %v5704_v28 = vmul.f32 1.442695, %v5687_v60 }
 0xd8c   :  { %v5702_v46 = vmul.f32 1.442695, %v5686_v49 }
 0xd8d   :  { %v5661_v63 = vpop.xlane.xlu0 %5660 }
 0xd8e   :  { %11605 = vpow2.f32 %v5702_v46  ;;  %v5689_v54 = vsub.f32 %v10581_v8, %v5661_v63  ;;  %v5667_v63 = vpop.xlane.xlu1 %5666 }
 0xd90   :  { %v5708_v40 = vmul.f32 1.442695, %v5689_v54  ;;  %v5692_v54 = vsub.f32 %v14893_v29, %v5667_v63 }
 0xd91   :  { %v14932_v12 = vpop.permute.xlu0 %6031 }
 0xd92   :  { %11607 = vpow2.f32 %v5708_v40  ;;  %10886 = vmatprep.subr.msk.bf16.mxu1 %vm2733_vm2, %v14932_v12  ;;  %v5663_v22 = vpop.xlane.xlu1 %5662  ;;  %v5714_v15 = vmul.f32 1.442695, %v5692_v54 }
 0xd93   :  { %11609 = vpow2.f32 %v5704_v28  ;;  %v5690_v44 = vsub.f32 %v14896_v31, %v5663_v22 }
 0xd94   :  { %v14936_v61 = vpop.eup %11603  ;;  %11611 = vpow2.f32 %v5714_v15 }
 0xd95   :  { %5738 = vadd.xlane.f32.xlu0 %v14936_v61  ;;  %v5710_v39 = vmul.f32 1.442695, %v5690_v44 }
 0xd96   :  { %v5675_v41 = vpop.xlane.xlu1 %5674 }
 0xd97   :  { %v5696_v29 = vsub.f32 %v14903_v3, %v5675_v41 }
 0xd98   :  { %v14939_v2 = vpop.eup %11605 }
 0xd99   :  { %5734 = vadd.xlane.f32.xlu1 %v14939_v2  ;;  %v5722_v22 = vmul.f32 1.442695, %v5696_v29  ;;  %v17586_v29 = vld [vmem:[#allocation62_spill] sm:$0xff] }
 0xd9a   :  { %v5671_v28 = vpop.xlane.xlu1 %5670 }
 0xd9c   :  { %v14942_v49 = vpop.eup %11607 }
 0xd9d   :  { %5740 = vadd.xlane.f32.xlu0 %v14942_v49  ;;  %v14945_v46 = vpop.eup %11609 }
 0xd9e   :  { %v5683_v60 = vpop.xlane.xlu1 %5682 }
 0xd9f   :  { %v5700_v21 = vsub.f32 %v10592_v18, %v5683_v60  ;;  %v14960_v60 = vpop.eup %11611 }
 0xda1   :  { %5736 = vadd.xlane.f32.xlu0 %v14945_v46  ;;  %v5730_v47 = vmul.f32 1.442695, %v5700_v21 }
 0xda2   :  { %v5679_v37 = vpop.xlane.xlu1 %5678 }
 0xda3   :  { %v5698_v26 = vsub.f32 %v14913_v20, %v5679_v37 }
 0xda5   :  { %v5726_v63 = vmul.f32 1.442695, %v5698_v26 }
 0xda6   :  { %v6036_v21 = vpop.permute.xlu1 %6035 }
 0xdaa   :  { %6039 = vrot.lane.b32.xlu1 %v17548_v32, %s11929_s18 }
 0xdb7   :  { %6037 = vrot.lane.b32.xlu0 %v17538_v14, %s11929_s18 }
 0xdc2   :  { %v5669_v40 = vpop.xlane.xlu0 %5668 }
 0xdc3   :  { %v5693_v7 = vsub.f32 %v14898_v19, %v5669_v40 }
 0xdc5   :  { %v5716_v18 = vmul.f32 1.442695, %v5693_v7 }
 0xdc6   :  { %v5665_v8 = vpop.xlane.xlu0 %5664 }
 0xdc7   :  { %v5691_v13 = vsub.f32 %v14900_v0, %v5665_v8 }
 0xdc9   :  { %v5712_v43 = vmul.f32 1.442695, %v5691_v13  ;;  %v5694_v13 = vsub.f32 %v14906_v52, %v5671_v28 }
 0xdca   :  { %v5677_v45 = vpop.xlane.xlu0 %5676 }
 0xdcb   :  { %11613 = vpow2.f32 %v5712_v43  ;;  %v5718_v26 = vmul.f32 1.442695, %v5694_v13 }
 0xdcc   :  { %11615 = vpow2.f32 %v5710_v39 }
 0xdcd   :  { %11617 = vpow2.f32 %v5730_v47  ;;  %v5697_v47 = vsub.f32 %v14908_v56, %v5677_v45 }
 0xdce   :  { %v5673_v31 = vpop.xlane.xlu0 %5672  ;;  %11619 = vpow2.f32 %v5726_v63 }
 0xdcf   :  { %11621 = vpow2.f32 %v5716_v18  ;;  %v5724_v19 = vmul.f32 1.442695, %v5697_v47  ;;  %v5695_v3 = vsub.f32 %v14910_v30, %v5673_v31 }
 0xdd0   :  { %11623 = vpow2.f32 %v5722_v22 }
 0xdd1   :  { %v5720_v45 = vmul.f32 1.442695, %v5695_v3 }
 0xdd2   :  { %v5685_v0 = vpop.xlane.xlu0 %5684 }
 0xdd3   :  { %v5701_v20 = vsub.f32 %v14915_v53, %v5685_v0 }
 0xdd5   :  { %v14962_v54 = vpop.eup %11613  ;;  %v5732_v43 = vmul.f32 1.442695, %v5701_v20 }
 0xdd6   :  { %5744 = vadd.xlane.f32.xlu1 %v14962_v54  ;;  %5746 = vadd.xlane.f32.xlu0 %v14960_v60  ;;  %v14967_v7 = vpop.eup %11615  ;;  %v5681_v53 = vpop.xlane.xlu0 %5680 }
 0xdd7   :  { %11625 = vpow2.f32 %v5732_v43  ;;  %v14969_v39 = vpop.eup %11617  ;;  %v5699_v56 = vsub.f32 %v14917_v35, %v5681_v53 }
 0xdd8   :  { %11627 = vpow2.f32 %v5718_v26  ;;  %v14974_v52 = vpop.eup %11619 }
 0xdd9   :  { %v14976_v41 = vpop.eup %11621  ;;  %11629 = vpow2.f32 %v5724_v19  ;;  %v5728_v30 = vmul.f32 1.442695, %v5699_v56 }
 0xdda   :  { %5742 = vadd.xlane.f32.xlu0 %v14967_v7  ;;  %5762 = vadd.xlane.f32.xlu1 %v14969_v39  ;;  %v14981_v28 = vpop.eup %11623  ;;  %11631 = vpow2.f32 %v5720_v45  ;;  %v6072_v45 = vsel %vm2733_vm2, %v14932_v12, 0 }
 0xddb   :  { %11633 = vpow2.f32 %v5728_v30 }
 0xdde   :  { %5748 = vadd.xlane.f32.xlu0 %v14976_v41  ;;  %5758 = vadd.xlane.f32.xlu1 %v14974_v52 }
 0xde1   :  { %v14983_v40 = vpop.eup %11625 }
 0xde2   :  { %5754 = vadd.xlane.f32.xlu0 %v14981_v28  ;;  %5764 = vadd.xlane.f32.xlu1 %v14983_v40  ;;  %v14987_v15 = vpop.eup %11627 }
 0xde3   :  { %v14990_v44 = vpop.eup %11629 }
 0xde4   :  { %v14993_v35 = vpop.eup %11631 }
 0xde5   :  { %v14996_v8 = vpop.eup %11633 }
 0xde6   :  { %5750 = vadd.xlane.f32.xlu0 %v14987_v15 }
 0xdea   :  { %5756 = vadd.xlane.f32.xlu0 %v14990_v44 }
 0xdee   :  { %5752 = vadd.xlane.f32.xlu0 %v14993_v35 }
 0xdf2   :  { %5760 = vadd.xlane.f32.xlu0 %v14996_v8 }
 0xdf3   :  { %6043 = vrot.lane.b32.xlu1 %v17539_v33, %s11929_s18 }
 0xdf7   :  { %6045 = vrot.lane.b32.xlu1 %v17550_v42, %s11929_s18 }
 0xdfb   :  { %6015 = vrot.lane.b32.xlu1 %v17551_v55, %s11929_s18 }
 0xdff   :  { %6017 = vrot.lane.b32.xlu1 %v17552_v9, %s11929_s18 }
 0xe03   :  { %6021 = vrot.lane.b32.xlu1 %v17540_v5, %s11929_s18 }
 0xe07   :  { %6025 = vrot.lane.b32.xlu1 %v17541_v59, %s11929_s18 }
 0xe08   :  { %6041 = vrot.lane.b32.xlu0 %v17549_v23, %s11929_s18 }
 0xe0b   :  { %6029 = vrot.lane.b32.xlu1 %v17542_v34, %s11929_s18 }
 0xe0c   :  { %6019 = vrot.lane.b32.xlu0 %v17554_v25, %s11929_s18 }
 0xe0f   :  { %6344 = vrot.lane.b32.xlu1 %v17523_v17, %s11929_s18 }
 0xe10   :  { %6023 = vrot.lane.b32.xlu0 %v17555_v11, %s11929_s18 }
 0xe13   :  { %6348 = vrot.lane.b32.xlu1 %v17543_v10, %s11929_s18 }
 0xe14   :  { %6027 = vrot.lane.b32.xlu0 %v17557_v27, %s11929_s18 }
 0xe17   :  { %6352 = vrot.lane.b32.xlu1 %v17544_v62, %s11929_s18 }
 0xe18   :  { %6346 = vrot.lane.b32.xlu0 %v17553_v24, %s11929_s18 }
 0xe1b   :  { %6354 = vrot.lane.b32.xlu1 %v17545_v6, %s11929_s18 }
 0xe1c   :  { %6350 = vrot.lane.b32.xlu0 %v17556_v4, %s11929_s18 }
 0xe1f   :  { %6356 = vrot.lane.b32.xlu1 %v17546_v38, %s11929_s18 }
 0xe22   :  { %v5739_v37 = vpop.xlane.xlu0 %5738 }
 0xe23   :  { %6358 = vrot.lane.b32.xlu1 %v17547_v36, %s11929_s18 }
 0xe26   :  { %v5735_v63 = vpop.xlane.xlu1 %5734 }
 0xe27   :  { %6563 = vrot.lane.b32.xlu1 %v17586_v29, %s11930_s19 }
 0xe2a   :  { %v5741_v31 = vpop.xlane.xlu0 %5740  ;;  %v6040_v56 = vpop.permute.xlu1 %6039 }
 0xe2b   :  { %11635 = vrcp.f32 %v5741_v31  ;;  %v6084_v12 = vsel %vm2733_vm2, %v6040_v56, 0 }
 0xe2c   :  { %11637 = vrcp.f32 %v5735_v63 }
 0xe2d   :  { %11639 = vrcp.f32 %v5739_v37 }
 0xe2e   :  { %v5737_v18 = vpop.xlane.xlu0 %5736 }
 0xe2f   :  { %11641 = vrcp.f32 %v5737_v18 }
 0xe35   :  { %v11636_v22 = vpop.eup %11635 }
 0xe36   :  { %v11638_v0 = vpop.eup %11637  ;;  %v5785_v43 = vmul.f32 %v11636_v22, %v14942_v49  ;;  %v6075_v49 = vsel %vm2733_vm2, %v14930_v48, 0 }
 0xe37   :  { %v11640_v13 = vpop.eup %11639  ;;  %v5782_v26 = vmul.f32 %v11638_v0, %v14939_v2  ;;  %v6078_v2 = vsel %vm2733_vm2, %v6036_v21, 0 }
 0xe38   :  { %v5784_v19 = vmul.f32 %v11640_v13, %v14936_v61  ;;  %v6038_v61 = vpop.permute.xlu0 %6037 }
 0xe39   :  { %v11642_v20 = vpop.eup %11641 }
 0xe3a   :  { %v5783_v47 = vmul.f32 %v11642_v20, %v14945_v46  ;;  %v5799_v53 = vpack.c.bf16 %v5785_v43, %v5784_v19  ;;  %v6081_v46 = vsel %vm2733_vm2, %v6038_v61, 0 }
 0xe3c   :  { %v5798_v3 = vpack.c.bf16 %v5783_v47, %v5782_v26 }
 0xe3e   :  { %10610 = vmatprep.mubr.bf16.mxu1 %v5798_v3 }
 0xe3f   :  { %10611 = vmatmul.mubr.bf16.vlgmr.msra.gmra.mrb[208].mxu1 %v5799_v53 }
 0xe40   :  { %10627 = vmatpush3.bf16.xpose.msra.mxu1 %v6072_v45 }
 0xe41   :  { %10887 = vmatprep.subr.msk.bf16.mxu1 %vm2733_vm2, %v14930_v48 }
 0xe48   :  { %10629 = vmatpush3.bf16.xpose.msra.mxu1 %v6075_v49 }
 0xe49   :  { %10888 = vmatprep.subr.msk.bf16.mxu1 %vm2733_vm2, %v6036_v21 }
 0xe50   :  { %10631 = vmatpush3.bf16.xpose.msra.mxu1 %v6078_v2 }
 0xe51   :  { %10889 = vmatprep.subr.msk.bf16.mxu1 %vm2733_vm2, %v6038_v61 }
 0xe58   :  { %10633 = vmatpush3.bf16.xpose.msra.mxu1 %v6081_v46 }
 0xe59   :  { %10890 = vmatprep.subr.msk.bf16.mxu1 %vm2733_vm2, %v6040_v56 }
 0xe60   :  { %10635 = vmatpush3.bf16.xpose.msra.mxu1 %v6084_v12 }
 0xe63   :  { %v5747_v30 = vpop.xlane.xlu0 %5746  ;;  %v5745_v48 = vpop.xlane.xlu1 %5744 }
 0xe64   :  { %11643 = vrcp.f32 %v5745_v48 }
 0xe67   :  { %v5743_v37 = vpop.xlane.xlu0 %5742  ;;  %v5763_v29 = vpop.xlane.xlu1 %5762 }
 0xe68   :  { %11645 = vrcp.f32 %v5743_v37 }
 0xe69   :  { %11647 = vrcp.f32 %v5747_v30 }
 0xe6b   :  { %v5749_v21 = vpop.xlane.xlu0 %5748  ;;  %v5759_v63 = vpop.xlane.xlu1 %5758 }
 0xe6c   :  { %11649 = vrcp.f32 %v5749_v21 }
 0xe6e   :  { %v11644_v22 = vpop.eup %11643 }
 0xe6f   :  { %v5755_v31 = vpop.xlane.xlu0 %5754  ;;  %v5765_v18 = vpop.xlane.xlu1 %5764  ;;  %v5787_v26 = vmul.f32 %v11644_v22, %v14962_v54 }
 0xe72   :  { %v11646_v0 = vpop.eup %11645 }
 0xe73   :  { %v5751_v13 = vpop.xlane.xlu0 %5750  ;;  %v6044_v20 = vpop.permute.xlu1 %6043  ;;  %v5786_v43 = vmul.f32 %v11646_v0, %v14967_v7 }
 0xe74   :  { %v11648_v47 = vpop.eup %11647 }
 0xe75   :  { %v5800_v19 = vpack.c.bf16 %v5787_v26, %v5786_v43  ;;  %v5788_v49 = vmul.f32 %v11648_v47, %v14960_v60 }
 0xe76   :  { %v11650_v3 = vpop.eup %11649 }
 0xe77   :  { %v5757_v53 = vpop.xlane.xlu0 %5756  ;;  %10614 = vmatprep.mubr.bf16.mxu1 %v5800_v19  ;;  %v6046_v45 = vpop.permute.xlu1 %6045  ;;  %v5789_v2 = vmul.f32 %v11650_v3, %v14976_v41 }
 0xe78   :  { %11651 = vrcp.f32 %v5757_v53 }
 0xe79   :  { %v5801_v61 = vpack.c.bf16 %v5789_v2, %v5788_v49  ;;  %11653 = vrcp.f32 %v5751_v13  ;;  %v6090_v2 = vsel %vm2733_vm2, %v6044_v20, 0 }
 0xe7a   :  { %11655 = vrcp.f32 %v5755_v31 }
 0xe7b   :  { %v5753_v46 = vpop.xlane.xlu0 %5752  ;;  %10615 = vmatmul.mubr.bf16.gmra.mrb[212].mxu1 %v5801_v61  ;;  %v6016_v56 = vpop.permute.xlu1 %6015 }
 0xe7c   :  { %11657 = vrcp.f32 %v5753_v46 }
 0xe7d   :  { %11659 = vrcp.f32 %v5759_v63 }
 0xe7f   :  { %v5761_v54 = vpop.xlane.xlu0 %5760  ;;  %v6018_v7 = vpop.permute.xlu1 %6017 }
 0xe80   :  { %11661 = vrcp.f32 %v5761_v54 }
 0xe81   :  { %11663 = vrcp.f32 %v5765_v18 }
 0xe82   :  { %v11652_v12 = vpop.eup %11651  ;;  %11665 = vrcp.f32 %v5763_v29 }
 0xe83   :  { %v6042_v30 = vpop.permute.xlu0 %6041  ;;  %v6022_v48 = vpop.permute.xlu1 %6021  ;;  %v5793_v63 = vmul.f32 %v11652_v12, %v14990_v44 }
 0xe84   :  { %v11654_v60 = vpop.eup %11653  ;;  %10891 = vmatprep.subr.msk.bf16.mxu1 %vm2733_vm2, %v6042_v30  ;;  %v6087_v41 = vsel %vm2733_vm2, %v6042_v30, 0 }
 0xe85   :  { %v11656_v37 = vpop.eup %11655  ;;  %10637 = vmatpush3.bf16.xpose.msra.mxu1 %v6087_v41  ;;  %v5790_v18 = vmul.f32 %v11654_v60, %v14987_v15 }
 0xe86   :  { %v11658_v21 = vpop.eup %11657  ;;  %10892 = vmatprep.subr.msk.bf16.mxu1 %vm2733_vm2, %v6044_v20  ;;  %v5792_v13 = vmul.f32 %v11656_v37, %v14981_v28  ;;  %v6093_v20 = vsel %vm2733_vm2, %v6046_v45, 0 }
 0xe87   :  { %v6020_v31 = vpop.permute.xlu0 %6019  ;;  %v6026_v22 = vpop.permute.xlu1 %6025  ;;  %v5791_v29 = vmul.f32 %v11658_v21, %v14993_v35 }
 0xe88   :  { %v11660_v0 = vpop.eup %11659  ;;  %v5803_v47 = vpack.c.bf16 %v5793_v63, %v5792_v13 }
 0xe89   :  { %v5802_v43 = vpack.c.bf16 %v5791_v29, %v5790_v18  ;;  %v5794_v49 = vmul.f32 %v11660_v0, %v14974_v52 }
 0xe8a   :  { %v11662_v26 = vpop.eup %11661 }
 0xe8b   :  { %v11664_v19 = vpop.eup %11663  ;;  %v6024_v3 = vpop.permute.xlu0 %6023  ;;  %10618 = vmatprep.mubr.bf16.mxu1 %v5802_v43  ;;  %v5795_v44 = vmul.f32 %v11662_v26, %v14996_v8 }
 0xe8c   :  { %v6030_v53 = vpop.permute.xlu1 %6029  ;;  %10619 = vmatmul.mubr.bf16.gmra.mrb[216].mxu1 %v5803_v47  ;;  %v11666_v15 = vpop.eup %11665  ;;  %v5797_v28 = vmul.f32 %v11664_v19, %v14983_v40 }
 0xe8d   :  { %10639 = vmatpush3.bf16.xpose.msra.mxu1 %v6090_v2  ;;  %v5804_v35 = vpack.c.bf16 %v5795_v44, %v5794_v49  ;;  %v5796_v54 = vmul.f32 %v11666_v15, %v14969_v39 }
 0xe8e   :  { %10893 = vmatprep.subr.msk.bf16.mxu1 %vm2733_vm2, %v6046_v45 }
 0xe8f   :  { %v6028_v61 = vpop.permute.xlu0 %6027  ;;  %10622 = vmatprep.mubr.bf16.mxu1 %v5804_v35  ;;  %v5805_v52 = vpack.c.bf16 %v5797_v28, %v5796_v54 }
 0xe90   :  { %v6345_v46 = vpop.permute.xlu1 %6344 }
 0xe91   :  { %10658 = vmatprep.subr.bf16.mxu0 %v6345_v46 }
 0xe92   :  { %10659 = vmatpush3.bf16.msra.mxu0 %v6345_v46 }
 0xe93   :  { %v6347_v12 = vpop.permute.xlu0 %6346 }
 0xe94   :  { %v6349_v8 = vpop.permute.xlu1 %6348  ;;  %10623 = vmatmul.mubr.bf16.gmra.mrb[220].mxu1 %v5805_v52  ;;  %10660 = vmatprep.subr.bf16.mxu0 %v6347_v12 }
 0xe95   :  { %10641 = vmatpush3.bf16.xpose.msra.mxu1 %v6093_v20  ;;  %10642 = vmatprep.mubr.msk.bf16.mxu1 %vm2733_vm2, %v6016_v56 }
 0xe96   :  { %10661 = vmatpush3.bf16.msra.mxu0 %v6347_v12 }
 0xe97   :  { %10662 = vmatprep.subr.bf16.mxu0 %v6349_v8  ;;  %v6351_v30 = vpop.permute.xlu0 %6350 }
 0xe98   :  { %v6353_v40 = vpop.permute.xlu1 %6352 }
 0xe9a   :  { %10663 = vmatpush3.bf16.msra.mxu0 %v6349_v8 }
 0xe9b   :  { %10664 = vmatprep.subr.bf16.mxu0 %v6351_v30 }
 0xe9c   :  { %10643 = vmatmul.mubr.msk.bf16.vlgmr.msra.gmra.mrb[224].mxu1 %vm2733_vm2, %v6018_v7  ;;  %v6355_v39 = vpop.permute.xlu1 %6354 }
 0xe9d   :  { %10646 = vmatprep.mubr.msk.bf16.mxu1 %vm2733_vm2, %v6020_v31 }
 0xe9e   :  { %10665 = vmatpush3.bf16.msra.mxu0 %v6351_v30 }
 0xe9f   :  { %10666 = vmatprep.subr.bf16.mxu0 %v6353_v40 }
 0xea0   :  { %v6357_v60 = vpop.permute.xlu1 %6356 }
 0xea2   :  { %10667 = vmatpush3.bf16.msra.mxu0 %v6353_v40 }
 0xea3   :  { %10668 = vmatprep.subr.bf16.mxu0 %v6355_v39 }
 0xea4   :  { %10647 = vmatmul.mubr.msk.bf16.gmra.mrb[228].mxu1 %vm2733_vm2, %v6022_v48  ;;  %v6359_v45 = vpop.permute.xlu1 %6358 }
 0xea5   :  { %10650 = vmatprep.mubr.msk.bf16.mxu1 %vm2733_vm2, %v6024_v3 }
 0xea6   :  { %10669 = vmatpush3.bf16.msra.mxu0 %v6355_v39 }
 0xea7   :  { %10670 = vmatprep.subr.bf16.mxu0 %v6357_v60 }
 0xea8   :  { %v15150_v39 = vpop.permute.xlu1 %6563 }
 0xeaa   :  { %10671 = vmatpush3.bf16.msra.mxu0 %v6357_v60 }
 0xeab   :  { %10672 = vmatprep.subr.bf16.mxu0 %v6359_v45 }
 0xeac   :  { %10651 = vmatmul.mubr.msk.bf16.gmra.mrb[232].mxu1 %vm2733_vm2, %v6026_v22 }
 0xead   :  { %10654 = vmatprep.mubr.msk.bf16.mxu1 %vm2733_vm2, %v6028_v61 }
 0xeae   :  { %10673 = vmatpush3.bf16.msra.mxu0 %v6359_v45 }
 0xeb4   :  { %10655 = vmatmul.mubr.msk.bf16.gmra.mrb[236].mxu1 %vm2733_vm2, %v6030_v53 }
 0xf12   :  { %v15081_v56 = vpop.f32.mrb[208].mxu1 }
 0xf13   :  { %v15083_v7 = vpop.f32.mrb[209].mxu1 }
 0xf14   :  { %v15085_v41 = vpop.f32.mrb[210].mxu1 }
 0xf15   :  { %17587 = vst [vmem:[#allocation45_spill] sm:$0xff] %v15085_v41  ;;  %v15087_v48 = vpop.f32.mrb[211].mxu1 }
 0xf4e   :  { %v15089_v37 = vpop.f32.mrb[212].mxu1 }
 0xf4f   :  { %17588 = vst [vmem:[#allocation56_spill] sm:$0xff] %v15089_v37  ;;  %v15091_v21 = vpop.f32.mrb[213].mxu1 }
 0xf50   :  { %v15093_v63 = vpop.f32.mrb[214].mxu1 }
 0xf51   :  { %17589 = vst [vmem:[#allocation50_spill] sm:$0xff] %v15093_v63  ;;  %v15095_v31 = vpop.f32.mrb[215].mxu1 }
 0xf52   :  { %17590 = vst [vmem:[#allocation47_spill] sm:$0xff] %v15095_v31 }
 0xf5f   :  { %v15097_v22 = vpop.f32.mrb[216].mxu1 }
 0xf60   :  { %17591 = vst [vmem:[#allocation55_spill] sm:$0xff] %v15097_v22  ;;  %v15099_v18 = vpop.f32.mrb[217].mxu1 }
 0xf61   :  { %17592 = vst [vmem:[#allocation51_spill] sm:$0xff] %v15099_v18  ;;  %v15101_v29 = vpop.f32.mrb[218].mxu1 }
 0xf62   :  { %17593 = vst [vmem:[#allocation40_spill] sm:$0xff] %v15101_v29  ;;  %v15103_v0 = vpop.f32.mrb[219].mxu1 }
 0xf63   :  { %17594 = vst [vmem:[#allocation39_spill] sm:$0xff] %v15103_v0 }
 0xf67   :  { %v15105_v13 = vpop.f32.mrb[220].mxu1 }
 0xf68   :  { %17595 = vst [vmem:[#allocation43_spill] sm:$0xff] %v15105_v13  ;;  %v15107_v43 = vpop.f32.mrb[221].mxu1 }
 0xf69   :  { %17596 = vst [vmem:[#allocation49_spill] sm:$0xff] %v15107_v43  ;;  %v15109_v26 = vpop.f32.mrb[222].mxu1 }
 0xf6a   :  { %17597 = vst [vmem:[#allocation42_spill] sm:$0xff] %v15109_v26  ;;  %v15111_v47 = vpop.f32.mrb[223].mxu1 }
 0xf6b   :  { %17598 = vst [vmem:[#allocation48_spill] sm:$0xff] %v15111_v47 }
 0xf6f   :  { %v10644_v19 = vpop.f32.mrb[224].mxu1 }
 0xf70   :  { %6196 = vmax.xlane.f32.xlu0 %v10644_v19  ;;  %v6129_v3 = vpop.f32.mrb[225].mxu1 }
 0xf71   :  { %v10645_v53 = vpop.f32.mrb[226].mxu1 }
 0xf72   :  { %v6132_v49 = vpop.f32.mrb[227].mxu1 }
 0xf73   :  { %6194 = vmax.xlane.f32.xlu1 %v6132_v49 }
 0xf74   :  { %6192 = vmax.xlane.f32.xlu0 %v6129_v3 }
 0xf77   :  { %v15113_v44 = vpop.f32.mrb[228].mxu1 }
 0xf78   :  { %6198 = vmax.xlane.f32.xlu0 %v10645_v53  ;;  %6204 = vmax.xlane.f32.xlu1 %v15113_v44  ;;  %v15116_v2 = vpop.f32.mrb[229].mxu1 }
 0xf79   :  { %v15118_v15 = vpop.f32.mrb[230].mxu1 }
 0xf7a   :  { %v15120_v35 = vpop.f32.mrb[231].mxu1 }
 0xf7c   :  { %6200 = vmax.xlane.f32.xlu1 %v15116_v2 }
 0xf7f   :  { %v15123_v28 = vpop.f32.mrb[232].mxu1 }
 0xf80   :  { %6212 = vmax.xlane.f32.xlu1 %v15123_v28  ;;  %v15126_v61 = vpop.f32.mrb[233].mxu1 }
 0xf81   :  { %v15128_v46 = vpop.f32.mrb[234].mxu1 }
 0xf82   :  { %v15130_v54 = vpop.f32.mrb[235].mxu1 }
 0xf84   :  { %6208 = vmax.xlane.f32.xlu1 %v15126_v61 }
 0xf87   :  { %v10656_v52 = vpop.f32.mrb[236].mxu1 }
 0xf88   :  { %6220 = vmax.xlane.f32.xlu1 %v10656_v52  ;;  %v15133_v12 = vpop.f32.mrb[237].mxu1 }
 0xf89   :  { %v15135_v8 = vpop.f32.mrb[238].mxu1 }
 0xf8a   :  { %v15137_v20 = vpop.f32.mrb[239].mxu1 }
 0xf8c   :  { %6216 = vmax.xlane.f32.xlu1 %v15133_v12 }
 0xf8e   :  { %6561 = vrot.lane.b32.xlu0 %v17529_v58, %s11930_s19 }
 0xf9d   :  { %6565 = vrot.lane.b32.xlu1 %v17537_v51, %s11930_s19 }
 0xfad   :  { %6206 = vmax.xlane.f32.xlu0 %v15118_v15 }
 0xfb1   :  { %6202 = vmax.xlane.f32.xlu0 %v15120_v35 }
 0xfb5   :  { %6214 = vmax.xlane.f32.xlu0 %v15128_v46 }
 0xfb9   :  { %6210 = vmax.xlane.f32.xlu0 %v15130_v54 }
 0xfbd   :  { %6222 = vmax.xlane.f32.xlu0 %v15135_v8 }
 0xfc1   :  { %6218 = vmax.xlane.f32.xlu0 %v15137_v20 }
 0xffd   :  { %v6197_v40 = vpop.xlane.xlu0 %6196 }
 0xffe   :  { %v6226_v30 = vsub.f32 %v10644_v19, %v6197_v40 }
0x1000   :  { %v6244_v58 = vmul.f32 1.442695, %v6226_v30  ;;  %v6195_v45 = vpop.xlane.xlu1 %6194 }
0x1001   :  { %v6193_v60 = vpop.xlane.xlu0 %6192  ;;  %v6225_v13 = vsub.f32 %v6132_v49, %v6195_v45 }
0x1002   :  { %11667 = vpow2.f32 %v6244_v58  ;;  %v6224_v51 = vsub.f32 %v6129_v3, %v6193_v60 }
0x1003   :  { %v6242_v22 = vmul.f32 1.442695, %v6225_v13 }
0x1004   :  { %v6240_v26 = vmul.f32 1.442695, %v6224_v51 }
0x1005   :  { %v6199_v47 = vpop.xlane.xlu0 %6198  ;;  %v6205_v13 = vpop.xlane.xlu1 %6204 }
0x1006   :  { %11669 = vpow2.f32 %v6240_v26  ;;  %v6227_v29 = vsub.f32 %v10645_v53, %v6199_v47  ;;  %v6230_v53 = vsub.f32 %v15113_v44, %v6205_v13 }
0x1008   :  { %v6246_v43 = vmul.f32 1.442695, %v6227_v29  ;;  %v6252_v30 = vmul.f32 1.442695, %v6230_v53 }
0x1009   :  { %v15152_v0 = vpop.permute.xlu0 %6561 }
0x100a   :  { %11671 = vpow2.f32 %v6246_v43  ;;  %10894 = vmatprep.subr.msk.bf16.mxu0 %vm2733_vm2, %v15152_v0  ;;  %v6201_v43 = vpop.xlane.xlu1 %6200 }
0x100b   :  { %11673 = vpow2.f32 %v6242_v22  ;;  %v6228_v58 = vsub.f32 %v15116_v2, %v6201_v43 }
0x100c   :  { %v15156_v19 = vpop.eup %11667  ;;  %11675 = vpow2.f32 %v6252_v30 }
0x100d   :  { %6276 = vadd.xlane.f32.xlu0 %v15156_v19 }
0x100e   :  { %v6213_v26 = vpop.xlane.xlu1 %6212 }
0x100f   :  { %v6234_v44 = vsub.f32 %v15123_v28, %v6213_v26 }
0x1010   :  { %v15159_v3 = vpop.eup %11669 }
0x1011   :  { %6272 = vadd.xlane.f32.xlu1 %v15159_v3  ;;  %v6260_v43 = vmul.f32 1.442695, %v6234_v44  ;;  %v6602_v44 = vsel %vm2733_vm2, %v15152_v0, 0 }
0x1012   :  { %v6209_v22 = vpop.xlane.xlu1 %6208 }
0x1014   :  { %v15162_v49 = vpop.eup %11671 }
0x1015   :  { %6278 = vadd.xlane.f32.xlu0 %v15162_v49  ;;  %v15165_v29 = vpop.eup %11673 }
0x1016   :  { %v6221_v47 = vpop.xlane.xlu1 %6220 }
0x1017   :  { %v6238_v51 = vsub.f32 %v10656_v52, %v6221_v47  ;;  %v15180_v47 = vpop.eup %11675 }
0x1019   :  { %6274 = vadd.xlane.f32.xlu0 %v15165_v29 }
0x101a   :  { %v6217_v45 = vpop.xlane.xlu1 %6216 }
0x101b   :  { %v6236_v31 = vsub.f32 %v15133_v12, %v6217_v45 }
0x101d   :  { %v6264_v13 = vmul.f32 1.442695, %v6236_v31 }
0x1022   :  { %6569 = vrot.lane.b32.xlu1 %v17548_v32, %s11930_s19  ;;  %v6248_v32 = vmul.f32 1.442695, %v6228_v58 }
0x102f   :  { %6567 = vrot.lane.b32.xlu0 %v17538_v14, %s11930_s19  ;;  %v6268_v14 = vmul.f32 1.442695, %v6238_v51 }
0x103a   :  { %v6207_v40 = vpop.xlane.xlu0 %6206 }
0x103b   :  { %v6231_v41 = vsub.f32 %v15118_v15, %v6207_v40 }
0x103d   :  { %v6254_v52 = vmul.f32 1.442695, %v6231_v41 }
0x103e   :  { %v6203_v60 = vpop.xlane.xlu0 %6202 }
0x103f   :  { %v6229_v63 = vsub.f32 %v15120_v35, %v6203_v60 }
0x1041   :  { %v6250_v18 = vmul.f32 1.442695, %v6229_v63  ;;  %v6232_v63 = vsub.f32 %v15126_v61, %v6209_v22 }
0x1042   :  { %v6215_v37 = vpop.xlane.xlu0 %6214 }
0x1043   :  { %11677 = vpow2.f32 %v6250_v18  ;;  %v6256_v31 = vmul.f32 1.442695, %v6232_v63  ;;  %v6235_v41 = vsub.f32 %v15128_v46, %v6215_v37 }
0x1044   :  { %11679 = vpow2.f32 %v6248_v32 }
0x1045   :  { %11681 = vpow2.f32 %v6268_v14  ;;  %v6262_v61 = vmul.f32 1.442695, %v6235_v41 }
0x1046   :  { %v6211_v2 = vpop.xlane.xlu0 %6210  ;;  %11683 = vpow2.f32 %v6264_v13 }
0x1047   :  { %11685 = vpow2.f32 %v6254_v52 }
0x1048   :  { %11687 = vpow2.f32 %v6260_v43 }
0x104a   :  { %v6223_v35 = vpop.xlane.xlu0 %6222 }
0x104b   :  { %v6239_v12 = vsub.f32 %v15135_v8, %v6223_v35  ;;  %v6233_v8 = vsub.f32 %v15130_v54, %v6211_v2 }
0x104d   :  { %v15182_v53 = vpop.eup %11677  ;;  %v6270_v18 = vmul.f32 1.442695, %v6239_v12  ;;  %v6258_v37 = vmul.f32 1.442695, %v6233_v8 }
0x104e   :  { %6282 = vadd.xlane.f32.xlu1 %v15182_v53  ;;  %6284 = vadd.xlane.f32.xlu0 %v15180_v47  ;;  %v15187_v15 = vpop.eup %11679  ;;  %v6219_v22 = vpop.xlane.xlu0 %6218 }
0x104f   :  { %11689 = vpow2.f32 %v6270_v18  ;;  %v15189_v28 = vpop.eup %11681  ;;  %v6237_v46 = vsub.f32 %v15137_v20, %v6219_v22 }
0x1050   :  { %11691 = vpow2.f32 %v6256_v31  ;;  %v15194_v26 = vpop.eup %11683 }
0x1051   :  { %v15196_v40 = vpop.eup %11685  ;;  %11693 = vpow2.f32 %v6262_v61  ;;  %v6266_v54 = vmul.f32 1.442695, %v6237_v46 }
0x1052   :  { %6280 = vadd.xlane.f32.xlu0 %v15187_v15  ;;  %6300 = vadd.xlane.f32.xlu1 %v15189_v28  ;;  %v15201_v30 = vpop.eup %11687  ;;  %11695 = vpow2.f32 %v6258_v37 }
0x1053   :  { %11697 = vpow2.f32 %v6266_v54 }
0x1056   :  { %6286 = vadd.xlane.f32.xlu0 %v15196_v40  ;;  %6296 = vadd.xlane.f32.xlu1 %v15194_v26 }
0x1059   :  { %v15203_v58 = vpop.eup %11689 }
0x105a   :  { %6292 = vadd.xlane.f32.xlu0 %v15201_v30  ;;  %6302 = vadd.xlane.f32.xlu1 %v15203_v58  ;;  %v15207_v60 = vpop.eup %11691 }
0x105b   :  { %v15210_v51 = vpop.eup %11693 }
0x105c   :  { %v15213_v20 = vpop.eup %11695 }
0x105d   :  { %v15216_v45 = vpop.eup %11697 }
0x105e   :  { %6288 = vadd.xlane.f32.xlu0 %v15207_v60 }
0x1062   :  { %6294 = vadd.xlane.f32.xlu0 %v15210_v51 }
0x1066   :  { %6290 = vadd.xlane.f32.xlu0 %v15213_v20 }
0x106a   :  { %6298 = vadd.xlane.f32.xlu0 %v15216_v45 }
0x106b   :  { %6573 = vrot.lane.b32.xlu1 %v17539_v33, %s11930_s19  ;;  %v6566_v33 = vpop.permute.xlu1 %6565 }
0x106f   :  { %6575 = vrot.lane.b32.xlu1 %v17550_v42, %s11930_s19 }
0x1073   :  { %6545 = vrot.lane.b32.xlu1 %v17551_v55, %s11930_s19 }
0x1077   :  { %6547 = vrot.lane.b32.xlu1 %v17552_v9, %s11930_s19 }
0x107b   :  { %6551 = vrot.lane.b32.xlu1 %v17540_v5, %s11930_s19 }
0x107f   :  { %6555 = vrot.lane.b32.xlu1 %v17541_v59, %s11930_s19 }
0x1080   :  { %6571 = vrot.lane.b32.xlu0 %v17549_v23, %s11930_s19 }
0x1083   :  { %6559 = vrot.lane.b32.xlu1 %v17542_v34, %s11930_s19 }
0x1084   :  { %6549 = vrot.lane.b32.xlu0 %v17554_v25, %s11930_s19 }
0x1087   :  { %6874 = vrot.lane.b32.xlu1 %v17523_v17, %s11930_s19 }
0x1088   :  { %6553 = vrot.lane.b32.xlu0 %v17555_v11, %s11930_s19 }
0x108c   :  { %6557 = vrot.lane.b32.xlu0 %v17557_v27, %s11930_s19 }
0x1090   :  { %6876 = vrot.lane.b32.xlu0 %v17553_v24, %s11930_s19 }
0x109a   :  { %v6277_v5 = vpop.xlane.xlu0 %6276 }
0x109e   :  { %v6273_v59 = vpop.xlane.xlu1 %6272 }
0x10a2   :  { %v6279_v23 = vpop.xlane.xlu0 %6278  ;;  %v6570_v13 = vpop.permute.xlu1 %6569 }
0x10a3   :  { %11699 = vrcp.f32 %v6279_v23  ;;  %v6614_v0 = vsel %vm2733_vm2, %v6570_v13, 0 }
0x10a4   :  { %11701 = vrcp.f32 %v6273_v59 }
0x10a5   :  { %11703 = vrcp.f32 %v6277_v5 }
0x10a6   :  { %v6275_v34 = vpop.xlane.xlu0 %6274 }
0x10a7   :  { %11705 = vrcp.f32 %v6275_v34 }
0x10ad   :  { %v11700_v42 = vpop.eup %11699 }
0x10ae   :  { %v11702_v17 = vpop.eup %11701  ;;  %v6323_v25 = vmul.f32 %v11700_v42, %v15162_v49  ;;  %v6605_v49 = vsel %vm2733_vm2, %v15150_v39, 0 }
0x10af   :  { %v11704_v55 = vpop.eup %11703  ;;  %v6320_v11 = vmul.f32 %v11702_v17, %v15159_v3  ;;  %v6608_v3 = vsel %vm2733_vm2, %v6566_v33, 0 }
0x10b0   :  { %v6322_v24 = vmul.f32 %v11704_v55, %v15156_v19  ;;  %v6568_v19 = vpop.permute.xlu0 %6567 }
0x10b1   :  { %v11706_v9 = vpop.eup %11705 }
0x10b2   :  { %v6321_v27 = vmul.f32 %v11706_v9, %v15165_v29  ;;  %v6337_v14 = vpack.c.bf16 %v6323_v25, %v6322_v24  ;;  %v6611_v29 = vsel %vm2733_vm2, %v6568_v19, 0 }
0x10b4   :  { %v6336_v32 = vpack.c.bf16 %v6321_v27, %v6320_v11 }
0x10b6   :  { %10674 = vmatprep.mubr.bf16.mxu0 %v6336_v32 }
0x10b7   :  { %10675 = vmatmul.mubr.bf16.vlgmr.msra.gmra.mrb[208].mxu0 %v6337_v14 }
0x10b8   :  { %10691 = vmatpush3.bf16.xpose.msra.mxu0 %v6602_v44 }
0x10b9   :  { %10895 = vmatprep.subr.msk.bf16.mxu0 %vm2733_vm2, %v15150_v39 }
0x10c0   :  { %10693 = vmatpush3.bf16.xpose.msra.mxu0 %v6605_v49 }
0x10c1   :  { %10896 = vmatprep.subr.msk.bf16.mxu0 %vm2733_vm2, %v6566_v33 }
0x10c8   :  { %10695 = vmatpush3.bf16.xpose.msra.mxu0 %v6608_v3 }
0x10c9   :  { %10897 = vmatprep.subr.msk.bf16.mxu0 %vm2733_vm2, %v6568_v19 }
0x10d0   :  { %10697 = vmatpush3.bf16.xpose.msra.mxu0 %v6611_v29 }
0x10d1   :  { %10898 = vmatprep.subr.msk.bf16.mxu0 %vm2733_vm2, %v6570_v13 }
0x10d8   :  { %10699 = vmatpush3.bf16.xpose.msra.mxu0 %v6614_v0 }
0x10db   :  { %v6285_v2 = vpop.xlane.xlu0 %6284  ;;  %v6283_v39 = vpop.xlane.xlu1 %6282 }
0x10dc   :  { %11707 = vrcp.f32 %v6283_v39 }
0x10df   :  { %v6281_v52 = vpop.xlane.xlu0 %6280  ;;  %v6301_v43 = vpop.xlane.xlu1 %6300 }
0x10e0   :  { %11709 = vrcp.f32 %v6281_v52 }
0x10e1   :  { %11711 = vrcp.f32 %v6285_v2 }
0x10e3   :  { %v6287_v35 = vpop.xlane.xlu0 %6286  ;;  %v6297_v63 = vpop.xlane.xlu1 %6296 }
0x10e4   :  { %11713 = vrcp.f32 %v6287_v35 }
0x10e6   :  { %v11708_v31 = vpop.eup %11707 }
0x10e7   :  { %v6293_v12 = vpop.xlane.xlu0 %6292  ;;  %v6303_v18 = vpop.xlane.xlu1 %6302  ;;  %v6325_v37 = vmul.f32 %v11708_v31, %v15182_v53 }
0x10ea   :  { %v11710_v41 = vpop.eup %11709 }
0x10eb   :  { %v6289_v61 = vpop.xlane.xlu0 %6288  ;;  %v6574_v8 = vpop.permute.xlu1 %6573  ;;  %v6324_v22 = vmul.f32 %v11710_v41, %v15187_v15 }
0x10ec   :  { %v11712_v46 = vpop.eup %11711 }
0x10ed   :  { %v6338_v54 = vpack.c.bf16 %v6325_v37, %v6324_v22  ;;  %v6326_v23 = vmul.f32 %v11712_v46, %v15180_v47  ;;  %v10979_v22 = vld [vmem:[%s17067_s5 + $0x24] ss:$8 sps:$4 sm:$0xff]   ;;  %v10977_v37 = vld [vmem:[%s17067_s5 + $0x20] ss:$8 sps:$4 sm:$0xff]   ;;  %v10982_v46 = vld [vmem:[%s17067_s5 + $0x34] ss:$8 sps:$4 sm:$0xff]  }
0x10ee   :  { %v11714_v33 = vpop.eup %11713 }
0x10ef   :  { %v6295_v5 = vpop.xlane.xlu0 %6294  ;;  %10678 = vmatprep.mubr.bf16.mxu0 %v6338_v54  ;;  %v6576_v59 = vpop.permute.xlu1 %6575  ;;  %v6327_v34 = vmul.f32 %v11714_v33, %v15196_v40  ;;  %v10980_v54 = vld [vmem:[%s17067_s5 + $0x30] ss:$8 sps:$4 sm:$0xff]   ;;  %v10985_v33 = vld [vmem:[%s17067_s5 + $0x44] ss:$8 sps:$4 sm:$0xff]  }
0x10f0   :  { %11715 = vrcp.f32 %v6295_v5  ;;  %v10983_v5 = vld [vmem:[%s17067_s5 + $0x40] ss:$8 sps:$4 sm:$0xff]  }
0x10f1   :  { %v6339_v42 = vpack.c.bf16 %v6327_v34, %v6326_v23  ;;  %11717 = vrcp.f32 %v6289_v61  ;;  %v6623_v61 = vsel %vm2733_vm2, %v6576_v59, 0  ;;  %v10986_v23 = vld [vmem:[%s17067_s5 + $0x50] ss:$8 sps:$4 sm:$0xff]   ;;  %v10991_v34 = vld [vmem:[%s17067_s5 + $0x64] ss:$8 sps:$4 sm:$0xff]  }
0x10f2   :  { %11719 = vrcp.f32 %v6293_v12 }
0x10f3   :  { %v6291_v17 = vpop.xlane.xlu0 %6290  ;;  %10679 = vmatmul.mubr.bf16.gmra.mrb[212].mxu0 %v6339_v42  ;;  %v6546_v55 = vpop.permute.xlu1 %6545  ;;  %v10989_v42 = vld [vmem:[%s17067_s5 + $0x60] ss:$8 sps:$4 sm:$0xff]  }
0x10f4   :  { %11721 = vrcp.f32 %v6291_v17  ;;  %v10994_v17 = vld [vmem:[%s17067_s5 + $0x74] ss:$8 sps:$4 sm:$0xff]  }
0x10f5   :  { %11723 = vrcp.f32 %v6297_v63  ;;  %v6620_v63 = vsel %vm2733_vm2, %v6574_v8, 0 }
0x10f7   :  { %v6299_v53 = vpop.xlane.xlu0 %6298  ;;  %v6548_v15 = vpop.permute.xlu1 %6547 }
0x10f8   :  { %11725 = vrcp.f32 %v6299_v53  ;;  %v17599_v53 = vmov 0  }
0x10f9   :  { %11727 = vrcp.f32 %v6303_v18 }
0x10fa   :  { %v11716_v9 = vpop.eup %11715  ;;  %11729 = vrcp.f32 %v6301_v43 }
0x10fb   :  { %v6572_v25 = vpop.permute.xlu0 %6571  ;;  %v6552_v11 = vpop.permute.xlu1 %6551  ;;  %v6331_v32 = vmul.f32 %v11716_v9, %v15210_v51  ;;  %v17601_v9 = vpack.c.bf16 %v14817_v1, %v14814_v57  ;;  %v17611_v57 = vld [vmem:[#allocation88_spill] sm:$0xff]  ;;  %v17612_v1 = vld [vmem:[#allocation102_spill] sm:$0xff] }
0x10fc   :  { %v11718_v47 = vpop.eup %11717  ;;  %v6617_v40 = vsel %vm2733_vm2, %v6572_v25, 0  ;;  %10899 = vmatprep.subr.msk.bf16.mxu0 %vm2733_vm2, %v6572_v25  ;;  %v17602_v25 = vld [vmem:[#allocation99_spill] sm:$0xff] }
0x10fd   :  { %v11720_v27 = vpop.eup %11719  ;;  %10701 = vmatpush3.bf16.xpose.msra.mxu0 %v6617_v40  ;;  %v6328_v49 = vmul.f32 %v11718_v47, %v15207_v60  ;;  %v17605_v40 = vld [vmem:[#allocation100_spill] sm:$0xff] }
0x10fe   :  { %v11722_v24 = vpop.eup %11721  ;;  %10900 = vmatprep.subr.msk.bf16.mxu0 %vm2733_vm2, %v6574_v8  ;;  %v6330_v29 = vmul.f32 %v11720_v27, %v15201_v30  ;;  %v10974_v8 = vld [vmem:[%s17067_s5 + $0x10] ss:$8 sps:$4 sm:$0xff]  }
0x10ff   :  { %v6550_v14 = vpop.permute.xlu0 %6549  ;;  %v6556_v44 = vpop.permute.xlu1 %6555  ;;  %v6329_v3 = vmul.f32 %v11722_v24, %v15213_v20  ;;  %v17606_v27 = vld [vmem:[#allocation84_spill] sm:$0xff] }
0x1100   :  { %v11724_v19 = vpop.eup %11723  ;;  %v6341_v2 = vpack.c.bf16 %v6331_v32, %v6330_v29  ;;  %v17607_v24 = vpack.c.bf16 %v17605_v40, %v17606_v27  ;;  %v17618_v29 = vld [vmem:[#allocation38_spill] sm:$0xff] }
0x1101   :  { %v6340_v13 = vpack.c.bf16 %v6329_v3, %v6328_v49  ;;  %v6332_v35 = vmul.f32 %v11724_v19, %v15194_v26  ;;  %v17615_v49 = vld [vmem:[#allocation41_spill] sm:$0xff]  ;;  %v17617_v19 = vld [vmem:[#allocation87_spill] sm:$0xff] }
0x1102   :  { %v11726_v0 = vpop.eup %11725 }
0x1103   :  { %v11728_v39 = vpop.eup %11727  ;;  %v6554_v52 = vpop.permute.xlu0 %6553  ;;  %10682 = vmatprep.mubr.bf16.mxu0 %v6340_v13  ;;  %v6333_v51 = vmul.f32 %v11726_v0, %v15216_v45  ;;  %v10973_v45 = vld [vmem:[%s17067_s5 + $0x4] ss:$8 sps:$4 sm:$0xff]   ;;  %v17619_v13 = vpack.c.bf16 %v17617_v19, %v17618_v29 }
0x1104   :  { %v6560_v43 = vpop.permute.xlu1 %6559  ;;  %10683 = vmatmul.mubr.bf16.gmra.mrb[216].mxu0 %v6341_v2  ;;  %v11730_v60 = vpop.eup %11729  ;;  %v6335_v30 = vmul.f32 %v11728_v39, %v15203_v58  ;;  %v10976_v58 = vld [vmem:[%s17067_s5 + $0x14] ss:$8 sps:$4 sm:$0xff]  }
0x1105   :  { %10703 = vmatpush3.bf16.xpose.msra.mxu0 %v6620_v63  ;;  %v6342_v20 = vpack.c.bf16 %v6333_v51, %v6332_v35  ;;  %v6334_v31 = vmul.f32 %v11730_v60, %v15189_v28  ;;  %v10971_v28 = vld [vmem:[%s17067_s5] ss:$8 sps:$4 sm:$0xff]  }
0x1106   :  { %10901 = vmatprep.subr.msk.bf16.mxu0 %vm2733_vm2, %v6576_v59  ;;  %v10988_v59 = vld [vmem:[%s17067_s5 + $0x54] ss:$8 sps:$4 sm:$0xff]  }
0x1107   :  { %v6558_v12 = vpop.permute.xlu0 %6557  ;;  %10686 = vmatprep.mubr.bf16.mxu0 %v6342_v20  ;;  %v6343_v26 = vpack.c.bf16 %v6335_v30, %v6334_v31 }
0x1108   :  { %v6875_v18 = vpop.permute.xlu1 %6874 }
0x1109   :  { %10722 = vmatprep.subr.bf16.mxu1 %v6875_v18 }
0x110a   :  { %10723 = vmatpush3.bf16.msra.mxu1 %v6875_v18 }
0x110b   :  { %v6877_v41 = vpop.permute.xlu0 %6876 }
0x110c   :  { %10687 = vmatmul.mubr.bf16.gmra.mrb[220].mxu0 %v6343_v26  ;;  %10724 = vmatprep.subr.bf16.mxu1 %v6877_v41 }
0x110d   :  { %10705 = vmatpush3.bf16.xpose.msra.mxu0 %v6623_v61  ;;  %10706 = vmatprep.mubr.msk.bf16.mxu0 %vm2733_vm2, %v6546_v55  ;;  %v10992_v55 = vld [vmem:[%s17067_s5 + $0x70] ss:$8 sps:$4 sm:$0xff]  }
0x110e   :  { %10725 = vmatpush3.bf16.msra.mxu1 %v6877_v41  ;;  %7496 = vmatprep.subr.bf16.mxu0 %v10973_v45 }
0x1114   :  { %10707 = vmatmul.mubr.msk.bf16.vlgmr.msra.gmra.mrb[224].mxu0 %vm2733_vm2, %v6548_v15  ;;  %v17600_v15 = vpack.c.bf16 %v14823_v16, %v14820_v50  ;;  %v17608_v50 = vld [vmem:[#allocation85_spill] sm:$0xff] }
0x1115   :  { %10710 = vmatprep.mubr.msk.bf16.mxu0 %vm2733_vm2, %v6550_v14  ;;  %7497 = vmatpush1.bf16.msra.mxu0 %v10971_v28  ;;  %v17609_v16 = vld [vmem:[#allocation53_spill] sm:$0xff]  ;;  %v17613_v14 = vpack.c.bf16 %v17611_v57, %v17612_v1 }
0x1116   :  { %7498 = vmatprep.subr.bf16.mxu0 %v10976_v58  ;;  %v17610_v32 = vpack.c.bf16 %v17608_v50, %v17609_v16 }
0x1119   :  { %7499 = vmatpush1.bf16.msra.mxu0 %v10974_v8 }
0x111a   :  { %7500 = vmatprep.subr.bf16.mxu0 %v10979_v22 }
0x111c   :  { %10711 = vmatmul.mubr.msk.bf16.gmra.mrb[228].mxu0 %vm2733_vm2, %v6552_v11  ;;  %v17603_v11 = vld [vmem:[#allocation101_spill] sm:$0xff] }
0x111d   :  { %10714 = vmatprep.mubr.msk.bf16.mxu0 %vm2733_vm2, %v6554_v52  ;;  %7501 = vmatpush1.bf16.msra.mxu0 %v10977_v37  ;;  %v17604_v47 = vpack.c.bf16 %v17602_v25, %v17603_v11 }
0x111e   :  { %7502 = vmatprep.subr.bf16.mxu0 %v10982_v46 }
0x1121   :  { %7503 = vmatpush1.bf16.msra.mxu0 %v10980_v54 }
0x1122   :  { %7504 = vmatprep.subr.bf16.mxu0 %v10985_v33 }
0x1124   :  { %10715 = vmatmul.mubr.msk.bf16.gmra.mrb[232].mxu0 %vm2733_vm2, %v6556_v44  ;;  %v17614_v44 = vld [vmem:[#allocation44_spill] sm:$0xff] }
0x1125   :  { %10718 = vmatprep.mubr.msk.bf16.mxu0 %vm2733_vm2, %v6558_v12  ;;  %7505 = vmatpush1.bf16.msra.mxu0 %v10983_v5  ;;  %v17616_v3 = vpack.c.bf16 %v17614_v44, %v17615_v49 }
0x1126   :  { %7506 = vmatprep.subr.bf16.mxu0 %v10988_v59 }
0x1129   :  { %7507 = vmatpush1.bf16.msra.mxu0 %v10986_v23 }
0x112a   :  { %7508 = vmatprep.subr.bf16.mxu0 %v10991_v34 }
0x112c   :  { %10719 = vmatmul.mubr.msk.bf16.gmra.mrb[236].mxu0 %vm2733_vm2, %v6560_v43 }
0x112d   :  { %7509 = vmatpush1.bf16.msra.mxu0 %v10989_v42  ;;  %7528 = vmatprep.mubr.bf16.mxu0 %v17599_v53 }
0x112e   :  { %7510 = vmatprep.subr.bf16.mxu0 %v10994_v17  ;;  %v7404_v17 = vld [vmem:[%s17068_s6] sm:$0x3] }
0x1131   :  { %7511 = vmatpush1.bf16.msra.mxu0 %v10992_v55 }
0x1134   :  { %7529 = vmatmul.mubr.bf16.vlgmr.msra.gmra.mrb[240].mxu0 %v17600_v15  ;;  %v17620_v15 = vld [vmem:[#allocation5_spill] sm:$0xff] }
0x1135   :  { %7538 = vmatprep.mubr.bf16.mxu0 %v17599_v53  ;;  %v17623_v11 = vsub.s32 1, %v17620_v15 }
0x113c   :  { %7539 = vmatmul.mubr.bf16.gmra.mrb[244].mxu0 %v17601_v9  ;;  %v17621_v9 = vsub.s32 0, %v17620_v15 }
0x113d   :  { %7548 = vmatprep.mubr.bf16.mxu0 %v17599_v53 }
0x113e   :  { %v15451_v25 = vrot.slane %v7404_v17, %v17621_v9 }
0x1140   :  { %17622 = vst [vmem:[#allocation54_spill] sm:$0xff] %v15451_v25 }
0x1144   :  { %7549 = vmatmul.mubr.bf16.gmra.mrb[248].mxu0 %v17604_v47  ;;  %v15455_v47 = vrot.slane %v7404_v17, %v17623_v11 }
0x1145   :  { %7558 = vmatprep.mubr.bf16.mxu0 %v17599_v53 }
0x1146   :  { %17624 = vst [vmem:[#allocation52_spill] sm:$0xff] %v15455_v47 }
0x114c   :  { %7559 = vmatmul.mubr.bf16.gmra.mrb[252].mxu0 %v17607_v24 }
0x114d   :  { %7568 = vmatprep.mubr.bf16.mxu0 %v17599_v53 }
0x1154   :  { %7569 = vmatmul.mubr.bf16.gmra.mrb[0].mxu0 %v17610_v32 }
0x1155   :  { %7578 = vmatprep.mubr.bf16.mxu0 %v17599_v53 }
0x115c   :  { %7579 = vmatmul.mubr.bf16.gmra.mrb[4].mxu0 %v17613_v14 }
0x115d   :  { %7588 = vmatprep.mubr.bf16.mxu0 %v17599_v53 }
0x1164   :  { %7589 = vmatmul.mubr.bf16.gmra.mrb[8].mxu0 %v17616_v3 }
0x1165   :  { %7598 = vmatprep.mubr.bf16.mxu0 %v17599_v53 }
0x116c   :  { %7599 = vmatmul.mubr.bf16.gmra.mrb[12].mxu0 %v17619_v13 }
0x116d   :  { %7608 = vmatprep.mubr.bf16.mxu0 %v17599_v53 }
0x118a   :  { %v15368_v0 = vpop.f32.mrb[208].mxu0 }
0x118b   :  { %v15370_v2 = vpop.f32.mrb[209].mxu0 }
0x118c   :  { %v15372_v39 = vpop.f32.mrb[210].mxu0 }
0x118d   :  { %v15374_v52 = vpop.f32.mrb[211].mxu0 }
0x11c6   :  { %v15376_v43 = vpop.f32.mrb[212].mxu0 }
0x11c7   :  { %v15378_v35 = vpop.f32.mrb[213].mxu0 }
0x11c8   :  { %v15380_v51 = vpop.f32.mrb[214].mxu0 }
0x11c9   :  { %v15382_v63 = vpop.f32.mrb[215].mxu0 }
0x11d7   :  { %v15384_v60 = vpop.f32.mrb[216].mxu0 }
0x11d8   :  { %v15386_v20 = vpop.f32.mrb[217].mxu0 }
0x11d9   :  { %v15388_v30 = vpop.f32.mrb[218].mxu0 }
0x11da   :  { %v15390_v12 = vpop.f32.mrb[219].mxu0 }
0x11df   :  { %v15392_v18 = vpop.f32.mrb[220].mxu0 }
0x11e0   :  { %v15394_v31 = vpop.f32.mrb[221].mxu0 }
0x11e1   :  { %v15396_v26 = vpop.f32.mrb[222].mxu0 }
0x11e2   :  { %v15398_v45 = vpop.f32.mrb[223].mxu0 }
0x11e7   :  { %v15400_v41 = vpop.f32.mrb[224].mxu0 }
0x11e8   :  { %6726 = vmax.xlane.f32.xlu0 %v15400_v41  ;;  %v15403_v61 = vpop.f32.mrb[225].mxu0 }
0x11e9   :  { %v15405_v28 = vpop.f32.mrb[226].mxu0 }
0x11ea   :  { %v15407_v58 = vpop.f32.mrb[227].mxu0 }
0x11eb   :  { %6724 = vmax.xlane.f32.xlu1 %v15407_v58 }
0x11ec   :  { %6722 = vmax.xlane.f32.xlu0 %v15403_v61 }
0x11ef   :  { %v15411_v8 = vpop.f32.mrb[228].mxu0 }
0x11f0   :  { %6728 = vmax.xlane.f32.xlu0 %v15405_v28  ;;  %6734 = vmax.xlane.f32.xlu1 %v15411_v8  ;;  %v15415_v22 = vpop.f32.mrb[229].mxu0 }
0x11f1   :  { %v15417_v37 = vpop.f32.mrb[230].mxu0 }
0x11f2   :  { %v15419_v46 = vpop.f32.mrb[231].mxu0 }
0x11f4   :  { %6730 = vmax.xlane.f32.xlu1 %v15415_v22  ;;  %6736 = vmax.xlane.f32.xlu0 %v15417_v37 }
0x11f7   :  { %v15423_v54 = vpop.f32.mrb[232].mxu0 }
0x11f8   :  { %6732 = vmax.xlane.f32.xlu0 %v15419_v46  ;;  %6742 = vmax.xlane.f32.xlu1 %v15423_v54  ;;  %v15427_v33 = vpop.f32.mrb[233].mxu0 }
0x11f9   :  { %v15429_v5 = vpop.f32.mrb[234].mxu0 }
0x11fa   :  { %v15431_v59 = vpop.f32.mrb[235].mxu0 }
0x11fc   :  { %6738 = vmax.xlane.f32.xlu1 %v15427_v33  ;;  %6744 = vmax.xlane.f32.xlu0 %v15429_v5 }
0x11ff   :  { %v15435_v23 = vpop.f32.mrb[236].mxu0 }
0x1200   :  { %6740 = vmax.xlane.f32.xlu0 %v15431_v59  ;;  %6750 = vmax.xlane.f32.xlu1 %v15435_v23  ;;  %v15439_v34 = vpop.f32.mrb[237].mxu0 }
0x1201   :  { %v15441_v42 = vpop.f32.mrb[238].mxu0 }
0x1202   :  { %v15446_v55 = vpop.f32.mrb[239].mxu0 }
0x1204   :  { %6746 = vmax.xlane.f32.xlu1 %v15439_v34 }
0x1207   :  { %v7530_v40 = vpop.f32.mrb[240].mxu0 }
0x1208   :  { %v15458_v27 = vadd.f32 %v7530_v40, %v15451_v25  ;;  %v7532_v24 = vpop.f32.mrb[241].mxu0 }
0x1209   :  { %v15461_v50 = vadd.f32 %v7532_v24, %v15455_v47  ;;  %v7534_v16 = vpop.f32.mrb[242].mxu0 }
0x120a   :  { %7689 = vst [vmem:[%s17069_s10] sm:$0xff] %v15458_v27  ;;  %v15468_v32 = vadd.f32 %v7534_v16, %v15451_v25  ;;  %v7536_v57 = vpop.f32.mrb[243].mxu0 }
0x120b   :  { %7690 = vst [vmem:[%s17069_s10 + $0x8] sm:$0xff] %v15461_v50  ;;  %v15475_v1 = vadd.f32 %v7536_v57, %v15455_v47 }
0x120c   :  { %7691 = vst [vmem:[%s17069_s10 + $0x10] sm:$0xff] %v15468_v32 }
0x120d   :  { %7692 = vst [vmem:[%s17069_s10 + $0x18] sm:$0xff] %v15475_v1 }
0x120f   :  { %v7540_v49 = vpop.f32.mrb[244].mxu0 }
0x1210   :  { %v15490_v3 = vadd.f32 %v7540_v49, %v15451_v25  ;;  %v7542_v19 = vpop.f32.mrb[245].mxu0 }
0x1211   :  { %v15493_v29 = vadd.f32 %v7542_v19, %v15455_v47  ;;  %v7544_v13 = vpop.f32.mrb[246].mxu0 }
0x1212   :  { %7693 = vst [vmem:[%s17069_s10 + $0x20] sm:$0xff] %v15490_v3  ;;  %v15500_v17 = vadd.f32 %v7544_v13, %v15451_v25  ;;  %v7546_v9 = vpop.f32.mrb[247].mxu0 }
0x1213   :  { %7694 = vst [vmem:[%s17069_s10 + $0x28] sm:$0xff] %v15493_v29  ;;  %v15507_v11 = vadd.f32 %v7546_v9, %v15455_v47 }
0x1214   :  { %7695 = vst [vmem:[%s17069_s10 + $0x30] sm:$0xff] %v15500_v17 }
0x1215   :  { %7696 = vst [vmem:[%s17069_s10 + $0x38] sm:$0xff] %v15507_v11  ;;  %6878 = vrot.lane.b32.xlu1 %v17543_v10, %s11930_s19 }
0x1216   :  { %6882 = vrot.lane.b32.xlu0 %v17544_v62, %s11930_s19 }
0x1217   :  { %v7550_v16 = vpop.f32.mrb[248].mxu0 }
0x1218   :  { %v15526_v57 = vadd.f32 %v7550_v16, %v15451_v25  ;;  %v7552_v49 = vpop.f32.mrb[249].mxu0 }
0x1219   :  { %v15529_v19 = vadd.f32 %v7552_v49, %v15455_v47  ;;  %6880 = vrot.lane.b32.xlu1 %v17556_v4, %s11930_s19  ;;  %v7554_v13 = vpop.f32.mrb[250].mxu0 }
0x121a   :  { %7697 = vst [vmem:[%s17069_s10 + $0x40] sm:$0xff] %v15526_v57  ;;  %v15538_v10 = vadd.f32 %v7554_v13, %v15451_v25  ;;  %v7556_v62 = vpop.f32.mrb[251].mxu0 }
0x121b   :  { %7698 = vst [vmem:[%s17069_s10 + $0x48] sm:$0xff] %v15529_v19  ;;  %v15545_v9 = vadd.f32 %v7556_v62, %v15455_v47 }
0x121c   :  { %7699 = vst [vmem:[%s17069_s10 + $0x50] sm:$0xff] %v15538_v10 }
0x121d   :  { %7700 = vst [vmem:[%s17069_s10 + $0x58] sm:$0xff] %v15545_v9  ;;  %6886 = vrot.lane.b32.xlu1 %v17546_v38, %s11930_s19 }
0x121f   :  { %v7560_v49 = vpop.f32.mrb[252].mxu0 }
0x1220   :  { %v15562_v13 = vadd.f32 %v7560_v49, %v15451_v25  ;;  %v7562_v62 = vpop.f32.mrb[253].mxu0 }
0x1221   :  { %v15565_v40 = vadd.f32 %v7562_v62, %v15455_v47  ;;  %v7564_v4 = vpop.f32.mrb[254].mxu0 }
0x1222   :  { %17625 = vst [vmem:[#allocation89_spill] sm:$0xff] %v15562_v13  ;;  %7701 = vst [vmem:[%s17069_s10 + $0x60] sm:$0xff] %v15562_v13  ;;  %v15572_v24 = vadd.f32 %v7564_v4, %v15451_v25  ;;  %v7566_v16 = vpop.f32.mrb[255].mxu0 }
0x1223   :  { %17626 = vst [vmem:[#allocation90_spill] sm:$0xff] %v15565_v40  ;;  %7702 = vst [vmem:[%s17069_s10 + $0x68] sm:$0xff] %v15565_v40  ;;  %v15579_v38 = vadd.f32 %v7566_v16, %v15455_v47 }
0x1224   :  { %17627 = vst [vmem:[#allocation93_spill] sm:$0xff] %v15572_v24  ;;  %7703 = vst [vmem:[%s17069_s10 + $0x70] sm:$0xff] %v15572_v24 }
0x1225   :  { %17628 = vst [vmem:[#allocation94_spill] sm:$0xff] %v15579_v38  ;;  %7704 = vst [vmem:[%s17069_s10 + $0x78] sm:$0xff] %v15579_v38 }
0x1227   :  { %v7570_v62 = vpop.f32.mrb[0].mxu0 }
0x1228   :  { %v15594_v16 = vadd.f32 %v7570_v62, %v15451_v25  ;;  %v7572_v14 = vpop.f32.mrb[1].mxu0 }
0x1229   :  { %v15597_v44 = vadd.f32 %v7572_v14, %v15455_v47  ;;  %v7574_v15 = vpop.f32.mrb[2].mxu0 }
0x122a   :  { %17629 = vst [vmem:[#allocation60_spill] sm:$0xff] %v15594_v16  ;;  %7705 = vst [vmem:[%s17069_s10 + $0x80] sm:$0xff] %v15594_v16  ;;  %v15604_v49 = vadd.f32 %v7574_v15, %v15451_v25  ;;  %v7576_v53 = vpop.f32.mrb[3].mxu0 }
0x122b   :  { %17630 = vst [vmem:[#allocation86_spill] sm:$0xff] %v15597_v44  ;;  %7706 = vst [vmem:[%s17069_s10 + $0x88] sm:$0xff] %v15597_v44  ;;  %v15611_v62 = vadd.f32 %v7576_v53, %v15455_v47 }
0x122c   :  { %17631 = vst [vmem:[#allocation91_spill] sm:$0xff] %v15604_v49  ;;  %7707 = vst [vmem:[%s17069_s10 + $0x90] sm:$0xff] %v15604_v49 }
0x122d   :  { %17632 = vst [vmem:[#allocation96_spill] sm:$0xff] %v15611_v62  ;;  %7708 = vst [vmem:[%s17069_s10 + $0x98] sm:$0xff] %v15611_v62 }
0x122f   :  { %v7580_v4 = vpop.f32.mrb[4].mxu0 }
0x1230   :  { %v15626_v53 = vadd.f32 %v7580_v4, %v15451_v25  ;;  %v7582_v13 = vpop.f32.mrb[5].mxu0 }
0x1231   :  { %v15629_v24 = vadd.f32 %v7582_v13, %v15455_v47  ;;  %v7584_v40 = vpop.f32.mrb[6].mxu0 }
0x1232   :  { %17633 = vst [vmem:[#allocation83_spill] sm:$0xff] %v15626_v53  ;;  %7709 = vst [vmem:[%s17069_s10 + $0xa0] sm:$0xff] %v15626_v53  ;;  %v15636_v14 = vadd.f32 %v7584_v40, %v15451_v25  ;;  %v7586_v16 = vpop.f32.mrb[7].mxu0 }
0x1233   :  { %17634 = vst [vmem:[#allocation98_spill] sm:$0xff] %v15629_v24  ;;  %7710 = vst [vmem:[%s17069_s10 + $0xa8] sm:$0xff] %v15629_v24  ;;  %v15643_v4 = vadd.f32 %v7586_v16, %v15455_v47 }
0x1234   :  { %17635 = vst [vmem:[#allocation58_spill] sm:$0xff] %v15636_v14  ;;  %7711 = vst [vmem:[%s17069_s10 + $0xb0] sm:$0xff] %v15636_v14 }
0x1235   :  { %17636 = vst [vmem:[#allocation95_spill] sm:$0xff] %v15643_v4  ;;  %7712 = vst [vmem:[%s17069_s10 + $0xb8] sm:$0xff] %v15643_v4  ;;  %6752 = vmax.xlane.f32.xlu0 %v15441_v42 }
0x1237   :  { %v7590_v16 = vpop.f32.mrb[8].mxu0 }
0x1238   :  { %v15659_v15 = vadd.f32 %v7590_v16, %v15451_v25  ;;  %v7592_v49 = vpop.f32.mrb[9].mxu0 }
0x1239   :  { %v15662_v44 = vadd.f32 %v7592_v49, %v15455_v47  ;;  %6748 = vmax.xlane.f32.xlu0 %v15446_v55  ;;  %v7594_v13 = vpop.f32.mrb[10].mxu0 }
0x123a   :  { %17637 = vst [vmem:[#allocation92_spill] sm:$0xff] %v15659_v15  ;;  %7713 = vst [vmem:[%s17069_s10 + $0xc0] sm:$0xff] %v15659_v15  ;;  %v15670_v40 = vadd.f32 %v7594_v13, %v15451_v25  ;;  %v7596_v53 = vpop.f32.mrb[11].mxu0 }
0x123b   :  { %17638 = vst [vmem:[#allocation81_spill] sm:$0xff] %v15662_v44  ;;  %7714 = vst [vmem:[%s17069_s10 + $0xc8] sm:$0xff] %v15662_v44  ;;  %v15677_v49 = vadd.f32 %v7596_v53, %v15455_v47 }
0x123c   :  { %17639 = vst [vmem:[#allocation46_spill] sm:$0xff] %v15670_v40  ;;  %7715 = vst [vmem:[%s17069_s10 + $0xd0] sm:$0xff] %v15670_v40 }
0x123d   :  { %17640 = vst [vmem:[#allocation97_spill] sm:$0xff] %v15677_v49  ;;  %7716 = vst [vmem:[%s17069_s10 + $0xd8] sm:$0xff] %v15677_v49 }
0x123f   :  { %v7600_v14 = vpop.f32.mrb[12].mxu0 }
0x1240   :  { %v15692_v53 = vadd.f32 %v7600_v14, %v15451_v25  ;;  %v7602_v24 = vpop.f32.mrb[13].mxu0 }
0x1241   :  { %v15695_v4 = vadd.f32 %v7602_v24, %v15455_v47  ;;  %v7604_v62 = vpop.f32.mrb[14].mxu0 }
0x1242   :  { %17641 = vst [vmem:[#allocation82_spill] sm:$0xff] %v15692_v53  ;;  %7717 = vst [vmem:[%s17069_s10 + $0xe0] sm:$0xff] %v15692_v53  ;;  %v15702_v16 = vadd.f32 %v7604_v62, %v15451_v25  ;;  %v7606_v15 = vpop.f32.mrb[15].mxu0 }
0x1243   :  { %17642 = vst [vmem:[#allocation66_spill] sm:$0xff] %v15695_v4  ;;  %7718 = vst [vmem:[%s17069_s10 + $0xe8] sm:$0xff] %v15695_v4  ;;  %v15709_v14 = vadd.f32 %v7606_v15, %v15455_v47 }
0x1244   :  { %17643 = vst [vmem:[#allocation68_spill] sm:$0xff] %v15702_v16  ;;  %7719 = vst [vmem:[%s17069_s10 + $0xf0] sm:$0xff] %v15702_v16 }
0x1245   :  { %17644 = vst [vmem:[#allocation78_spill] sm:$0xff] %v15709_v14  ;;  %7720 = vst [vmem:[%s17069_s10 + $0xf8] sm:$0xff] %v15709_v14 }
0x124f   :  { %6884 = vrot.lane.b32.xlu0 %v17545_v6, %s11930_s19 }
0x1275   :  { %v6727_v15 = vpop.xlane.xlu0 %6726 }
0x1276   :  { %v6756_v13 = vsub.f32 %v15400_v41, %v6727_v15 }
0x1278   :  { %v6774_v47 = vmul.f32 1.442695, %v6756_v13  ;;  %v6725_v25 = vpop.xlane.xlu1 %6724 }
0x1279   :  { %v6723_v40 = vpop.xlane.xlu0 %6722  ;;  %v6755_v49 = vsub.f32 %v15407_v58, %v6725_v25 }
0x127a   :  { %11731 = vpow2.f32 %v6774_v47  ;;  %v6754_v24 = vsub.f32 %v15403_v61, %v6723_v40 }
0x127b   :  { %v6772_v13 = vmul.f32 1.442695, %v6755_v49 }
0x127c   :  { %v6770_v53 = vmul.f32 1.442695, %v6754_v24 }
0x127d   :  { %v6729_v16 = vpop.xlane.xlu0 %6728  ;;  %v6735_v44 = vpop.xlane.xlu1 %6734 }
0x127e   :  { %11733 = vpow2.f32 %v6770_v53  ;;  %v6757_v62 = vsub.f32 %v15405_v28, %v6729_v16  ;;  %v6760_v4 = vsub.f32 %v15411_v8, %v6735_v44 }
0x1280   :  { %v6776_v6 = vmul.f32 1.442695, %v6757_v62  ;;  %v6782_v14 = vmul.f32 1.442695, %v6760_v4 }
0x1281   :  { %v6737_v38 = vpop.xlane.xlu0 %6736  ;;  %v6731_v41 = vpop.xlane.xlu1 %6730 }
0x1282   :  { %11735 = vpow2.f32 %v6776_v6  ;;  %v6758_v47 = vsub.f32 %v15415_v22, %v6731_v41  ;;  %v6761_v61 = vsub.f32 %v15417_v37, %v6737_v38 }
0x1283   :  { %11737 = vpow2.f32 %v6782_v14 }
0x1284   :  { %v15732_v40 = vpop.eup %11731  ;;  %v6778_v24 = vmul.f32 1.442695, %v6758_v47  ;;  %11739 = vpow2.f32 %v6772_v13  ;;  %v6784_v25 = vmul.f32 1.442695, %v6761_v61 }
0x1285   :  { %v6733_v58 = vpop.xlane.xlu0 %6732  ;;  %6806 = vadd.xlane.f32.xlu0 %v15732_v40  ;;  %v6743_v28 = vpop.xlane.xlu1 %6742 }
0x1286   :  { %v6759_v8 = vsub.f32 %v15419_v46, %v6733_v58  ;;  %11741 = vpow2.f32 %v6778_v24  ;;  %v6764_v44 = vsub.f32 %v15423_v54, %v6743_v28 }
0x1288   :  { %v15737_v4 = vpop.eup %11733  ;;  %v6780_v22 = vmul.f32 1.442695, %v6759_v8  ;;  %v6790_v38 = vmul.f32 1.442695, %v6764_v44 }
0x1289   :  { %v6745_v49 = vpop.xlane.xlu0 %6744  ;;  %6802 = vadd.xlane.f32.xlu0 %v15737_v4  ;;  %v6739_v37 = vpop.xlane.xlu1 %6738 }
0x128a   :  { %11743 = vpow2.f32 %v6780_v22  ;;  %v6762_v16 = vsub.f32 %v15427_v33, %v6739_v37  ;;  %v6765_v6 = vsub.f32 %v15429_v5, %v6745_v49 }
0x128b   :  { %11745 = vpow2.f32 %v6784_v25 }
0x128c   :  { %v15741_v53 = vpop.eup %11735  ;;  %11747 = vpow2.f32 %v6790_v38  ;;  %v6786_v41 = vmul.f32 1.442695, %v6762_v16 }
0x128d   :  { %v15743_v14 = vpop.eup %11737  ;;  %v6741_v46 = vpop.xlane.xlu0 %6740  ;;  %6808 = vadd.xlane.f32.xlu0 %v15741_v53 }
0x128e   :  { %v6751_v54 = vpop.xlane.xlu1 %6750  ;;  %v6763_v62 = vsub.f32 %v15431_v59, %v6741_v46  ;;  %6814 = vadd.xlane.f32.xlu1 %v15743_v14  ;;  %v15750_v13 = vpop.eup %11739  ;;  %v6792_v59 = vmul.f32 1.442695, %v6765_v6 }
0x128f   :  { %v6768_v15 = vsub.f32 %v15435_v23, %v6751_v54 }
0x1290   :  { %v6788_v33 = vmul.f32 1.442695, %v6763_v62  ;;  %v15752_v47 = vpop.eup %11741 }
0x1291   :  { %6804 = vadd.xlane.f32.xlu0 %v15750_v13  ;;  %v6798_v24 = vmul.f32 1.442695, %v6768_v15 }
0x1292   :  { %v6747_v61 = vpop.xlane.xlu1 %6746  ;;  %11749 = vpow2.f32 %v6788_v33  ;;  %6810 = vadd.xlane.f32.xlu1 %v15752_v47 }
0x1293   :  { %11751 = vpow2.f32 %v6786_v41  ;;  %v6766_v23 = vsub.f32 %v15439_v34, %v6747_v61  ;;  %v6883_v34 = vpop.permute.xlu0 %6882 }
0x1294   :  { %v15757_v58 = vpop.eup %11743  ;;  %11753 = vpow2.f32 %v6798_v24 }
0x1295   :  { %v15759_v5 = vpop.eup %11745  ;;  %6812 = vadd.xlane.f32.xlu0 %v15757_v58  ;;  %11755 = vpow2.f32 %v6792_v59  ;;  %v6794_v8 = vmul.f32 1.442695, %v6766_v23 }
0x1296   :  { %v6879_v28 = vpop.permute.xlu1 %6878  ;;  %6816 = vadd.xlane.f32.xlu1 %v15759_v5  ;;  %v15763_v25 = vpop.eup %11747 }
0x1297   :  { %10726 = vmatprep.subr.bf16.mxu1 %v6879_v28  ;;  %11757 = vpow2.f32 %v6794_v8 }
0x1298   :  { %10727 = vmatpush3.bf16.msra.mxu1 %v6879_v28 }
0x129a   :  { %v6881_v44 = vpop.permute.xlu1 %6880  ;;  %6822 = vadd.xlane.f32.xlu1 %v15763_v25 }
0x129b   :  { %10728 = vmatprep.subr.bf16.mxu1 %v6881_v44 }
0x129c   :  { %10729 = vmatpush3.bf16.msra.mxu1 %v6881_v44  ;;  %v15766_v22 = vpop.eup %11749 }
0x129d   :  { %10730 = vmatprep.subr.bf16.mxu1 %v6883_v34  ;;  %v15768_v49 = vpop.eup %11751  ;;  %6820 = vadd.xlane.f32.xlu0 %v15766_v22 }
0x129e   :  { %6818 = vadd.xlane.f32.xlu1 %v15768_v49  ;;  %v15772_v37 = vpop.eup %11753  ;;  %v6887_v61 = vpop.permute.xlu1 %6886 }
0x129f   :  { %v15774_v38 = vpop.eup %11755 }
0x12a0   :  { %10731 = vmatpush3.bf16.msra.mxu1 %v6883_v34 }
0x12a1   :  { %6830 = vadd.xlane.f32.xlu0 %v15772_v37  ;;  %v15778_v16 = vpop.eup %11757 }
0x12a2   :  { %6824 = vadd.xlane.f32.xlu1 %v15774_v38 }
0x12a6   :  { %6826 = vadd.xlane.f32.xlu1 %v15778_v16 }
0x12c2   :  { %v6753_v46 = vpop.xlane.xlu0 %6752 }
0x12c3   :  { %v6769_v54 = vsub.f32 %v15441_v42, %v6753_v46 }
0x12c5   :  { %v6800_v62 = vmul.f32 1.442695, %v6769_v54 }
0x12c6   :  { %v6749_v15 = vpop.xlane.xlu0 %6748 }
0x12c7   :  { %11759 = vpow2.f32 %v6800_v62  ;;  %v6767_v6 = vsub.f32 %v15446_v55, %v6749_v15 }
0x12c9   :  { %v6796_v41 = vmul.f32 1.442695, %v6767_v6 }
0x12ca   :  { %v6885_v33 = vpop.permute.xlu0 %6884 }
0x12cb   :  { %11761 = vpow2.f32 %v6796_v41  ;;  %10732 = vmatprep.subr.bf16.mxu1 %v6885_v33 }
0x12cc   :  { %10733 = vmatpush3.bf16.msra.mxu1 %v6885_v33 }
0x12cd   :  { %10734 = vmatprep.subr.bf16.mxu1 %v6887_v61 }
0x12d0   :  { %10735 = vmatpush3.bf16.msra.mxu1 %v6887_v61 }
0x12d1   :  { %v15783_v24 = vpop.eup %11759 }
0x12d2   :  { %6832 = vadd.xlane.f32.xlu1 %v15783_v24 }
0x12d5   :  { %v15786_v59 = vpop.eup %11761 }
0x12d6   :  { %6828 = vadd.xlane.f32.xlu0 %v15786_v59 }
0x12e3   :  { %5951 = vrot.lane.b32.xlu1 %v15083_v7, %s11930_s19  ;;  %v17647_v7 = vld [vmem:[#allocation47_spill] sm:$0xff] }
0x12e7   :  { %6481 = vrot.lane.b32.xlu1 %v15370_v2, %s11929_s18  ;;  %v17651_v2 = vld [vmem:[#allocation39_spill] sm:$0xff] }
0x12eb   :  { %5955 = vrot.lane.b32.xlu1 %v15081_v56, %s11930_s19  ;;  %v17645_v56 = vld [vmem:[#allocation45_spill] sm:$0xff] }
0x12ec   :  { %6888 = vrot.lane.b32.xlu0 %v17547_v36, %s11930_s19  ;;  %v17646_v36 = vld [vmem:[#allocation56_spill] sm:$0xff] }
0x12ef   :  { %6485 = vrot.lane.b32.xlu1 %v15368_v0, %s11929_s18  ;;  %v17650_v0 = vld [vmem:[#allocation55_spill] sm:$0xff] }
0x12f0   :  { %5953 = vrot.lane.b32.xlu0 %v15087_v48, %s11930_s19  ;;  %v17648_v48 = vld [vmem:[#allocation51_spill] sm:$0xff] }
0x12f3   :  { %5959 = vrot.lane.b32.xlu1 %v15091_v21, %s11930_s19  ;;  %v17649_v21 = vld [vmem:[#allocation50_spill] sm:$0xff] }
0x12f4   :  { %6483 = vrot.lane.b32.xlu0 %v15374_v52, %s11929_s18  ;;  %v17652_v52 = vld [vmem:[#allocation49_spill] sm:$0xff] }
0x12f7   :  { %6489 = vrot.lane.b32.xlu1 %v15378_v35, %s11929_s18  ;;  %v17653_v35 = vld [vmem:[#allocation40_spill] sm:$0xff] }
0x12f8   :  { %5957 = vrot.lane.b32.xlu0 %v17645_v56, %s11930_s19 }
0x12fb   :  { %5963 = vrot.lane.b32.xlu1 %v17646_v36, %s11930_s19 }
0x12fc   :  { %6487 = vrot.lane.b32.xlu0 %v15372_v39, %s11929_s18 }
0x12ff   :  { %6493 = vrot.lane.b32.xlu1 %v15376_v43, %s11929_s18 }
0x1300   :  { %5961 = vrot.lane.b32.xlu0 %v17647_v7, %s11930_s19 }
0x1303   :  { %5967 = vrot.lane.b32.xlu1 %v17648_v48, %s11930_s19 }
0x1304   :  { %6491 = vrot.lane.b32.xlu0 %v15382_v63, %s11929_s18  ;;  %v17654_v63 = vld [vmem:[#allocation43_spill] sm:$0xff] }
0x1307   :  { %6497 = vrot.lane.b32.xlu1 %v15386_v20, %s11929_s18  ;;  %v17655_v20 = vld [vmem:[#allocation48_spill] sm:$0xff] }
0x1308   :  { %5965 = vrot.lane.b32.xlu0 %v17649_v21, %s11930_s19 }
0x130b   :  { %5971 = vrot.lane.b32.xlu1 %v17650_v0, %s11930_s19 }
0x130c   :  { %6495 = vrot.lane.b32.xlu0 %v15380_v51, %s11929_s18 }
0x130f   :  { %6501 = vrot.lane.b32.xlu1 %v15384_v60, %s11929_s18 }
0x1310   :  { %5969 = vrot.lane.b32.xlu0 %v17651_v2, %s11930_s19 }
0x1312   :  { %v6807_v39 = vpop.xlane.xlu0 %6806 }
0x1313   :  { %5975 = vrot.lane.b32.xlu1 %v17652_v52, %s11930_s19  ;;  %11763 = vrcp.f32 %v6807_v39 }
0x1314   :  { %6499 = vrot.lane.b32.xlu0 %v15390_v12, %s11929_s18 }
0x1316   :  { %v6803_v43 = vpop.xlane.xlu0 %6802 }
0x1317   :  { %6505 = vrot.lane.b32.xlu1 %v15394_v31, %s11929_s18 }
0x1318   :  { %5973 = vrot.lane.b32.xlu0 %v17653_v35, %s11930_s19 }
0x131a   :  { %v6809_v51 = vpop.xlane.xlu0 %6808 }
0x131b   :  { %11765 = vrcp.f32 %v6809_v51  ;;  %5979 = vrot.lane.b32.xlu1 %v17654_v63, %s11930_s19  ;;  %v6815_v46 = vpop.xlane.xlu1 %6814 }
0x131c   :  { %6503 = vrot.lane.b32.xlu0 %v15388_v30, %s11929_s18  ;;  %11767 = vrcp.f32 %v6803_v43 }
0x131d   :  { %v11764_v12 = vpop.eup %11763 }
0x131e   :  { %v6805_v60 = vpop.xlane.xlu0 %6804  ;;  %v6852_v42 = vmul.f32 %v11764_v12, %v15732_v40 }
0x131f   :  { %11769 = vrcp.f32 %v6805_v60  ;;  %v6811_v54 = vpop.xlane.xlu1 %6810 }
0x1320   :  { %5977 = vrot.lane.b32.xlu0 %v17655_v20, %s11930_s19 }
0x1323   :  { %v6817_v62 = vpop.xlane.xlu1 %6816 }
0x1324   :  { %6507 = vrot.lane.b32.xlu0 %v15398_v45, %s11929_s18  ;;  %v6813_v45 = vpop.xlane.xlu0 %6812 }
0x1325   :  { %v11766_v31 = vpop.eup %11765  ;;  %11771 = vrcp.f32 %v6813_v45 }
0x1326   :  { %v6853_v55 = vmul.f32 %v11766_v31, %v15741_v53  ;;  %v11768_v23 = vpop.eup %11767  ;;  %11773 = vrcp.f32 %v6811_v54 }
0x1327   :  { %v6850_v30 = vmul.f32 %v11768_v23, %v15737_v4  ;;  %v6823_v15 = vpop.xlane.xlu1 %6822  ;;  %11775 = vrcp.f32 %v6817_v62 }
0x1328   :  { %v6867_v28 = vpack.c.bf16 %v6853_v55, %v6852_v42 }
0x1329   :  { %v11770_v8 = vpop.eup %11769 }
0x132a   :  { %v6851_v44 = vmul.f32 %v11770_v8, %v15750_v13  ;;  %v6821_v33 = vpop.xlane.xlu0 %6820 }
0x132b   :  { %v6819_v6 = vpop.xlane.xlu1 %6818  ;;  %11777 = vrcp.f32 %v6821_v33 }
0x132c   :  { %v6866_v34 = vpack.c.bf16 %v6851_v44, %v6850_v30  ;;  %11779 = vrcp.f32 %v6819_v6 }
0x132d   :  { %11781 = vrcp.f32 %v6815_v46 }
0x132e   :  { %10738 = vmatprep.mubr.bf16.mxu1 %v6866_v34  ;;  %v6831_v53 = vpop.xlane.xlu0 %6830 }
0x132f   :  { %v6825_v41 = vpop.xlane.xlu1 %6824  ;;  %v11772_v56 = vpop.eup %11771 }
0x1330   :  { %v11774_v36 = vpop.eup %11773  ;;  %v6855_v21 = vmul.f32 %v11772_v56, %v15757_v58  ;;  %11783 = vrcp.f32 %v6825_v41 }
0x1331   :  { %v6854_v0 = vmul.f32 %v11774_v36, %v15752_v47  ;;  %v11776_v2 = vpop.eup %11775 }
0x1332   :  { %v6857_v63 = vmul.f32 %v11776_v2, %v15759_v5 }
0x1333   :  { %v6827_v40 = vpop.xlane.xlu1 %6826  ;;  %v6868_v35 = vpack.c.bf16 %v6855_v21, %v6854_v0 }
0x1335   :  { %v11778_v39 = vpop.eup %11777 }
0x1336   :  { %v11780_v51 = vpop.eup %11779  ;;  %v6859_v12 = vmul.f32 %v11778_v39, %v15766_v22 }
0x1337   :  { %v11782_v58 = vpop.eup %11781  ;;  %v6858_v20 = vmul.f32 %v11780_v51, %v15768_v49 }
0x1338   :  { %v6856_v31 = vmul.f32 %v11782_v58, %v15743_v14 }
0x1339   :  { %v6870_v8 = vpack.c.bf16 %v6859_v12, %v6858_v20 }
0x133a   :  { %v6869_v42 = vpack.c.bf16 %v6857_v63, %v6856_v31  ;;  %v11784_v55 = vpop.eup %11783 }
0x133b   :  { %v6861_v30 = vmul.f32 %v11784_v55, %v15774_v38  ;;  %v17656_v55 = vld [vmem:[#allocation42_spill] sm:$0xff] }
0x135f   :  { %v6833_v61 = vpop.xlane.xlu1 %6832 }
0x1363   :  { %v6829_v4 = vpop.xlane.xlu0 %6828  ;;  %v5952_v13 = vpop.permute.xlu1 %5951 }
0x1364   :  { %5999 = vst.msk [vmem:[#allocation3] sm:$0xff] %vm3682_vm3, %v5952_v13  ;;  %11785 = vrcp.f32 %v6829_v4 }
0x1365   :  { %11787 = vrcp.f32 %v6823_v15 }
0x1366   :  { %11789 = vrcp.f32 %v6827_v40 }
0x1367   :  { %v6889_v7 = vpop.permute.xlu0 %6888  ;;  %v6482_v48 = vpop.permute.xlu1 %6481  ;;  %11791 = vrcp.f32 %v6833_v61 }
0x1368   :  { %6529 = vst.msk [vmem:[#allocation3] sm:$0xff] %vm4213_vm4, %v6482_v48  ;;  %10736 = vmatprep.subr.bf16.mxu1 %v6889_v7  ;;  %11793 = vrcp.f32 %v6831_v53 }
0x1369   :  { %10737 = vmatpush3.bf16.msra.mxu1 %v6889_v7 }
0x136b   :  { %v5954_v52 = vpop.permute.xlu0 %5953  ;;  %v5956_v43 = vpop.permute.xlu1 %5955 }
0x136c   :  { %6000 = vst.msk [vmem:[#allocation3 + $0x8] sm:$0xff] %vm3682_vm3, %v5954_v52  ;;  %6001 = vst.msk [vmem:[#allocation3 + $0x10] sm:$0xff] %vm3682_vm3, %v5956_v43  ;;  %10739 = vmatmul.mubr.bf16.vlgmr.msra.gmra.mrb[240].mxu1 %v6867_v28 }
0x136d   :  { %10742 = vmatprep.mubr.bf16.mxu1 %v6868_v35 }
0x136e   :  { %v11786_v5 = vpop.eup %11785 }
0x136f   :  { %v6484_v60 = vpop.permute.xlu0 %6483  ;;  %v6486_v47 = vpop.permute.xlu1 %6485  ;;  %v6863_v34 = vmul.f32 %v11786_v5, %v15786_v59 }
0x1370   :  { %6530 = vst.msk [vmem:[#allocation3 + $0x8] sm:$0xff] %vm4213_vm4, %v6484_v60  ;;  %6531 = vst.msk [vmem:[#allocation3 + $0x10] sm:$0xff] %vm4213_vm4, %v6486_v47  ;;  %v11788_v22 = vpop.eup %11787 }
0x1371   :  { %v11790_v49 = vpop.eup %11789  ;;  %v6860_v46 = vmul.f32 %v11788_v22, %v15763_v25 }
0x1372   :  { %v6862_v54 = vmul.f32 %v11790_v49, %v15778_v16  ;;  %v11792_v15 = vpop.eup %11791  ;;  %v10996_v49 = vld [vmem:[%s17064_s3 + $0xc8] sm:$0xff]  }
0x1373   :  { %v5958_v23 = vpop.permute.xlu0 %5957  ;;  %v5960_v28 = vpop.permute.xlu1 %5959  ;;  %v6871_v62 = vpack.c.bf16 %v6861_v30, %v6860_v46  ;;  %v6865_v59 = vmul.f32 %v11792_v15, %v15783_v24  ;;  %v10998_v30 = vld [vmem:[%s17064_s3 + $0xd8] sm:$0xff]  }
0x1374   :  { %6002 = vst.msk [vmem:[#allocation3 + $0x18] sm:$0xff] %vm3682_vm3, %v5958_v23  ;;  %6003 = vst.msk [vmem:[#allocation3 + $0x20] sm:$0xff] %vm3682_vm3, %v5960_v28  ;;  %10743 = vmatmul.mubr.bf16.gmra.mrb[244].mxu1 %v6869_v42  ;;  %v6872_v41 = vpack.c.bf16 %v6863_v34, %v6862_v54  ;;  %v11794_v38 = vpop.eup %11793 }
0x1375   :  { %10746 = vmatprep.mubr.bf16.mxu1 %v6870_v8  ;;  %v6864_v25 = vmul.f32 %v11794_v38, %v15772_v37 }
0x1377   :  { %v6488_v44 = vpop.permute.xlu0 %6487  ;;  %v6490_v14 = vpop.permute.xlu1 %6489  ;;  %v6873_v16 = vpack.c.bf16 %v6865_v59, %v6864_v25  ;;  %v11001_v25 = vld [vmem:[%s17064_s3 + $0xf0] sm:$0xff]  }
0x1378   :  { %6532 = vst.msk [vmem:[#allocation3 + $0x18] sm:$0xff] %vm4213_vm4, %v6488_v44  ;;  %6533 = vst.msk [vmem:[#allocation3 + $0x20] sm:$0xff] %vm4213_vm4, %v6490_v14  ;;  %v10999_v44 = vld [vmem:[%s17064_s3 + $0xe0] sm:$0xff]  }
0x137b   :  { %v5962_v6 = vpop.permute.xlu0 %5961  ;;  %v5964_v45 = vpop.permute.xlu1 %5963 }
0x137c   :  { %6004 = vst.msk [vmem:[#allocation3 + $0x28] sm:$0xff] %vm3682_vm3, %v5962_v6  ;;  %6005 = vst.msk [vmem:[#allocation3 + $0x30] sm:$0xff] %vm3682_vm3, %v5964_v45  ;;  %10747 = vmatmul.mubr.bf16.gmra.mrb[248].mxu1 %v6871_v62 }
0x137d   :  { %10750 = vmatprep.mubr.bf16.mxu1 %v6872_v41  ;;  %v11000_v41 = vld [vmem:[%s17064_s3 + $0xe8] sm:$0xff]  }
0x137f   :  { %v6492_v33 = vpop.permute.xlu0 %6491  ;;  %v6494_v40 = vpop.permute.xlu1 %6493 }
0x1380   :  { %6534 = vst.msk [vmem:[#allocation3 + $0x28] sm:$0xff] %vm4213_vm4, %v6492_v33  ;;  %6535 = vst.msk [vmem:[#allocation3 + $0x30] sm:$0xff] %vm4213_vm4, %v6494_v40 }
0x1383   :  { %v5966_v53 = vpop.permute.xlu0 %5965  ;;  %v5968_v61 = vpop.permute.xlu1 %5967 }
0x1384   :  { %6006 = vst.msk [vmem:[#allocation3 + $0x38] sm:$0xff] %vm3682_vm3, %v5966_v53  ;;  %6007 = vst.msk [vmem:[#allocation3 + $0x40] sm:$0xff] %vm3682_vm3, %v5968_v61  ;;  %10751 = vmatmul.mubr.bf16.gmra.mrb[252].mxu1 %v6873_v16  ;;  %v11002_v61 = vld [vmem:[%s17064_s3 + $0xf8] sm:$0xff]  }
0x1387   :  { %v6496_v4 = vpop.permute.xlu0 %6495  ;;  %v6498_v13 = vpop.permute.xlu1 %6497 }
0x1388   :  { %6536 = vst.msk [vmem:[#allocation3 + $0x38] sm:$0xff] %vm4213_vm4, %v6496_v4  ;;  %6537 = vst.msk [vmem:[#allocation3 + $0x40] sm:$0xff] %vm4213_vm4, %v6498_v13 }
0x138b   :  { %v5970_v24 = vpop.permute.xlu0 %5969  ;;  %v5972_v56 = vpop.permute.xlu1 %5971 }
0x138c   :  { %6008 = vst.msk [vmem:[#allocation3 + $0x48] sm:$0xff] %vm3682_vm3, %v5970_v24  ;;  %6009 = vst.msk [vmem:[#allocation3 + $0x50] sm:$0xff] %vm3682_vm3, %v5972_v56 }
0x138f   :  { %v6500_v37 = vpop.permute.xlu0 %6499  ;;  %v6502_v36 = vpop.permute.xlu1 %6501 }
0x1390   :  { %6538 = vst.msk [vmem:[#allocation3 + $0x48] sm:$0xff] %vm4213_vm4, %v6500_v37  ;;  %6539 = vst.msk [vmem:[#allocation3 + $0x50] sm:$0xff] %vm4213_vm4, %v6502_v36 }
0x1393   :  { %v5974_v7 = vpop.permute.xlu0 %5973  ;;  %v5976_v48 = vpop.permute.xlu1 %5975 }
0x1394   :  { %6010 = vst.msk [vmem:[#allocation3 + $0x58] sm:$0xff] %vm3682_vm3, %v5974_v7  ;;  %6011 = vst.msk [vmem:[#allocation3 + $0x60] sm:$0xff] %vm3682_vm3, %v5976_v48 }
0x1397   :  { %v6504_v21 = vpop.permute.xlu0 %6503  ;;  %v6506_v0 = vpop.permute.xlu1 %6505 }
0x1398   :  { %6540 = vst.msk [vmem:[#allocation3 + $0x58] sm:$0xff] %vm4213_vm4, %v6504_v21  ;;  %6541 = vst.msk [vmem:[#allocation3 + $0x60] sm:$0xff] %vm4213_vm4, %v6506_v0 }
0x139b   :  { %v5978_v2 = vpop.permute.xlu0 %5977  ;;  %v5980_v39 = vpop.permute.xlu1 %5979 }
0x139c   :  { %6012 = vst.msk [vmem:[#allocation3 + $0x68] sm:$0xff] %vm3682_vm3, %v5978_v2  ;;  %6013 = vst.msk [vmem:[#allocation3 + $0x70] sm:$0xff] %vm3682_vm3, %v5980_v39 }
0x139f   :  { %v6508_v52 = vpop.permute.xlu0 %6507 }
0x13a0   :  { %6542 = vst.msk [vmem:[#allocation3 + $0x68] sm:$0xff] %vm4213_vm4, %v6508_v52 }
0x143f   :  { %v10740_v43 = vpop.f32.mrb[240].mxu1 }
0x1440   :  { %7015 = vrot.lane.b32.xlu1 %v10740_v43, %s11928_s4  ;;  %v6932_v35 = vpop.f32.mrb[241].mxu1 }
0x1441   :  { %v10741_v51 = vpop.f32.mrb[242].mxu1 }
0x1442   :  { %7017 = vrot.lane.b32.xlu0 %v10741_v51, %s11928_s4  ;;  %v6935_v58 = vpop.f32.mrb[243].mxu1  ;;  %v11003_v51 = vld [vmem:[%s17070_s7 + $0x40] sm:$0xff]  }
0x1444   :  { %7011 = vrot.lane.b32.xlu1 %v6932_v35, %s11928_s4 }
0x1446   :  { %7013 = vrot.lane.b32.xlu0 %v6935_v58, %s11928_s4 }
0x1447   :  { %v10744_v63 = vpop.f32.mrb[244].mxu1 }
0x1448   :  { %7023 = vrot.lane.b32.xlu1 %v10744_v63, %s11928_s4  ;;  %v6948_v60 = vpop.f32.mrb[245].mxu1 }
0x1449   :  { %v10745_v47 = vpop.f32.mrb[246].mxu1 }
0x144a   :  { %7025 = vrot.lane.b32.xlu0 %v10745_v47, %s11928_s4  ;;  %v6951_v20 = vpop.f32.mrb[247].mxu1 }
0x144c   :  { %7019 = vrot.lane.b32.xlu1 %v6948_v60, %s11928_s4 }
0x144e   :  { %7021 = vrot.lane.b32.xlu0 %v6951_v20, %s11928_s4 }
0x144f   :  { %v10748_v12 = vpop.f32.mrb[248].mxu1 }
0x1450   :  { %7031 = vrot.lane.b32.xlu1 %v10748_v12, %s11928_s4  ;;  %v6964_v31 = vpop.f32.mrb[249].mxu1 }
0x1451   :  { %v10749_v42 = vpop.f32.mrb[250].mxu1 }
0x1452   :  { %5981 = vrot.lane.b32.xlu0 %v17656_v55, %s11930_s19  ;;  %v6967_v23 = vpop.f32.mrb[251].mxu1 }
0x1454   :  { %7027 = vrot.lane.b32.xlu1 %v6964_v31, %s11928_s4 }
0x1456   :  { %7033 = vrot.lane.b32.xlu0 %v10749_v42, %s11928_s4 }
0x1457   :  { %v10752_v28 = vpop.f32.mrb[252].mxu1 }
0x1458   :  { %6509 = vrot.lane.b32.xlu1 %v15392_v18, %s11929_s18  ;;  %v6980_v8 = vpop.f32.mrb[253].mxu1  ;;  %v10995_v18 = vld [vmem:[%s17064_s3 + $0xc0] sm:$0xff]  }
0x1459   :  { %v10753_v5 = vpop.f32.mrb[254].mxu1  ;;  %10754 = vmatprep.subr.bf16.mxu1 %v10995_v18 }
0x145a   :  { %7029 = vrot.lane.b32.xlu0 %v6967_v23, %s11928_s4  ;;  %v6983_v22 = vpop.f32.mrb[255].mxu1  ;;  %10755 = vmatpush3.bf16.msra.mxu1 %v10995_v18 }
0x145b   :  { %10756 = vmatprep.subr.bf16.mxu1 %v10996_v49 }
0x145c   :  { %7035 = vrot.lane.b32.xlu1 %v6980_v8, %s11928_s4  ;;  %v11004_v8 = vld [vmem:[%s17070_s7] sm:$0xff]  }
0x145e   :  { %6511 = vrot.lane.b32.xlu0 %v15396_v26, %s11929_s18  ;;  %v10997_v26 = vld [vmem:[%s17064_s3 + $0xd0] sm:$0xff]   ;;  %10757 = vmatpush3.bf16.msra.mxu1 %v10996_v49  ;;  %v11006_v49 = vld [vmem:[%s17070_s7 + $0x8] sm:$0xff]  }
0x145f   :  { %10758 = vmatprep.subr.bf16.mxu1 %v10997_v26 }
0x1460   :  { %7039 = vrot.lane.b32.xlu1 %v10752_v28, %s11928_s4 }
0x1462   :  { %7037 = vrot.lane.b32.xlu0 %v6983_v22, %s11928_s4  ;;  %10759 = vmatpush3.bf16.msra.mxu1 %v10997_v26  ;;  %v11005_v22 = vld [vmem:[%s17070_s7 + $0x48] sm:$0xff]   ;;  %v11007_v26 = vld [vmem:[%s17070_s7 + $0x50] sm:$0xff]  }
0x1463   :  { %10760 = vmatprep.subr.bf16.mxu1 %v10998_v30 }
0x1464   :  { %7041 = vrot.lane.b32.xlu1 %v10753_v5, %s11928_s4 }
0x1466   :  { %10761 = vmatpush3.bf16.msra.mxu1 %v10998_v30 }
0x1467   :  { %10762 = vmatprep.subr.bf16.mxu1 %v10999_v44 }
0x146a   :  { %10763 = vmatpush3.bf16.msra.mxu1 %v10999_v44  ;;  %v11008_v44 = vld [vmem:[%s17070_s7 + $0x10] sm:$0xff]  }
0x146b   :  { %10764 = vmatprep.subr.bf16.mxu1 %v11000_v41 }
0x146e   :  { %10765 = vmatpush3.bf16.msra.mxu1 %v11000_v41  ;;  %v11013_v41 = vld [vmem:[%s17070_s7 + $0x68] sm:$0xff]  }
0x146f   :  { %10766 = vmatprep.subr.bf16.mxu1 %v11001_v25 }
0x1472   :  { %10767 = vmatpush3.bf16.msra.mxu1 %v11001_v25  ;;  %v11016_v25 = vld [vmem:[%s17070_s7 + $0x30] sm:$0xff]  }
0x1473   :  { %10768 = vmatprep.subr.bf16.mxu1 %v11002_v61 }
0x1476   :  { %10769 = vmatpush3.bf16.msra.mxu1 %v11002_v61 }
0x1477   :  { %9848 = vmatprep.subr.bf16.mxu1 %v11003_v51  ;;  %v17667_v51 = vld [vmem:[#allocation89_spill] sm:$0xff] }
0x14b2   :  { %v7016_v14 = vpop.permute.xlu1 %7015 }
0x14b3   :  { %7061 = vst.msk [vmem:[#allocation3 + $0x10] sm:$0xff] %vm4744_vm5, %v7016_v14 }
0x14b4   :  { %v7018_v34 = vpop.permute.xlu0 %7017 }
0x14b5   :  { %7062 = vst.msk [vmem:[#allocation3 + $0x18] sm:$0xff] %vm4744_vm5, %v7018_v34  ;;  %v11009_v34 = vld [vmem:[%s17070_s7 + $0x58] sm:$0xff]  }
0x14b6   :  { %v7012_v46 = vpop.permute.xlu1 %7011 }
0x14b7   :  { %7059 = vst.msk [vmem:[#allocation3] sm:$0xff] %vm4744_vm5, %v7012_v46 }
0x14b8   :  { %v7014_v54 = vpop.permute.xlu0 %7013 }
0x14b9   :  { %7060 = vst.msk [vmem:[#allocation3 + $0x8] sm:$0xff] %vm4744_vm5, %v7014_v54  ;;  %v11010_v54 = vld [vmem:[%s17070_s7 + $0x18] sm:$0xff]  }
0x14ba   :  { %v7024_v62 = vpop.permute.xlu1 %7023  ;;  %v7077_v53 = vld [vmem:[#allocation3 + $0x10] sm:$0xff] }
0x14bb   :  { %7065 = vst.msk [vmem:[#allocation3 + $0x30] sm:$0xff] %vm4744_vm5, %v7024_v62  ;;  %v11011_v62 = vld [vmem:[%s17070_s7 + $0x60] sm:$0xff]  }
0x14bc   :  { %v7026_v15 = vpop.permute.xlu0 %7025  ;;  %v7078_v24 = vld [vmem:[#allocation3 + $0x18] sm:$0xff] }
0x14bd   :  { %7066 = vst.msk [vmem:[#allocation3 + $0x38] sm:$0xff] %vm4744_vm5, %v7026_v15 }
0x14be   :  { %v7020_v6 = vpop.permute.xlu1 %7019  ;;  %v7075_v45 = vld [vmem:[#allocation3] sm:$0xff] }
0x14bf   :  { %7063 = vst.msk [vmem:[#allocation3 + $0x20] sm:$0xff] %vm4744_vm5, %v7020_v6  ;;  %7091 = vxpose.xlu0.b32.start [1/16] %v7075_v45, 128  ;;  %v11012_v6 = vld [vmem:[%s17070_s7 + $0x20] sm:$0xff]  }
0x14c0   :  { %v7022_v38 = vpop.permute.xlu0 %7021  ;;  %v7076_v33 = vld [vmem:[#allocation3 + $0x8] sm:$0xff] }
0x14c1   :  { %7064 = vst.msk [vmem:[#allocation3 + $0x28] sm:$0xff] %vm4744_vm5, %v7022_v38 }
0x14c2   :  { %v7032_v59 = vpop.permute.xlu1 %7031  ;;  %v7081_v39 = vld [vmem:[#allocation3 + $0x30] sm:$0xff] }
0x14c3   :  { %7069 = vst.msk [vmem:[#allocation3 + $0x50] sm:$0xff] %vm4744_vm5, %v7032_v59  ;;  %7092 = vxpose.xlu0.b32.cont [2/16] %v7076_v33, 128  ;;  %v11014_v59 = vld [vmem:[%s17070_s7 + $0x28] sm:$0xff]   ;;  %v11015_v33 = vld [vmem:[%s17070_s7 + $0x70] sm:$0xff]  }
0x14c4   :  { %v5982_v40 = vpop.permute.xlu0 %5981  ;;  %v7082_v52 = vld [vmem:[#allocation3 + $0x38] sm:$0xff] }
0x14c5   :  { %6014 = vst.msk [vmem:[#allocation3 + $0x78] sm:$0xff] %vm3682_vm3, %v5982_v40 }
0x14c6   :  { %v7028_v16 = vpop.permute.xlu1 %7027  ;;  %v7079_v36 = vld [vmem:[#allocation3 + $0x20] sm:$0xff] }
0x14c7   :  { %7067 = vst.msk [vmem:[#allocation3 + $0x40] sm:$0xff] %vm4744_vm5, %v7028_v16  ;;  %7093 = vxpose.xlu0.b32.cont [3/16] %v7077_v53, 128  ;;  %v11017_v53 = vld [vmem:[%s17070_s7 + $0x78] sm:$0xff]  }
0x14c8   :  { %v7034_v4 = vpop.permute.xlu0 %7033  ;;  %v7080_v21 = vld [vmem:[#allocation3 + $0x28] sm:$0xff] }
0x14c9   :  { %7070 = vst.msk [vmem:[#allocation3 + $0x58] sm:$0xff] %vm4744_vm5, %v7034_v4  ;;  %v11018_v4 = vld [vmem:[%s17070_s7 + $0x38] sm:$0xff]  }
0x14ca   :  { %v6510_v13 = vpop.permute.xlu1 %6509  ;;  %v7085_v58 = vld [vmem:[#allocation3 + $0x50] sm:$0xff] }
0x14cb   :  { %6543 = vst.msk [vmem:[#allocation3 + $0x70] sm:$0xff] %vm4213_vm4, %v6510_v13  ;;  %7094 = vxpose.xlu0.b32.cont [4/16] %v7078_v24, 128 }
0x14cc   :  { %v7030_v56 = vpop.permute.xlu0 %7029 }
0x14cd   :  { %7068 = vst.msk [vmem:[#allocation3 + $0x48] sm:$0xff] %vm4744_vm5, %v7030_v56 }
0x14ce   :  { %v7036_v37 = vpop.permute.xlu1 %7035  ;;  %v7083_v43 = vld [vmem:[#allocation3 + $0x40] sm:$0xff] }
0x14cf   :  { %7071 = vst.msk [vmem:[#allocation3 + $0x60] sm:$0xff] %vm4744_vm5, %v7036_v37  ;;  %7095 = vxpose.xlu0.b32.cont [5/16] %v7079_v36, 128 }
0x14d0   :  { %v6512_v7 = vpop.permute.xlu0 %6511  ;;  %v7086_v63 = vld [vmem:[#allocation3 + $0x58] sm:$0xff] }
0x14d1   :  { %6544 = vst.msk [vmem:[#allocation3 + $0x78] sm:$0xff] %vm4213_vm4, %v6512_v7 }
0x14d2   :  { %v7040_v48 = vpop.permute.xlu1 %7039 }
0x14d3   :  { %7073 = vst.msk [vmem:[#allocation3 + $0x70] sm:$0xff] %vm4744_vm5, %v7040_v48  ;;  %7096 = vxpose.xlu0.b32.cont [6/16] %v7080_v21, 128 }
0x14d4   :  { %v7038_v0 = vpop.permute.xlu0 %7037  ;;  %v7084_v35 = vld [vmem:[#allocation3 + $0x48] sm:$0xff] }
0x14d5   :  { %7072 = vst.msk [vmem:[#allocation3 + $0x68] sm:$0xff] %vm4744_vm5, %v7038_v0  ;;  %v17657_v0 = vpack.c.bf16 %v15475_v1, %v15461_v50  ;;  %v17662_v50 = vpack.c.bf16 %v15538_v10, %v15526_v57  ;;  %v17663_v1 = vld [vmem:[#allocation94_spill] sm:$0xff] }
0x14d6   :  { %v7042_v2 = vpop.permute.xlu1 %7041  ;;  %v7087_v60 = vld [vmem:[#allocation3 + $0x60] sm:$0xff]  ;;  %v17678_v10 = vld [vmem:[#allocation58_spill] sm:$0xff] }
0x14d7   :  { %7074 = vst.msk [vmem:[#allocation3 + $0x78] sm:$0xff] %vm4744_vm5, %v7042_v2  ;;  %7097 = vxpose.xlu0.b32.cont [7/16] %v7081_v39, 128  ;;  %v17658_v2 = vpack.c.bf16 %v15468_v32, %v15458_v27  ;;  %v17659_v39 = vpack.c.bf16 %v15507_v11, %v15493_v29  ;;  %v17666_v32 = vld [vmem:[#allocation93_spill] sm:$0xff]  ;;  %v17669_v11 = vld [vmem:[#allocation96_spill] sm:$0xff] }
0x14d8   :  { %v17668_v29 = vpack.c.bf16 %v17666_v32, %v17667_v51 }
0x14da   :  { %v7089_v20 = vld [vmem:[#allocation3 + $0x70] sm:$0xff] }
0x14db   :  { %7098 = vxpose.xlu0.b32.cont [8/16] %v7082_v52, 128  ;;  %v17660_v52 = vpack.c.bf16 %v15500_v17, %v15490_v3  ;;  %v17672_v17 = vld [vmem:[#allocation91_spill] sm:$0xff] }
0x14dc   :  { %v7088_v47 = vld [vmem:[#allocation3 + $0x68] sm:$0xff] }
0x14de   :  { %v7090_v12 = vld [vmem:[#allocation3 + $0x78] sm:$0xff] }
0x14df   :  { %7099 = vxpose.xlu0.b32.cont [9/16] %v7083_v43, 128  ;;  %v17661_v43 = vpack.c.bf16 %v15545_v9, %v15529_v19  ;;  %v17675_v9 = vld [vmem:[#allocation95_spill] sm:$0xff] }
0x14e3   :  { %7100 = vxpose.xlu0.b32.cont [10/16] %v7084_v35, 128  ;;  %v17664_v35 = vld [vmem:[#allocation90_spill] sm:$0xff] }
0x14e4   :  { %v17665_v27 = vpack.c.bf16 %v17663_v1, %v17664_v35 }
0x14e7   :  { %7101 = vxpose.xlu0.b32.cont [11/16] %v7085_v58, 128  ;;  %v17670_v58 = vld [vmem:[#allocation86_spill] sm:$0xff] }
0x14e8   :  { %v17671_v3 = vpack.c.bf16 %v17669_v11, %v17670_v58  ;;  %v17703_v58 = vld [vmem:[#allocation35_spill] sm:$0xff] }
0x14eb   :  { %7102 = vxpose.xlu0.b32.cont [12/16] %v7086_v63, 128  ;;  %v17673_v63 = vld [vmem:[#allocation60_spill] sm:$0xff] }
0x14ec   :  { %v17674_v19 = vpack.c.bf16 %v17672_v17, %v17673_v63  ;;  %v17704_v63 = vld [vmem:[#allocation9_spill] sm:$0xff] }
0x14ef   :  { %7103 = vxpose.xlu0.b32.cont [13/16] %v7087_v60, 128  ;;  %v17676_v60 = vld [vmem:[#allocation98_spill] sm:$0xff] }
0x14f0   :  { %v17677_v57 = vpack.c.bf16 %v17675_v9, %v17676_v60  ;;  %v17705_v9 = vld [vmem:[#allocation8_spill] sm:$0xff] }
0x14f3   :  { %7104 = vxpose.xlu0.b32.cont [14/16] %v7088_v47, 128  ;;  %v17679_v47 = vld [vmem:[#allocation83_spill] sm:$0xff] }
0x14f7   :  { %7105 = vxpose.xlu0.b32.cont [15/16] %v7089_v20, 128  ;;  %v17680_v20 = vpack.c.bf16 %v17678_v10, %v17679_v47  ;;  %v11026_v10 = vld [vmem:[%s17071_s8 + $0x38] sm:$0xff]  }
0x14fb   :  { %7106 = vxpose.xlu0.b32.end [16/16] %v7090_v12, 128  ;;  %v17681_v12 = vld [vmem:[#allocation97_spill] sm:$0xff] }
0x153f   :  { %v7107_v31 = vpop.trf.xlu0 }
0x1543   :  { %v7108_v42 = vpop.trf.xlu0 }
0x1544   :  { %v7123_v55 = vpack.c.bf16 %v7108_v42, %v7107_v31  ;;  %v17682_v31 = vld [vmem:[#allocation81_spill] sm:$0xff] }
0x1545   :  { %v17683_v42 = vpack.c.bf16 %v17681_v12, %v17682_v31 }
0x1546   :  { %10770 = vmatprep.mubr.bf16.mxu1 %v7123_v55  ;;  %v17684_v55 = vld [vmem:[#allocation46_spill] sm:$0xff] }
0x1547   :  { %v7109_v23 = vpop.trf.xlu0 }
0x154b   :  { %v7110_v28 = vpop.trf.xlu0 }
0x154c   :  { %v7124_v5 = vpack.c.bf16 %v7110_v28, %v7109_v23  ;;  %v17685_v23 = vld [vmem:[#allocation92_spill] sm:$0xff] }
0x154d   :  { %v17686_v28 = vpack.c.bf16 %v17684_v55, %v17685_v23  ;;  %v17707_v23 = vld [vmem:[#allocation16_spill] sm:$0xff] }
0x154e   :  { %10771 = vmatmul.mubr.bf16.vlgmr.msra.gmra.mrb[0].mxu1 %v7124_v5  ;;  %v17688_v5 = vld [vmem:[#allocation66_spill] sm:$0xff] }
0x154f   :  { %v7111_v18 = vpop.trf.xlu0  ;;  %9849 = vmatpush3.bf16.msra.mxu1 %v11004_v8  ;;  %v17687_v8 = vld [vmem:[#allocation78_spill] sm:$0xff] }
0x1550   :  { %9850 = vmatprep.subr.bf16.mxu1 %v11005_v22  ;;  %v17689_v22 = vpack.c.bf16 %v17687_v8, %v17688_v5  ;;  %v17708_v5 = vld [vmem:[#allocation36_spill] sm:$0xff] }
0x1553   :  { %v7112_v30 = vpop.trf.xlu0  ;;  %9851 = vmatpush3.bf16.msra.mxu1 %v11006_v49  ;;  %v17691_v49 = vld [vmem:[#allocation82_spill] sm:$0xff] }
0x1554   :  { %v7125_v14 = vpack.c.bf16 %v7112_v30, %v7111_v18  ;;  %9852 = vmatprep.subr.bf16.mxu1 %v11007_v26  ;;  %v17690_v18 = vld [vmem:[#allocation68_spill] sm:$0xff]  ;;  %v11019_v30 = vld [vmem:[%s17071_s8] sm:$0xff]  }
0x1555   :  { %v17692_v26 = vpack.c.bf16 %v17690_v18, %v17691_v49  ;;  %10786 = vmatprep.subr.bf16.mxu0 %v11019_v30  ;;  %v17709_v18 = vld [vmem:[#allocation37_spill] sm:$0xff] }
0x1556   :  { %10774 = vmatprep.mubr.bf16.mxu1 %v7125_v14  ;;  %10787 = vmatpush3.bf16.msra.mxu0 %v11019_v30  ;;  %v11021_v14 = vld [vmem:[%s17071_s8 + $0x10] sm:$0xff]  }
0x1557   :  { %v7113_v46 = vpop.trf.xlu0  ;;  %9853 = vmatpush3.bf16.msra.mxu1 %v11008_v44  ;;  %v11020_v44 = vld [vmem:[%s17071_s8 + $0x8] sm:$0xff]  }
0x1558   :  { %9854 = vmatprep.subr.bf16.mxu1 %v11009_v34  ;;  %10788 = vmatprep.subr.bf16.mxu0 %v11020_v44 }
0x155a   :  { %10789 = vmatpush3.bf16.msra.mxu0 %v11020_v44 }
0x155b   :  { %v7114_v15 = vpop.trf.xlu0  ;;  %9855 = vmatpush3.bf16.msra.mxu1 %v11010_v54  ;;  %10790 = vmatprep.subr.bf16.mxu0 %v11021_v14  ;;  %v11022_v54 = vld [vmem:[%s17071_s8 + $0x18] sm:$0xff]  }
0x155c   :  { %v7126_v45 = vpack.c.bf16 %v7114_v15, %v7113_v46  ;;  %9856 = vmatprep.subr.bf16.mxu1 %v11011_v62  ;;  %v17693_v15 = vld [vmem:[#allocation26_spill] sm:$0xff] }
0x155e   :  { %10775 = vmatmul.mubr.bf16.gmra.mrb[4].mxu1 %v7126_v45  ;;  %10791 = vmatpush3.bf16.msra.mxu0 %v11021_v14  ;;  %v17694_v45 = vld [vmem:[#allocation27_spill] sm:$0xff] }
0x155f   :  { %v7115_v38 = vpop.trf.xlu0  ;;  %9857 = vmatpush3.bf16.msra.mxu1 %v11012_v6  ;;  %10792 = vmatprep.subr.bf16.mxu0 %v11022_v54 }
0x1560   :  { %9858 = vmatprep.subr.bf16.mxu1 %v11013_v41 }
0x1562   :  { %10793 = vmatpush3.bf16.msra.mxu0 %v11022_v54 }
0x1563   :  { %v7116_v40 = vpop.trf.xlu0  ;;  %9859 = vmatpush3.bf16.msra.mxu1 %v11014_v59  ;;  %v17695_v59 = vld [vmem:[#allocation22_spill] sm:$0xff] }
0x1564   :  { %v7127_v16 = vpack.c.bf16 %v7116_v40, %v7115_v38  ;;  %9860 = vmatprep.subr.bf16.mxu1 %v11015_v33  ;;  %v17696_v40 = vld [vmem:[#allocation18_spill] sm:$0xff] }
0x1566   :  { %10778 = vmatprep.mubr.bf16.mxu1 %v7127_v16 }
0x1567   :  { %v7117_v61 = vpop.trf.xlu0  ;;  %9861 = vmatpush3.bf16.msra.mxu1 %v11016_v25 }
0x1568   :  { %9862 = vmatprep.subr.bf16.mxu1 %v11017_v53  ;;  %v11023_v53 = vld [vmem:[%s17071_s8 + $0x20] sm:$0xff]  }
0x1569   :  { %10794 = vmatprep.subr.bf16.mxu0 %v11023_v53 }
0x156a   :  { %10795 = vmatpush3.bf16.msra.mxu0 %v11023_v53 }
0x156b   :  { %v7118_v13 = vpop.trf.xlu0  ;;  %9863 = vmatpush3.bf16.msra.mxu1 %v11018_v4  ;;  %v17697_v4 = vmov 0  }
0x156c   :  { %v7128_v24 = vpack.c.bf16 %v7118_v13, %v7117_v61  ;;  %v11024_v13 = vld [vmem:[%s17071_s8 + $0x28] sm:$0xff]  }
0x156d   :  { %10796 = vmatprep.subr.bf16.mxu0 %v11024_v13 }
0x156e   :  { %10779 = vmatmul.mubr.bf16.gmra.mrb[8].mxu1 %v7128_v24  ;;  %10797 = vmatpush3.bf16.msra.mxu0 %v11024_v13  ;;  %v11025_v24 = vld [vmem:[%s17071_s8 + $0x30] sm:$0xff]  }
0x156f   :  { %v7119_v56 = vpop.trf.xlu0  ;;  %10798 = vmatprep.subr.bf16.mxu0 %v11025_v24 }
0x1572   :  { %10799 = vmatpush3.bf16.msra.mxu0 %v11025_v24 }
0x1573   :  { %v7120_v37 = vpop.trf.xlu0  ;;  %10800 = vmatprep.subr.bf16.mxu0 %v11026_v10 }
0x1574   :  { %v7129_v36 = vpack.c.bf16 %v7120_v37, %v7119_v56 }
0x1576   :  { %10782 = vmatprep.mubr.bf16.mxu1 %v7129_v36  ;;  %10801 = vmatpush3.bf16.msra.mxu0 %v11026_v10 }
0x1577   :  { %v7121_v7 = vpop.trf.xlu0 }
0x157b   :  { %v7122_v48 = vpop.trf.xlu0 }
0x157c   :  { %v7130_v21 = vpack.c.bf16 %v7122_v48, %v7121_v7  ;;  %v17698_v7 = vld [vmem:[#allocation23_spill] sm:$0xff] }
0x157e   :  { %10783 = vmatmul.mubr.bf16.gmra.mrb[12].mxu1 %v7130_v21  ;;  %v17699_v21 = vld [vmem:[#allocation21_spill] sm:$0xff] }
0x157f   :  { %7949 = vmatprep.mubr.bf16.mxu1 %v17657_v0 }
0x1586   :  { %7950 = vmatmul.mubr.bf16.vlgmr.msra.gmra.mrb[16].mxu1 %v17658_v2 }
0x1587   :  { %7957 = vmatprep.mubr.bf16.mxu1 %v17659_v39  ;;  %v17700_v39 = vld [vmem:[#allocation32_spill] sm:$0xff] }
0x158e   :  { %7958 = vmatmul.mubr.bf16.gmra.mrb[20].mxu1 %v17660_v52 }
0x158f   :  { %7965 = vmatprep.mubr.bf16.mxu1 %v17661_v43  ;;  %v17701_v43 = vld [vmem:[#allocation19_spill] sm:$0xff] }
0x1596   :  { %7966 = vmatmul.mubr.bf16.gmra.mrb[24].mxu1 %v17662_v50 }
0x1597   :  { %7973 = vmatprep.mubr.bf16.mxu1 %v17665_v27 }
0x159e   :  { %7974 = vmatmul.mubr.bf16.gmra.mrb[28].mxu1 %v17668_v29  ;;  %v17702_v29 = vld [vmem:[#allocation31_spill] sm:$0xff] }
0x159f   :  { %7981 = vmatprep.mubr.bf16.mxu1 %v17671_v3 }
0x15a6   :  { %7982 = vmatmul.mubr.bf16.gmra.mrb[32].mxu1 %v17674_v19 }
0x15a7   :  { %7989 = vmatprep.mubr.bf16.mxu1 %v17677_v57 }
0x15ae   :  { %7990 = vmatmul.mubr.bf16.gmra.mrb[36].mxu1 %v17680_v20 }
0x15af   :  { %7997 = vmatprep.mubr.bf16.mxu1 %v17683_v42  ;;  %v17706_v42 = vld [vmem:[#allocation6_spill] sm:$0xff] }
0x15b6   :  { %7998 = vmatmul.mubr.bf16.gmra.mrb[40].mxu1 %v17686_v28 }
0x15b7   :  { %8005 = vmatprep.mubr.bf16.mxu1 %v17689_v22 }
0x15be   :  { %8006 = vmatmul.mubr.bf16.gmra.mrb[44].mxu1 %v17692_v26  ;;  %v17710_v26 = vld [vmem:[#allocation5_spill] sm:$0xff] }
0x15bf   :  { %v7819_v30 = vsub.s32 4, %v17710_v26 }
0x1621   :  { %v10772_v34 = vpop.f32.mrb[0].mxu1 }
0x1622   :  { %v7229_v46 = vpop.f32.mrb[1].mxu1  ;;  %v7310_v6 = vadd.f32 %v10772_v34, %v17693_v15 }
0x1623   :  { %v10773_v62 = vpop.f32.mrb[2].mxu1  ;;  %v7308_v33 = vadd.f32 %v7229_v46, %v17695_v59  ;;  %v11924_v46 = vld [vmem:[%s17065_s2] sm:$0x1f] }
0x1624   :  { %v7311_v41 = vadd.f32 %v10773_v62, %v17694_v45  ;;  %v7232_v38 = vpop.f32.mrb[3].mxu1  ;;  %v16105_v54 = vrot.slane %v11924_v46, %v7819_v30 }
0x1625   :  { %v7309_v25 = vadd.f32 %v7232_v38, %v17696_v40 }
0x1626   :  { %v7381_v16 = vpack.c.bf16 %v7311_v41, %v7310_v6 }
0x1627   :  { %v7380_v61 = vpack.c.bf16 %v7309_v25, %v7308_v33 }
0x1629   :  { %7609 = vmatmul.mubr.bf16.gmra.mrb[16].mxu0 %v7380_v61 }
0x162a   :  { %7618 = vmatprep.mubr.bf16.mxu0 %v17697_v4 }
0x1631   :  { %v10776_v56 = vpop.f32.mrb[4].mxu1  ;;  %7619 = vmatmul.mubr.bf16.gmra.mrb[20].mxu0 %v7381_v16 }
0x1632   :  { %v7245_v37 = vpop.f32.mrb[5].mxu1  ;;  %7628 = vmatprep.mubr.bf16.mxu0 %v17697_v4  ;;  %v7314_v48 = vadd.f32 %v10776_v56, %v17698_v7 }
0x1633   :  { %v10777_v36 = vpop.f32.mrb[6].mxu1  ;;  %v7312_v52 = vadd.f32 %v7245_v37, %v17700_v39 }
0x1634   :  { %v7315_v0 = vadd.f32 %v10777_v36, %v17699_v21  ;;  %v7248_v2 = vpop.f32.mrb[7].mxu1 }
0x1635   :  { %v7313_v50 = vadd.f32 %v7248_v2, %v17701_v43 }
0x1636   :  { %v7383_v1 = vpack.c.bf16 %v7315_v0, %v7314_v48 }
0x1637   :  { %v7382_v35 = vpack.c.bf16 %v7313_v50, %v7312_v52 }
0x1639   :  { %7629 = vmatmul.mubr.bf16.gmra.mrb[24].mxu0 %v7382_v35 }
0x163a   :  { %7638 = vmatprep.mubr.bf16.mxu0 %v17697_v4 }
0x1641   :  { %v10780_v27 = vpop.f32.mrb[8].mxu1  ;;  %7639 = vmatmul.mubr.bf16.gmra.mrb[28].mxu0 %v7383_v1 }
0x1642   :  { %v7261_v32 = vpop.f32.mrb[9].mxu1  ;;  %7648 = vmatprep.mubr.bf16.mxu0 %v17697_v4  ;;  %v7318_v11 = vadd.f32 %v10780_v27, %v17702_v29 }
0x1643   :  { %v10781_v51 = vpop.f32.mrb[10].mxu1  ;;  %v7316_v19 = vadd.f32 %v7261_v32, %v17704_v63 }
0x1644   :  { %v7319_v3 = vadd.f32 %v10781_v51, %v17703_v58  ;;  %v7264_v17 = vpop.f32.mrb[11].mxu1 }
0x1645   :  { %v7317_v60 = vadd.f32 %v7264_v17, %v17705_v9 }
0x1646   :  { %v7385_v57 = vpack.c.bf16 %v7319_v3, %v7318_v11 }
0x1647   :  { %v7384_v47 = vpack.c.bf16 %v7317_v60, %v7316_v19 }
0x1649   :  { %7649 = vmatmul.mubr.bf16.gmra.mrb[32].mxu0 %v7384_v47 }
0x164a   :  { %7658 = vmatprep.mubr.bf16.mxu0 %v17697_v4 }
0x1651   :  { %v10784_v20 = vpop.f32.mrb[12].mxu1  ;;  %7659 = vmatmul.mubr.bf16.gmra.mrb[36].mxu0 %v7385_v57 }
0x1652   :  { %v7277_v12 = vpop.f32.mrb[13].mxu1  ;;  %7668 = vmatprep.mubr.bf16.mxu0 %v17697_v4  ;;  %v7322_v55 = vadd.f32 %v10784_v20, %v17706_v42 }
0x1653   :  { %v10785_v31 = vpop.f32.mrb[14].mxu1  ;;  %v7320_v22 = vadd.f32 %v7277_v12, %v17708_v5  ;;  %v17711_v12 = vmov -1.0  }
0x1654   :  { %v7323_v28 = vadd.f32 %v10785_v31, %v17707_v23  ;;  %v7280_v8 = vpop.f32.mrb[15].mxu1 }
0x1655   :  { %v7321_v49 = vadd.f32 %v7280_v8, %v17709_v18 }
0x1656   :  { %v7387_v44 = vpack.c.bf16 %v7323_v28, %v7322_v55 }
0x1657   :  { %v7386_v14 = vpack.c.bf16 %v7321_v49, %v7320_v22 }
0x1659   :  { %7669 = vmatmul.mubr.bf16.gmra.mrb[40].mxu0 %v7386_v14  ;;  %v9864_v34 = vpop.f32.mrb[16].mxu1 }
0x165a   :  { %v9865_v62 = vpop.f32.mrb[17].mxu1  ;;  %7678 = vmatprep.mubr.bf16.mxu0 %v17697_v4 }
0x165b   :  { %v9866_v15 = vadd.f32 %v9865_v62, %v9864_v34  ;;  %v9867_v6 = vpop.f32.mrb[18].mxu1 }
0x165c   :  { %v9868_v45 = vpop.f32.mrb[19].mxu1 }
0x165d   :  { %v7952_v41 = vadd.f32 %v9866_v15, %v16105_v54  ;;  %v9869_v38 = vadd.f32 %v9868_v45, %v9867_v6 }
0x165f   :  { %v8110_v59 = vmul.f32 0.70710677, %v7952_v41  ;;  %v7955_v33 = vadd.f32 %v9869_v38, %v16105_v54  ;;  %v16112_v50 = vmul.f32 0.5, %v7952_v41 }
0x1661   :  { %7679 = vmatmul.mubr.bf16.gmra.mrb[44].mxu0 %v7387_v44  ;;  %v9870_v40 = vpop.f32.mrb[20].mxu1  ;;  %v8206_v25 = vand.u32 2147483647, %v8110_v59  ;;  %v8111_v16 = vmul.f32 0.70710677, %v7955_v33  ;;  %vm8142_vm6 = vcmp.ge.f32.partialorder %v8110_v59, 0.0 }
0x1662   :  { %v9871_v53 = vpop.f32.mrb[21].mxu1  ;;  %v16115_v58 = vmul.f32 0.5, %v7955_v33  ;;  %v16119_v31 = vsel %vm8142_vm6, 1.0, %v17711_v12 }
0x1663   :  { %v9873_v61 = vpop.f32.mrb[22].mxu1  ;;  %v9872_v13 = vadd.f32 %v9871_v53, %v9870_v40  ;;  %v8622_v56 = vsub.f32 0.0, %v8206_v25  ;;  %v8207_v37 = vand.u32 2147483647, %v8111_v16  ;;  %v8238_v7 = vmul.f32 0.3275911, %v8206_v25 }
0x1664   :  { %v9874_v24 = vpop.f32.mrb[23].mxu1  ;;  %vm8143_vm7 = vcmp.ge.f32.partialorder %v8111_v16, 0.0 }
0x1665   :  { %v7960_v4 = vadd.f32 %v9872_v13, %v16105_v54  ;;  %v9875_v36 = vadd.f32 %v9874_v24, %v9873_v61  ;;  %v8654_v39 = vmul.f32 %v8622_v56, %v8206_v25  ;;  %v8623_v1 = vsub.f32 0.0, %v8207_v37 }
0x1666   :  { %v8270_v32 = vadd.f32 1.0, %v8238_v7  ;;  %v8239_v51 = vmul.f32 0.3275911, %v8207_v37  ;;  %v16124_v18 = vsel %vm8143_vm7, 1.0, %v17711_v12 }
0x1667   :  { %v8112_v21 = vmul.f32 0.70710677, %v7960_v4  ;;  %v7963_v0 = vadd.f32 %v9875_v36, %v16105_v54  ;;  %v8686_v19 = vmul.f32 1.442695, %v8654_v39  ;;  %v8655_v57 = vmul.f32 %v8623_v1, %v8207_v37 }
0x1668   :  { %11795 = vrcp.f32 %v8270_v32  ;;  %v8271_v28 = vadd.f32 1.0, %v8239_v51  ;;  %v16127_v38 = vmul.f32 0.5, %v7960_v4 }
0x1669   :  { %v9876_v48 = vpop.f32.mrb[24].mxu1  ;;  %v8208_v35 = vand.u32 2147483647, %v8112_v21  ;;  %v8113_v27 = vmul.f32 0.70710677, %v7963_v0  ;;  %vm8144_vm8 = vcmp.ge.f32.partialorder %v8112_v21, 0.0 }
0x166a   :  { %v9877_v2 = vpop.f32.mrb[25].mxu1  ;;  %v8688_v44 = vmul.f32 1.442695, %v8655_v57  ;;  %v16129_v59 = vmul.f32 0.5, %v7963_v0  ;;  %v16134_v25 = vsel %vm8144_vm8, 1.0, %v17711_v12 }
0x166b   :  { %v9878_v52 = vadd.f32 %v9877_v2, %v9876_v48  ;;  %v9879_v43 = vpop.f32.mrb[26].mxu1  ;;  %v8240_v3 = vmul.f32 0.3275911, %v8208_v35  ;;  %v8624_v17 = vsub.f32 0.0, %v8208_v35  ;;  %v8209_v63 = vand.u32 2147483647, %v8113_v27 }
0x166c   :  { %v9880_v11 = vpop.f32.mrb[27].mxu1  ;;  %vm8145_vm9 = vcmp.ge.f32.partialorder %v8113_v27, 0.0 }
0x166d   :  { %v7968_v29 = vadd.f32 %v9878_v52, %v16105_v54  ;;  %v9881_v60 = vadd.f32 %v9880_v11, %v9879_v43  ;;  %v8272_v10 = vadd.f32 1.0, %v8240_v3  ;;  %v8241_v47 = vmul.f32 0.3275911, %v8209_v63 }
0x166e   :  { %v8625_v20 = vsub.f32 0.0, %v8209_v63  ;;  %v8656_v8 = vmul.f32 %v8624_v17, %v8208_v35  ;;  %v16137_v16 = vsel %vm8145_vm9, 1.0, %v17711_v12 }
0x166f   :  { %v8114_v9 = vmul.f32 0.70710677, %v7968_v29  ;;  %v7971_v55 = vadd.f32 %v9881_v60, %v16105_v54  ;;  %11797 = vrcp.f32 %v8272_v10  ;;  %v8273_v5 = vadd.f32 1.0, %v8241_v47 }
0x1670   :  { %11799 = vpow2.f32 %v8686_v19  ;;  %v8657_v49 = vmul.f32 %v8625_v20, %v8209_v63  ;;  %v8690_v6 = vmul.f32 1.442695, %v8656_v8  ;;  %v16146_v48 = vmul.f32 0.5, %v7968_v29 }
0x1671   :  { %v8210_v42 = vand.u32 2147483647, %v8114_v9  ;;  %v9882_v23 = vpop.f32.mrb[28].mxu1  ;;  %11801 = vrcp.f32 %v8273_v5  ;;  %v8115_v62 = vmul.f32 0.70710677, %v7971_v55  ;;  %vm8146_vm10 = vcmp.ge.f32.partialorder %v8114_v9, 0.0 }
0x1672   :  { %v9883_v22 = vpop.f32.mrb[29].mxu1  ;;  %11803 = vrcp.f32 %v8271_v28  ;;  %v8692_v33 = vmul.f32 1.442695, %v8657_v49  ;;  %v16144_v7 = vpop.eup %11795  ;;  %17712 = vst [vmem:[#allocation67_spill] sm:$0xff] %v16146_v48  ;;  %v16153_v52 = vsel %vm8146_vm10, 1.0, %v17711_v12  ;;  %v16155_v43 = vmul.f32 0.5, %v7971_v55 }
0x1673   :  { %v8626_v26 = vsub.f32 0.0, %v8210_v42  ;;  %v9885_v30 = vpop.f32.mrb[30].mxu1  ;;  %v8242_v14 = vmul.f32 0.3275911, %v8210_v42  ;;  %v9884_v34 = vadd.f32 %v9883_v22, %v9882_v23  ;;  %11805 = vpow2.f32 %v8688_v44 }
0x1674   :  { %v9886_v46 = vpop.f32.mrb[31].mxu1  ;;  %v8211_v13 = vand.u32 2147483647, %v8115_v62  ;;  %11807 = vpow2.f32 %v8690_v6  ;;  %vm8147_vm11 = vcmp.ge.f32.partialorder %v8115_v62, 0.0  ;;  %17713 = vst [vmem:[#allocation75_spill] sm:$0xff] %v16155_v43 }
0x1675   :  { %v9887_v15 = vadd.f32 %v9886_v46, %v9885_v30  ;;  %v8658_v45 = vmul.f32 %v8626_v26, %v8210_v42  ;;  %v7976_v41 = vadd.f32 %v9884_v34, %v16105_v54  ;;  %v8274_v53 = vadd.f32 1.0, %v8242_v14 }
0x1676   :  { %11809 = vpow2.f32 %v8692_v33  ;;  %v16162_v51 = vsel %vm8147_vm11, 1.0, %v17711_v12  ;;  %v8627_v29 = vsub.f32 0.0, %v8211_v13  ;;  %v8243_v3 = vmul.f32 0.3275911, %v8211_v13 }
0x1677   :  { %v7979_v40 = vadd.f32 %v9887_v15, %v16105_v54  ;;  %v16139_v61 = vmul.f32 0.70710677, %v7976_v41  ;;  %v8694_v37 = vmul.f32 1.442695, %v8658_v45  ;;  %11811 = vrcp.f32 %v8274_v53 }
0x1678   :  { %v16172_v42 = vmul.f32 0.5, %v7976_v41  ;;  %v8659_v28 = vmul.f32 %v8627_v29, %v8211_v13  ;;  %v8275_v34 = vadd.f32 1.0, %v8243_v3  ;;  %v16185_v15 = vmul.f32 1.0614054, %v16144_v7 }
0x1679   :  { %v16141_v24 = vmul.f32 0.70710677, %v7979_v40  ;;  %v9888_v56 = vpop.f32.mrb[32].mxu1  ;;  %v8212_v4 = vand.u32 2147483647, %v16139_v61  ;;  %v16149_v39 = vpop.eup %11797  ;;  %11813 = vpow2.f32 %v8694_v37  ;;  %vm8148_vm12 = vcmp.ge.f32.partialorder %v16139_v61, 0.0 }
0x167a   :  { %v9889_v36 = vpop.f32.mrb[33].mxu1  ;;  %v16157_v27 = vpop.eup %11799  ;;  %v8336_v32 = vmul.f32 1.0614054, %v16149_v39  ;;  %v16177_v49 = vmul.f32 0.5, %v7979_v40  ;;  %v16195_v37 = vsel %vm8148_vm12, 1.0, %v17711_v12 }
0x167b   :  { %v8213_v21 = vand.u32 2147483647, %v16141_v24  ;;  %v9890_v0 = vadd.f32 %v9889_v36, %v9888_v56  ;;  %v9891_v2 = vpop.f32.mrb[34].mxu1  ;;  %v8244_v1 = vmul.f32 0.3275911, %v8212_v4  ;;  %v16167_v19 = vpop.eup %11801  ;;  %v8628_v60 = vsub.f32 0.0, %v8212_v4 }
0x167c   :  { %v9892_v35 = vpop.f32.mrb[35].mxu1  ;;  %v8368_v9 = vadd.f32 -1.4531521, %v8336_v32  ;;  %v16169_v47 = vpop.eup %11803  ;;  %v8337_v20 = vmul.f32 1.0614054, %v16167_v19  ;;  %vm8149_vm13 = vcmp.ge.f32.partialorder %v16141_v24, 0.0 }
0x167d   :  { %v8245_v11 = vmul.f32 0.3275911, %v8213_v21  ;;  %v8276_v17 = vadd.f32 1.0, %v8244_v1  ;;  %v16165_v63 = vadd.f32 %v9890_v0, %v16105_v54  ;;  %v9893_v10 = vadd.f32 %v9892_v35, %v9891_v2  ;;  %v16182_v44 = vpop.eup %11805 }
0x167e   :  { %v8629_v55 = vsub.f32 0.0, %v8213_v21  ;;  %v8400_v23 = vmul.f32 %v16149_v39, %v8368_v9  ;;  %v8369_v22 = vadd.f32 -1.4531521, %v8337_v20  ;;  %v8660_v46 = vmul.f32 %v8628_v60, %v8212_v4  ;;  %v11808_v6 = vpop.eup %11807 }
0x167f   :  { %17714 = vst [vmem:[#allocation79_spill] sm:$0xff] %v16165_v63  ;;  %v8277_v57 = vadd.f32 1.0, %v8245_v11  ;;  %11815 = vrcp.f32 %v8276_v17  ;;  %v8118_v8 = vmul.f32 0.70710677, %v16165_v63  ;;  %v16180_v26 = vadd.f32 %v9893_v10, %v16105_v54 }
0x1680   :  { %v8432_v14 = vadd.f32 1.4214138, %v8400_v23  ;;  %v8401_v45 = vmul.f32 %v16167_v19, %v8369_v22  ;;  %v8661_v41 = vmul.f32 %v8629_v55, %v8213_v21  ;;  %v16189_v53 = vpop.eup %11809  ;;  %v8696_v56 = vmul.f32 1.442695, %v8659_v28 }
0x1681   :  { %11817 = vrcp.f32 %v8277_v57  ;;  %v9894_v5 = vpop.f32.mrb[36].mxu1  ;;  %17715 = vst [vmem:[#allocation64_spill] sm:$0xff] %v16180_v26  ;;  %v8214_v33 = vand.u32 2147483647, %v8118_v8  ;;  %v16197_v36 = vpop.eup %11811  ;;  %vm8150_vm14 = vcmp.ge.f32.partialorder %v8118_v8, 0.0  ;;  %v16203_v32 = vsel %vm8149_vm13, 1.0, %v17711_v12 }
0x1682   :  { %v9895_v30 = vpop.f32.mrb[37].mxu1  ;;  %v8464_v13 = vmul.f32 %v16149_v39, %v8432_v14  ;;  %v8433_v0 = vadd.f32 1.4214138, %v8401_v45  ;;  %v8119_v2 = vmul.f32 0.70710677, %v16180_v26  ;;  %11819 = vrcp.f32 %v8275_v34 }
0x1683   :  { %v9897_v62 = vpop.f32.mrb[38].mxu1  ;;  %v9896_v4 = vadd.f32 %v9895_v30, %v9894_v5  ;;  %v8698_v35 = vmul.f32 1.442695, %v8660_v46  ;;  %v16205_v29 = vpop.eup %11813  ;;  %v8700_v11 = vmul.f32 1.442695, %v8661_v41  ;;  %v8630_v3 = vsub.f32 0.0, %v8214_v33 }
0x1684   :  { %v9898_v40 = vpop.f32.mrb[39].mxu1  ;;  %v8496_v1 = vadd.f32 -0.28449672, %v8464_v13  ;;  %v8465_v61 = vmul.f32 %v16167_v19, %v8433_v0  ;;  %v16213_v60 = vsel %vm8150_vm14, 1.0, %v17711_v12  ;;  %v8246_v57 = vmul.f32 0.3275911, %v8214_v33 }
0x1685   :  { %v9899_v21 = vadd.f32 %v9898_v40, %v9897_v62  ;;  %v16209_v17 = vadd.f32 %v9896_v4, %v16105_v54  ;;  %17716 = vst [vmem:[#allocation70_spill] sm:$0xff] %v16213_v60  ;;  %v16218_v24 = vmul.f32 1.0614054, %v16169_v47  ;;  %11821 = vpow2.f32 %v8696_v56 }
0x1686   :  { %v8528_v9 = vmul.f32 %v16149_v39, %v8496_v1  ;;  %v8497_v55 = vadd.f32 -0.28449672, %v8465_v61  ;;  %vm8151_vm15 = vcmp.ge.f32.partialorder %v8119_v2, 0.0  ;;  %v8215_v23 = vand.u32 2147483647, %v8119_v2 }
0x1687   :  { %11823 = vpow2.f32 %v8698_v35  ;;  %v16226_v30 = vmul.f32 0.70710677, %v16209_v17  ;;  %v8662_v46 = vmul.f32 %v8630_v3, %v8214_v33  ;;  %v16231_v62 = vadd.f32 %v9899_v21, %v16105_v54 }
0x1688   :  { %v8560_v5 = vadd.f32 0.2548296, %v8528_v9  ;;  %v8529_v14 = vmul.f32 %v16167_v19, %v8497_v55  ;;  %v8278_v13 = vadd.f32 1.0, %v8246_v57  ;;  %11825 = vpow2.f32 %v8700_v11 }
0x1689   :  { %v16215_v10 = vpop.f32.mrb[40].mxu1  ;;  %v16220_v20 = vpop.eup %11815  ;;  %v8216_v56 = vand.u32 2147483647, %v16226_v30  ;;  %v8247_v35 = vmul.f32 0.3275911, %v8215_v23  ;;  %v8631_v55 = vsub.f32 0.0, %v8215_v23 }
0x168a   :  { %v9901_v28 = vpop.f32.mrb[41].mxu1  ;;  %v8340_v22 = vmul.f32 1.0614054, %v16220_v20  ;;  %v8592_v41 = vmul.f32 %v16149_v39, %v8560_v5  ;;  %v8561_v0 = vadd.f32 0.2548296, %v8529_v14  ;;  %v16245_v11 = vsel %vm8151_vm15, 1.0, %v17711_v12 }
0x168b   :  { %v16222_v8 = vpop.eup %11817  ;;  %v9903_v45 = vpop.f32.mrb[42].mxu1  ;;  %v8248_v33 = vmul.f32 0.3275911, %v8216_v56  ;;  %v8702_v26 = vmul.f32 1.442695, %v8662_v46  ;;  %17717 = vst [vmem:[#allocation69_spill] sm:$0xff] %v16245_v11  ;;  %11827 = vrcp.f32 %v8278_v13  ;;  %v8663_v11 = vmul.f32 %v8631_v55, %v8215_v23 }
0x168c   :  { %v8341_v34 = vmul.f32 1.0614054, %v16222_v8  ;;  %v8372_v40 = vadd.f32 -1.4531521, %v8340_v22  ;;  %v9904_v4 = vpop.f32.mrb[43].mxu1  ;;  %v8752_v61 = vmul.f32 %v11808_v6, %v8592_v41  ;;  %v8593_v21 = vmul.f32 %v16167_v19, %v8561_v0  ;;  %v16241_v57 = vpop.eup %11819 }
0x168d   :  { %v16239_v39 = vmul.f32 0.70710677, %v16231_v62  ;;  %v8280_v6 = vadd.f32 1.0, %v8248_v33  ;;  %v9902_v63 = vadd.f32 %v9901_v28, %v16215_v10  ;;  %v9905_v55 = vadd.f32 %v9904_v4, %v9903_v45 }
0x168e   :  { %v8373_v1 = vadd.f32 -1.4531521, %v8341_v34  ;;  %v8404_v9 = vmul.f32 %v16220_v20, %v8372_v40  ;;  %v8784_v5 = vsub.f32 1.0, %v8752_v61  ;;  %v8753_v34 = vmul.f32 %v16189_v53, %v8593_v21 }
0x168f   :  { %v8217_v19 = vand.u32 2147483647, %v16239_v39  ;;  %11829 = vrcp.f32 %v8280_v6  ;;  %v16253_v2 = vpop.eup %11821  ;;  %vm8152_vm0 = vcmp.ge.f32.partialorder %v16226_v30, 0.0  ;;  %vm8153_vm1 = vcmp.ge.f32.partialorder %v16239_v39, 0.0 }
0x1690   :  { %v8405_v3 = vmul.f32 %v16222_v8, %v8373_v1  ;;  %v8436_v22 = vadd.f32 1.4214138, %v8404_v9  ;;  %v8816_v40 = vmul.f32 %v8784_v5, %v16134_v25  ;;  %v8279_v1 = vadd.f32 1.0, %v8247_v35 }
0x1691   :  { %v9906_v14 = vpop.f32.mrb[44].mxu1  ;;  %v8785_v9 = vsub.f32 1.0, %v8753_v34  ;;  %v8249_v53 = vmul.f32 0.3275911, %v8217_v19  ;;  %v11824_v13 = vpop.eup %11823  ;;  %v16259_v25 = vmul.f32 0.5, %v16209_v17  ;;  %v8632_v5 = vsub.f32 0.0, %v8216_v56 }
0x1692   :  { %v8437_v41 = vadd.f32 1.4214138, %v8405_v3  ;;  %v9907_v46 = vpop.f32.mrb[45].mxu1  ;;  %v8468_v0 = vmul.f32 %v16220_v20, %v8436_v22  ;;  %v8848_v3 = vadd.f32 1.0, %v8816_v40  ;;  %11831 = vpow2.f32 %v8702_v26 }
0x1693   :  { %v16251_v61 = vpop.f32.mrb[46].mxu1  ;;  %v8817_v35 = vmul.f32 %v8785_v9, %v16137_v16  ;;  %v8281_v6 = vadd.f32 1.0, %v8249_v53  ;;  %v8633_v23 = vsub.f32 0.0, %v8217_v19  ;;  %v16266_v17 = vadd.f32 %v9902_v63, %v16105_v54 }
0x1694   :  { %v8469_v33 = vmul.f32 %v16222_v8, %v8437_v41  ;;  %v16256_v21 = vpop.f32.mrb[47].mxu1  ;;  %v8500_v60 = vadd.f32 -0.28449672, %v8468_v0  ;;  %v11826_v41 = vpop.eup %11825  ;;  %v8664_v48 = vmul.f32 %v8632_v5, %v8216_v56  ;;  %v16269_v16 = vadd.f32 %v9905_v55, %v16105_v54 }
0x1695   :  { %v8849_v43 = vadd.f32 1.0, %v8817_v35  ;;  %11833 = vrcp.f32 %v8281_v6  ;;  %v9908_v9 = vadd.f32 %v9907_v46, %v9906_v14  ;;  %v16272_v10 = vmul.f32 %v8848_v3, %v16127_v38 }
0x1696   :  { %v8501_v22 = vadd.f32 -0.28449672, %v8469_v33  ;;  %v8532_v34 = vmul.f32 %v16220_v20, %v8500_v60  ;;  %v16278_v28 = vmul.f32 0.70710677, %v16266_v17  ;;  %v8704_v63 = vmul.f32 1.442695, %v8663_v11  ;;  %v16284_v33 = vpop.eup %11827 }
0x1697   :  { %v16275_v26 = vmul.f32 %v8849_v43, %v16129_v59  ;;  %v8665_v4 = vmul.f32 %v8633_v23, %v8217_v19  ;;  %v16282_v56 = vmul.f32 0.70710677, %v16269_v16  ;;  %11835 = vrcp.f32 %v8279_v1 }
0x1698   :  { %v8533_v40 = vmul.f32 %v16222_v8, %v8501_v22  ;;  %v8564_v0 = vadd.f32 0.2548296, %v8532_v34  ;;  %v8218_v59 = vand.u32 2147483647, %v16278_v28  ;;  %11837 = vpow2.f32 %v8704_v63 }
0x1699   :  { %v8911_v38 = vpack.c.bf16 %v16275_v26, %v16272_v10  ;;  %v16290_v43 = vpop.eup %11829  ;;  %v8219_v11 = vand.u32 2147483647, %v16282_v56  ;;  %v8708_v22 = vmul.f32 1.442695, %v8665_v4  ;;  %v16311_v63 = vmul.f32 0.5, %v16231_v62 }
0x169a   :  { %v8565_v60 = vadd.f32 0.2548296, %v8533_v40  ;;  %v8596_v45 = vmul.f32 %v16220_v20, %v8564_v0  ;;  %v8706_v20 = vmul.f32 1.442695, %v8664_v48  ;;  %v8344_v53 = vmul.f32 1.0614054, %v16290_v43 }
0x169b   :  { %v8250_v3 = vmul.f32 0.3275911, %v8218_v59  ;;  %v8634_v5 = vsub.f32 0.0, %v8218_v59  ;;  %v8635_v23 = vsub.f32 0.0, %v8219_v11  ;;  %v16301_v48 = vsel %vm8152_vm0, 1.0, %v17711_v12 }
0x169c   :  { %v8597_v14 = vmul.f32 %v16222_v8, %v8565_v60  ;;  %v8756_v46 = vmul.f32 %v11824_v13, %v8596_v45  ;;  %v8251_v8 = vmul.f32 0.3275911, %v8219_v11  ;;  %v8376_v6 = vadd.f32 -1.4531521, %v8344_v53  ;;  %v16295_v55 = vpop.eup %11831 }
0x169d   :  { %v8282_v34 = vadd.f32 1.0, %v8250_v3  ;;  %v16304_v40 = vadd.f32 %v9908_v9, %v16105_v54  ;;  %11839 = vpow2.f32 %v8706_v20  ;;  %v8667_v9 = vmul.f32 %v8635_v23, %v8219_v11 }
0x169e   :  { %v8757_v19 = vmul.f32 %v11826_v41, %v8597_v14  ;;  %v8788_v35 = vsub.f32 1.0, %v8756_v46  ;;  %v8666_v41 = vmul.f32 %v8634_v5, %v8218_v59  ;;  %v8408_v45 = vmul.f32 %v16290_v43, %v8376_v6 }
0x169f   :  { %v16306_v0 = vpop.eup %11833  ;;  %11841 = vpow2.f32 %v8708_v22  ;;  %v8283_v30 = vadd.f32 1.0, %v8251_v8  ;;  %v16319_v20 = vmul.f32 0.70710677, %v16304_v40  ;;  %v8366_v5 = vadd.f32 -1.4531521, %v16185_v15 }
0x16a0   :  { %v8789_v1 = vsub.f32 1.0, %v8757_v19  ;;  %v8820_v13 = vmul.f32 %v8788_v35, %v16195_v37  ;;  %v8345_v4 = vmul.f32 1.0614054, %v16306_v0  ;;  %v8440_v59 = vadd.f32 1.4214138, %v8408_v45 }
0x16a1   :  { %11843 = vrcp.f32 %v8282_v34  ;;  %v8710_v19 = vmul.f32 1.442695, %v8666_v41  ;;  %v16321_v62 = vpop.eup %11835  ;;  %v8367_v35 = vadd.f32 -1.4531521, %v16218_v24  ;;  %v9911_v22 = vadd.f32 %v16256_v21, %v16251_v61 }
0x16a2   :  { %v8821_v60 = vmul.f32 %v8789_v1, %v16203_v32  ;;  %v8852_v37 = vadd.f32 1.0, %v8820_v13  ;;  %v8377_v32 = vadd.f32 -1.4531521, %v8345_v4  ;;  %v8472_v3 = vmul.f32 %v16290_v43, %v8440_v59  ;;  %v16336_v34 = vpop.eup %11837 }
0x16a3   :  { %11845 = vrcp.f32 %v8283_v30  ;;  %v8398_v6 = vmul.f32 %v16144_v7, %v8366_v5  ;;  %v8399_v13 = vmul.f32 %v16169_v47, %v8367_v35  ;;  %v16341_v61 = vadd.f32 %v9911_v22, %v16105_v54 }
0x16a4   :  { %v8853_v14 = vadd.f32 1.0, %v8821_v60  ;;  %v16316_v46 = vmul.f32 %v8852_v37, %v16172_v42  ;;  %v8409_v11 = vmul.f32 %v16306_v0, %v8377_v32  ;;  %v8220_v42 = vand.u32 2147483647, %v16319_v20 }
0x16a5   :  { %v8504_v1 = vadd.f32 -0.28449672, %v8472_v3  ;;  %11847 = vpow2.f32 %v8710_v19  ;;  %v8430_v60 = vadd.f32 1.4214138, %v8398_v6  ;;  %v8431_v4 = vadd.f32 1.4214138, %v8399_v13 }
0x16a6   :  { %v16324_v53 = vmul.f32 %v8853_v14, %v16177_v49  ;;  %v8712_v49 = vmul.f32 1.442695, %v8667_v9  ;;  %v8441_v15 = vadd.f32 1.4214138, %v8409_v11  ;;  %v8252_v23 = vmul.f32 0.3275911, %v8220_v42 }
0x16a7   :  { %v8636_v24 = vsub.f32 0.0, %v8220_v42  ;;  %v8536_v41 = vmul.f32 %v16290_v43, %v8504_v1  ;;  %v11840_v30 = vpop.eup %11839  ;;  %v8462_v59 = vmul.f32 %v16144_v7, %v8430_v60  ;;  %v16346_v9 = vmul.f32 0.70710677, %v16341_v61 }
0x16a8   :  { %v8473_v21 = vmul.f32 %v16306_v0, %v8441_v15  ;;  %v8284_v45 = vadd.f32 1.0, %v8252_v23  ;;  %v8338_v32 = vmul.f32 1.0614054, %v16197_v36  ;;  %v8463_v35 = vmul.f32 %v16169_v47, %v8431_v4 }
0x16a9   :  { %v8668_v37 = vmul.f32 %v8636_v24, %v8220_v42  ;;  %v8568_v14 = vadd.f32 0.2548296, %v8536_v41  ;;  %v11842_v3 = vpop.eup %11841  ;;  %v8494_v22 = vadd.f32 -0.28449672, %v8462_v59  ;;  %v8221_v1 = vand.u32 2147483647, %v16346_v9 }
0x16aa   :  { %v8505_v19 = vadd.f32 -0.28449672, %v8473_v21  ;;  %11849 = vrcp.f32 %v8284_v45  ;;  %v8185_v6 = vsel %vm8153_vm1, 1.0, %v17711_v12  ;;  %v8495_v23 = vadd.f32 -0.28449672, %v8463_v35 }
0x16ab   :  { %v8714_v5 = vmul.f32 1.442695, %v8668_v37  ;;  %v16350_v11 = vpop.eup %11843  ;;  %v8600_v42 = vmul.f32 %v16290_v43, %v8568_v14  ;;  %11851 = vpow2.f32 %v8712_v49  ;;  %v8526_v13 = vmul.f32 %v16144_v7, %v8494_v22 }
0x16ac   :  { %v8537_v15 = vmul.f32 %v16306_v0, %v8505_v19  ;;  %v8253_v41 = vmul.f32 0.3275911, %v8221_v1  ;;  %v8637_v60 = vsub.f32 0.0, %v8221_v1  ;;  %v8527_v49 = vmul.f32 %v16169_v47, %v8495_v23 }
0x16ad   :  { %11853 = vpow2.f32 %v8714_v5  ;;  %v8760_v24 = vmul.f32 %v11840_v30, %v8600_v42  ;;  %v16359_v21 = vpop.eup %11845  ;;  %v8339_v45 = vmul.f32 1.0614054, %v16241_v57  ;;  %v8370_v37 = vadd.f32 -1.4531521, %v8338_v32 }
0x16ae   :  { %v8569_v43 = vadd.f32 0.2548296, %v8537_v15  ;;  %v8558_v39 = vadd.f32 0.2548296, %v8526_v13  ;;  %v8285_v14 = vadd.f32 1.0, %v8253_v41  ;;  %v8669_v59 = vmul.f32 %v8637_v60, %v8221_v1 }
0x16af   :  { %v8792_v4 = vsub.f32 1.0, %v8760_v24  ;;  %v8559_v5 = vadd.f32 0.2548296, %v8527_v49  ;;  %v8371_v30 = vadd.f32 -1.4531521, %v8339_v45  ;;  %v8402_v35 = vmul.f32 %v16197_v36, %v8370_v37  ;;  %v16365_v42 = vpop.eup %11847 }
0x16b0   :  { %v8601_v19 = vmul.f32 %v16306_v0, %v8569_v43  ;;  %v8590_v15 = vmul.f32 %v16144_v7, %v8558_v39  ;;  %11855 = vrcp.f32 %v8285_v14  ;;  %v8716_v23 = vmul.f32 1.442695, %v8669_v59 }
0x16b1   :  { %v8824_v22 = vmul.f32 %v8792_v4, %v16301_v48  ;;  %v8591_v32 = vmul.f32 %v16169_v47, %v8559_v5  ;;  %v8403_v24 = vmul.f32 %v16241_v57, %v8371_v30  ;;  %v8434_v1 = vadd.f32 1.4214138, %v8402_v35 }
0x16b2   :  { %v8761_v8 = vmul.f32 %v11842_v3, %v8601_v19  ;;  %v8750_v0 = vmul.f32 %v16157_v27, %v8590_v15  ;;  %11857 = vpow2.f32 %v8716_v23  ;;  %v8342_v41 = vmul.f32 1.0614054, %v16284_v33 }
0x16b3   :  { %v8856_v13 = vadd.f32 1.0, %v8824_v22  ;;  %v8751_v48 = vmul.f32 %v16182_v44, %v8591_v32  ;;  %v8435_v7 = vadd.f32 1.4214138, %v8403_v24  ;;  %v8466_v49 = vmul.f32 %v16197_v36, %v8434_v1 }
0x16b4   :  { %v16373_v60 = vpop.eup %11849  ;;  %v8793_v43 = vsub.f32 1.0, %v8761_v8  ;;  %v8782_v37 = vsub.f32 1.0, %v8750_v0  ;;  %v8343_v27 = vmul.f32 1.0614054, %v16321_v62  ;;  %v8374_v5 = vadd.f32 -1.4531521, %v8342_v41 }
0x16b5   :  { %v16377_v3 = vpop.eup %11851  ;;  %v16380_v47 = vmul.f32 %v8856_v13, %v16259_v25  ;;  %v8348_v45 = vmul.f32 1.0614054, %v16373_v60  ;;  %v8783_v14 = vsub.f32 1.0, %v8751_v48  ;;  %v8467_v8 = vmul.f32 %v16241_v57, %v8435_v7 }
0x16b6   :  { %v8825_v39 = vmul.f32 %v8793_v43, %v8185_v6  ;;  %v8498_v44 = vadd.f32 -0.28449672, %v8466_v49  ;;  %v8814_v19 = vmul.f32 %v8782_v37, %v16119_v31  ;;  %v8375_v30 = vadd.f32 -1.4531521, %v8343_v27 }
0x16b7   :  { %v16384_v4 = vpop.eup %11853  ;;  %v8380_v59 = vadd.f32 -1.4531521, %v8348_v45  ;;  %v8815_v25 = vmul.f32 %v8783_v14, %v16124_v18  ;;  %v8499_v22 = vadd.f32 -0.28449672, %v8467_v8  ;;  %v8406_v6 = vmul.f32 %v16284_v33, %v8374_v5 }
0x16b8   :  { %v8857_v35 = vadd.f32 1.0, %v8825_v39  ;;  %v8530_v15 = vmul.f32 %v16197_v36, %v8498_v44  ;;  %v8846_v32 = vadd.f32 1.0, %v8814_v19  ;;  %v8407_v24 = vmul.f32 %v16321_v62, %v8375_v30 }
0x16b9   :  { %v8412_v23 = vmul.f32 %v16373_v60, %v8380_v59  ;;  %v8847_v13 = vadd.f32 1.0, %v8815_v25  ;;  %v8531_v31 = vmul.f32 %v16241_v57, %v8499_v22  ;;  %v8438_v48 = vadd.f32 1.4214138, %v8406_v6 }
0x16ba   :  { %v16394_v1 = vmul.f32 %v8857_v35, %v16311_v63  ;;  %v8562_v0 = vadd.f32 0.2548296, %v8530_v15  ;;  %v16397_v41 = vpop.eup %11855  ;;  %v8878_v43 = vmul.f32 %v8846_v32, %v16112_v50  ;;  %v8439_v7 = vadd.f32 1.4214138, %v8407_v24 }
0x16bb   :  { %v8444_v18 = vadd.f32 1.4214138, %v8412_v23  ;;  %v8879_v45 = vmul.f32 %v8847_v13, %v16115_v58  ;;  %v8349_v37 = vmul.f32 1.0614054, %v16397_v41  ;;  %v8563_v63 = vadd.f32 0.2548296, %v8531_v31 }
0x16bc   :  { %v8915_v49 = vpack.c.bf16 %v16394_v1, %v16380_v47  ;;  %v16404_v27 = vpop.eup %11857  ;;  %v8594_v14 = vmul.f32 %v16197_v36, %v8562_v0  ;;  %v8470_v8 = vmul.f32 %v16284_v33, %v8438_v48  ;;  %v8471_v50 = vmul.f32 %v16321_v62, %v8439_v7  ;;  %v17726_v1 = vld [vmem:[#allocation52_spill] sm:$0xff] }
0x16bd   :  { %v8476_v39 = vmul.f32 %v16373_v60, %v8444_v18  ;;  %v8910_v44 = vpack.c.bf16 %v8879_v45, %v8878_v43  ;;  %v8381_v59 = vadd.f32 -1.4531521, %v8349_v37  ;;  %v8595_v19 = vmul.f32 %v16241_v57, %v8563_v63 }
0x16be   :  { %v8346_v5 = vmul.f32 1.0614054, %v16350_v11  ;;  %v8754_v30 = vmul.f32 %v16205_v29, %v8594_v14  ;;  %v8502_v35 = vadd.f32 -0.28449672, %v8470_v8  ;;  %v8503_v25 = vadd.f32 -0.28449672, %v8471_v50 }
0x16bf   :  { %v8508_v58 = vadd.f32 -0.28449672, %v8476_v39  ;;  %10802 = vmatprep.mubr.bf16.mxu0 %v8910_v44  ;;  %v8413_v22 = vmul.f32 %v16397_v41, %v8381_v59  ;;  %v8755_v36 = vmul.f32 %v16253_v2, %v8595_v19  ;;  %v8347_v15 = vmul.f32 1.0614054, %v16359_v21  ;;  %v17718_v59 = vld [vmem:[#allocation67_spill] sm:$0xff] }
0x16c0   :  { %v8378_v23 = vadd.f32 -1.4531521, %v8346_v5  ;;  %10803 = vmatmul.mubr.bf16.vlgmr.msra.gmra.mrb[48].mxu0 %v8911_v38  ;;  %v8786_v57 = vsub.f32 1.0, %v8754_v30  ;;  %v8534_v6 = vmul.f32 %v16284_v33, %v8502_v35  ;;  %v8535_v29 = vmul.f32 %v16321_v62, %v8503_v25 }
0x16c1   :  { %v8540_v32 = vmul.f32 %v16373_v60, %v8508_v58  ;;  %v8445_v24 = vadd.f32 1.4214138, %v8413_v22  ;;  %v8787_v13 = vsub.f32 1.0, %v8755_v36  ;;  %v8379_v31 = vadd.f32 -1.4531521, %v8347_v15  ;;  %v17719_v58 = vld [vmem:[#allocation75_spill] sm:$0xff] }
0x16c2   :  { %v8410_v0 = vmul.f32 %v16350_v11, %v8378_v23  ;;  %v8818_v18 = vmul.f32 %v8786_v57, %v16153_v52  ;;  %v8566_v43 = vadd.f32 0.2548296, %v8534_v6  ;;  %v8567_v48 = vadd.f32 0.2548296, %v8535_v29  ;;  %v17722_v6 = vld [vmem:[#allocation69_spill] sm:$0xff] }
0x16c3   :  { %v8572_v2 = vadd.f32 0.2548296, %v8540_v32  ;;  %v8477_v7 = vmul.f32 %v16397_v41, %v8445_v24  ;;  %v8819_v10 = vmul.f32 %v8787_v13, %v16162_v51  ;;  %v8411_v26 = vmul.f32 %v16359_v21, %v8379_v31  ;;  %v17723_v24 = vld [vmem:[#allocation64_spill] sm:$0xff] }
0x16c4   :  { %v8442_v38 = vadd.f32 1.4214138, %v8410_v0  ;;  %v8850_v37 = vadd.f32 1.0, %v8818_v18  ;;  %v8598_v63 = vmul.f32 %v16284_v33, %v8566_v43  ;;  %v8599_v39 = vmul.f32 %v16321_v62, %v8567_v48 }
0x16c5   :  { %v8604_v45 = vmul.f32 %v16373_v60, %v8572_v2  ;;  %v8509_v14 = vadd.f32 -0.28449672, %v8477_v7  ;;  %v8851_v8 = vadd.f32 1.0, %v8819_v10  ;;  %v8443_v50 = vadd.f32 1.4214138, %v8411_v26 }
0x16c6   :  { %v8474_v52 = vmul.f32 %v16350_v11, %v8442_v38  ;;  %v8882_v19 = vmul.f32 %v8850_v37, %v17718_v59  ;;  %v8758_v51 = vmul.f32 %v16295_v55, %v8598_v63  ;;  %v8759_v5 = vmul.f32 %v16336_v34, %v8599_v39  ;;  %v17720_v55 = vld [vmem:[#allocation79_spill] sm:$0xff]  ;;  %v17721_v34 = vld [vmem:[#allocation70_spill] sm:$0xff] }
0x16c7   :  { %v8764_v44 = vmul.f32 %v16384_v4, %v8604_v45  ;;  %v8541_v60 = vmul.f32 %v16397_v41, %v8509_v14  ;;  %v8883_v30 = vmul.f32 %v8851_v8, %v17719_v58  ;;  %v8475_v33 = vmul.f32 %v16359_v21, %v8443_v50 }
0x16c8   :  { %v8506_v62 = vadd.f32 -0.28449672, %v8474_v52  ;;  %vm8156_vm2 = vcmp.ge.f32.partialorder %v16319_v20, 0.0  ;;  %v8790_v25 = vsub.f32 1.0, %v8758_v51  ;;  %v8791_v22 = vsub.f32 1.0, %v8759_v5 }
0x16c9   :  { %v8796_v35 = vsub.f32 1.0, %v8764_v44  ;;  %v8573_v36 = vadd.f32 0.2548296, %v8541_v60  ;;  %v8912_v4 = vpack.c.bf16 %v8883_v30, %v8882_v19  ;;  %v8507_v15 = vadd.f32 -0.28449672, %v8475_v33 }
0x16ca   :  { %v8538_v23 = vmul.f32 %v16350_v11, %v8506_v62  ;;  %v8086_v32 = vmul.f32 0.5, %v17720_v55  ;;  %v8822_v57 = vmul.f32 %v8790_v25, %v17721_v34  ;;  %v8823_v29 = vmul.f32 %v8791_v22, %v17722_v6  ;;  %v17725_v62 = vld [vmem:[#allocation54_spill] sm:$0xff] }
0x16cb   :  { %v8087_v13 = vmul.f32 0.5, %v17723_v24  ;;  %v8605_v31 = vmul.f32 %v16397_v41, %v8573_v36  ;;  %10806 = vmatprep.mubr.bf16.mxu0 %v8912_v4  ;;  %v8539_v0 = vmul.f32 %v16359_v21, %v8507_v15  ;;  %v8188_v18 = vsel %vm8156_vm2, 1.0, %v17711_v12 }
0x16cc   :  { %v8570_v2 = vadd.f32 0.2548296, %v8538_v23  ;;  %vm8157_vm3 = vcmp.ge.f32.partialorder %v16346_v9, 0.0  ;;  %v17724_v43 = vpack.c.bf16 %v16324_v53, %v16316_v46  ;;  %v8854_v48 = vadd.f32 1.0, %v8822_v57 }
0x16cd   :  { %v8855_v7 = vadd.f32 1.0, %v8823_v29  ;;  %v8828_v10 = vmul.f32 %v8796_v35, %v8188_v18  ;;  %v8765_v26 = vmul.f32 %v16404_v27, %v8605_v31  ;;  %v8571_v41 = vadd.f32 0.2548296, %v8539_v0 }
0x16ce   :  { %10807 = vmatmul.mubr.bf16.gmra.mrb[52].mxu0 %v17724_v43  ;;  %v8602_v38 = vmul.f32 %v16350_v11, %v8570_v2  ;;  %v8886_v45 = vmul.f32 %v8854_v48, %v8086_v32  ;;  %vm8154_vm4 = vcmp.ge.f32.partialorder %v16278_v28, 0.0  ;;  %vm8155_vm5 = vcmp.ge.f32.partialorder %v16282_v56, 0.0 }
0x16cf   :  { %v8887_v37 = vmul.f32 %v8855_v7, %v8087_v13  ;;  %v8797_v20 = vsub.f32 1.0, %v8765_v26  ;;  %v8603_v63 = vmul.f32 %v16359_v21, %v8571_v41  ;;  %v8189_v46 = vsel %vm8157_vm3, 1.0, %v17711_v12 }
0x16d0   :  { %v8762_v9 = vmul.f32 %v16365_v42, %v8602_v38  ;;  %v8860_v39 = vadd.f32 1.0, %v8828_v10  ;;  %v8186_v11 = vsel %vm8154_vm4, 1.0, %v17711_v12  ;;  %v8092_v50 = vmul.f32 0.5, %v16304_v40 }
0x16d1   :  { %v8914_v53 = vpack.c.bf16 %v8887_v37, %v8886_v45  ;;  %v8829_v14 = vmul.f32 %v8797_v20, %v8189_v46  ;;  %v8763_v27 = vmul.f32 %v16377_v3, %v8603_v63  ;;  %v8093_v28 = vmul.f32 0.5, %v16341_v61 }
0x16d2   :  { %v8794_v8 = vsub.f32 1.0, %v8762_v9  ;;  %v8187_v56 = vsel %vm8155_vm5, 1.0, %v17711_v12  ;;  %v8892_v44 = vmul.f32 %v8860_v39, %v8092_v50  ;;  %v8090_v51 = vmul.f32 0.5, %v16266_v17 }
0x16d3   :  { %10810 = vmatprep.mubr.bf16.mxu0 %v8914_v53  ;;  %v8861_v21 = vadd.f32 1.0, %v8829_v14  ;;  %v8795_v52 = vsub.f32 1.0, %v8763_v27  ;;  %v8091_v40 = vmul.f32 0.5, %v16269_v16 }
0x16d4   :  { %v8826_v42 = vmul.f32 %v8794_v8, %v8186_v11 }
0x16d5   :  { %v8893_v59 = vmul.f32 %v8861_v21, %v8093_v28  ;;  %v8827_v3 = vmul.f32 %v8795_v52, %v8187_v56 }
0x16d6   :  { %10811 = vmatmul.mubr.bf16.gmra.mrb[56].mxu0 %v8915_v49  ;;  %v8858_v19 = vadd.f32 1.0, %v8826_v42 }
0x16d7   :  { %v8917_v5 = vpack.c.bf16 %v8893_v59, %v8892_v44  ;;  %v8859_v60 = vadd.f32 1.0, %v8827_v3 }
0x16d8   :  { %v8890_v61 = vmul.f32 %v8858_v19, %v8090_v51 }
0x16d9   :  { %v8891_v58 = vmul.f32 %v8859_v60, %v8091_v40 }
0x16db   :  { %v8916_v30 = vpack.c.bf16 %v8891_v58, %v8890_v61 }
0x16dd   :  { %10814 = vmatprep.mubr.bf16.mxu0 %v8916_v30 }
0x16de   :  { %10815 = vmatmul.mubr.bf16.gmra.mrb[60].mxu0 %v8917_v5 }
0x16fc   :  { %v7610_v33 = vpop.f32.mrb[16].mxu0 }
0x16fd   :  { %v7611_v35 = vadd.f32 %v7610_v33, %v17725_v62  ;;  %v7612_v47 = vpop.f32.mrb[17].mxu0 }
0x16fe   :  { %v7613_v49 = vadd.f32 %v7612_v47, %v17726_v1  ;;  %v7614_v25 = vpop.f32.mrb[18].mxu0 }
0x16ff   :  { %7721 = vst [vmem:[%s17069_s10 + $0x100] sm:$0xff] %v7611_v35  ;;  %v7615_v17 = vadd.f32 %v7614_v25, %v17725_v62  ;;  %v7616_v16 = vpop.f32.mrb[19].mxu0 }
0x1700   :  { %7722 = vst [vmem:[%s17069_s10 + $0x108] sm:$0xff] %v7613_v49  ;;  %v7617_v22 = vadd.f32 %v7616_v16, %v17726_v1 }
0x1701   :  { %7723 = vst [vmem:[%s17069_s10 + $0x110] sm:$0xff] %v7615_v17  ;;  %v7769_v36 = vpack.c.bf16 %v7615_v17, %v7611_v35 }
0x1702   :  { %7724 = vst [vmem:[%s17069_s10 + $0x118] sm:$0xff] %v7617_v22  ;;  %v7770_v4 = vpack.c.bf16 %v7617_v22, %v7613_v49 }
0x1704   :  { %v7620_v15 = vpop.f32.mrb[20].mxu0  ;;  %8013 = vmatprep.mubr.bf16.mxu1 %v7770_v4 }
0x1705   :  { %v7621_v23 = vadd.f32 %v7620_v15, %v17725_v62  ;;  %v7622_v55 = vpop.f32.mrb[21].mxu0  ;;  %8014 = vmatmul.mubr.bf16.gmra.mrb[48].mxu1 %v7769_v36 }
0x1706   :  { %v7623_v32 = vadd.f32 %v7622_v55, %v17726_v1  ;;  %v7624_v34 = vpop.f32.mrb[22].mxu0 }
0x1707   :  { %7725 = vst [vmem:[%s17069_s10 + $0x120] sm:$0xff] %v7621_v23  ;;  %v7625_v57 = vadd.f32 %v7624_v34, %v17725_v62  ;;  %v7626_v6 = vpop.f32.mrb[23].mxu0 }
0x1708   :  { %7726 = vst [vmem:[%s17069_s10 + $0x128] sm:$0xff] %v7623_v32  ;;  %v7627_v29 = vadd.f32 %v7626_v6, %v17726_v1 }
0x1709   :  { %7727 = vst [vmem:[%s17069_s10 + $0x130] sm:$0xff] %v7625_v57  ;;  %v7771_v24 = vpack.c.bf16 %v7625_v57, %v7621_v23 }
0x170a   :  { %7728 = vst [vmem:[%s17069_s10 + $0x138] sm:$0xff] %v7627_v29  ;;  %v7772_v13 = vpack.c.bf16 %v7627_v29, %v7623_v32 }
0x170c   :  { %v7630_v31 = vpop.f32.mrb[24].mxu0  ;;  %8021 = vmatprep.mubr.bf16.mxu1 %v7772_v13 }
0x170d   :  { %v7631_v0 = vadd.f32 %v7630_v31, %v17725_v62  ;;  %v7632_v2 = vpop.f32.mrb[25].mxu0  ;;  %8022 = vmatmul.mubr.bf16.gmra.mrb[52].mxu1 %v7771_v24 }
0x170e   :  { %v7633_v18 = vadd.f32 %v7632_v2, %v17726_v1  ;;  %v7634_v43 = vpop.f32.mrb[26].mxu0 }
0x170f   :  { %7729 = vst [vmem:[%s17069_s10 + $0x140] sm:$0xff] %v7631_v0  ;;  %v7635_v48 = vadd.f32 %v7634_v43, %v17725_v62  ;;  %v7636_v7 = vpop.f32.mrb[27].mxu0 }
0x1710   :  { %7730 = vst [vmem:[%s17069_s10 + $0x148] sm:$0xff] %v7633_v18  ;;  %v7637_v10 = vadd.f32 %v7636_v7, %v17726_v1 }
0x1711   :  { %7731 = vst [vmem:[%s17069_s10 + $0x150] sm:$0xff] %v7635_v48  ;;  %v7773_v26 = vpack.c.bf16 %v7635_v48, %v7631_v0 }
0x1712   :  { %7732 = vst [vmem:[%s17069_s10 + $0x158] sm:$0xff] %v7637_v10  ;;  %v7774_v41 = vpack.c.bf16 %v7637_v10, %v7633_v18 }
0x1714   :  { %v7640_v38 = vpop.f32.mrb[28].mxu0  ;;  %8029 = vmatprep.mubr.bf16.mxu1 %v7774_v41 }
0x1715   :  { %v7641_v45 = vadd.f32 %v7640_v38, %v17725_v62  ;;  %v7642_v37 = vpop.f32.mrb[29].mxu0  ;;  %8030 = vmatmul.mubr.bf16.gmra.mrb[56].mxu1 %v7773_v26 }
0x1716   :  { %v7643_v20 = vadd.f32 %v7642_v37, %v17726_v1  ;;  %v7644_v63 = vpop.f32.mrb[30].mxu0 }
0x1717   :  { %7733 = vst [vmem:[%s17069_s10 + $0x160] sm:$0xff] %v7641_v45  ;;  %v7645_v9 = vadd.f32 %v7644_v63, %v17725_v62  ;;  %v7646_v46 = vpop.f32.mrb[31].mxu0 }
0x1718   :  { %7734 = vst [vmem:[%s17069_s10 + $0x168] sm:$0xff] %v7643_v20  ;;  %v7647_v53 = vadd.f32 %v7646_v46, %v17726_v1 }
0x1719   :  { %7735 = vst [vmem:[%s17069_s10 + $0x170] sm:$0xff] %v7645_v9  ;;  %v7775_v39 = vpack.c.bf16 %v7645_v9, %v7641_v45 }
0x171a   :  { %7736 = vst [vmem:[%s17069_s10 + $0x178] sm:$0xff] %v7647_v53  ;;  %v7776_v14 = vpack.c.bf16 %v7647_v53, %v7643_v20 }
0x171c   :  { %v7650_v27 = vpop.f32.mrb[32].mxu0  ;;  %8037 = vmatprep.mubr.bf16.mxu1 %v7776_v14 }
0x171d   :  { %v7651_v8 = vadd.f32 %v7650_v27, %v17725_v62  ;;  %v7652_v11 = vpop.f32.mrb[33].mxu0  ;;  %8038 = vmatmul.mubr.bf16.gmra.mrb[60].mxu1 %v7775_v39 }
0x171e   :  { %v7653_v50 = vadd.f32 %v7652_v11, %v17726_v1  ;;  %v7654_v28 = vpop.f32.mrb[34].mxu0 }
0x171f   :  { %7737 = vst [vmem:[%s17069_s10 + $0x180] sm:$0xff] %v7651_v8  ;;  %v7655_v21 = vadd.f32 %v7654_v28, %v17725_v62  ;;  %v7656_v52 = vpop.f32.mrb[35].mxu0 }
0x1720   :  { %7738 = vst [vmem:[%s17069_s10 + $0x188] sm:$0xff] %v7653_v50  ;;  %v7657_v42 = vadd.f32 %v7656_v52, %v17726_v1 }
0x1721   :  { %7739 = vst [vmem:[%s17069_s10 + $0x190] sm:$0xff] %v7655_v21  ;;  %v7777_v56 = vpack.c.bf16 %v7655_v21, %v7651_v8 }
0x1722   :  { %7740 = vst [vmem:[%s17069_s10 + $0x198] sm:$0xff] %v7657_v42  ;;  %v7778_v44 = vpack.c.bf16 %v7657_v42, %v7653_v50 }
0x1724   :  { %v7660_v59 = vpop.f32.mrb[36].mxu0  ;;  %8045 = vmatprep.mubr.bf16.mxu1 %v7778_v44 }
0x1725   :  { %v7661_v3 = vadd.f32 %v7660_v59, %v17725_v62  ;;  %v7662_v19 = vpop.f32.mrb[37].mxu0  ;;  %8046 = vmatmul.mubr.bf16.gmra.mrb[64].mxu1 %v7777_v56 }
0x1726   :  { %v7663_v51 = vadd.f32 %v7662_v19, %v17726_v1  ;;  %v7664_v40 = vpop.f32.mrb[38].mxu0 }
0x1727   :  { %7741 = vst [vmem:[%s17069_s10 + $0x1a0] sm:$0xff] %v7661_v3  ;;  %v7665_v5 = vadd.f32 %v7664_v40, %v17725_v62  ;;  %v7666_v60 = vpop.f32.mrb[39].mxu0 }
0x1728   :  { %7742 = vst [vmem:[%s17069_s10 + $0x1a8] sm:$0xff] %v7663_v51  ;;  %v7667_v61 = vadd.f32 %v7666_v60, %v17726_v1 }
0x1729   :  { %7743 = vst [vmem:[%s17069_s10 + $0x1b0] sm:$0xff] %v7665_v5  ;;  %v7779_v58 = vpack.c.bf16 %v7665_v5, %v7661_v3 }
0x172a   :  { %7744 = vst [vmem:[%s17069_s10 + $0x1b8] sm:$0xff] %v7667_v61  ;;  %v7780_v30 = vpack.c.bf16 %v7667_v61, %v7663_v51 }
0x172c   :  { %v7670_v33 = vpop.f32.mrb[40].mxu0  ;;  %8053 = vmatprep.mubr.bf16.mxu1 %v7780_v30 }
0x172d   :  { %v7671_v35 = vadd.f32 %v7670_v33, %v17725_v62  ;;  %v7672_v47 = vpop.f32.mrb[41].mxu0  ;;  %8054 = vmatmul.mubr.bf16.gmra.mrb[68].mxu1 %v7779_v58 }
0x172e   :  { %v7673_v49 = vadd.f32 %v7672_v47, %v17726_v1  ;;  %v7674_v25 = vpop.f32.mrb[42].mxu0 }
0x172f   :  { %7745 = vst [vmem:[%s17069_s10 + $0x1c0] sm:$0xff] %v7671_v35  ;;  %v7675_v17 = vadd.f32 %v7674_v25, %v17725_v62  ;;  %v7676_v16 = vpop.f32.mrb[43].mxu0 }
0x1730   :  { %7746 = vst [vmem:[%s17069_s10 + $0x1c8] sm:$0xff] %v7673_v49  ;;  %v7677_v22 = vadd.f32 %v7676_v16, %v17726_v1 }
0x1731   :  { %7747 = vst [vmem:[%s17069_s10 + $0x1d0] sm:$0xff] %v7675_v17  ;;  %v7781_v36 = vpack.c.bf16 %v7675_v17, %v7671_v35 }
0x1732   :  { %7748 = vst [vmem:[%s17069_s10 + $0x1d8] sm:$0xff] %v7677_v22  ;;  %v7782_v4 = vpack.c.bf16 %v7677_v22, %v7673_v49 }
0x1734   :  { %v7680_v15 = vpop.f32.mrb[44].mxu0  ;;  %8061 = vmatprep.mubr.bf16.mxu1 %v7782_v4 }
0x1735   :  { %v7681_v23 = vadd.f32 %v7680_v15, %v17725_v62  ;;  %v7682_v55 = vpop.f32.mrb[45].mxu0  ;;  %8062 = vmatmul.mubr.bf16.gmra.mrb[72].mxu1 %v7781_v36 }
0x1736   :  { %v7683_v32 = vadd.f32 %v7682_v55, %v17726_v1  ;;  %v7684_v34 = vpop.f32.mrb[46].mxu0 }
0x1737   :  { %7749 = vst [vmem:[%s17069_s10 + $0x1e0] sm:$0xff] %v7681_v23  ;;  %v7685_v57 = vadd.f32 %v7684_v34, %v17725_v62  ;;  %v7686_v6 = vpop.f32.mrb[47].mxu0  ;;  %v9438_v62 = vld [vmem:[%s17072_s9] ss:$0 sm:$0xff] }
0x1738   :  { %7750 = vst [vmem:[%s17069_s10 + $0x1e8] sm:$0xff] %v7683_v32  ;;  %v7687_v29 = vadd.f32 %v7686_v6, %v17726_v1 }
0x1739   :  { %7751 = vst [vmem:[%s17069_s10 + $0x1f0] sm:$0xff] %v7685_v57  ;;  %v7783_v24 = vpack.c.bf16 %v7685_v57, %v7681_v23 }
0x173a   :  { %7752 = vst [vmem:[%s17069_s10 + $0x1f8] sm:$0xff] %v7687_v29  ;;  %v7784_v13 = vpack.c.bf16 %v7687_v29, %v7683_v32 }
0x173c   :  { %8069 = vmatprep.mubr.bf16.mxu1 %v7784_v13 }
0x173d   :  { %8070 = vmatmul.mubr.bf16.gmra.mrb[76].mxu1 %v7783_v24 }
0x1793   :  { %v10804_v31 = vpop.f32.mrb[48].mxu0 }
0x1794   :  { %v9040_v0 = vadd.f32 %v10804_v31, %v9438_v62  ;;  %v9031_v2 = vpop.f32.mrb[49].mxu0 }
0x1795   :  { %v9032_v1 = vadd.f32 %v9438_v62, %v9031_v2  ;;  %v10805_v18 = vpop.f32.mrb[50].mxu0 }
0x1796   :  { %9160 = vst [vmem:[%s17073_s11 + $0x10] sm:$0xff] %v9040_v0  ;;  %v9043_v43 = vadd.f32 %v10805_v18, %v9438_v62  ;;  %v9034_v48 = vpop.f32.mrb[51].mxu0 }
0x1797   :  { %9158 = vst [vmem:[%s17073_s11] sm:$0xff] %v9032_v1  ;;  %v9035_v7 = vadd.f32 %v9438_v62, %v9034_v48 }
0x1798   :  { %9161 = vst [vmem:[%s17073_s11 + $0x18] sm:$0xff] %v9043_v43 }
0x1799   :  { %9159 = vst [vmem:[%s17073_s11 + $0x8] sm:$0xff] %v9035_v7 }
0x17a1   :  { %v10808_v10 = vpop.f32.mrb[52].mxu0 }
0x17a2   :  { %v9056_v26 = vadd.f32 %v10808_v10, %v9438_v62  ;;  %v9047_v41 = vpop.f32.mrb[53].mxu0 }
0x17a3   :  { %v9048_v38 = vadd.f32 %v9438_v62, %v9047_v41  ;;  %v10809_v45 = vpop.f32.mrb[54].mxu0 }
0x17a4   :  { %9164 = vst [vmem:[%s17073_s11 + $0x30] sm:$0xff] %v9056_v26  ;;  %v9059_v37 = vadd.f32 %v10809_v45, %v9438_v62  ;;  %v9050_v20 = vpop.f32.mrb[55].mxu0 }
0x17a5   :  { %9162 = vst [vmem:[%s17073_s11 + $0x20] sm:$0xff] %v9048_v38  ;;  %v9051_v63 = vadd.f32 %v9438_v62, %v9050_v20 }
0x17a6   :  { %9165 = vst [vmem:[%s17073_s11 + $0x38] sm:$0xff] %v9059_v37 }
0x17a7   :  { %9163 = vst [vmem:[%s17073_s11 + $0x28] sm:$0xff] %v9051_v63 }
0x17a9   :  { %v10812_v9 = vpop.f32.mrb[56].mxu0 }
0x17aa   :  { %v9072_v46 = vadd.f32 %v10812_v9, %v9438_v62  ;;  %v9063_v53 = vpop.f32.mrb[57].mxu0 }
0x17ab   :  { %v9064_v39 = vadd.f32 %v9438_v62, %v9063_v53  ;;  %v10813_v14 = vpop.f32.mrb[58].mxu0 }
0x17ac   :  { %9168 = vst [vmem:[%s17073_s11 + $0x50] sm:$0xff] %v9072_v46  ;;  %v9075_v27 = vadd.f32 %v10813_v14, %v9438_v62  ;;  %v9066_v8 = vpop.f32.mrb[59].mxu0 }
0x17ad   :  { %9166 = vst [vmem:[%s17073_s11 + $0x40] sm:$0xff] %v9064_v39  ;;  %v9067_v11 = vadd.f32 %v9438_v62, %v9066_v8 }
0x17ae   :  { %9169 = vst [vmem:[%s17073_s11 + $0x58] sm:$0xff] %v9075_v27 }
0x17af   :  { %9167 = vst [vmem:[%s17073_s11 + $0x48] sm:$0xff] %v9067_v11 }
0x17b1   :  { %v10816_v50 = vpop.f32.mrb[60].mxu0 }
0x17b2   :  { %v9088_v28 = vadd.f32 %v10816_v50, %v9438_v62  ;;  %v9079_v21 = vpop.f32.mrb[61].mxu0 }
0x17b3   :  { %v9080_v52 = vadd.f32 %v9438_v62, %v9079_v21  ;;  %v10817_v42 = vpop.f32.mrb[62].mxu0 }
0x17b4   :  { %9172 = vst [vmem:[%s17073_s11 + $0x70] sm:$0xff] %v9088_v28  ;;  %v9091_v56 = vadd.f32 %v10817_v42, %v9438_v62  ;;  %v9082_v44 = vpop.f32.mrb[63].mxu0 }
0x17b5   :  { %9170 = vst [vmem:[%s17073_s11 + $0x60] sm:$0xff] %v9080_v52  ;;  %v9083_v59 = vadd.f32 %v9438_v62, %v9082_v44 }
0x17b6   :  { %9173 = vst [vmem:[%s17073_s11 + $0x78] sm:$0xff] %v9091_v56 }
0x17b7   :  { %9171 = vst [vmem:[%s17073_s11 + $0x68] sm:$0xff] %v9083_v59 }
0x17d8   :  { %v9912_v3 = vpop.f32.mrb[48].mxu1 }
0x17d9   :  { %v9913_v19 = vpop.f32.mrb[49].mxu1 }
0x17da   :  { %v9914_v51 = vadd.f32 %v9913_v19, %v9912_v3  ;;  %v9915_v40 = vpop.f32.mrb[50].mxu1 }
0x17db   :  { %v9916_v5 = vpop.f32.mrb[51].mxu1 }
0x17dc   :  { %v8016_v60 = vadd.f32 %v9914_v51, %v16105_v54  ;;  %v9917_v61 = vadd.f32 %v9916_v5, %v9915_v40 }
0x17de   :  { %v8126_v58 = vmul.f32 0.70710677, %v8016_v60  ;;  %v8019_v30 = vadd.f32 %v9917_v61, %v16105_v54  ;;  %v16653_v13 = vmul.f32 0.5, %v8016_v60 }
0x17e0   :  { %v9918_v33 = vpop.f32.mrb[52].mxu1  ;;  %v8222_v35 = vand.u32 2147483647, %v8126_v58  ;;  %v8127_v47 = vmul.f32 0.70710677, %v8019_v30  ;;  %vm8158_vm6 = vcmp.ge.f32.partialorder %v8126_v58, 0.0 }
0x17e1   :  { %v9919_v49 = vpop.f32.mrb[53].mxu1  ;;  %v16656_v48 = vmul.f32 0.5, %v8019_v30  ;;  %v16660_v46 = vsel %vm8158_vm6, 1.0, %v17711_v12 }
0x17e2   :  { %v9921_v25 = vpop.f32.mrb[54].mxu1  ;;  %v9920_v17 = vadd.f32 %v9919_v49, %v9918_v33  ;;  %v8638_v22 = vsub.f32 0.0, %v8222_v35  ;;  %v8223_v36 = vand.u32 2147483647, %v8127_v47  ;;  %v8254_v23 = vmul.f32 0.3275911, %v8222_v35 }
0x17e3   :  { %v9922_v16 = vpop.f32.mrb[55].mxu1  ;;  %vm8159_vm7 = vcmp.ge.f32.partialorder %v8127_v47, 0.0 }
0x17e4   :  { %v8024_v4 = vadd.f32 %v9920_v17, %v16105_v54  ;;  %v9923_v15 = vadd.f32 %v9922_v16, %v9921_v25  ;;  %v8670_v6 = vmul.f32 %v8638_v22, %v8222_v35  ;;  %v8639_v62 = vsub.f32 0.0, %v8223_v36 }
0x17e5   :  { %v8286_v2 = vadd.f32 1.0, %v8254_v23  ;;  %v8255_v1 = vmul.f32 0.3275911, %v8223_v36  ;;  %v16665_v28 = vsel %vm8159_vm7, 1.0, %v17711_v12 }
0x17e6   :  { %v8128_v32 = vmul.f32 0.70710677, %v8024_v4  ;;  %v8027_v34 = vadd.f32 %v9923_v15, %v16105_v54  ;;  %v8718_v41 = vmul.f32 1.442695, %v8670_v6  ;;  %v8671_v37 = vmul.f32 %v8639_v62, %v8223_v36 }
0x17e7   :  { %11859 = vrcp.f32 %v8286_v2  ;;  %v8287_v27 = vadd.f32 1.0, %v8255_v1  ;;  %v16668_v61 = vmul.f32 0.5, %v8024_v4 }
0x17e8   :  { %v9924_v55 = vpop.f32.mrb[56].mxu1  ;;  %v8224_v31 = vand.u32 2147483647, %v8128_v32  ;;  %v8129_v0 = vmul.f32 0.70710677, %v8027_v34  ;;  %vm8160_vm8 = vcmp.ge.f32.partialorder %v8128_v32, 0.0 }
0x17e9   :  { %v9925_v57 = vpop.f32.mrb[57].mxu1  ;;  %v8720_v56 = vmul.f32 1.442695, %v8671_v37  ;;  %v16670_v58 = vmul.f32 0.5, %v8027_v34  ;;  %v16675_v35 = vsel %vm8160_vm8, 1.0, %v17711_v12 }
0x17ea   :  { %v9926_v29 = vadd.f32 %v9925_v57, %v9924_v55  ;;  %v9927_v24 = vpop.f32.mrb[58].mxu1  ;;  %v8256_v7 = vmul.f32 0.3275911, %v8224_v31  ;;  %v8640_v10 = vsub.f32 0.0, %v8224_v31  ;;  %v8225_v26 = vand.u32 2147483647, %v8129_v0 }
0x17eb   :  { %v9928_v43 = vpop.f32.mrb[59].mxu1  ;;  %vm8161_vm9 = vcmp.ge.f32.partialorder %v8129_v0, 0.0 }
0x17ec   :  { %v8032_v18 = vadd.f32 %v9926_v29, %v16105_v54  ;;  %v9929_v45 = vadd.f32 %v9928_v43, %v9927_v24  ;;  %v8288_v20 = vadd.f32 1.0, %v8256_v7  ;;  %v8257_v63 = vmul.f32 0.3275911, %v8225_v26 }
0x17ed   :  { %v8641_v9 = vsub.f32 0.0, %v8225_v26  ;;  %v8672_v8 = vmul.f32 %v8640_v10, %v8224_v31  ;;  %v16678_v47 = vsel %vm8161_vm9, 1.0, %v17711_v12 }
0x17ee   :  { %v8130_v38 = vmul.f32 0.70710677, %v8032_v18  ;;  %v8035_v39 = vadd.f32 %v9929_v45, %v16105_v54  ;;  %11861 = vrcp.f32 %v8288_v20  ;;  %v8289_v11 = vadd.f32 1.0, %v8257_v63 }
0x17ef   :  { %11863 = vpow2.f32 %v8718_v41  ;;  %v8673_v21 = vmul.f32 %v8641_v9, %v8225_v26  ;;  %v8722_v40 = vmul.f32 1.442695, %v8672_v8  ;;  %v16687_v55 = vmul.f32 0.5, %v8032_v18 }
0x17f0   :  { %v8226_v53 = vand.u32 2147483647, %v8130_v38  ;;  %v9930_v14 = vpop.f32.mrb[60].mxu1  ;;  %11865 = vrcp.f32 %v8289_v11  ;;  %v8131_v19 = vmul.f32 0.70710677, %v8035_v39  ;;  %vm8162_vm10 = vcmp.ge.f32.partialorder %v8130_v38, 0.0 }
0x17f1   :  { %v9931_v50 = vpop.f32.mrb[61].mxu1  ;;  %11867 = vrcp.f32 %v8287_v27  ;;  %v8724_v30 = vmul.f32 1.442695, %v8673_v21  ;;  %v16685_v23 = vpop.eup %11859  ;;  %17727 = vst [vmem:[#allocation74_spill] sm:$0xff] %v16687_v55  ;;  %v16694_v29 = vsel %vm8162_vm10, 1.0, %v17711_v12  ;;  %v16696_v24 = vmul.f32 0.5, %v8035_v39 }
0x17f2   :  { %v8642_v52 = vsub.f32 0.0, %v8226_v53  ;;  %v9933_v42 = vpop.f32.mrb[62].mxu1  ;;  %v8258_v44 = vmul.f32 0.3275911, %v8226_v53  ;;  %v9932_v59 = vadd.f32 %v9931_v50, %v9930_v14  ;;  %11869 = vpow2.f32 %v8720_v56 }
0x17f3   :  { %v9934_v3 = vpop.f32.mrb[63].mxu1  ;;  %v8227_v17 = vand.u32 2147483647, %v8131_v19  ;;  %11871 = vpow2.f32 %v8722_v40  ;;  %vm8163_vm11 = vcmp.ge.f32.partialorder %v8131_v19, 0.0  ;;  %17728 = vst [vmem:[#allocation73_spill] sm:$0xff] %v16696_v24 }
0x17f4   :  { %v9935_v51 = vadd.f32 %v9934_v3, %v9933_v42  ;;  %v8674_v5 = vmul.f32 %v8642_v52, %v8226_v53  ;;  %v8040_v60 = vadd.f32 %v9932_v59, %v16105_v54  ;;  %v8290_v49 = vadd.f32 1.0, %v8258_v44 }
0x17f5   :  { %11873 = vpow2.f32 %v8724_v30  ;;  %v16703_v1 = vsel %vm8163_vm11, 1.0, %v17711_v12  ;;  %v8643_v18 = vsub.f32 0.0, %v8227_v17  ;;  %v8259_v7 = vmul.f32 0.3275911, %v8227_v17 }
0x17f6   :  { %v8043_v33 = vadd.f32 %v9935_v51, %v16105_v54  ;;  %v16680_v25 = vmul.f32 0.70710677, %v8040_v60  ;;  %v8726_v36 = vmul.f32 1.442695, %v8674_v5  ;;  %11875 = vrcp.f32 %v8290_v49 }
0x17f7   :  { %v16713_v53 = vmul.f32 0.5, %v8040_v60  ;;  %v8675_v27 = vmul.f32 %v8643_v18, %v8227_v17  ;;  %v8291_v59 = vadd.f32 1.0, %v8259_v7  ;;  %v16726_v51 = vmul.f32 1.0614054, %v16685_v23 }
0x17f8   :  { %v16682_v16 = vmul.f32 0.70710677, %v8043_v33  ;;  %v9936_v22 = vpop.f32.mrb[64].mxu1  ;;  %v8228_v4 = vand.u32 2147483647, %v16680_v25  ;;  %v16690_v6 = vpop.eup %11861  ;;  %11877 = vpow2.f32 %v8726_v36  ;;  %vm8164_vm12 = vcmp.ge.f32.partialorder %v16680_v25, 0.0 }
0x17f9   :  { %v9937_v15 = vpop.f32.mrb[65].mxu1  ;;  %v16698_v0 = vpop.eup %11863  ;;  %v8352_v2 = vmul.f32 1.0614054, %v16690_v6  ;;  %v16718_v21 = vmul.f32 0.5, %v8043_v33  ;;  %v16736_v36 = vsel %vm8164_vm12, 1.0, %v17711_v12 }
0x17fa   :  { %v8229_v32 = vand.u32 2147483647, %v16682_v16  ;;  %v9938_v34 = vadd.f32 %v9937_v15, %v9936_v22  ;;  %v9939_v57 = vpop.f32.mrb[66].mxu1  ;;  %v8260_v62 = vmul.f32 0.3275911, %v8228_v4  ;;  %v16708_v41 = vpop.eup %11865  ;;  %v8644_v45 = vsub.f32 0.0, %v8228_v4 }
0x17fb   :  { %v9940_v31 = vpop.f32.mrb[67].mxu1  ;;  %v8384_v38 = vadd.f32 -1.4531521, %v8352_v2  ;;  %v16710_v63 = vpop.eup %11867  ;;  %v8353_v9 = vmul.f32 1.0614054, %v16708_v41  ;;  %vm8165_vm13 = vcmp.ge.f32.partialorder %v16682_v16, 0.0 }
0x17fc   :  { %v8261_v43 = vmul.f32 0.3275911, %v8229_v32  ;;  %v8292_v10 = vadd.f32 1.0, %v8260_v62  ;;  %v16706_v26 = vadd.f32 %v9938_v34, %v16105_v54  ;;  %v9941_v20 = vadd.f32 %v9940_v31, %v9939_v57  ;;  %v16723_v56 = vpop.eup %11869 }
0x17fd   :  { %v8645_v39 = vsub.f32 0.0, %v8229_v32  ;;  %v8416_v14 = vmul.f32 %v16690_v6, %v8384_v38  ;;  %v8385_v50 = vadd.f32 -1.4531521, %v8353_v9  ;;  %v8676_v3 = vmul.f32 %v8644_v45, %v8228_v4  ;;  %v11872_v40 = vpop.eup %11871 }
0x17fe   :  { %17729 = vst [vmem:[#allocation72_spill] sm:$0xff] %v16706_v26  ;;  %v8293_v37 = vadd.f32 1.0, %v8261_v43  ;;  %11879 = vrcp.f32 %v8292_v10  ;;  %v8134_v8 = vmul.f32 0.70710677, %v16706_v26  ;;  %v16721_v52 = vadd.f32 %v9941_v20, %v16105_v54 }
0x17ff   :  { %v8448_v44 = vadd.f32 1.4214138, %v8416_v14  ;;  %v8417_v5 = vmul.f32 %v16708_v41, %v8385_v50  ;;  %v8677_v60 = vmul.f32 %v8645_v39, %v8229_v32  ;;  %v16730_v49 = vpop.eup %11873  ;;  %v8728_v22 = vmul.f32 1.442695, %v8675_v27 }
0x1800   :  { %11881 = vrcp.f32 %v8293_v37  ;;  %v9942_v11 = vpop.f32.mrb[68].mxu1  ;;  %17730 = vst [vmem:[#allocation76_spill] sm:$0xff] %v16721_v52  ;;  %v8230_v30 = vand.u32 2147483647, %v8134_v8  ;;  %v16738_v15 = vpop.eup %11875  ;;  %vm8166_vm14 = vcmp.ge.f32.partialorder %v8134_v8, 0.0  ;;  %v16744_v2 = vsel %vm8165_vm13, 1.0, %v17711_v12 }
0x1801   :  { %v9943_v42 = vpop.f32.mrb[69].mxu1  ;;  %v8480_v17 = vmul.f32 %v16690_v6, %v8448_v44  ;;  %v8449_v34 = vadd.f32 1.4214138, %v8417_v5  ;;  %v8135_v57 = vmul.f32 0.70710677, %v16721_v52  ;;  %11883 = vrcp.f32 %v8291_v59 }
0x1802   :  { %v9945_v19 = vpop.f32.mrb[70].mxu1  ;;  %v9944_v4 = vadd.f32 %v9943_v42, %v9942_v11  ;;  %v8730_v31 = vmul.f32 1.442695, %v8676_v3  ;;  %v16746_v18 = vpop.eup %11877  ;;  %v8732_v43 = vmul.f32 1.442695, %v8677_v60  ;;  %v8646_v7 = vsub.f32 0.0, %v8230_v30 }
0x1803   :  { %v9946_v33 = vpop.f32.mrb[71].mxu1  ;;  %v8512_v62 = vadd.f32 -0.28449672, %v8480_v17  ;;  %v8481_v25 = vmul.f32 %v16708_v41, %v8449_v34  ;;  %v16754_v45 = vsel %vm8166_vm14, 1.0, %v17711_v12  ;;  %v8262_v37 = vmul.f32 0.3275911, %v8230_v30 }
0x1804   :  { %v9947_v32 = vadd.f32 %v9946_v33, %v9945_v19  ;;  %v16750_v10 = vadd.f32 %v9944_v4, %v16105_v54  ;;  %17731 = vst [vmem:[#allocation80_spill] sm:$0xff] %v16754_v45  ;;  %v16759_v16 = vmul.f32 1.0614054, %v16710_v63  ;;  %11885 = vpow2.f32 %v8728_v22 }
0x1805   :  { %v8544_v38 = vmul.f32 %v16690_v6, %v8512_v62  ;;  %v8513_v39 = vadd.f32 -0.28449672, %v8481_v25  ;;  %vm8167_vm15 = vcmp.ge.f32.partialorder %v8135_v57, 0.0  ;;  %v8231_v14 = vand.u32 2147483647, %v8135_v57 }
0x1806   :  { %11887 = vpow2.f32 %v8730_v31  ;;  %v16767_v42 = vmul.f32 0.70710677, %v16750_v10  ;;  %v8678_v3 = vmul.f32 %v8646_v7, %v8230_v30  ;;  %v16772_v19 = vadd.f32 %v9947_v32, %v16105_v54 }
0x1807   :  { %v8576_v11 = vadd.f32 0.2548296, %v8544_v38  ;;  %v8545_v44 = vmul.f32 %v16708_v41, %v8513_v39  ;;  %v8294_v17 = vadd.f32 1.0, %v8262_v37  ;;  %11889 = vpow2.f32 %v8732_v43 }
0x1808   :  { %v16756_v20 = vpop.f32.mrb[72].mxu1  ;;  %v16761_v9 = vpop.eup %11879  ;;  %v8232_v22 = vand.u32 2147483647, %v16767_v42  ;;  %v8263_v31 = vmul.f32 0.3275911, %v8231_v14  ;;  %v8647_v39 = vsub.f32 0.0, %v8231_v14 }
0x1809   :  { %v9949_v27 = vpop.f32.mrb[73].mxu1  ;;  %v8356_v50 = vmul.f32 1.0614054, %v16761_v9  ;;  %v8608_v60 = vmul.f32 %v16690_v6, %v8576_v11  ;;  %v8577_v34 = vadd.f32 0.2548296, %v8545_v44  ;;  %v16786_v43 = vsel %vm8167_vm15, 1.0, %v17711_v12 }
0x180a   :  { %v16763_v8 = vpop.eup %11881  ;;  %v9951_v5 = vpop.f32.mrb[74].mxu1  ;;  %v8264_v30 = vmul.f32 0.3275911, %v8232_v22  ;;  %v8734_v52 = vmul.f32 1.442695, %v8678_v3  ;;  %17732 = vst [vmem:[#allocation57_spill] sm:$0xff] %v16786_v43  ;;  %11891 = vrcp.f32 %v8294_v17  ;;  %v8679_v43 = vmul.f32 %v8647_v39, %v8231_v14 }
0x180b   :  { %v8357_v59 = vmul.f32 1.0614054, %v16763_v8  ;;  %v8388_v33 = vadd.f32 -1.4531521, %v8356_v50  ;;  %v9952_v4 = vpop.f32.mrb[75].mxu1  ;;  %v8768_v25 = vmul.f32 %v11872_v40, %v8608_v60  ;;  %v8609_v32 = vmul.f32 %v16708_v41, %v8577_v34  ;;  %v16782_v37 = vpop.eup %11883 }
0x180c   :  { %v16780_v6 = vmul.f32 0.70710677, %v16772_v19  ;;  %v8296_v40 = vadd.f32 1.0, %v8264_v30  ;;  %v9950_v26 = vadd.f32 %v9949_v27, %v16756_v20  ;;  %v9953_v39 = vadd.f32 %v9952_v4, %v9951_v5 }
0x180d   :  { %v8389_v62 = vadd.f32 -1.4531521, %v8357_v59  ;;  %v8420_v38 = vmul.f32 %v16761_v9, %v8388_v33  ;;  %v8800_v11 = vsub.f32 1.0, %v8768_v25  ;;  %v8769_v59 = vmul.f32 %v16730_v49, %v8609_v32 }
0x180e   :  { %v8233_v41 = vand.u32 2147483647, %v16780_v6  ;;  %11893 = vrcp.f32 %v8296_v40  ;;  %v16794_v57 = vpop.eup %11885  ;;  %vm8168_vm0 = vcmp.ge.f32.partialorder %v16767_v42, 0.0  ;;  %vm8169_vm1 = vcmp.ge.f32.partialorder %v16780_v6, 0.0 }
0x180f   :  { %v8421_v7 = vmul.f32 %v16763_v8, %v8389_v62  ;;  %v8452_v50 = vadd.f32 1.4214138, %v8420_v38  ;;  %v8832_v33 = vmul.f32 %v8800_v11, %v16675_v35  ;;  %v8295_v62 = vadd.f32 1.0, %v8263_v31 }
0x1810   :  { %v9954_v44 = vpop.f32.mrb[76].mxu1  ;;  %v8801_v38 = vsub.f32 1.0, %v8769_v59  ;;  %v8265_v49 = vmul.f32 0.3275911, %v8233_v41  ;;  %v11888_v17 = vpop.eup %11887  ;;  %v16800_v35 = vmul.f32 0.5, %v16750_v10  ;;  %v8648_v11 = vsub.f32 0.0, %v8232_v22 }
0x1811   :  { %v8453_v60 = vadd.f32 1.4214138, %v8421_v7  ;;  %v9955_v3 = vpop.f32.mrb[77].mxu1  ;;  %v8484_v34 = vmul.f32 %v16761_v9, %v8452_v50  ;;  %v8864_v7 = vadd.f32 1.0, %v8832_v33  ;;  %11895 = vpow2.f32 %v8734_v52 }
0x1812   :  { %v16792_v25 = vpop.f32.mrb[78].mxu1  ;;  %v8833_v31 = vmul.f32 %v8801_v38, %v16678_v47  ;;  %v8297_v40 = vadd.f32 1.0, %v8265_v49  ;;  %v8649_v14 = vsub.f32 0.0, %v8233_v41  ;;  %v16807_v10 = vadd.f32 %v9950_v26, %v16105_v54 }
0x1813   :  { %v8485_v30 = vmul.f32 %v16763_v8, %v8453_v60  ;;  %v16797_v32 = vpop.f32.mrb[79].mxu1  ;;  %v8516_v45 = vadd.f32 -0.28449672, %v8484_v34  ;;  %v11890_v60 = vpop.eup %11889  ;;  %v8680_v55 = vmul.f32 %v8648_v11, %v8232_v22  ;;  %v16810_v47 = vadd.f32 %v9953_v39, %v16105_v54 }
0x1814   :  { %v8865_v24 = vadd.f32 1.0, %v8833_v31  ;;  %11897 = vrcp.f32 %v8297_v40  ;;  %v9956_v38 = vadd.f32 %v9955_v3, %v9954_v44  ;;  %v16813_v20 = vmul.f32 %v8864_v7, %v16668_v61 }
0x1815   :  { %v8517_v50 = vadd.f32 -0.28449672, %v8485_v30  ;;  %v8548_v59 = vmul.f32 %v16761_v9, %v8516_v45  ;;  %v16819_v27 = vmul.f32 0.70710677, %v16807_v10  ;;  %v8736_v26 = vmul.f32 1.442695, %v8679_v43  ;;  %v16825_v30 = vpop.eup %11891 }
0x1816   :  { %v16816_v52 = vmul.f32 %v8865_v24, %v16670_v58  ;;  %v8681_v4 = vmul.f32 %v8649_v14, %v8233_v41  ;;  %v16823_v22 = vmul.f32 0.70710677, %v16810_v47  ;;  %11899 = vrcp.f32 %v8295_v62 }
0x1817   :  { %v8549_v33 = vmul.f32 %v16763_v8, %v8517_v50  ;;  %v8580_v34 = vadd.f32 0.2548296, %v8548_v59  ;;  %v8234_v58 = vand.u32 2147483647, %v16819_v27  ;;  %11901 = vpow2.f32 %v8736_v26 }
0x1818   :  { %v8919_v61 = vpack.c.bf16 %v16816_v52, %v16813_v20  ;;  %v16831_v24 = vpop.eup %11893  ;;  %v8235_v43 = vand.u32 2147483647, %v16823_v22  ;;  %v8740_v50 = vmul.f32 1.442695, %v8681_v4  ;;  %v16852_v26 = vmul.f32 0.5, %v16772_v19 }
0x1819   :  { %v8581_v45 = vadd.f32 0.2548296, %v8549_v33  ;;  %v8612_v5 = vmul.f32 %v16761_v9, %v8580_v34  ;;  %v8738_v9 = vmul.f32 1.442695, %v8680_v55  ;;  %v8360_v49 = vmul.f32 1.0614054, %v16831_v24 }
0x181a   :  { %v8266_v7 = vmul.f32 0.3275911, %v8234_v58  ;;  %v8650_v11 = vsub.f32 0.0, %v8234_v58  ;;  %v8651_v14 = vsub.f32 0.0, %v8235_v43  ;;  %v16842_v55 = vsel %vm8168_vm0, 1.0, %v17711_v12 }
0x181b   :  { %v8613_v44 = vmul.f32 %v16763_v8, %v8581_v45  ;;  %v8772_v3 = vmul.f32 %v11888_v17, %v8612_v5  ;;  %v8267_v8 = vmul.f32 0.3275911, %v8235_v43  ;;  %v8392_v40 = vadd.f32 -1.4531521, %v8360_v49  ;;  %v16836_v39 = vpop.eup %11895 }
0x181c   :  { %v8298_v59 = vadd.f32 1.0, %v8266_v7  ;;  %v16845_v33 = vadd.f32 %v9956_v38, %v16105_v54  ;;  %11903 = vpow2.f32 %v8738_v9  ;;  %v8683_v38 = vmul.f32 %v8651_v14, %v8235_v43 }
0x181d   :  { %v8773_v41 = vmul.f32 %v11890_v60, %v8613_v44  ;;  %v8804_v31 = vsub.f32 1.0, %v8772_v3  ;;  %v8682_v60 = vmul.f32 %v8650_v11, %v8234_v58  ;;  %v8424_v5 = vmul.f32 %v16831_v24, %v8392_v40 }
0x181e   :  { %v16847_v34 = vpop.eup %11897  ;;  %11905 = vpow2.f32 %v8740_v50  ;;  %v8299_v42 = vadd.f32 1.0, %v8267_v8  ;;  %v16860_v9 = vmul.f32 0.70710677, %v16845_v33  ;;  %v8382_v11 = vadd.f32 -1.4531521, %v16726_v51 }
0x181f   :  { %v8805_v62 = vsub.f32 1.0, %v8773_v41  ;;  %v8836_v17 = vmul.f32 %v8804_v31, %v16736_v36  ;;  %v8361_v4 = vmul.f32 1.0614054, %v16847_v34  ;;  %v8456_v58 = vadd.f32 1.4214138, %v8424_v5 }
0x1820   :  { %11907 = vrcp.f32 %v8298_v59  ;;  %v8742_v41 = vmul.f32 1.442695, %v8682_v60  ;;  %v16862_v19 = vpop.eup %11899  ;;  %v8383_v31 = vadd.f32 -1.4531521, %v16759_v16  ;;  %v9959_v50 = vadd.f32 %v16797_v32, %v16792_v25 }
0x1821   :  { %v8837_v45 = vmul.f32 %v8805_v62, %v16744_v2  ;;  %v8868_v36 = vadd.f32 1.0, %v8836_v17  ;;  %v8393_v2 = vadd.f32 -1.4531521, %v8361_v4  ;;  %v8488_v7 = vmul.f32 %v16831_v24, %v8456_v58  ;;  %v16877_v59 = vpop.eup %11901 }
0x1822   :  { %11909 = vrcp.f32 %v8299_v42  ;;  %v8414_v40 = vmul.f32 %v16685_v23, %v8382_v11  ;;  %v8415_v17 = vmul.f32 %v16710_v63, %v8383_v31  ;;  %v16882_v25 = vadd.f32 %v9959_v50, %v16105_v54 }
0x1823   :  { %v8869_v44 = vadd.f32 1.0, %v8837_v45  ;;  %v16857_v3 = vmul.f32 %v8868_v36, %v16713_v53  ;;  %v8425_v43 = vmul.f32 %v16847_v34, %v8393_v2  ;;  %v8236_v53 = vand.u32 2147483647, %v16860_v9 }
0x1824   :  { %v8520_v62 = vadd.f32 -0.28449672, %v8488_v7  ;;  %11911 = vpow2.f32 %v8742_v41  ;;  %v8446_v45 = vadd.f32 1.4214138, %v8414_v40  ;;  %v8447_v4 = vadd.f32 1.4214138, %v8415_v17 }
0x1825   :  { %v16865_v49 = vmul.f32 %v8869_v44, %v16718_v21  ;;  %v8744_v21 = vmul.f32 1.442695, %v8683_v38  ;;  %v8457_v51 = vadd.f32 1.4214138, %v8425_v43  ;;  %v8268_v14 = vmul.f32 0.3275911, %v8236_v53 }
0x1826   :  { %v8652_v16 = vsub.f32 0.0, %v8236_v53  ;;  %v8552_v60 = vmul.f32 %v16831_v24, %v8520_v62  ;;  %v11904_v42 = vpop.eup %11903  ;;  %v8478_v58 = vmul.f32 %v16685_v23, %v8446_v45  ;;  %v16887_v38 = vmul.f32 0.70710677, %v16882_v25 }
0x1827   :  { %v8921_v8 = vpack.c.bf16 %v16865_v49, %v16857_v3  ;;  %v8489_v32 = vmul.f32 %v16847_v34, %v8457_v51  ;;  %v8300_v5 = vadd.f32 1.0, %v8268_v14  ;;  %v8354_v2 = vmul.f32 1.0614054, %v16738_v15 }
0x1828   :  { %v8684_v36 = vmul.f32 %v8652_v16, %v8236_v53  ;;  %v8584_v44 = vadd.f32 0.2548296, %v8552_v60  ;;  %v11906_v7 = vpop.eup %11905  ;;  %v8479_v54 = vmul.f32 %v16710_v63, %v8447_v4  ;;  %v8510_v53 = vadd.f32 -0.28449672, %v8478_v58 }
0x1829   :  { %v8521_v41 = vadd.f32 -0.28449672, %v8489_v32  ;;  %11913 = vrcp.f32 %v8300_v5  ;;  %v8237_v50 = vand.u32 2147483647, %v16887_v38  ;;  %v8201_v62 = vsel %vm8169_vm1, 1.0, %v17711_v12 }
0x182a   :  { %v8746_v11 = vmul.f32 1.442695, %v8684_v36  ;;  %v16891_v31 = vpop.eup %11907  ;;  %v8616_v43 = vmul.f32 %v16831_v24, %v8584_v44  ;;  %11915 = vpow2.f32 %v8744_v21  ;;  %v8511_v51 = vadd.f32 -0.28449672, %v8479_v54 }
0x182b   :  { %v8553_v40 = vmul.f32 %v16847_v34, %v8521_v41  ;;  %v8542_v16 = vmul.f32 %v16685_v23, %v8510_v53  ;;  %v8269_v17 = vmul.f32 0.3275911, %v8237_v50  ;;  %v8653_v60 = vsub.f32 0.0, %v8237_v50 }
0x182c   :  { %11917 = vpow2.f32 %v8746_v11  ;;  %v8776_v14 = vmul.f32 %v11904_v42, %v8616_v43  ;;  %v16900_v45 = vpop.eup %11909  ;;  %v8543_v21 = vmul.f32 %v16710_v63, %v8511_v51  ;;  %v8355_v32 = vmul.f32 1.0614054, %v16782_v37 }
0x182d   :  { %v8585_v24 = vadd.f32 0.2548296, %v8553_v40  ;;  %v8386_v5 = vadd.f32 -1.4531521, %v8354_v2  ;;  %v8574_v6 = vadd.f32 0.2548296, %v8542_v16  ;;  %v8685_v44 = vmul.f32 %v8653_v60, %v8237_v50 }
0x182e   :  { %v8808_v36 = vsub.f32 1.0, %v8776_v14  ;;  %v8301_v4 = vadd.f32 1.0, %v8269_v17  ;;  %v8575_v41 = vadd.f32 0.2548296, %v8543_v21  ;;  %v8387_v42 = vadd.f32 -1.4531521, %v8355_v32  ;;  %v16906_v54 = vpop.eup %11911 }
0x182f   :  { %v8617_v58 = vmul.f32 %v16847_v34, %v8585_v24  ;;  %v8418_v11 = vmul.f32 %v16738_v15, %v8386_v5  ;;  %v8606_v53 = vmul.f32 %v16685_v23, %v8574_v6  ;;  %v8748_v40 = vmul.f32 1.442695, %v8685_v44 }
0x1830   :  { %v8840_v43 = vmul.f32 %v8808_v36, %v16842_v55  ;;  %11919 = vrcp.f32 %v8301_v4  ;;  %v8607_v2 = vmul.f32 %v16710_v63, %v8575_v41  ;;  %v8419_v14 = vmul.f32 %v16782_v37, %v8387_v42 }
0x1831   :  { %v8777_v51 = vmul.f32 %v11906_v7, %v8617_v58  ;;  %v8450_v50 = vadd.f32 1.4214138, %v8418_v11  ;;  %v8766_v34 = vmul.f32 %v16698_v0, %v8606_v53  ;;  %11921 = vpow2.f32 %v8748_v40 }
0x1832   :  { %v8872_v16 = vadd.f32 1.0, %v8840_v43  ;;  %v8358_v17 = vmul.f32 1.0614054, %v16825_v30  ;;  %v8767_v55 = vmul.f32 %v16723_v56, %v8607_v2  ;;  %v8451_v23 = vadd.f32 1.4214138, %v8419_v14 }
0x1833   :  { %v16914_v60 = vpop.eup %11913  ;;  %v8809_v24 = vsub.f32 1.0, %v8777_v51  ;;  %v8482_v21 = vmul.f32 %v16738_v15, %v8450_v50  ;;  %v8798_v5 = vsub.f32 1.0, %v8766_v34  ;;  %v8359_v0 = vmul.f32 1.0614054, %v16862_v19 }
0x1834   :  { %v16918_v7 = vpop.eup %11915  ;;  %v16921_v63 = vmul.f32 %v8872_v16, %v16800_v35  ;;  %v8364_v32 = vmul.f32 1.0614054, %v16914_v60  ;;  %v8799_v4 = vsub.f32 1.0, %v8767_v55  ;;  %v8483_v44 = vmul.f32 %v16782_v37, %v8451_v23 }
0x1835   :  { %v8841_v6 = vmul.f32 %v8809_v24, %v8201_v62  ;;  %v8514_v56 = vadd.f32 -0.28449672, %v8482_v21  ;;  %v8830_v41 = vmul.f32 %v8798_v5, %v16660_v46  ;;  %v8390_v42 = vadd.f32 -1.4531521, %v8358_v17 }
0x1836   :  { %v16925_v36 = vpop.eup %11917  ;;  %v8396_v58 = vadd.f32 -1.4531521, %v8364_v32  ;;  %v8391_v11 = vadd.f32 -1.4531521, %v8359_v0  ;;  %v8831_v35 = vmul.f32 %v8799_v4, %v16665_v28  ;;  %v8515_v53 = vadd.f32 -0.28449672, %v8483_v44 }
0x1837   :  { %v8873_v43 = vadd.f32 1.0, %v8841_v6  ;;  %v8546_v40 = vmul.f32 %v16738_v15, %v8514_v56  ;;  %v8862_v2 = vadd.f32 1.0, %v8830_v41  ;;  %v8422_v62 = vmul.f32 %v16825_v30, %v8390_v42 }
0x1838   :  { %v8428_v51 = vmul.f32 %v16914_v60, %v8396_v58  ;;  %v8423_v14 = vmul.f32 %v16862_v19, %v8391_v11  ;;  %v8863_v16 = vadd.f32 1.0, %v8831_v35  ;;  %v8547_v46 = vmul.f32 %v16782_v37, %v8515_v53 }
0x1839   :  { %v16935_v50 = vmul.f32 %v8873_v43, %v16852_v26  ;;  %v8578_v34 = vadd.f32 0.2548296, %v8546_v40  ;;  %v8894_v24 = vmul.f32 %v8862_v2, %v16653_v13  ;;  %v8454_v55 = vadd.f32 1.4214138, %v8422_v62 }
0x183a   :  { %v16938_v17 = vpop.eup %11919  ;;  %v8460_v28 = vadd.f32 1.4214138, %v8428_v51  ;;  %v8455_v23 = vadd.f32 1.4214138, %v8423_v14  ;;  %v8895_v32 = vmul.f32 %v8863_v16, %v16656_v48  ;;  %v8579_v26 = vadd.f32 0.2548296, %v8547_v46 }
0x183b   :  { %v8923_v21 = vpack.c.bf16 %v16935_v50, %v16921_v63  ;;  %v8365_v5 = vmul.f32 1.0614054, %v16938_v17  ;;  %v16945_v0 = vpop.eup %11921  ;;  %v8610_v4 = vmul.f32 %v16738_v15, %v8578_v34  ;;  %v8486_v44 = vmul.f32 %v16825_v30, %v8454_v55  ;;  %v11925_v63 = vld [vmem:[%s17072_s9] ss:$0 sm:$0xff] }
0x183c   :  { %v8492_v6 = vmul.f32 %v16914_v60, %v8460_v28  ;;  %v8487_v13 = vmul.f32 %v16862_v19, %v8455_v23  ;;  %v8918_v56 = vpack.c.bf16 %v8895_v32, %v8894_v24  ;;  %v8611_v41 = vmul.f32 %v16782_v37, %v8579_v26 }
0x183d   :  { %v8397_v58 = vadd.f32 -1.4531521, %v8365_v5  ;;  %v8362_v42 = vmul.f32 1.0614054, %v16891_v31  ;;  %v8770_v11 = vmul.f32 %v16746_v18, %v8610_v4  ;;  %v8518_v43 = vadd.f32 -0.28449672, %v8486_v44 }
0x183e   :  { %v8524_v48 = vadd.f32 -0.28449672, %v8492_v6  ;;  %v8519_v35 = vadd.f32 -0.28449672, %v8487_v13  ;;  %10818 = vmatprep.mubr.bf16.mxu0 %v8918_v56  ;;  %v8771_v15 = vmul.f32 %v16794_v57, %v8611_v41  ;;  %v8363_v40 = vmul.f32 1.0614054, %v16900_v45 }
0x183f   :  { %v8429_v53 = vmul.f32 %v16938_v17, %v8397_v58  ;;  %v8394_v51 = vadd.f32 -1.4531521, %v8362_v42  ;;  %10819 = vmatmul.mubr.bf16.gmra.mrb[64].mxu0 %v8919_v61  ;;  %v8802_v37 = vsub.f32 1.0, %v8770_v11  ;;  %v8550_v62 = vmul.f32 %v16825_v30, %v8518_v43  ;;  %v17733_v58 = vld [vmem:[#allocation74_spill] sm:$0xff] }
0x1840   :  { %v8556_v2 = vmul.f32 %v16914_v60, %v8524_v48  ;;  %v8551_v18 = vmul.f32 %v16862_v19, %v8519_v35  ;;  %v8803_v16 = vsub.f32 1.0, %v8771_v15  ;;  %v8395_v46 = vadd.f32 -1.4531521, %v8363_v40  ;;  %v17734_v48 = vld [vmem:[#allocation73_spill] sm:$0xff] }
0x1841   :  { %v8461_v14 = vadd.f32 1.4214138, %v8429_v53  ;;  %v8426_v34 = vmul.f32 %v16891_v31, %v8394_v51  ;;  %v8834_v28 = vmul.f32 %v8802_v37, %v16694_v29  ;;  %v8582_v24 = vadd.f32 0.2548296, %v8550_v62  ;;  %v17737_v62 = vld [vmem:[#allocation57_spill] sm:$0xff] }
0x1842   :  { %v8588_v57 = vadd.f32 0.2548296, %v8556_v2  ;;  %v8583_v55 = vadd.f32 0.2548296, %v8551_v18  ;;  %v8835_v20 = vmul.f32 %v8803_v16, %v16703_v1  ;;  %v8427_v52 = vmul.f32 %v16900_v45, %v8395_v46 }
0x1843   :  { %v8493_v23 = vmul.f32 %v16938_v17, %v8461_v14  ;;  %v8458_v61 = vadd.f32 1.4214138, %v8426_v34  ;;  %v8866_v5 = vadd.f32 1.0, %v8834_v28  ;;  %v8614_v26 = vmul.f32 %v16825_v30, %v8582_v24  ;;  %v17738_v14 = vld [vmem:[#allocation76_spill] sm:$0xff] }
0x1844   :  { %v8620_v32 = vmul.f32 %v16914_v60, %v8588_v57  ;;  %v8615_v6 = vmul.f32 %v16862_v19, %v8583_v55  ;;  %v8867_v44 = vadd.f32 1.0, %v8835_v20  ;;  %v8459_v13 = vadd.f32 1.4214138, %v8427_v52 }
0x1845   :  { %v8525_v4 = vadd.f32 -0.28449672, %v8493_v23  ;;  %v8490_v29 = vmul.f32 %v16891_v31, %v8458_v61  ;;  %v8898_v41 = vmul.f32 %v8866_v5, %v17733_v58  ;;  %v8774_v1 = vmul.f32 %v16836_v39, %v8614_v26  ;;  %v17735_v39 = vld [vmem:[#allocation72_spill] sm:$0xff] }
0x1846   :  { %v8780_v56 = vmul.f32 %v16925_v36, %v8620_v32  ;;  %v8775_v42 = vmul.f32 %v16877_v59, %v8615_v6  ;;  %v8899_v11 = vmul.f32 %v8867_v44, %v17734_v48  ;;  %v8491_v30 = vmul.f32 %v16900_v45, %v8459_v13  ;;  %v17736_v59 = vld [vmem:[#allocation80_spill] sm:$0xff] }
0x1847   :  { %v8557_v60 = vmul.f32 %v16938_v17, %v8525_v4  ;;  %v8522_v19 = vadd.f32 -0.28449672, %v8490_v29  ;;  %vm8172_vm2 = vcmp.ge.f32.partialorder %v16860_v9, 0.0  ;;  %v8806_v35 = vsub.f32 1.0, %v8774_v1 }
0x1848   :  { %v8812_v43 = vsub.f32 1.0, %v8780_v56  ;;  %v8807_v53 = vsub.f32 1.0, %v8775_v42  ;;  %v8920_v36 = vpack.c.bf16 %v8899_v11, %v8898_v41  ;;  %v8523_v40 = vadd.f32 -0.28449672, %v8491_v30 }
0x1849   :  { %v8589_v15 = vadd.f32 0.2548296, %v8557_v60  ;;  %v8554_v51 = vmul.f32 %v16891_v31, %v8522_v19  ;;  %v8102_v2 = vmul.f32 0.5, %v17735_v39  ;;  %v8838_v37 = vmul.f32 %v8806_v35, %v17736_v59 }
0x184a   :  { %v8839_v18 = vmul.f32 %v8807_v53, %v17737_v62  ;;  %v8103_v16 = vmul.f32 0.5, %v17738_v14  ;;  %10822 = vmatprep.mubr.bf16.mxu0 %v8920_v36  ;;  %v8555_v34 = vmul.f32 %v16900_v45, %v8523_v40  ;;  %v8204_v28 = vsel %vm8172_vm2, 1.0, %v17711_v12 }
0x184b   :  { %v8621_v46 = vmul.f32 %v16938_v17, %v8589_v15  ;;  %v8586_v57 = vadd.f32 0.2548296, %v8554_v51  ;;  %vm8173_vm3 = vcmp.ge.f32.partialorder %v16887_v38, 0.0  ;;  %10823 = vmatmul.mubr.bf16.gmra.mrb[68].mxu0 %v8921_v8  ;;  %v8870_v24 = vadd.f32 1.0, %v8838_v37 }
0x184c   :  { %v8871_v55 = vadd.f32 1.0, %v8839_v18  ;;  %v8844_v23 = vmul.f32 %v8812_v43, %v8204_v28  ;;  %v8587_v17 = vadd.f32 0.2548296, %v8555_v34  ;;  %vm8170_vm4 = vcmp.ge.f32.partialorder %v16819_v27, 0.0 }
0x184d   :  { %v8781_v20 = vmul.f32 %v16945_v0, %v8621_v46  ;;  %v8618_v52 = vmul.f32 %v16891_v31, %v8586_v57  ;;  %v8902_v61 = vmul.f32 %v8870_v24, %v8102_v2  ;;  %vm8171_vm5 = vcmp.ge.f32.partialorder %v16823_v22, 0.0 }
0x184e   :  { %v8903_v32 = vmul.f32 %v8871_v55, %v8103_v16  ;;  %v8619_v5 = vmul.f32 %v16900_v45, %v8587_v17  ;;  %v8205_v3 = vsel %vm8173_vm3, 1.0, %v17711_v12  ;;  %v8876_v8 = vadd.f32 1.0, %v8844_v23 }
0x184f   :  { %v8813_v9 = vsub.f32 1.0, %v8781_v20  ;;  %v8778_v38 = vmul.f32 %v16906_v54, %v8618_v52  ;;  %v8202_v31 = vsel %vm8170_vm4, 1.0, %v17711_v12  ;;  %v8108_v4 = vmul.f32 0.5, %v16845_v33 }
0x1850   :  { %v8922_v49 = vpack.c.bf16 %v8903_v32, %v8902_v61  ;;  %v8779_v0 = vmul.f32 %v16918_v7, %v8619_v5  ;;  %v8109_v27 = vmul.f32 0.5, %v16882_v25  ;;  %v8203_v22 = vsel %vm8171_vm5, 1.0, %v17711_v12 }
0x1851   :  { %v8845_v26 = vmul.f32 %v8813_v9, %v8205_v3  ;;  %v8810_v6 = vsub.f32 1.0, %v8778_v38  ;;  %v8908_v13 = vmul.f32 %v8876_v8, %v8108_v4  ;;  %v8106_v58 = vmul.f32 0.5, %v16807_v10 }
0x1852   :  { %10826 = vmatprep.mubr.bf16.mxu0 %v8922_v49  ;;  %v8811_v44 = vsub.f32 1.0, %v8779_v0  ;;  %v8107_v33 = vmul.f32 0.5, %v16810_v47 }
0x1853   :  { %v8877_v45 = vadd.f32 1.0, %v8845_v26  ;;  %v8842_v54 = vmul.f32 %v8810_v6, %v8202_v31  ;;  %10827 = vmatmul.mubr.bf16.gmra.mrb[72].mxu0 %v8923_v21 }
0x1854   :  { %v8843_v7 = vmul.f32 %v8811_v44, %v8203_v22 }
0x1855   :  { %v8909_v29 = vmul.f32 %v8877_v45, %v8109_v27  ;;  %v8874_v56 = vadd.f32 1.0, %v8842_v54 }
0x1856   :  { %v8875_v1 = vadd.f32 1.0, %v8843_v7 }
0x1857   :  { %v8925_v41 = vpack.c.bf16 %v8909_v29, %v8908_v13  ;;  %v8906_v25 = vmul.f32 %v8874_v56, %v8106_v58 }
0x1858   :  { %v8907_v42 = vmul.f32 %v8875_v1, %v8107_v33 }
0x185a   :  { %v8924_v60 = vpack.c.bf16 %v8907_v42, %v8906_v25 }
0x185c   :  { %10830 = vmatprep.mubr.bf16.mxu0 %v8924_v60 }
0x185d   :  { %10831 = vmatmul.mubr.bf16.gmra.mrb[76].mxu0 %v8925_v41 }
0x1912   :  { %v10820_v12 = vpop.f32.mrb[64].mxu0 }
0x1913   :  { %v9104_v50 = vadd.f32 %v11925_v63, %v10820_v12  ;;  %v9095_v21 = vpop.f32.mrb[65].mxu0 }
0x1914   :  { %v9096_v48 = vadd.f32 %v11925_v63, %v9095_v21  ;;  %v10821_v11 = vpop.f32.mrb[66].mxu0 }
0x1915   :  { %9176 = vst [vmem:[%s17073_s11 + $0x90] sm:$0xff] %v9104_v50  ;;  %v9107_v10 = vadd.f32 %v11925_v63, %v10821_v11  ;;  %v9098_v47 = vpop.f32.mrb[67].mxu0 }
0x1916   :  { %9174 = vst [vmem:[%s17073_s11 + $0x80] sm:$0xff] %v9096_v48  ;;  %v9099_v30 = vadd.f32 %v11925_v63, %v9098_v47 }
0x1917   :  { %9177 = vst [vmem:[%s17073_s11 + $0x98] sm:$0xff] %v9107_v10 }
0x1918   :  { %9175 = vst [vmem:[%s17073_s11 + $0x88] sm:$0xff] %v9099_v30 }
0x191e   :  { %v10824_v19 = vpop.f32.mrb[68].mxu0 }
0x191f   :  { %v9120_v43 = vadd.f32 %v11925_v63, %v10824_v19  ;;  %v9111_v35 = vpop.f32.mrb[69].mxu0 }
0x1920   :  { %v9112_v53 = vadd.f32 %v11925_v63, %v9111_v35  ;;  %v10825_v15 = vpop.f32.mrb[70].mxu0 }
0x1921   :  { %9180 = vst [vmem:[%s17073_s11 + $0xb0] sm:$0xff] %v9120_v43  ;;  %v9123_v36 = vadd.f32 %v11925_v63, %v10825_v15  ;;  %v9114_v40 = vpop.f32.mrb[71].mxu0 }
0x1922   :  { %9178 = vst [vmem:[%s17073_s11 + $0xa0] sm:$0xff] %v9112_v53  ;;  %v9115_v51 = vadd.f32 %v11925_v63, %v9114_v40 }
0x1923   :  { %9181 = vst [vmem:[%s17073_s11 + $0xb8] sm:$0xff] %v9123_v36 }
0x1924   :  { %9179 = vst [vmem:[%s17073_s11 + $0xa8] sm:$0xff] %v9115_v51 }
0x1926   :  { %v10828_v39 = vpop.f32.mrb[72].mxu0 }
0x1927   :  { %v9136_v2 = vadd.f32 %v11925_v63, %v10828_v39  ;;  %v9127_v59 = vpop.f32.mrb[73].mxu0 }
0x1928   :  { %v9128_v37 = vadd.f32 %v11925_v63, %v9127_v59  ;;  %v10829_v62 = vpop.f32.mrb[74].mxu0 }
0x1929   :  { %9184 = vst [vmem:[%s17073_s11 + $0xd0] sm:$0xff] %v9136_v2  ;;  %v9139_v18 = vadd.f32 %v11925_v63, %v10829_v62  ;;  %v9130_v14 = vpop.f32.mrb[75].mxu0 }
0x192a   :  { %9182 = vst [vmem:[%s17073_s11 + $0xc0] sm:$0xff] %v9128_v37  ;;  %v9131_v16 = vadd.f32 %v11925_v63, %v9130_v14 }
0x192b   :  { %9185 = vst [vmem:[%s17073_s11 + $0xd8] sm:$0xff] %v9139_v18 }
0x192c   :  { %9183 = vst [vmem:[%s17073_s11 + $0xc8] sm:$0xff] %v9131_v16 }
0x1930   :  { %v10832_v46 = vpop.f32.mrb[76].mxu0 }
0x1931   :  { %v9152_v34 = vadd.f32 %v11925_v63, %v10832_v46  ;;  %v9143_v57 = vpop.f32.mrb[77].mxu0 }
0x1932   :  { %v9144_v28 = vadd.f32 %v11925_v63, %v9143_v57  ;;  %v10833_v24 = vpop.f32.mrb[78].mxu0 }
0x1933   :  { %9188 = vst [vmem:[%s17073_s11 + $0xf0] sm:$0xff] %v9152_v34  ;;  %v9155_v55 = vadd.f32 %v11925_v63, %v10833_v24  ;;  %v9146_v23 = vpop.f32.mrb[79].mxu0 }
0x1934   :  { %9186 = vst [vmem:[%s17073_s11 + $0xe0] sm:$0xff] %v9144_v28  ;;  %v9147_v20 = vadd.f32 %v11925_v63, %v9146_v23 }
0x1935   :  { %9189 = vst [vmem:[%s17073_s11 + $0xf8] sm:$0xff] %v9155_v55 }
0x1936   :  { %9187 = vst [vmem:[%s17073_s11 + $0xe8] sm:$0xff] %v9147_v20 }

</bundles_post_ra>
